<compile_context>
chip_gen: v6e
topology: v6e:2x2x1
jax: 0.10.0
libtpu: 0.0.40
codegen_flags: <defaults>
</compile_context>

<pallas_src>
import functools

import numpy as np

import jax
import jax.numpy as jnp
from jax import lax
from jax.experimental import pallas as pl
from jax.experimental.pallas import tpu as pltpu


# ----------------------------------------------------------------------------
# small in-kernel helpers
# ----------------------------------------------------------------------------
def _lif_update(mem, x, tau, threshold):
    """LIF: integrate, fire (heaviside), hard reset. Returns (new_mem, spike_f32)."""
    mem = mem + (x - mem) * (1.0 / tau)
    spike = (mem > threshold).astype(jnp.float32)
    mem = mem * (1.0 - spike)
    return mem, spike


def _pick_row_tile(rows):
    for cand in (512, 256, 128, 64, 32, 16):
        if rows % cand == 0:
            return cand
    return rows


# ----------------------------------------------------------------------------
# kernel 1: shortcut-LIF + q/k/v (1x1 conv + folded BN + LIF), fully fused
# ----------------------------------------------------------------------------
def _sdsa_qkv_kernel(x_ref, wq_ref, bq_ref, wk_ref, bk_ref, wv_ref, bv_ref,
                     q_ref, k_ref, v_ref,
                     msc_ref, mq_ref, mk_ref, mv_ref, *, tau, threshold):
    @pl.when(pl.program_id(1) == 0)
    def _():
        msc_ref[...] = jnp.zeros_like(msc_ref)
        mq_ref[...] = jnp.zeros_like(mq_ref)
        mk_ref[...] = jnp.zeros_like(mk_ref)
        mv_ref[...] = jnp.zeros_like(mv_ref)

    msc, s = _lif_update(msc_ref[...], x_ref[0], tau, threshold)
    msc_ref[...] = msc
    s16 = s.astype(jnp.bfloat16)                      # spikes are exactly 0/1 in bf16

    def branch(w_ref, b_ref, m_ref, o_ref):
        r = jnp.dot(s16, w_ref[...], preferred_element_type=jnp.float32) + b_ref[...]
        m, spike = _lif_update(m_ref[...], r, tau, threshold)
        m_ref[...] = m
        o_ref[0] = spike.astype(o_ref.dtype)

    branch(wq_ref, bq_ref, mq_ref, q_ref)
    branch(wk_ref, bk_ref, mk_ref, k_ref)
    branch(wv_ref, bv_ref, mv_ref, v_ref)


def _sdsa_qkv(x, wq, bq, wk, bk, wv, bv, *, tau, threshold):
    """x: (T, R, C) f32 -> (q, k, v) spike tensors, each (T, R, C) bf16."""
    T, R, C = x.shape
    tr = _pick_row_tile(R)
    row = lambda r, t: (t, r, 0)
    full = lambda r, t: (0, 0)
    spk = jax.ShapeDtypeStruct((T, R, C), jnp.bfloat16)
    return pl.pallas_call(
        functools.partial(_sdsa_qkv_kernel, tau=tau, threshold=threshold),
        out_shape=(spk, spk, spk),
        grid=(R // tr, T),
        in_specs=[
            pl.BlockSpec((1, tr, C), row),
            pl.BlockSpec((C, C), full), pl.BlockSpec((1, C), full),
            pl.BlockSpec((C, C), full), pl.BlockSpec((1, C), full),
            pl.BlockSpec((C, C), full), pl.BlockSpec((1, C), full),
        ],
        out_specs=(pl.BlockSpec((1, tr, C), row),) * 3,
        scratch_shapes=[pltpu.VMEM((tr, C), jnp.float32)] * 4,
        compiler_params=pltpu.CompilerParams(
            dimension_semantics=("parallel", "arbitrary")),
        cost_estimate=pl.CostEstimate(
            flops=6 * T * R * C * C, transcendentals=0,
            bytes_accessed=int(x.size * 4 + 3 * (C * C * 2 + C * 4) + 3 * T * R * C * 2)),
    )(x, wq, bq, wk, bk, wv, bv)


# ----------------------------------------------------------------------------
# kernel 2: SDSA core (pools, kv-LIF, q*kv, +residual), one (batch, t) plane per step
# ----------------------------------------------------------------------------
def _sdsa_core_kernel(q_ref, k_ref, v_ref, xid_ref,
                      shp_ref, shn_ref, swp_ref, swn_ref,   # spatial (H, W) shifts (N,N)
                      stp_ref, stn_ref,                     # flat-token shifts      (N,N)
                      chp_ref, chn_ref,                     # within-head chan shifts (C,C)
                      o_ref, kvmem_ref, *, tau, threshold):
    @pl.when(pl.program_id(1) == 0)
    def _():
        kvmem_ref[...] = jnp.zeros_like(kvmem_ref)

    def lmax(x, m_ref):   # max(x, neighbour) via left one-hot matmul (token axis)
        return jnp.maximum(
            x, jnp.dot(m_ref[...], x.astype(jnp.bfloat16),
                       preferred_element_type=jnp.float32))

    def rmax(x, m_ref):   # max(x, neighbour) via right one-hot matmul (channel axis)
        return jnp.maximum(
            x, jnp.dot(x.astype(jnp.bfloat16), m_ref[...],
                       preferred_element_type=jnp.float32))

    def pool_hw(x):       # 3x3 'same' max pool over the (H, W) structure of the token dim
        x = jnp.maximum(lmax(x, shp_ref), lmax(x, shn_ref))
        x = jnp.maximum(lmax(x, swp_ref), lmax(x, swn_ref))
        return x

    def pool_tok_chan(x):  # 3x3 'same' max pool over (flat token N, within-head channel)
        x = jnp.maximum(lmax(x, stp_ref), lmax(x, stn_ref))
        x = jnp.maximum(rmax(x, chp_ref), rmax(x, chn_ref))
        return x

    q = q_ref[0, 0].astype(jnp.float32)                     # (N, C) spikes
    k = pool_hw(k_ref[0, 0].astype(jnp.float32))            # pooled k spikes
    v = pool_hw(v_ref[0, 0].astype(jnp.float32))            # pooled v spikes

    kv = pool_tok_chan(k * v)
    kv_sum = jnp.sum(kv, axis=0, keepdims=True)             # (1, C) sum over tokens
    mem, kv_spk = _lif_update(kvmem_ref[...], kv_sum, tau, threshold)
    kvmem_ref[...] = mem

    attn = pool_tok_chan(q * kv_spk)                        # broadcast over tokens
    o_ref[0, 0] = (attn + xid_ref[0, 0]).astype(o_ref.dtype)


def _sdsa_core(q, k, v, x_id, shift_mats, *, tau, threshold):
    T, B, N, C = q.shape
    plane = lambda b, t: (t, b, 0, 0)
    full = lambda b, t: (0, 0)
    in_specs = ([pl.BlockSpec((1, 1, N, C), plane)] * 4 +
                [pl.BlockSpec(m.shape, full) for m in shift_mats])
    return pl.pallas_call(
        functools.partial(_sdsa_core_kernel, tau=tau, threshold=threshold),
        out_shape=jax.ShapeDtypeStruct((T, B, N, C), jnp.float32),
        grid=(B, T),
        in_specs=in_specs,
        out_specs=pl.BlockSpec((1, 1, N, C), plane),
        scratch_shapes=[pltpu.VMEM((1, C), jnp.float32)],
        compiler_params=pltpu.CompilerParams(
            dimension_semantics=("parallel", "arbitrary")),
    )(q, k, v, x_id, *shift_mats)


# ----------------------------------------------------------------------------
# kernel 3: Sdt_MLP, fully fused (LIF -> fc1+BN -> LIF -> fc2+BN -> +residual)
# ----------------------------------------------------------------------------
def _mlp_kernel(x_ref, w1_ref, b1_ref, w2_ref, b2_ref, o_ref,
                m1_ref, m2_ref, *, tau, threshold):
    @pl.when(pl.program_id(1) == 0)
    def _():
        m1_ref[...] = jnp.zeros_like(m1_ref)
        m2_ref[...] = jnp.zeros_like(m2_ref)

    x = x_ref[0]                                             # (tr, C) f32
    m1, s1 = _lif_update(m1_ref[...], x, tau, threshold)
    m1_ref[...] = m1
    h = jnp.dot(s1.astype(jnp.bfloat16), w1_ref[...],
                preferred_element_type=jnp.float32) + b1_ref[...]
    m2, s2 = _lif_update(m2_ref[...], h, tau, threshold)
    m2_ref[...] = m2
    y = jnp.dot(s2.astype(jnp.bfloat16), w2_ref[...],
                preferred_element_type=jnp.float32) + b2_ref[...]
    o_ref[0] = (y + x).astype(o_ref.dtype)


def _mlp(x, w1, b1, w2, b2, *, tau, threshold):
    T, R, C = x.shape
    Ch = w1.shape[1]
    tr = _pick_row_tile(R)
    row_in = lambda r, t: (t, r, 0)
    full = lambda r, t: (0, 0)
    return pl.pallas_call(
        functools.partial(_mlp_kernel, tau=tau, threshold=threshold),
        out_shape=jax.ShapeDtypeStruct((T, R, C), jnp.float32),
        grid=(R // tr, T),
        in_specs=[
            pl.BlockSpec((1, tr, C), row_in),
            pl.BlockSpec((C, Ch), full), pl.BlockSpec((1, Ch), full),
            pl.BlockSpec((Ch, C), full), pl.BlockSpec((1, C), full),
        ],
        out_specs=pl.BlockSpec((1, tr, C), row_in),
        scratch_shapes=[pltpu.VMEM((tr, C), jnp.float32),
                        pltpu.VMEM((tr, Ch), jnp.float32)],
        compiler_params=pltpu.CompilerParams(
            dimension_semantics=("parallel", "arbitrary")),
        cost_estimate=pl.CostEstimate(
            flops=4 * T * R * C * Ch, transcendentals=0,
            bytes_accessed=int(2 * x.size * 4 + 2 * C * Ch * 2 + (C + Ch) * 4)),
    )(x, w1, b1, w2, b2)


# ----------------------------------------------------------------------------
# constant one-hot neighbour-shift matrices for the 3x3 'same' max pools
# ----------------------------------------------------------------------------
def _shift_mats(h, w, coh, c):
    n = h * w
    idx = np.arange(n)
    rows, cols = idx // w, idx % w

    def left(src):        # y = M @ x   ->  y[i, :] = x[src[i], :]
        m = np.zeros((n, n), np.float32)
        m[idx, src] = 1.0
        return jnp.asarray(m, jnp.bfloat16)

    sp_h_prev = left(np.where(rows > 0, idx - w, idx))
    sp_h_next = left(np.where(rows < h - 1, idx + w, idx))
    sp_w_prev = left(np.where(cols > 0, idx - 1, idx))
    sp_w_next = left(np.where(cols < w - 1, idx + 1, idx))
    tok_prev = left(np.clip(idx - 1, 0, n - 1))
    tok_next = left(np.clip(idx + 1, 0, n - 1))

    cidx = np.arange(c)
    pos = cidx % coh

    def right(src):       # y = x @ M   ->  y[:, j] = x[:, src[j]]
        m = np.zeros((c, c), np.float32)
        m[src, cidx] = 1.0
        return jnp.asarray(m, jnp.bfloat16)

    ch_prev = right(np.where(pos > 0, cidx - 1, cidx))
    ch_next = right(np.where(pos < coh - 1, cidx + 1, cidx))
    return (sp_h_prev, sp_h_next, sp_w_prev, sp_w_next,
            tok_prev, tok_next, ch_prev, ch_next)


# ----------------------------------------------------------------------------
# parameter preparation (done once): fold 1x1 conv + eval BatchNorm, pre-transpose
# ----------------------------------------------------------------------------
def _fold_conv_bn_params(key, cin, cout, *, conv_has_bias):
    kw, kb, kg, kbt, km, kv = jax.random.split(key, 6)
    w = jax.random.normal(kw, (cout, cin), jnp.float32) / jnp.sqrt(cin)   # torch (Cout, Cin)
    conv_b = (0.1 * jax.random.normal(kb, (cout,), jnp.float32)
              if conv_has_bias else jnp.zeros((cout,), jnp.float32))
    gamma = 1.0 + 0.2 * jax.random.normal(kg, (cout,), jnp.float32)
    beta = 0.1 * jax.random.normal(kbt, (cout,), jnp.float32)
    mean = 0.1 * jax.random.normal(km, (cout,), jnp.float32)
    var = 1.0 + 0.2 * jax.random.uniform(kv, (cout,), jnp.float32)
    scale = gamma / jnp.sqrt(var + 1e-5)
    w_eff = (w * scale[:, None]).T.astype(jnp.bfloat16)                   # (Cin, Cout)
    b_eff = (scale * (conv_b - mean) + beta).reshape(1, cout).astype(jnp.float32)
    return w_eff, b_eff


def init_sdt_block_params(key, embed_dim, mlp_hidden):
    ks = jax.random.split(key, 5)
    wq, bq = _fold_conv_bn_params(ks[0], embed_dim, embed_dim, conv_has_bias=False)
    wk, bk = _fold_conv_bn_params(ks[1], embed_dim, embed_dim, conv_has_bias=False)
    wv, bv = _fold_conv_bn_params(ks[2], embed_dim, embed_dim, conv_has_bias=False)
    w1, b1 = _fold_conv_bn_params(ks[3], embed_dim, mlp_hidden, conv_has_bias=True)
    w2, b2 = _fold_conv_bn_params(ks[4], mlp_hidden, embed_dim, conv_has_bias=True)
    return dict(wq=wq, bq=bq, wk=wk, bk=bk, wv=wv, bv=bv, w1=w1, b1=b1, w2=w2, b2=b2)


# ----------------------------------------------------------------------------
# full Sdt_Block forward (SDSA + Sdt_MLP)
# ----------------------------------------------------------------------------
def sdt_block_forward(x, params, *, num_heads, tau, threshold):
    """x: (T, B, C, H, W) float32 -> (T, B, C, H, W) float32."""
    T, B, C, H, W = x.shape
    N = H * W
    coh = C // num_heads

    # one-time layout plumbing: channels-last so C sits on the 128-lane axis
    x_cl = jnp.transpose(x.reshape(T, B, C, N), (0, 1, 3, 2))      # (T, B, N, C)
    x_rows = x_cl.reshape(T, B * N, C)

    # --- SDSA ---
    q, k, v = _sdsa_qkv(x_rows, params["wq"], params["bq"], params["wk"], params["bk"],
                        params["wv"], params["bv"], tau=tau, threshold=threshold)
    shift = _shift_mats(H, W, coh, C)
    x_attn = _sdsa_core(q.reshape(T, B, N, C), k.reshape(T, B, N, C),
                        v.reshape(T, B, N, C), x_cl, shift,
                        tau=tau, threshold=threshold)              # (T, B, N, C) f32

    # --- Sdt_MLP ---
    y = _mlp(x_attn.reshape(T, B * N, C), params["w1"], params["b1"],
             params["w2"], params["b2"], tau=tau, threshold=threshold)

    return jnp.transpose(y.reshape(T, B, N, C), (0, 1, 3, 2)).reshape(T, B, C, H, W)


# ----------------------------------------------------------------------------
# pure-JAX reference (mirrors the PyTorch module, eval mode, folded BN)
# ----------------------------------------------------------------------------
def _ref_lif_seq(x, tau, threshold):
    def step(mem, xt):
        mem = mem + (xt - mem) * (1.0 / tau)
        spk = (mem > threshold).astype(jnp.float32)
        return mem * (1.0 - spk), spk
    _, spikes = lax.scan(step, jnp.zeros_like(x[0]), x)
    return spikes


def _ref_maxpool3x3_last2(x):
    pads = [(0, 0)] * (x.ndim - 2) + [(1, 1), (1, 1)]
    xp = jnp.pad(x, pads, constant_values=-jnp.inf)
    h, w = x.shape[-2], x.shape[-1]
    windows = [xp[..., i:i + h, j:j + w] for i in range(3) for j in range(3)]
    return jnp.max(jnp.stack(windows, axis=0), axis=0)


def sdt_block_reference(x, params, *, num_heads, tau, threshold):
    T, B, C, H, W = x.shape
    N = H * W
    coh = C // num_heads
    xr = x.reshape(T, B, C, N).astype(jnp.float32)

    def conv_bn(s, w, b):                       # s: (T, B, Cin, N)
        s_cl = jnp.transpose(s, (0, 1, 3, 2)).astype(jnp.bfloat16)
        y = jnp.dot(s_cl, w, preferred_element_type=jnp.float32) + b
        return jnp.transpose(y, (0, 1, 3, 2))

    def to_heads(z):                            # (T, B, C, N) -> (T, B, Hh, N, coh)
        z = jnp.transpose(z, (0, 1, 3, 2)).reshape(T, B, N, num_heads, coh)
        return jnp.transpose(z, (0, 1, 3, 2, 4))

    # SDSA
    s = _ref_lif_seq(xr, tau, threshold)
    q = _ref_lif_seq(conv_bn(s, params["wq"], params["bq"]), tau, threshold)
    k = _ref_lif_seq(conv_bn(s, params["wk"], params["bk"]), tau, threshold)
    v = _ref_lif_seq(conv_bn(s, params["wv"], params["bv"]), tau, threshold)
    k = _ref_maxpool3x3_last2(k.reshape(T, B, C, H, W)).reshape(T, B, C, N)
    v = _ref_maxpool3x3_last2(v.reshape(T, B, C, H, W)).reshape(T, B, C, N)
    qh, kh, vh = to_heads(q), to_heads(k), to_heads(v)
    kv = _ref_maxpool3x3_last2(kh * vh)
    kv = jnp.sum(kv, axis=-2, keepdims=True)
    kv = _ref_lif_seq(kv, tau, threshold)
    attn = _ref_maxpool3x3_last2(qh * kv)
    x_attn = jnp.transpose(attn, (0, 1, 2, 4, 3)).reshape(T, B, C, N) + xr

    # Sdt_MLP
    s1 = _ref_lif_seq(x_attn, tau, threshold)
    h = conv_bn(s1, params["w1"], params["b1"])
    s2 = _ref_lif_seq(h, tau, threshold)
    y = conv_bn(s2, params["w2"], params["b2"]) + x_attn
    return y.reshape(T, B, C, H, W)


# ----------------------------------------------------------------------------
if __name__ == "__main__":
    T, B, C, H, W = 4, 2, 128, 8, 8          # step, batch, embed_dim, spatial
    NUM_HEADS = 16
    TAU, THRESHOLD = 2.0, 0.5
    MLP_RATIO = 4.0
    HIDDEN = int(C * MLP_RATIO)

    key = jax.random.PRNGKey(0)
    kp, kx = jax.random.split(key)
    params = init_sdt_block_params(kp, C, HIDDEN)
    x = jax.random.normal(kx, (T, B, C, H, W), dtype=jnp.float32)

    fwd = jax.jit(functools.partial(sdt_block_forward, num_heads=NUM_HEADS,
                                    tau=TAU, threshold=THRESHOLD))
    y = fwd(x, params)
    jax.block_until_ready(y)
    assert y.shape == (T, B, C, H, W)

    y_ref = jax.jit(functools.partial(sdt_block_reference, num_heads=NUM_HEADS,
                                      tau=TAU, threshold=THRESHOLD))(x, params)
    mean_err = float(jnp.mean(jnp.abs(y - y_ref)))
    denom = float(jnp.mean(jnp.abs(y_ref))) + 1e-6
    # Tolerant bulk check: isolated spike flips from accumulation-order differences are
    # possible in principle; the bulk of the output must agree with the reference.
    assert mean_err / denom < 1e-2, f"mismatch vs reference: mean_err={mean_err}"

    print("KERNEL_OK")
</pallas_src>

<mosaic_0001>
module attributes {stable_mosaic.version = 11 : i64} {
  func.func @_sdsa_core_kernel(%arg0: i32, %arg1: i32, %arg2: memref<1x1x64x128xbf16, #tpu.memory_space<vmem>>, %arg3: memref<1x1x64x128xbf16, #tpu.memory_space<vmem>>, %arg4: memref<1x1x64x128xbf16, #tpu.memory_space<vmem>>, %arg5: memref<1x1x64x128xf32, #tpu.memory_space<vmem>>, %arg6: memref<64x64xbf16, #tpu.memory_space<vmem>>, %arg7: memref<64x64xbf16, #tpu.memory_space<vmem>>, %arg8: memref<64x64xbf16, #tpu.memory_space<vmem>>, %arg9: memref<64x64xbf16, #tpu.memory_space<vmem>>, %arg10: memref<64x64xbf16, #tpu.memory_space<vmem>>, %arg11: memref<64x64xbf16, #tpu.memory_space<vmem>>, %arg12: memref<128x128xbf16, #tpu.memory_space<vmem>>, %arg13: memref<128x128xbf16, #tpu.memory_space<vmem>>, %arg14: memref<1x1x64x128xf32, #tpu.memory_space<vmem>>, %arg15: memref<1x128xf32, #tpu.memory_space<vmem>>) attributes {dimension_semantics = [#tpu.dimension_semantics<parallel>, #tpu.dimension_semantics<arbitrary>], iteration_bounds = array<i64: 2, 4>, scalar_prefetch = 0 : i64, scratch_operands = 1 : i64, tpu.core_type = #tpu.core_type<tc>, window_params = [{transform_indices = @transform_0, window_bounds = array<i64: 1, 1, 64, 128>}, {transform_indices = @transform_1, window_bounds = array<i64: 1, 1, 64, 128>}, {transform_indices = @transform_2, window_bounds = array<i64: 1, 1, 64, 128>}, {transform_indices = @transform_3, window_bounds = array<i64: 1, 1, 64, 128>}, {pipeline_mode = #tpu.pipeline_mode<synchronous>, transform_indices = @transform_4, window_bounds = array<i64: 64, 64>}, {pipeline_mode = #tpu.pipeline_mode<synchronous>, transform_indices = @transform_5, window_bounds = array<i64: 64, 64>}, {pipeline_mode = #tpu.pipeline_mode<synchronous>, transform_indices = @transform_6, window_bounds = array<i64: 64, 64>}, {pipeline_mode = #tpu.pipeline_mode<synchronous>, transform_indices = @transform_7, window_bounds = array<i64: 64, 64>}, {pipeline_mode = #tpu.pipeline_mode<synchronous>, transform_indices = @transform_8, window_bounds = array<i64: 64, 64>}, {pipeline_mode = #tpu.pipeline_mode<synchronous>, transform_indices = @transform_9, window_bounds = array<i64: 64, 64>}, {pipeline_mode = #tpu.pipeline_mode<synchronous>, transform_indices = @transform_10, window_bounds = array<i64: 128, 128>}, {pipeline_mode = #tpu.pipeline_mode<synchronous>, transform_indices = @transform_11, window_bounds = array<i64: 128, 128>}, {transform_indices = @transform_12, window_bounds = array<i64: 1, 1, 64, 128>}]} {
    %c0_i32 = arith.constant 0 : i32
    %0 = arith.cmpi eq, %arg1, %c0_i32 : i32
    %1 = arith.extui %0 : i1 to i32
    %c0_i32_0 = arith.constant 0 : i32
    %2 = arith.cmpi ne, %1, %c0_i32_0 : i32
    scf.if %2 {
      %cst_75 = arith.constant 0.000000e+00 : f32
      %108 = vector.broadcast %cst_75 : f32 to vector<1x128xf32>
      %c0_76 = arith.constant 0 : index
      %c0_77 = arith.constant 0 : index
      %109 = vector.load %arg15[%c0_76, %c0_77] : memref<1x128xf32, #tpu.memory_space<vmem>>, vector<1x128xf32>
      tpu.vector_store %arg15[%c0_76, %c0_77], %108 {strides = array<i32>} : memref<1x128xf32, #tpu.memory_space<vmem>>, vector<1x128xf32>,
    } else {
    }
    %c0 = arith.constant 0 : index
    %c0_1 = arith.constant 0 : index
    %c0_2 = arith.constant 0 : index
    %c0_3 = arith.constant 0 : index
    %3 = vector.load %arg2[%c0, %c0_1, %c0_2, %c0_3] : memref<1x1x64x128xbf16, #tpu.memory_space<vmem>>, vector<1x1x64x128xbf16>
    %4 = vector.shape_cast %3 : vector<1x1x64x128xbf16> to vector<64x128xbf16>
    %5 = arith.extf %4 : vector<64x128xbf16> to vector<64x128xf32>
    %c0_4 = arith.constant 0 : index
    %c0_5 = arith.constant 0 : index
    %c0_6 = arith.constant 0 : index
    %c0_7 = arith.constant 0 : index
    %6 = vector.load %arg3[%c0_4, %c0_5, %c0_6, %c0_7] : memref<1x1x64x128xbf16, #tpu.memory_space<vmem>>, vector<1x1x64x128xbf16>
    %7 = vector.shape_cast %6 : vector<1x1x64x128xbf16> to vector<64x128xbf16>
    %8 = arith.extf %7 : vector<64x128xbf16> to vector<64x128xf32>
    %c0_8 = arith.constant 0 : index
    %c0_9 = arith.constant 0 : index
    %9 = vector.load %arg6[%c0_8, %c0_9] : memref<64x64xbf16, #tpu.memory_space<vmem>>, vector<64x64xbf16>
    %10 = arith.truncf %8 : vector<64x128xf32> to vector<64x128xbf16>
    %cst = arith.constant dense<0.000000e+00> : vector<64x128xf32>
    %11 = tpu.matmul %9, %10, %cst {dimension_numbers = #tpu.dot_dimension_numbers<[1], [0], [0], [1], [0, 0, 1, 1], [], []>} : vector<64x64xbf16>, vector<64x128xbf16>, vector<64x128xf32> -> vector<64x128xf32>
    %12 = arith.maximumf %8, %11 : vector<64x128xf32>
    %c0_10 = arith.constant 0 : index
    %c0_11 = arith.constant 0 : index
    %13 = vector.load %arg7[%c0_10, %c0_11] : memref<64x64xbf16, #tpu.memory_space<vmem>>, vector<64x64xbf16>
    %14 = arith.truncf %8 : vector<64x128xf32> to vector<64x128xbf16>
    %cst_12 = arith.constant dense<0.000000e+00> : vector<64x128xf32>
    %15 = tpu.matmul %13, %14, %cst_12 {dimension_numbers = #tpu.dot_dimension_numbers<[1], [0], [0], [1], [0, 0, 1, 1], [], []>} : vector<64x64xbf16>, vector<64x128xbf16>, vector<64x128xf32> -> vector<64x128xf32>
    %16 = arith.maximumf %8, %15 : vector<64x128xf32>
    %17 = arith.maximumf %12, %16 : vector<64x128xf32>
    %c0_13 = arith.constant 0 : index
    %c0_14 = arith.constant 0 : index
    %18 = vector.load %arg8[%c0_13, %c0_14] : memref<64x64xbf16, #tpu.memory_space<vmem>>, vector<64x64xbf16>
    %19 = arith.truncf %17 : vector<64x128xf32> to vector<64x128xbf16>
    %cst_15 = arith.constant dense<0.000000e+00> : vector<64x128xf32>
    %20 = tpu.matmul %18, %19, %cst_15 {dimension_numbers = #tpu.dot_dimension_numbers<[1], [0], [0], [1], [0, 0, 1, 1], [], []>} : vector<64x64xbf16>, vector<64x128xbf16>, vector<64x128xf32> -> vector<64x128xf32>
    %21 = arith.maximumf %17, %20 : vector<64x128xf32>
    %c0_16 = arith.constant 0 : index
    %c0_17 = arith.constant 0 : index
    %22 = vector.load %arg9[%c0_16, %c0_17] : memref<64x64xbf16, #tpu.memory_space<vmem>>, vector<64x64xbf16>
    %23 = arith.truncf %17 : vector<64x128xf32> to vector<64x128xbf16>
    %cst_18 = arith.constant dense<0.000000e+00> : vector<64x128xf32>
    %24 = tpu.matmul %22, %23, %cst_18 {dimension_numbers = #tpu.dot_dimension_numbers<[1], [0], [0], [1], [0, 0, 1, 1], [], []>} : vector<64x64xbf16>, vector<64x128xbf16>, vector<64x128xf32> -> vector<64x128xf32>
    %25 = arith.maximumf %17, %24 : vector<64x128xf32>
    %26 = arith.maximumf %21, %25 : vector<64x128xf32>
    %c0_19 = arith.constant 0 : index
    %c0_20 = arith.constant 0 : index
    %c0_21 = arith.constant 0 : index
    %c0_22 = arith.constant 0 : index
    %27 = vector.load %arg4[%c0_19, %c0_20, %c0_21, %c0_22] : memref<1x1x64x128xbf16, #tpu.memory_space<vmem>>, vector<1x1x64x128xbf16>
    %28 = vector.shape_cast %27 : vector<1x1x64x128xbf16> to vector<64x128xbf16>
    %29 = arith.extf %28 : vector<64x128xbf16> to vector<64x128xf32>
    %c0_23 = arith.constant 0 : index
    %c0_24 = arith.constant 0 : index
    %30 = vector.load %arg6[%c0_23, %c0_24] : memref<64x64xbf16, #tpu.memory_space<vmem>>, vector<64x64xbf16>
    %31 = arith.truncf %29 : vector<64x128xf32> to vector<64x128xbf16>
    %cst_25 = arith.constant dense<0.000000e+00> : vector<64x128xf32>
    %32 = tpu.matmul %30, %31, %cst_25 {dimension_numbers = #tpu.dot_dimension_numbers<[1], [0], [0], [1], [0, 0, 1, 1], [], []>} : vector<64x64xbf16>, vector<64x128xbf16>, vector<64x128xf32> -> vector<64x128xf32>
    %33 = arith.maximumf %29, %32 : vector<64x128xf32>
    %c0_26 = arith.constant 0 : index
    %c0_27 = arith.constant 0 : index
    %34 = vector.load %arg7[%c0_26, %c0_27] : memref<64x64xbf16, #tpu.memory_space<vmem>>, vector<64x64xbf16>
    %35 = arith.truncf %29 : vector<64x128xf32> to vector<64x128xbf16>
    %cst_28 = arith.constant dense<0.000000e+00> : vector<64x128xf32>
    %36 = tpu.matmul %34, %35, %cst_28 {dimension_numbers = #tpu.dot_dimension_numbers<[1], [0], [0], [1], [0, 0, 1, 1], [], []>} : vector<64x64xbf16>, vector<64x128xbf16>, vector<64x128xf32> -> vector<64x128xf32>
    %37 = arith.maximumf %29, %36 : vector<64x128xf32>
    %38 = arith.maximumf %33, %37 : vector<64x128xf32>
    %c0_29 = arith.constant 0 : index
    %c0_30 = arith.constant 0 : index
    %39 = vector.load %arg8[%c0_29, %c0_30] : memref<64x64xbf16, #tpu.memory_space<vmem>>, vector<64x64xbf16>
    %40 = arith.truncf %38 : vector<64x128xf32> to vector<64x128xbf16>
    %cst_31 = arith.constant dense<0.000000e+00> : vector<64x128xf32>
    %41 = tpu.matmul %39, %40, %cst_31 {dimension_numbers = #tpu.dot_dimension_numbers<[1], [0], [0], [1], [0, 0, 1, 1], [], []>} : vector<64x64xbf16>, vector<64x128xbf16>, vector<64x128xf32> -> vector<64x128xf32>
    %42 = arith.maximumf %38, %41 : vector<64x128xf32>
    %c0_32 = arith.constant 0 : index
    %c0_33 = arith.constant 0 : index
    %43 = vector.load %arg9[%c0_32, %c0_33] : memref<64x64xbf16, #tpu.memory_space<vmem>>, vector<64x64xbf16>
    %44 = arith.truncf %38 : vector<64x128xf32> to vector<64x128xbf16>
    %cst_34 = arith.constant dense<0.000000e+00> : vector<64x128xf32>
    %45 = tpu.matmul %43, %44, %cst_34 {dimension_numbers = #tpu.dot_dimension_numbers<[1], [0], [0], [1], [0, 0, 1, 1], [], []>} : vector<64x64xbf16>, vector<64x128xbf16>, vector<64x128xf32> -> vector<64x128xf32>
    %46 = arith.maximumf %38, %45 : vector<64x128xf32>
    %47 = arith.maximumf %42, %46 : vector<64x128xf32>
    %48 = arith.mulf %26, %47 : vector<64x128xf32>
    %c0_35 = arith.constant 0 : index
    %c0_36 = arith.constant 0 : index
    %49 = vector.load %arg10[%c0_35, %c0_36] : memref<64x64xbf16, #tpu.memory_space<vmem>>, vector<64x64xbf16>
    %50 = arith.truncf %48 : vector<64x128xf32> to vector<64x128xbf16>
    %cst_37 = arith.constant dense<0.000000e+00> : vector<64x128xf32>
    %51 = tpu.matmul %49, %50, %cst_37 {dimension_numbers = #tpu.dot_dimension_numbers<[1], [0], [0], [1], [0, 0, 1, 1], [], []>} : vector<64x64xbf16>, vector<64x128xbf16>, vector<64x128xf32> -> vector<64x128xf32>
    %52 = arith.maximumf %48, %51 : vector<64x128xf32>
    %c0_38 = arith.constant 0 : index
    %c0_39 = arith.constant 0 : index
    %53 = vector.load %arg11[%c0_38, %c0_39] : memref<64x64xbf16, #tpu.memory_space<vmem>>, vector<64x64xbf16>
    %54 = arith.truncf %48 : vector<64x128xf32> to vector<64x128xbf16>
    %cst_40 = arith.constant dense<0.000000e+00> : vector<64x128xf32>
    %55 = tpu.matmul %53, %54, %cst_40 {dimension_numbers = #tpu.dot_dimension_numbers<[1], [0], [0], [1], [0, 0, 1, 1], [], []>} : vector<64x64xbf16>, vector<64x128xbf16>, vector<64x128xf32> -> vector<64x128xf32>
    %56 = arith.maximumf %48, %55 : vector<64x128xf32>
    %57 = arith.maximumf %52, %56 : vector<64x128xf32>
    %58 = arith.truncf %57 : vector<64x128xf32> to vector<64x128xbf16>
    %c0_41 = arith.constant 0 : index
    %c0_42 = arith.constant 0 : index
    %59 = vector.load %arg12[%c0_41, %c0_42] : memref<128x128xbf16, #tpu.memory_space<vmem>>, vector<128x128xbf16>
    %cst_43 = arith.constant dense<0.000000e+00> : vector<64x128xf32>
    %60 = tpu.matmul %58, %59, %cst_43 {dimension_numbers = #tpu.dot_dimension_numbers<[1], [0], [0], [1], [0, 0, 1, 1], [], []>} : vector<64x128xbf16>, vector<128x128xbf16>, vector<64x128xf32> -> vector<64x128xf32>
    %61 = arith.maximumf %57, %60 : vector<64x128xf32>
    %62 = arith.truncf %57 : vector<64x128xf32> to vector<64x128xbf16>
    %c0_44 = arith.constant 0 : index
    %c0_45 = arith.constant 0 : index
    %63 = vector.load %arg13[%c0_44, %c0_45] : memref<128x128xbf16, #tpu.memory_space<vmem>>, vector<128x128xbf16>
    %cst_46 = arith.constant dense<0.000000e+00> : vector<64x128xf32>
    %64 = tpu.matmul %62, %63, %cst_46 {dimension_numbers = #tpu.dot_dimension_numbers<[1], [0], [0], [1], [0, 0, 1, 1], [], []>} : vector<64x128xbf16>, vector<128x128xbf16>, vector<64x128xf32> -> vector<64x128xf32>
    %65 = arith.maximumf %57, %64 : vector<64x128xf32>
    %66 = arith.maximumf %61, %65 : vector<64x128xf32>
    %cst_47 = arith.constant dense<0.000000e+00> : vector<128xf32>
    %67 = vector.multi_reduction <add>, %66, %cst_47 [0] : vector<64x128xf32> to vector<128xf32>
    %68 = vector.shape_cast %67 : vector<128xf32> to vector<1x128xf32>
    %c0_48 = arith.constant 0 : index
    %c0_49 = arith.constant 0 : index
    %69 = vector.load %arg15[%c0_48, %c0_49] : memref<1x128xf32, #tpu.memory_space<vmem>>, vector<1x128xf32>
    %70 = arith.subf %68, %69 : vector<1x128xf32>
    %cst_50 = arith.constant 5.000000e-01 : f32
    %71 = vector.broadcast %cst_50 : f32 to vector<1x128xf32>
    %72 = arith.mulf %70, %71 : vector<1x128xf32>
    %73 = arith.addf %69, %72 : vector<1x128xf32>
    %cst_51 = arith.constant 5.000000e-01 : f32
    %74 = vector.broadcast %cst_51 : f32 to vector<1x128xf32>
    %75 = arith.cmpf ogt, %73, %74 : vector<1x128xf32>
    %76 = arith.extui %75 : vector<1x128xi1> to vector<1x128xi32>
    %77 = arith.sitofp %76 : vector<1x128xi32> to vector<1x128xf32>
    %cst_52 = arith.constant 1.000000e+00 : f32
    %78 = vector.broadcast %cst_52 : f32 to vector<1x128xf32>
    %79 = arith.subf %78, %77 : vector<1x128xf32>
    %80 = arith.mulf %73, %79 : vector<1x128xf32>
    %c0_53 = arith.constant 0 : index
    %c0_54 = arith.constant 0 : index
    %81 = vector.load %arg15[%c0_53, %c0_54] : memref<1x128xf32, #tpu.memory_space<vmem>>, vector<1x128xf32>
    tpu.vector_store %arg15[%c0_53, %c0_54], %80 {strides = array<i32>} : memref<1x128xf32, #tpu.memory_space<vmem>>, vector<1x128xf32>,
    %82 = vector.broadcast %77 : vector<1x128xf32> to vector<64x128xf32>
    %83 = arith.mulf %5, %82 : vector<64x128xf32>
    %c0_55 = arith.constant 0 : index
    %c0_56 = arith.constant 0 : index
    %84 = vector.load %arg10[%c0_55, %c0_56] : memref<64x64xbf16, #tpu.memory_space<vmem>>, vector<64x64xbf16>
    %85 = arith.truncf %83 : vector<64x128xf32> to vector<64x128xbf16>
    %cst_57 = arith.constant dense<0.000000e+00> : vector<64x128xf32>
    %86 = tpu.matmul %84, %85, %cst_57 {dimension_numbers = #tpu.dot_dimension_numbers<[1], [0], [0], [1], [0, 0, 1, 1], [], []>} : vector<64x64xbf16>, vector<64x128xbf16>, vector<64x128xf32> -> vector<64x128xf32>
    %87 = arith.maximumf %83, %86 : vector<64x128xf32>
    %c0_58 = arith.constant 0 : index
    %c0_59 = arith.constant 0 : index
    %88 = vector.load %arg11[%c0_58, %c0_59] : memref<64x64xbf16, #tpu.memory_space<vmem>>, vector<64x64xbf16>
    %89 = arith.truncf %83 : vector<64x128xf32> to vector<64x128xbf16>
    %cst_60 = arith.constant dense<0.000000e+00> : vector<64x128xf32>
    %90 = tpu.matmul %88, %89, %cst_60 {dimension_numbers = #tpu.dot_dimension_numbers<[1], [0], [0], [1], [0, 0, 1, 1], [], []>} : vector<64x64xbf16>, vector<64x128xbf16>, vector<64x128xf32> -> vector<64x128xf32>
    %91 = arith.maximumf %83, %90 : vector<64x128xf32>
    %92 = arith.maximumf %87, %91 : vector<64x128xf32>
    %93 = arith.truncf %92 : vector<64x128xf32> to vector<64x128xbf16>
    %c0_61 = arith.constant 0 : index
    %c0_62 = arith.constant 0 : index
    %94 = vector.load %arg12[%c0_61, %c0_62] : memref<128x128xbf16, #tpu.memory_space<vmem>>, vector<128x128xbf16>
    %cst_63 = arith.constant dense<0.000000e+00> : vector<64x128xf32>
    %95 = tpu.matmul %93, %94, %cst_63 {dimension_numbers = #tpu.dot_dimension_numbers<[1], [0], [0], [1], [0, 0, 1, 1], [], []>} : vector<64x128xbf16>, vector<128x128xbf16>, vector<64x128xf32> -> vector<64x128xf32>
    %96 = arith.maximumf %92, %95 : vector<64x128xf32>
    %97 = arith.truncf %92 : vector<64x128xf32> to vector<64x128xbf16>
    %c0_64 = arith.constant 0 : index
    %c0_65 = arith.constant 0 : index
    %98 = vector.load %arg13[%c0_64, %c0_65] : memref<128x128xbf16, #tpu.memory_space<vmem>>, vector<128x128xbf16>
    %cst_66 = arith.constant dense<0.000000e+00> : vector<64x128xf32>
    %99 = tpu.matmul %97, %98, %cst_66 {dimension_numbers = #tpu.dot_dimension_numbers<[1], [0], [0], [1], [0, 0, 1, 1], [], []>} : vector<64x128xbf16>, vector<128x128xbf16>, vector<64x128xf32> -> vector<64x128xf32>
    %100 = arith.maximumf %92, %99 : vector<64x128xf32>
    %101 = arith.maximumf %96, %100 : vector<64x128xf32>
    %c0_67 = arith.constant 0 : index
    %c0_68 = arith.constant 0 : index
    %c0_69 = arith.constant 0 : index
    %c0_70 = arith.constant 0 : index
    %102 = vector.load %arg5[%c0_67, %c0_68, %c0_69, %c0_70] : memref<1x1x64x128xf32, #tpu.memory_space<vmem>>, vector<1x1x64x128xf32>
    %103 = vector.shape_cast %102 : vector<1x1x64x128xf32> to vector<64x128xf32>
    %104 = arith.addf %101, %103 : vector<64x128xf32>
    %c0_71 = arith.constant 0 : index
    %c0_72 = arith.constant 0 : index
    %c0_73 = arith.constant 0 : index
    %c0_74 = arith.constant 0 : index
    %105 = vector.load %arg14[%c0_71, %c0_72, %c0_73, %c0_74] : memref<1x1x64x128xf32, #tpu.memory_space<vmem>>, vector<1x1x64x128xf32>
    %106 = vector.shape_cast %105 : vector<1x1x64x128xf32> to vector<64x128xf32>
    %107 = vector.shape_cast %104 : vector<64x128xf32> to vector<1x1x64x128xf32>
    tpu.vector_store %arg14[%c0_71, %c0_72, %c0_73, %c0_74], %107 {strides = array<i32>} : memref<1x1x64x128xf32, #tpu.memory_space<vmem>>, vector<1x1x64x128xf32>,
    return
  }
  func.func @transform_0(%arg0: i32, %arg1: i32) -> (i32, i32, i32, i32) {
    %c0_i32 = arith.constant 0 : i32
    %c0_i32_0 = arith.constant 0 : i32
    %c0_i32_1 = arith.constant 0 : i32
    return %arg1, %arg0, %c0_i32, %c0_i32_0 : i32, i32, i32, i32
  }
  func.func @transform_1(%arg0: i32, %arg1: i32) -> (i32, i32, i32, i32) {
    %c0_i32 = arith.constant 0 : i32
    %c0_i32_0 = arith.constant 0 : i32
    %c0_i32_1 = arith.constant 0 : i32
    return %arg1, %arg0, %c0_i32, %c0_i32_0 : i32, i32, i32, i32
  }
  func.func @transform_2(%arg0: i32, %arg1: i32) -> (i32, i32, i32, i32) {
    %c0_i32 = arith.constant 0 : i32
    %c0_i32_0 = arith.constant 0 : i32
    %c0_i32_1 = arith.constant 0 : i32
    return %arg1, %arg0, %c0_i32, %c0_i32_0 : i32, i32, i32, i32
  }
  func.func @transform_3(%arg0: i32, %arg1: i32) -> (i32, i32, i32, i32) {
    %c0_i32 = arith.constant 0 : i32
    %c0_i32_0 = arith.constant 0 : i32
    %c0_i32_1 = arith.constant 0 : i32
    return %arg1, %arg0, %c0_i32, %c0_i32_0 : i32, i32, i32, i32
  }
  func.func @transform_4(%arg0: i32, %arg1: i32) -> (i32, i32) {
    %c0_i32 = arith.constant 0 : i32
    %c0_i32_0 = arith.constant 0 : i32
    %c0_i32_1 = arith.constant 0 : i32
    return %c0_i32, %c0_i32_0 : i32, i32
  }
  func.func @transform_5(%arg0: i32, %arg1: i32) -> (i32, i32) {
    %c0_i32 = arith.constant 0 : i32
    %c0_i32_0 = arith.constant 0 : i32
    %c0_i32_1 = arith.constant 0 : i32
    return %c0_i32, %c0_i32_0 : i32, i32
  }
  func.func @transform_6(%arg0: i32, %arg1: i32) -> (i32, i32) {
    %c0_i32 = arith.constant 0 : i32
    %c0_i32_0 = arith.constant 0 : i32
    %c0_i32_1 = arith.constant 0 : i32
    return %c0_i32, %c0_i32_0 : i32, i32
  }
  func.func @transform_7(%arg0: i32, %arg1: i32) -> (i32, i32) {
    %c0_i32 = arith.constant 0 : i32
    %c0_i32_0 = arith.constant 0 : i32
    %c0_i32_1 = arith.constant 0 : i32
    return %c0_i32, %c0_i32_0 : i32, i32
  }
  func.func @transform_8(%arg0: i32, %arg1: i32) -> (i32, i32) {
    %c0_i32 = arith.constant 0 : i32
    %c0_i32_0 = arith.constant 0 : i32
    %c0_i32_1 = arith.constant 0 : i32
    return %c0_i32, %c0_i32_0 : i32, i32
  }
  func.func @transform_9(%arg0: i32, %arg1: i32) -> (i32, i32) {
    %c0_i32 = arith.constant 0 : i32
    %c0_i32_0 = arith.constant 0 : i32
    %c0_i32_1 = arith.constant 0 : i32
    return %c0_i32, %c0_i32_0 : i32, i32
  }
  func.func @transform_10(%arg0: i32, %arg1: i32) -> (i32, i32) {
    %c0_i32 = arith.constant 0 : i32
    %c0_i32_0 = arith.constant 0 : i32
    %c0_i32_1 = arith.constant 0 : i32
    return %c0_i32, %c0_i32_0 : i32, i32
  }
  func.func @transform_11(%arg0: i32, %arg1: i32) -> (i32, i32) {
    %c0_i32 = arith.constant 0 : i32
    %c0_i32_0 = arith.constant 0 : i32
    %c0_i32_1 = arith.constant 0 : i32
    return %c0_i32, %c0_i32_0 : i32, i32
  }
  func.func @transform_12(%arg0: i32, %arg1: i32) -> (i32, i32, i32, i32) {
    %c0_i32 = arith.constant 0 : i32
    %c0_i32_0 = arith.constant 0 : i32
    %c0_i32_1 = arith.constant 0 : i32
    return %arg1, %arg0, %c0_i32, %c0_i32_0 : i32, i32, i32, i32
  }
}

module attributes {stable_mosaic.version = 11 : i64} {
  func.func @_mlp_kernel(%arg0: i32, %arg1: i32, %arg2: memref<1x128x128xf32, #tpu.memory_space<vmem>>, %arg3: memref<128x512xbf16, #tpu.memory_space<vmem>>, %arg4: memref<1x512xf32, #tpu.memory_space<vmem>>, %arg5: memref<512x128xbf16, #tpu.memory_space<vmem>>, %arg6: memref<1x128xf32, #tpu.memory_space<vmem>>, %arg7: memref<1x128x128xf32, #tpu.memory_space<vmem>>, %arg8: memref<128x128xf32, #tpu.memory_space<vmem>>, %arg9: memref<128x512xf32, #tpu.memory_space<vmem>>) attributes {dimension_semantics = [#tpu.dimension_semantics<parallel>, #tpu.dimension_semantics<arbitrary>], iteration_bounds = array<i64: 1, 4>, scalar_prefetch = 0 : i64, scratch_operands = 2 : i64, tpu.core_type = #tpu.core_type<tc>, window_params = [{transform_indices = @transform_0, window_bounds = array<i64: 1, 128, 128>}, {pipeline_mode = #tpu.pipeline_mode<synchronous>, transform_indices = @transform_1, window_bounds = array<i64: 128, 512>}, {pipeline_mode = #tpu.pipeline_mode<synchronous>, transform_indices = @transform_2, window_bounds = array<i64: 1, 512>}, {pipeline_mode = #tpu.pipeline_mode<synchronous>, transform_indices = @transform_3, window_bounds = array<i64: 512, 128>}, {pipeline_mode = #tpu.pipeline_mode<synchronous>, transform_indices = @transform_4, window_bounds = array<i64: 1, 128>}, {transform_indices = @transform_5, window_bounds = array<i64: 1, 128, 128>}]} {
    %c0_i32 = arith.constant 0 : i32
    %0 = arith.cmpi eq, %arg1, %c0_i32 : i32
    %1 = arith.extui %0 : i1 to i32
    %c0_i32_0 = arith.constant 0 : i32
    %2 = arith.cmpi ne, %1, %c0_i32_0 : i32
    scf.if %2 {
      %cst_29 = arith.constant 0.000000e+00 : f32
      %47 = vector.broadcast %cst_29 : f32 to vector<128x128xf32>
      %c0_30 = arith.constant 0 : index
      %c0_31 = arith.constant 0 : index
      %48 = vector.load %arg8[%c0_30, %c0_31] : memref<128x128xf32, #tpu.memory_space<vmem>>, vector<128x128xf32>
      tpu.vector_store %arg8[%c0_30, %c0_31], %47 {strides = array<i32>} : memref<128x128xf32, #tpu.memory_space<vmem>>, vector<128x128xf32>,
      %cst_32 = arith.constant 0.000000e+00 : f32
      %49 = vector.broadcast %cst_32 : f32 to vector<128x512xf32>
      %c0_33 = arith.constant 0 : index
      %c0_34 = arith.constant 0 : index
      %50 = vector.load %arg9[%c0_33, %c0_34] : memref<128x512xf32, #tpu.memory_space<vmem>>, vector<128x512xf32>
      tpu.vector_store %arg9[%c0_33, %c0_34], %49 {strides = array<i32>} : memref<128x512xf32, #tpu.memory_space<vmem>>, vector<128x512xf32>,
    } else {
    }
    %c0 = arith.constant 0 : index
    %c0_1 = arith.constant 0 : index
    %c0_2 = arith.constant 0 : index
    %3 = vector.load %arg2[%c0, %c0_1, %c0_2] : memref<1x128x128xf32, #tpu.memory_space<vmem>>, vector<1x128x128xf32>
    %4 = vector.shape_cast %3 : vector<1x128x128xf32> to vector<128x128xf32>
    %c0_3 = arith.constant 0 : index
    %c0_4 = arith.constant 0 : index
    %5 = vector.load %arg8[%c0_3, %c0_4] : memref<128x128xf32, #tpu.memory_space<vmem>>, vector<128x128xf32>
    %6 = arith.subf %4, %5 : vector<128x128xf32>
    %cst = arith.constant 5.000000e-01 : f32
    %7 = vector.broadcast %cst : f32 to vector<128x128xf32>
    %8 = arith.mulf %6, %7 : vector<128x128xf32>
    %9 = arith.addf %5, %8 : vector<128x128xf32>
    %cst_5 = arith.constant 5.000000e-01 : f32
    %10 = vector.broadcast %cst_5 : f32 to vector<128x128xf32>
    %11 = arith.cmpf ogt, %9, %10 : vector<128x128xf32>
    %12 = arith.extui %11 : vector<128x128xi1> to vector<128x128xi32>
    %13 = arith.sitofp %12 : vector<128x128xi32> to vector<128x128xf32>
    %cst_6 = arith.constant 1.000000e+00 : f32
    %14 = vector.broadcast %cst_6 : f32 to vector<128x128xf32>
    %15 = arith.subf %14, %13 : vector<128x128xf32>
    %16 = arith.mulf %9, %15 : vector<128x128xf32>
    %c0_7 = arith.constant 0 : index
    %c0_8 = arith.constant 0 : index
    %17 = vector.load %arg8[%c0_7, %c0_8] : memref<128x128xf32, #tpu.memory_space<vmem>>, vector<128x128xf32>
    tpu.vector_store %arg8[%c0_7, %c0_8], %16 {strides = array<i32>} : memref<128x128xf32, #tpu.memory_space<vmem>>, vector<128x128xf32>,
    %18 = arith.truncf %13 : vector<128x128xf32> to vector<128x128xbf16>
    %c0_9 = arith.constant 0 : index
    %c0_10 = arith.constant 0 : index
    %19 = vector.load %arg3[%c0_9, %c0_10] : memref<128x512xbf16, #tpu.memory_space<vmem>>, vector<128x512xbf16>
    %cst_11 = arith.constant dense<0.000000e+00> : vector<128x512xf32>
    %20 = tpu.matmul %18, %19, %cst_11 {dimension_numbers = #tpu.dot_dimension_numbers<[1], [0], [0], [1], [0, 0, 1, 1], [], []>} : vector<128x128xbf16>, vector<128x512xbf16>, vector<128x512xf32> -> vector<128x512xf32>
    %c0_12 = arith.constant 0 : index
    %c0_13 = arith.constant 0 : index
    %21 = vector.load %arg4[%c0_12, %c0_13] : memref<1x512xf32, #tpu.memory_space<vmem>>, vector<1x512xf32>
    %22 = vector.broadcast %21 : vector<1x512xf32> to vector<128x512xf32>
    %23 = arith.addf %20, %22 : vector<128x512xf32>
    %c0_14 = arith.constant 0 : index
    %c0_15 = arith.constant 0 : index
    %24 = vector.load %arg9[%c0_14, %c0_15] : memref<128x512xf32, #tpu.memory_space<vmem>>, vector<128x512xf32>
    %25 = arith.subf %23, %24 : vector<128x512xf32>
    %cst_16 = arith.constant 5.000000e-01 : f32
    %26 = vector.broadcast %cst_16 : f32 to vector<128x512xf32>
    %27 = arith.mulf %25, %26 : vector<128x512xf32>
    %28 = arith.addf %24, %27 : vector<128x512xf32>
    %cst_17 = arith.constant 5.000000e-01 : f32
    %29 = vector.broadcast %cst_17 : f32 to vector<128x512xf32>
    %30 = arith.cmpf ogt, %28, %29 : vector<128x512xf32>
    %31 = arith.extui %30 : vector<128x512xi1> to vector<128x512xi32>
    %32 = arith.sitofp %31 : vector<128x512xi32> to vector<128x512xf32>
    %cst_18 = arith.constant 1.000000e+00 : f32
    %33 = vector.broadcast %cst_18 : f32 to vector<128x512xf32>
    %34 = arith.subf %33, %32 : vector<128x512xf32>
    %35 = arith.mulf %28, %34 : vector<128x512xf32>
    %c0_19 = arith.constant 0 : index
    %c0_20 = arith.constant 0 : index
    %36 = vector.load %arg9[%c0_19, %c0_20] : memref<128x512xf32, #tpu.memory_space<vmem>>, vector<128x512xf32>
    tpu.vector_store %arg9[%c0_19, %c0_20], %35 {strides = array<i32>} : memref<128x512xf32, #tpu.memory_space<vmem>>, vector<128x512xf32>,
    %37 = arith.truncf %32 : vector<128x512xf32> to vector<128x512xbf16>
    %c0_21 = arith.constant 0 : index
    %c0_22 = arith.constant 0 : index
    %38 = vector.load %arg5[%c0_21, %c0_22] : memref<512x128xbf16, #tpu.memory_space<vmem>>, vector<512x128xbf16>
    %cst_23 = arith.constant dense<0.000000e+00> : vector<128x128xf32>
    %39 = tpu.matmul %37, %38, %cst_23 {dimension_numbers = #tpu.dot_dimension_numbers<[1], [0], [0], [1], [0, 0, 1, 1], [], []>} : vector<128x512xbf16>, vector<512x128xbf16>, vector<128x128xf32> -> vector<128x128xf32>
    %c0_24 = arith.constant 0 : index
    %c0_25 = arith.constant 0 : index
    %40 = vector.load %arg6[%c0_24, %c0_25] : memref<1x128xf32, #tpu.memory_space<vmem>>, vector<1x128xf32>
    %41 = vector.broadcast %40 : vector<1x128xf32> to vector<128x128xf32>
    %42 = arith.addf %39, %41 : vector<128x128xf32>
    %43 = arith.addf %42, %4 : vector<128x128xf32>
    %c0_26 = arith.constant 0 : index
    %c0_27 = arith.constant 0 : index
    %c0_28 = arith.constant 0 : index
    %44 = vector.load %arg7[%c0_26, %c0_27, %c0_28] : memref<1x128x128xf32, #tpu.memory_space<vmem>>, vector<1x128x128xf32>
    %45 = vector.shape_cast %44 : vector<1x128x128xf32> to vector<128x128xf32>
    %46 = vector.shape_cast %43 : vector<128x128xf32> to vector<1x128x128xf32>
    tpu.vector_store %arg7[%c0_26, %c0_27, %c0_28], %46 {strides = array<i32>} : memref<1x128x128xf32, #tpu.memory_space<vmem>>, vector<1x128x128xf32>,
    return
  }
  func.func @transform_0(%arg0: i32, %arg1: i32) -> (i32, i32, i32) {
    %c0_i32 = arith.constant 0 : i32
    %c0_i32_0 = arith.constant 0 : i32
    return %arg1, %arg0, %c0_i32 : i32, i32, i32
  }
  func.func @transform_1(%arg0: i32, %arg1: i32) -> (i32, i32) {
    %c0_i32 = arith.constant 0 : i32
    %c0_i32_0 = arith.constant 0 : i32
    %c0_i32_1 = arith.constant 0 : i32
    return %c0_i32, %c0_i32_0 : i32, i32
  }
  func.func @transform_2(%arg0: i32, %arg1: i32) -> (i32, i32) {
    %c0_i32 = arith.constant 0 : i32
    %c0_i32_0 = arith.constant 0 : i32
    %c0_i32_1 = arith.constant 0 : i32
    return %c0_i32, %c0_i32_0 : i32, i32
  }
  func.func @transform_3(%arg0: i32, %arg1: i32) -> (i32, i32) {
    %c0_i32 = arith.constant 0 : i32
    %c0_i32_0 = arith.constant 0 : i32
    %c0_i32_1 = arith.constant 0 : i32
    return %c0_i32, %c0_i32_0 : i32, i32
  }
  func.func @transform_4(%arg0: i32, %arg1: i32) -> (i32, i32) {
    %c0_i32 = arith.constant 0 : i32
    %c0_i32_0 = arith.constant 0 : i32
    %c0_i32_1 = arith.constant 0 : i32
    return %c0_i32, %c0_i32_0 : i32, i32
  }
  func.func @transform_5(%arg0: i32, %arg1: i32) -> (i32, i32, i32) {
    %c0_i32 = arith.constant 0 : i32
    %c0_i32_0 = arith.constant 0 : i32
    return %arg1, %arg0, %c0_i32 : i32, i32, i32
  }
}

module attributes {stable_mosaic.version = 11 : i64} {
  func.func @_sdsa_qkv_kernel(%arg0: i32, %arg1: i32, %arg2: memref<1x128x128xf32, #tpu.memory_space<vmem>>, %arg3: memref<128x128xbf16, #tpu.memory_space<vmem>>, %arg4: memref<1x128xf32, #tpu.memory_space<vmem>>, %arg5: memref<128x128xbf16, #tpu.memory_space<vmem>>, %arg6: memref<1x128xf32, #tpu.memory_space<vmem>>, %arg7: memref<128x128xbf16, #tpu.memory_space<vmem>>, %arg8: memref<1x128xf32, #tpu.memory_space<vmem>>, %arg9: memref<1x128x128xbf16, #tpu.memory_space<vmem>>, %arg10: memref<1x128x128xbf16, #tpu.memory_space<vmem>>, %arg11: memref<1x128x128xbf16, #tpu.memory_space<vmem>>, %arg12: memref<128x128xf32, #tpu.memory_space<vmem>>, %arg13: memref<128x128xf32, #tpu.memory_space<vmem>>, %arg14: memref<128x128xf32, #tpu.memory_space<vmem>>, %arg15: memref<128x128xf32, #tpu.memory_space<vmem>>) attributes {dimension_semantics = [#tpu.dimension_semantics<parallel>, #tpu.dimension_semantics<arbitrary>], iteration_bounds = array<i64: 1, 4>, scalar_prefetch = 0 : i64, scratch_operands = 4 : i64, tpu.core_type = #tpu.core_type<tc>, window_params = [{transform_indices = @transform_0, window_bounds = array<i64: 1, 128, 128>}, {pipeline_mode = #tpu.pipeline_mode<synchronous>, transform_indices = @transform_1, window_bounds = array<i64: 128, 128>}, {pipeline_mode = #tpu.pipeline_mode<synchronous>, transform_indices = @transform_2, window_bounds = array<i64: 1, 128>}, {pipeline_mode = #tpu.pipeline_mode<synchronous>, transform_indices = @transform_3, window_bounds = array<i64: 128, 128>}, {pipeline_mode = #tpu.pipeline_mode<synchronous>, transform_indices = @transform_4, window_bounds = array<i64: 1, 128>}, {pipeline_mode = #tpu.pipeline_mode<synchronous>, transform_indices = @transform_5, window_bounds = array<i64: 128, 128>}, {pipeline_mode = #tpu.pipeline_mode<synchronous>, transform_indices = @transform_6, window_bounds = array<i64: 1, 128>}, {transform_indices = @transform_7, window_bounds = array<i64: 1, 128, 128>}, {transform_indices = @transform_8, window_bounds = array<i64: 1, 128, 128>}, {transform_indices = @transform_9, window_bounds = array<i64: 1, 128, 128>}]} {
    %c0_i32 = arith.constant 0 : i32
    %0 = arith.cmpi eq, %arg1, %c0_i32 : i32
    %1 = arith.extui %0 : i1 to i32
    %c0_i32_0 = arith.constant 0 : i32
    %2 = arith.cmpi ne, %1, %c0_i32_0 : i32
    scf.if %2 {
      %cst_54 = arith.constant 0.000000e+00 : f32
      %85 = vector.broadcast %cst_54 : f32 to vector<128x128xf32>
      %c0_55 = arith.constant 0 : index
      %c0_56 = arith.constant 0 : index
      %86 = vector.load %arg12[%c0_55, %c0_56] : memref<128x128xf32, #tpu.memory_space<vmem>>, vector<128x128xf32>
      tpu.vector_store %arg12[%c0_55, %c0_56], %85 {strides = array<i32>} : memref<128x128xf32, #tpu.memory_space<vmem>>, vector<128x128xf32>,
      %cst_57 = arith.constant 0.000000e+00 : f32
      %87 = vector.broadcast %cst_57 : f32 to vector<128x128xf32>
      %c0_58 = arith.constant 0 : index
      %c0_59 = arith.constant 0 : index
      %88 = vector.load %arg13[%c0_58, %c0_59] : memref<128x128xf32, #tpu.memory_space<vmem>>, vector<128x128xf32>
      tpu.vector_store %arg13[%c0_58, %c0_59], %87 {strides = array<i32>} : memref<128x128xf32, #tpu.memory_space<vmem>>, vector<128x128xf32>,
      %cst_60 = arith.constant 0.000000e+00 : f32
      %89 = vector.broadcast %cst_60 : f32 to vector<128x128xf32>
      %c0_61 = arith.constant 0 : index
      %c0_62 = arith.constant 0 : index
      %90 = vector.load %arg14[%c0_61, %c0_62] : memref<128x128xf32, #tpu.memory_space<vmem>>, vector<128x128xf32>
      tpu.vector_store %arg14[%c0_61, %c0_62], %89 {strides = array<i32>} : memref<128x128xf32, #tpu.memory_space<vmem>>, vector<128x128xf32>,
      %cst_63 = arith.constant 0.000000e+00 : f32
      %91 = vector.broadcast %cst_63 : f32 to vector<128x128xf32>
      %c0_64 = arith.constant 0 : index
      %c0_65 = arith.constant 0 : index
      %92 = vector.load %arg15[%c0_64, %c0_65] : memref<128x128xf32, #tpu.memory_space<vmem>>, vector<128x128xf32>
      tpu.vector_store %arg15[%c0_64, %c0_65], %91 {strides = array<i32>} : memref<128x128xf32, #tpu.memory_space<vmem>>, vector<128x128xf32>,
    } else {
    }
    %c0 = arith.constant 0 : index
    %c0_1 = arith.constant 0 : index
    %3 = vector.load %arg12[%c0, %c0_1] : memref<128x128xf32, #tpu.memory_space<vmem>>, vector<128x128xf32>
    %c0_2 = arith.constant 0 : index
    %c0_3 = arith.constant 0 : index
    %c0_4 = arith.constant 0 : index
    %4 = vector.load %arg2[%c0_2, %c0_3, %c0_4] : memref<1x128x128xf32, #tpu.memory_space<vmem>>, vector<1x128x128xf32>
    %5 = vector.shape_cast %4 : vector<1x128x128xf32> to vector<128x128xf32>
    %6 = arith.subf %5, %3 : vector<128x128xf32>
    %cst = arith.constant 5.000000e-01 : f32
    %7 = vector.broadcast %cst : f32 to vector<128x128xf32>
    %8 = arith.mulf %6, %7 : vector<128x128xf32>
    %9 = arith.addf %3, %8 : vector<128x128xf32>
    %cst_5 = arith.constant 5.000000e-01 : f32
    %10 = vector.broadcast %cst_5 : f32 to vector<128x128xf32>
    %11 = arith.cmpf ogt, %9, %10 : vector<128x128xf32>
    %12 = arith.extui %11 : vector<128x128xi1> to vector<128x128xi32>
    %13 = arith.sitofp %12 : vector<128x128xi32> to vector<128x128xf32>
    %cst_6 = arith.constant 1.000000e+00 : f32
    %14 = vector.broadcast %cst_6 : f32 to vector<128x128xf32>
    %15 = arith.subf %14, %13 : vector<128x128xf32>
    %16 = arith.mulf %9, %15 : vector<128x128xf32>
    %c0_7 = arith.constant 0 : index
    %c0_8 = arith.constant 0 : index
    %17 = vector.load %arg12[%c0_7, %c0_8] : memref<128x128xf32, #tpu.memory_space<vmem>>, vector<128x128xf32>
    tpu.vector_store %arg12[%c0_7, %c0_8], %16 {strides = array<i32>} : memref<128x128xf32, #tpu.memory_space<vmem>>, vector<128x128xf32>,
    %18 = arith.truncf %13 : vector<128x128xf32> to vector<128x128xbf16>
    %c0_9 = arith.constant 0 : index
    %c0_10 = arith.constant 0 : index
    %19 = vector.load %arg3[%c0_9, %c0_10] : memref<128x128xbf16, #tpu.memory_space<vmem>>, vector<128x128xbf16>
    %cst_11 = arith.constant dense<0.000000e+00> : vector<128x128xf32>
    %20 = tpu.matmul %18, %19, %cst_11 {dimension_numbers = #tpu.dot_dimension_numbers<[1], [0], [0], [1], [0, 0, 1, 1], [], []>} : vector<128x128xbf16>, vector<128x128xbf16>, vector<128x128xf32> -> vector<128x128xf32>
    %c0_12 = arith.constant 0 : index
    %c0_13 = arith.constant 0 : index
    %21 = vector.load %arg4[%c0_12, %c0_13] : memref<1x128xf32, #tpu.memory_space<vmem>>, vector<1x128xf32>
    %22 = vector.broadcast %21 : vector<1x128xf32> to vector<128x128xf32>
    %23 = arith.addf %20, %22 : vector<128x128xf32>
    %c0_14 = arith.constant 0 : index
    %c0_15 = arith.constant 0 : index
    %24 = vector.load %arg13[%c0_14, %c0_15] : memref<128x128xf32, #tpu.memory_space<vmem>>, vector<128x128xf32>
    %25 = arith.subf %23, %24 : vector<128x128xf32>
    %cst_16 = arith.constant 5.000000e-01 : f32
    %26 = vector.broadcast %cst_16 : f32 to vector<128x128xf32>
    %27 = arith.mulf %25, %26 : vector<128x128xf32>
    %28 = arith.addf %24, %27 : vector<128x128xf32>
    %cst_17 = arith.constant 5.000000e-01 : f32
    %29 = vector.broadcast %cst_17 : f32 to vector<128x128xf32>
    %30 = arith.cmpf ogt, %28, %29 : vector<128x128xf32>
    %31 = arith.extui %30 : vector<128x128xi1> to vector<128x128xi32>
    %32 = arith.sitofp %31 : vector<128x128xi32> to vector<128x128xf32>
    %cst_18 = arith.constant 1.000000e+00 : f32
    %33 = vector.broadcast %cst_18 : f32 to vector<128x128xf32>
    %34 = arith.subf %33, %32 : vector<128x128xf32>
    %35 = arith.mulf %28, %34 : vector<128x128xf32>
    %c0_19 = arith.constant 0 : index
    %c0_20 = arith.constant 0 : index
    %36 = vector.load %arg13[%c0_19, %c0_20] : memref<128x128xf32, #tpu.memory_space<vmem>>, vector<128x128xf32>
    tpu.vector_store %arg13[%c0_19, %c0_20], %35 {strides = array<i32>} : memref<128x128xf32, #tpu.memory_space<vmem>>, vector<128x128xf32>,
    %37 = arith.truncf %32 : vector<128x128xf32> to vector<128x128xbf16>
    %c0_21 = arith.constant 0 : index
    %c0_22 = arith.constant 0 : index
    %c0_23 = arith.constant 0 : index
    %38 = vector.load %arg9[%c0_21, %c0_22, %c0_23] : memref<1x128x128xbf16, #tpu.memory_space<vmem>>, vector<1x128x128xbf16>
    %39 = vector.shape_cast %38 : vector<1x128x128xbf16> to vector<128x128xbf16>
    %40 = vector.shape_cast %37 : vector<128x128xbf16> to vector<1x128x128xbf16>
    tpu.vector_store %arg9[%c0_21, %c0_22, %c0_23], %40 {strides = array<i32>} : memref<1x128x128xbf16, #tpu.memory_space<vmem>>, vector<1x128x128xbf16>,
    %c0_24 = arith.constant 0 : index
    %c0_25 = arith.constant 0 : index
    %41 = vector.load %arg5[%c0_24, %c0_25] : memref<128x128xbf16, #tpu.memory_space<vmem>>, vector<128x128xbf16>
    %cst_26 = arith.constant dense<0.000000e+00> : vector<128x128xf32>
    %42 = tpu.matmul %18, %41, %cst_26 {dimension_numbers = #tpu.dot_dimension_numbers<[1], [0], [0], [1], [0, 0, 1, 1], [], []>} : vector<128x128xbf16>, vector<128x128xbf16>, vector<128x128xf32> -> vector<128x128xf32>
    %c0_27 = arith.constant 0 : index
    %c0_28 = arith.constant 0 : index
    %43 = vector.load %arg6[%c0_27, %c0_28] : memref<1x128xf32, #tpu.memory_space<vmem>>, vector<1x128xf32>
    %44 = vector.broadcast %43 : vector<1x128xf32> to vector<128x128xf32>
    %45 = arith.addf %42, %44 : vector<128x128xf32>
    %c0_29 = arith.constant 0 : index
    %c0_30 = arith.constant 0 : index
    %46 = vector.load %arg14[%c0_29, %c0_30] : memref<128x128xf32, #tpu.memory_space<vmem>>, vector<128x128xf32>
    %47 = arith.subf %45, %46 : vector<128x128xf32>
    %cst_31 = arith.constant 5.000000e-01 : f32
    %48 = vector.broadcast %cst_31 : f32 to vector<128x128xf32>
    %49 = arith.mulf %47, %48 : vector<128x128xf32>
    %50 = arith.addf %46, %49 : vector<128x128xf32>
    %cst_32 = arith.constant 5.000000e-01 : f32
    %51 = vector.broadcast %cst_32 : f32 to vector<128x128xf32>
    %52 = arith.cmpf ogt, %50, %51 : vector<128x128xf32>
    %53 = arith.extui %52 : vector<128x128xi1> to vector<128x128xi32>
    %54 = arith.sitofp %53 : vector<128x128xi32> to vector<128x128xf32>
    %cst_33 = arith.constant 1.000000e+00 : f32
    %55 = vector.broadcast %cst_33 : f32 to vector<128x128xf32>
    %56 = arith.subf %55, %54 : vector<128x128xf32>
    %57 = arith.mulf %50, %56 : vector<128x128xf32>
    %c0_34 = arith.constant 0 : index
    %c0_35 = arith.constant 0 : index
    %58 = vector.load %arg14[%c0_34, %c0_35] : memref<128x128xf32, #tpu.memory_space<vmem>>, vector<128x128xf32>
    tpu.vector_store %arg14[%c0_34, %c0_35], %57 {strides = array<i32>} : memref<128x128xf32, #tpu.memory_space<vmem>>, vector<128x128xf32>,
    %59 = arith.truncf %54 : vector<128x128xf32> to vector<128x128xbf16>
    %c0_36 = arith.constant 0 : index
    %c0_37 = arith.constant 0 : index
    %c0_38 = arith.constant 0 : index
    %60 = vector.load %arg10[%c0_36, %c0_37, %c0_38] : memref<1x128x128xbf16, #tpu.memory_space<vmem>>, vector<1x128x128xbf16>
    %61 = vector.shape_cast %60 : vector<1x128x128xbf16> to vector<128x128xbf16>
    %62 = vector.shape_cast %59 : vector<128x128xbf16> to vector<1x128x128xbf16>
    tpu.vector_store %arg10[%c0_36, %c0_37, %c0_38], %62 {strides = array<i32>} : memref<1x128x128xbf16, #tpu.memory_space<vmem>>, vector<1x128x128xbf16>,
    %c0_39 = arith.constant 0 : index
    %c0_40 = arith.constant 0 : index
    %63 = vector.load %arg7[%c0_39, %c0_40] : memref<128x128xbf16, #tpu.memory_space<vmem>>, vector<128x128xbf16>
    %cst_41 = arith.constant dense<0.000000e+00> : vector<128x128xf32>
    %64 = tpu.matmul %18, %63, %cst_41 {dimension_numbers = #tpu.dot_dimension_numbers<[1], [0], [0], [1], [0, 0, 1, 1], [], []>} : vector<128x128xbf16>, vector<128x128xbf16>, vector<128x128xf32> -> vector<128x128xf32>
    %c0_42 = arith.constant 0 : index
    %c0_43 = arith.constant 0 : index
    %65 = vector.load %arg8[%c0_42, %c0_43] : memref<1x128xf32, #tpu.memory_space<vmem>>, vector<1x128xf32>
    %66 = vector.broadcast %65 : vector<1x128xf32> to vector<128x128xf32>
    %67 = arith.addf %64, %66 : vector<128x128xf32>
    %c0_44 = arith.constant 0 : index
    %c0_45 = arith.constant 0 : index
    %68 = vector.load %arg15[%c0_44, %c0_45] : memref<128x128xf32, #tpu.memory_space<vmem>>, vector<128x128xf32>
    %69 = arith.subf %67, %68 : vector<128x128xf32>
    %cst_46 = arith.constant 5.000000e-01 : f32
    %70 = vector.broadcast %cst_46 : f32 to vector<128x128xf32>
    %71 = arith.mulf %69, %70 : vector<128x128xf32>
    %72 = arith.addf %68, %71 : vector<128x128xf32>
    %cst_47 = arith.constant 5.000000e-01 : f32
    %73 = vector.broadcast %cst_47 : f32 to vector<128x128xf32>
    %74 = arith.cmpf ogt, %72, %73 : vector<128x128xf32>
    %75 = arith.extui %74 : vector<128x128xi1> to vector<128x128xi32>
    %76 = arith.sitofp %75 : vector<128x128xi32> to vector<128x128xf32>
    %cst_48 = arith.constant 1.000000e+00 : f32
    %77 = vector.broadcast %cst_48 : f32 to vector<128x128xf32>
    %78 = arith.subf %77, %76 : vector<128x128xf32>
    %79 = arith.mulf %72, %78 : vector<128x128xf32>
    %c0_49 = arith.constant 0 : index
    %c0_50 = arith.constant 0 : index
    %80 = vector.load %arg15[%c0_49, %c0_50] : memref<128x128xf32, #tpu.memory_space<vmem>>, vector<128x128xf32>
    tpu.vector_store %arg15[%c0_49, %c0_50], %79 {strides = array<i32>} : memref<128x128xf32, #tpu.memory_space<vmem>>, vector<128x128xf32>,
    %81 = arith.truncf %76 : vector<128x128xf32> to vector<128x128xbf16>
    %c0_51 = arith.constant 0 : index
    %c0_52 = arith.constant 0 : index
    %c0_53 = arith.constant 0 : index
    %82 = vector.load %arg11[%c0_51, %c0_52, %c0_53] : memref<1x128x128xbf16, #tpu.memory_space<vmem>>, vector<1x128x128xbf16>
    %83 = vector.shape_cast %82 : vector<1x128x128xbf16> to vector<128x128xbf16>
    %84 = vector.shape_cast %81 : vector<128x128xbf16> to vector<1x128x128xbf16>
    tpu.vector_store %arg11[%c0_51, %c0_52, %c0_53], %84 {strides = array<i32>} : memref<1x128x128xbf16, #tpu.memory_space<vmem>>, vector<1x128x128xbf16>,
    return
  }
  func.func @transform_0(%arg0: i32, %arg1: i32) -> (i32, i32, i32) {
    %c0_i32 = arith.constant 0 : i32
    %c0_i32_0 = arith.constant 0 : i32
    return %arg1, %arg0, %c0_i32 : i32, i32, i32
  }
  func.func @transform_1(%arg0: i32, %arg1: i32) -> (i32, i32) {
    %c0_i32 = arith.constant 0 : i32
    %c0_i32_0 = arith.constant 0 : i32
    %c0_i32_1 = arith.constant 0 : i32
    return %c0_i32, %c0_i32_0 : i32, i32
  }
  func.func @transform_2(%arg0: i32, %arg1: i32) -> (i32, i32) {
    %c0_i32 = arith.constant 0 : i32
    %c0_i32_0 = arith.constant 0 : i32
    %c0_i32_1 = arith.constant 0 : i32
    return %c0_i32, %c0_i32_0 : i32, i32
  }
  func.func @transform_3(%arg0: i32, %arg1: i32) -> (i32, i32) {
    %c0_i32 = arith.constant 0 : i32
    %c0_i32_0 = arith.constant 0 : i32
    %c0_i32_1 = arith.constant 0 : i32
    return %c0_i32, %c0_i32_0 : i32, i32
  }
  func.func @transform_4(%arg0: i32, %arg1: i32) -> (i32, i32) {
    %c0_i32 = arith.constant 0 : i32
    %c0_i32_0 = arith.constant 0 : i32
    %c0_i32_1 = arith.constant 0 : i32
    return %c0_i32, %c0_i32_0 : i32, i32
  }
  func.func @transform_5(%arg0: i32, %arg1: i32) -> (i32, i32) {
    %c0_i32 = arith.constant 0 : i32
    %c0_i32_0 = arith.constant 0 : i32
    %c0_i32_1 = arith.constant 0 : i32
    return %c0_i32, %c0_i32_0 : i32, i32
  }
  func.func @transform_6(%arg0: i32, %arg1: i32) -> (i32, i32) {
    %c0_i32 = arith.constant 0 : i32
    %c0_i32_0 = arith.constant 0 : i32
    %c0_i32_1 = arith.constant 0 : i32
    return %c0_i32, %c0_i32_0 : i32, i32
  }
  func.func @transform_7(%arg0: i32, %arg1: i32) -> (i32, i32, i32) {
    %c0_i32 = arith.constant 0 : i32
    %c0_i32_0 = arith.constant 0 : i32
    return %arg1, %arg0, %c0_i32 : i32, i32, i32
  }
  func.func @transform_8(%arg0: i32, %arg1: i32) -> (i32, i32, i32) {
    %c0_i32 = arith.constant 0 : i32
    %c0_i32_0 = arith.constant 0 : i32
    return %arg1, %arg0, %c0_i32 : i32, i32, i32
  }
  func.func @transform_9(%arg0: i32, %arg1: i32) -> (i32, i32, i32) {
    %c0_i32 = arith.constant 0 : i32
    %c0_i32_0 = arith.constant 0 : i32
    return %arg1, %arg0, %c0_i32 : i32, i32, i32
  }
}

</mosaic_0001>

<bundles_post_ra>
// kernel: sdt_block_forward.3
= control target key start
LH: loop header
LB: loop body
LE: loop exit
PB: predicated region body
PF: predicated region fallthrough
CT: control target
= control target key end

     0   :  { %s3839_s0 = inlined_call_operand.hbm [shape: f32[4,128,128], index: 0, kind: input, shape index: {}]   ;;  %s3840_s1 = inlined_call_operand.hbm [shape: bf16[128,128], index: 1, kind: input, shape index: {}]   ;;  %s3841_s2 = inlined_call_operand.hbm [shape: f32[1,128], index: 2, kind: input, shape index: {}]   ;;  %s3842_s3 = inlined_call_operand.hbm [shape: bf16[128,128], index: 3, kind: input, shape index: {}]   ;;  %s3843_s4 = inlined_call_operand.hbm [shape: f32[1,128], index: 4, kind: input, shape index: {}]   ;;  %s3844_s5 = inlined_call_operand.hbm [shape: bf16[128,128], index: 5, kind: input, shape index: {}]   ;;  %s3845_s6 = inlined_call_operand.hbm [shape: f32[1,128], index: 6, kind: input, shape index: {}]   ;;  %s3846_s7 = inlined_call_operand.vmem [shape: bf16[4,128,128], index: 7, kind: output, shape index: {0}]   ;;  %s3847_s8 = inlined_call_operand.vmem [shape: bf16[4,128,128], index: 8, kind: output, shape index: {1}]   ;;  %s3848_s9 = inlined_call_operand.vmem [shape: bf16[4,128,128], index: 9, kind: output, shape index: {2}]  }
   0x1   :  { %3852 = sst [smem:[#allocation21_spill]] %s3840_s1 }
   0x2   :  { %3853 = sst [smem:[#allocation22_spill]] %s3841_s2 }
   0x3   :  { %3854 = sst [smem:[#allocation23_spill]] %s3842_s3 }
   0x4   :  { %15 = vsyncpa [#allocation7], 0 }
   0x5   :  { %17 = vsyncpa [#allocation7 + $0x1], 0 }
   0x6   :  { %18 = vsyncpa [#allocation9], 0 }
   0x7   :  { %19 = vsyncpa [#allocation12], 0 }
   0x8   :  { %20 = vsyncpa [#allocation15], 0  ;;  %s3219_s30 = smov 0   ;;  %s3221_s10 = smov 0  }
   0x9   :  { %s3223_s11 = smov 0   ;;  %s3225_s12 = smov 0  }
   0xa   :  { %s3227_s13 = smov 0   ;;  %s3229_s14 = smov 0  }
   0xb LB: > { %s2238_s15 = sadd.s32 4294967295, %s3153_s14   ;;  %p2240_p0 = scmp.ge.s32.totalorder %s3153_s14, 1  ;;  %s3153_s14 = sphi %s3229_s14, %s26_s14   ;;  %s3149_s13 = sphi %s3227_s13, %s3888_s13   ;;  %s3145_s12 = sphi %s3225_s12, %s3887_s12   ;;  %s3141_s11 = sphi %s3223_s11, %s3886_s11   ;;  %s3137_s10 = sphi %s3221_s10, %s3885_s10   ;;  %s3133_s30 = sphi %s3219_s30, %s3884_s30  }
   0xc   : > { %p3251_p1 = scmp.eq.s32.totalorder %s2238_s15, 0  ;;  %p281_p2 = scmp.lt.s32.totalorder %s3153_s14, 5 }
   0xd   : > { %s3155_s18 = smov [#allocation8]   ;;  %s3156_s21 = smov [#allocation11]  }
   0xe   : > { %s3855_s16 = scalar_select %p3251_p1, 1, 0 }
   0xf   : > { %p3256_p3 = pnand %p2240_p0, %p281_p2  ;;  %s293_s19 = sshll.u32 %s3155_s18, 4  ;;  %s294_s19 = int_to_ptr.vmem [resolvable:$true] %s293_s19 }
  0x10   : > { %s317_s22 = sshll.u32 %s3156_s21, 4  ;;  %s3157_s23 = smov [#allocation14]   ;;  %s318_s22 = int_to_ptr.vmem [resolvable:$true] %s317_s22 }
  0x11   : > { %s3856_s17 = scalar_select %p3256_p3, 1, 0 }
  0x12   : > { %p2786_p4 = pneg %p3256_p3  ;;  %s341_s24 = sshll.u32 %s3157_s23, 4  ;;  %s342_s24 = int_to_ptr.vmem [resolvable:$true] %s341_s24 }
  0x13   : > { %s2918_s26 = scalar_lea.vmem %s294_s19, 1024  ;;  %p2926_p10 = scmp.lt.s32.totalorder %s294_s19, %s294_s19 }
  0x14   : > { %p3264_p5 = pnand %p2786_p4, %p3251_p1  ;;  %p2919_p7 = scmp.ne.s32.totalorder %s294_s19, %s2918_s26 }
  0x15   : > { %p2927_p11 = scmp.lt.s32.totalorder %s2918_s26, %s2918_s26 }
  0x16   : > { %p3270_p6 = pneg %p3264_p5 }
  0x17   : > { %p2928_p12 = por %p2927_p11, %p2926_p10 }
  0x18   : > { %p2921_p8 = pnand %p2919_p7, %p3270_p6 }
  0x1a   : > { %p2922_p9 = pneg %p2921_p8 }
  0x1c   : > { %p2929_p13 = pnand %p2928_p12, %p2922_p9 }
  0x1e   : > { %2932 = shalt.err (!%p2929_p13)
}
  0x1f   : > { %s3158_s27 = smov 64   ;;  %s3159_s28 = smov 4  }
  0x20   : > { %s3859_s1 = sld [smem:[#allocation21_spill]]  ;;  %s2944_s18 = scalar_lea.vmem %s318_s22, 1024 }
  0x21   : > { %p2945_p0 = scmp.ne.s32.totalorder %s318_s22, %s2944_s18  ;;  %p2952_p7 = scmp.lt.s32.totalorder %s318_s22, %s318_s22 }
  0x22   : > { %p2953_p8 = scmp.lt.s32.totalorder %s2944_s18, %s2944_s18 }
  0x23   : > { %p2947_p2 = pnand %p2945_p0, %p3270_p6 }
  0x24   : > { %p2954_p3 = por %p2953_p8, %p2952_p7 }
  0x25   : > { %p2948_p4 = pneg %p2947_p2 }
  0x26   : > { %2789 = dma.hbm_to_vmem [thread:$0]  (!%p3264_p5), %s3859_s1, 1024, %s294_s19, [#allocation9], %s3158_s27, %s3158_s27, %s3159_s28  }
  0x27   : > { %p2955_p10 = pnand %p2954_p3, %p2948_p4 }
  0x29   : > { %2958 = shalt.err (!%p2955_p10)
}
  0x2a   : > { %s3860_s3 = sld [smem:[#allocation23_spill]]  ;;  %s2970_s26 = scalar_lea.vmem %s342_s24, 1024 }
  0x2b   : > { %p2971_p9 = scmp.ne.s32.totalorder %s342_s24, %s2970_s26  ;;  %p2978_p13 = scmp.lt.s32.totalorder %s342_s24, %s342_s24 }
  0x2c   : > { %p2979_p0 = scmp.lt.s32.totalorder %s2970_s26, %s2970_s26 }
  0x2d   : > { %p2973_p11 = pnand %p2971_p9, %p3270_p6 }
  0x2e   : > { %p2980_p2 = por %p2979_p0, %p2978_p13 }
  0x2f   : > { %p2974_p12 = pneg %p2973_p11 }
  0x30   : > { %2795 = dma.hbm_to_vmem [thread:$0]  (!%p3264_p5), %s3860_s3, 1024, %s318_s22, [#allocation12], %s3158_s27, %s3158_s27, %s3159_s28  }
  0x31   : > { %p2981_p1 = pnand %p2980_p2, %p2974_p12 }
  0x33   : > { %2984 = shalt.err (!%p2981_p1)
}
  0x34   : > { %2801 = dma.hbm_to_vmem [thread:$0]  (!%p3264_p5), %s3844_s5, 1024, %s342_s24, [#allocation15], %s3158_s27, %s3158_s27, %s3159_s28  }
  0x35   : > { %s3160_s15 = smov [#allocation10]   ;;  %s3161_s18 = smov [#allocation13]  }
  0x36   : > { %s307_s22 = sshll.u32 %s3160_s15, 4  ;;  %s331_s21 = sshll.u32 %s3161_s18, 4  ;;  %s308_s22 = int_to_ptr.vmem [resolvable:$true] %s307_s22  ;;  %s332_s21 = int_to_ptr.vmem [resolvable:$true] %s331_s21 }
  0x37   : > { %s2996_s23 = scalar_lea.vmem %s308_s22, 16  ;;  %s3003_s26 = scalar_lea.vmem %s308_s22, 32 }
  0x38   : > { %p2997_p3 = scmp.ne.s32.totalorder %s308_s22, %s2996_s23  ;;  %p3004_p8 = scmp.lt.s32.totalorder %s308_s22, %s308_s22 }
  0x39   : > { %p3005_p1 = scmp.lt.s32.totalorder %s3003_s26, %s2996_s23 }
  0x3a   : > { %p2999_p4 = pnand %p2997_p3, %p3270_p6 }
  0x3b   : > { %p3006_p10 = por %p3005_p1, %p3004_p8 }
  0x3c   : > { %p3000_p7 = pneg %p2999_p4 }
  0x3e   : > { %p3007_p9 = pnand %p3006_p10, %p3000_p7 }
  0x40   : > { %3010 = shalt.err (!%p3007_p9)
}
  0x41   : > { %s3861_s2 = sld [smem:[#allocation22_spill]]  ;;  %s3022_s27 = scalar_lea.vmem %s332_s21, 16 }
  0x42   : > { %p3023_p11 = scmp.ne.s32.totalorder %s332_s21, %s3022_s27  ;;  %s3029_s28 = scalar_lea.vmem %s332_s21, 32 }
  0x43   : > { %p3030_p0 = scmp.lt.s32.totalorder %s332_s21, %s332_s21  ;;  %p3031_p2 = scmp.lt.s32.totalorder %s3029_s28, %s3022_s27 }
  0x44   : > { %p3025_p12 = pnand %p3023_p11, %p3270_p6 }
  0x45   : > { %p3032_p3 = por %p3031_p2, %p3030_p0 }
  0x46   : > { %p3026_p13 = pneg %p3025_p12 }
  0x47   : > { %2792 = dma.hbm_to_vmem [thread:$0]  (!%p3264_p5), %s3861_s2, 16, %s308_s22, [#allocation9]  }
  0x48   : > { %p3033_p4 = pnand %p3032_p3, %p3026_p13 }
  0x4a   : > { %3036 = shalt.err (!%p3033_p4)
}
  0x4b   : > { %2798 = dma.hbm_to_vmem [thread:$0]  (!%p3264_p5), %s3843_s4, 16, %s332_s21, [#allocation12]  }
  0x4c   : > { %s3162_s22 = smov [#allocation16]  }
  0x4d   : > { %s355_s18 = sshll.u32 %s3162_s22, 4  ;;  %s356_s18 = int_to_ptr.vmem [resolvable:$true] %s355_s18 }
  0x4e   : > { %s3048_s23 = scalar_lea.vmem %s356_s18, 16  ;;  %s3055_s26 = scalar_lea.vmem %s356_s18, 32 }
  0x4f   : > { %p3049_p7 = scmp.ne.s32.totalorder %s356_s18, %s3048_s23  ;;  %p3056_p10 = scmp.lt.s32.totalorder %s356_s18, %s356_s18 }
  0x50   : > { %p3057_p9 = scmp.lt.s32.totalorder %s3055_s26, %s3048_s23 }
  0x51   : > { %p3051_p8 = pnand %p3049_p7, %p3270_p6 }
  0x52   : > { %p3058_p11 = por %p3057_p9, %p3056_p10 }
  0x53   : > { %p3052_p1 = pneg %p3051_p8 }
  0x55   : > { %p3059_p12 = pnand %p3058_p11, %p3052_p1 }
  0x57   : > { %3062 = shalt.err (!%p3059_p12)
}
  0x58   : > { %2804 = dma.hbm_to_vmem [thread:$0]  (!%p3264_p5), %s3845_s6, 16, %s356_s18, [#allocation15]  }
  0x59   : > { %s35_s25 = sadd.s32 1, %s3149_s13  ;;  %s47_s21 = sadd.s32 1, %s3141_s11 }
  0x5a   : > { %p36_p6 = scmp.ge.s32.totalorder %s35_s25, 4  ;;  %p54_p13 = scmp.ne.s32.totalorder %s3141_s11, %s3137_s10 }
  0x5b   : > { %p55_p0 = scmp.eq.s32.totalorder %s3153_s14, 0  ;;  %p60_p2 = scmp.ne.s32.totalorder %s3137_s10, %s3133_s30 }
  0x5c   : > { %s3890_s25 = smov (%p36_p6, %s35_s25), 0  ;;  %p3863_p4 = scmp.ne.s32.totalorder %s3855_s16, 0 }
  0x5d   : > { %p3325_p3 = por %p55_p0, %p54_p13  ;;  %s42_s28 = ssub.s32 %s3149_s13, %s3890_s25 }
  0x5e   : > { %p3331_p7 = por %p3863_p4, %p60_p2  ;;  %p2815_p5 = scmp.lt.s32.totalorder %s3153_s14, 4 }
  0x5f   : > { %p45_p8 = scmp.eq.s32.totalorder %s42_s28, 0  ;;  %s366_s29 = sand.u32 1, %s3141_s11  }
  0x60   : > { %s2248_s15 = sshll.u32 %s366_s29, 7  ;;  %s2455_s30 = sshll.u32 %s3149_s13, 11 }
  0x61   : > { %s3340_s22 = scalar_select %p45_p8, %s3141_s11, %s47_s21  }
  0x62   : > { %s378_s26 = scalar_lea.hbm %s3839_s0, %s2455_s30  ;;  %s370_s19 = scalar_lea.vmem [#allocation6], %s2248_s15 }
  0x63   : > { %s379_s24 = sshll.u32 %s370_s19, 4  ;;  %p3348_p1 = pnand %p2815_p5, %p3325_p3  ;;  %s380_s24 = int_to_ptr.vmem [resolvable:$true] %s379_s24 }
  0x64   : > { %s367_s2 = scalar_lea.sflag [#allocation7], %s366_s29  ;;  %s3076_s28 = scalar_lea.vmem %s380_s24, 2048 }
  0x65   : > { %p3065_p10 = pneg %p3348_p1  ;;  %p3077_p9 = scmp.ne.s32.totalorder %s380_s24, %s3076_s28 }
  0x66   : > { %s3163_s21 = smov [#allocation6]  }
  0x67   : > { %p3079_p11 = pnand %p3077_p9, %p3065_p10  ;;  %s3081_s3 = sshll.u32 %s3163_s21, 4  ;;  %s3082_s3 = int_to_ptr.vmem [resolvable:$false] %s3081_s3 }
  0x68   : > { %s3083_s30 = scalar_lea.vmem %s3082_s3, 4096  ;;  %p3084_p6 = scmp.lt.s32.totalorder %s380_s24, %s3082_s3 }
  0x69   : > { %p3080_p12 = pneg %p3079_p11  ;;  %p3085_p13 = scmp.lt.s32.totalorder %s3083_s30, %s3076_s28 }
  0x6b   : > { %p3086_p0 = por %p3085_p13, %p3084_p6 }
  0x6d   : > { %p3087_p2 = pnand %p3086_p0, %p3080_p12 }
  0x6f   : > { %3090 = shalt.err (!%p3087_p2)
}
  0x70   : > { %s3164_s20 = smov 128   ;;  %s3165_s15 = smov 8  }
  0x71   : > { %2808 = dma.hbm_to_vmem [thread:$0]  (!%p3348_p1), %s378_s26, 2048, %s380_s24, %s367_s2, %s3164_s20, %s3164_s20, %s3165_s15  }
  0x72   : > { %p3866_p3 = scmp.ne.s32.totalorder %s3856_s17, 0 }
  0x73   : > { %s393_s29 = sand.u32 (!%p3866_p3), 1, %s3137_s10  }
  0x74   : > { %391 = sbr.rel (%p3866_p3) target bundleno = 508 (0x1fc), region = 48  ;;  %s2252_s18 = sshll.u32 (!%p3866_p3), %s393_s29, 7 }
  0x75   : > { %s394_s23 = scalar_lea.sflag (!%p3866_p3), [#allocation7], %s393_s29  ;;  %s3359_s19 = scalar_lea.vmem (!%p3866_p3), [#allocation6], %s2252_s18 }
  0x79   : > { %3116 = dma.done.wait (%p3331_p7), %s394_s23, 2048  }
  0x7a   : > { %3118 = vsyncadd (%p3331_p7), %s394_s23, 4294965248  ;;  %p3867_p4 = scmp.ne.s32.totalorder %s3855_s16, 0 }
  0x7c   : > { %3120 = dma.done.wait (%p3867_p4), [#allocation9], 1040  }
  0x7d   : > { %3122 = vsyncadd (%p3867_p4), [#allocation9], 4294966256 }
  0x7e   : > { %3124 = dma.done.wait (%p3867_p4), [#allocation12], 1040  }
  0x7f   : > { %3126 = vsyncadd (%p3867_p4), [#allocation12], 4294966256 }
  0x80   : > { %3128 = dma.done.wait (%p3867_p4), [#allocation15], 1040  }
  0x81   : > { %3130 = vsyncadd (%p3867_p4), [#allocation15], 4294966256  ;;  %p480_p7 = scmp.lt.s32.totalorder %s3145_s12, 3  ;;  %p2265_p5 = scmp.ne.s32.totalorder %s3145_s12, 0 }
  0x83   : > { %s481_s1 = scalar_select %p480_p7, %s3145_s12, 3 }
  0x84   : > { %513 = sbr.rel (%p2265_p5) target bundleno = 170 (0xaa), region = 80 }
  0x85   : > { %s2456_s2 = sshll.u32 %s481_s1, 6 }
  0x86   : > { %s3382_s27 = scalar_lea.vmem %s3846_s7, %s2456_s2  ;;  %s3387_s28 = scalar_lea.vmem %s3847_s8, %s2456_s2 }
  0x87   : > { %s3392_s16 = scalar_lea.vmem %s3848_s9, %s2456_s2 }
  0x89   : > { %v3166_v0 = vmov 0.0  }
  0x8a   : > { %514 = vst [vmem:[#allocation2 + $0x30] sm:$0xff] %v3166_v0  ;;  %515 = vst [vmem:[#allocation2] sm:$0xff] %v3166_v0 }
  0x8b   : > { %516 = vst [vmem:[#allocation2 + $0x58] sm:$0xff] %v3166_v0  ;;  %517 = vst [vmem:[#allocation2 + $0x18] sm:$0xff] %v3166_v0 }
  0x8c   : > { %518 = vst [vmem:[#allocation2 + $0x50] sm:$0xff] %v3166_v0  ;;  %519 = vst [vmem:[#allocation2 + $0x68] sm:$0xff] %v3166_v0 }
  0x8d   : > { %520 = vst [vmem:[#allocation2 + $0x8] sm:$0xff] %v3166_v0  ;;  %521 = vst [vmem:[#allocation2 + $0x48] sm:$0xff] %v3166_v0 }
  0x8e   : > { %522 = vst [vmem:[#allocation2 + $0x40] sm:$0xff] %v3166_v0  ;;  %523 = vst [vmem:[#allocation2 + $0x20] sm:$0xff] %v3166_v0 }
  0x8f   : > { %524 = vst [vmem:[#allocation2 + $0x10] sm:$0xff] %v3166_v0  ;;  %525 = vst [vmem:[#allocation2 + $0x38] sm:$0xff] %v3166_v0 }
  0x90   : > { %526 = vst [vmem:[#allocation2 + $0x60] sm:$0xff] %v3166_v0  ;;  %527 = vst [vmem:[#allocation2 + $0x70] sm:$0xff] %v3166_v0 }
  0x91   : > { %528 = vst [vmem:[#allocation2 + $0x78] sm:$0xff] %v3166_v0  ;;  %529 = vst [vmem:[#allocation2 + $0x28] sm:$0xff] %v3166_v0 }
  0x92   : > { %530 = vst [vmem:[#allocation3 + $0x28] sm:$0xff] %v3166_v0  ;;  %531 = vst [vmem:[#allocation3 + $0x68] sm:$0xff] %v3166_v0 }
  0x93   : > { %532 = vst [vmem:[#allocation3 + $0x10] sm:$0xff] %v3166_v0  ;;  %533 = vst [vmem:[#allocation3 + $0x40] sm:$0xff] %v3166_v0 }
  0x94   : > { %534 = vst [vmem:[#allocation3 + $0x48] sm:$0xff] %v3166_v0  ;;  %535 = vst [vmem:[#allocation3 + $0x30] sm:$0xff] %v3166_v0 }
  0x95   : > { %536 = vst [vmem:[#allocation3 + $0x70] sm:$0xff] %v3166_v0  ;;  %537 = vst [vmem:[#allocation3 + $0x38] sm:$0xff] %v3166_v0 }
  0x96   : > { %538 = vst [vmem:[#allocation3 + $0x20] sm:$0xff] %v3166_v0  ;;  %539 = vst [vmem:[#allocation3 + $0x78] sm:$0xff] %v3166_v0 }
  0x97   : > { %540 = vst [vmem:[#allocation3 + $0x18] sm:$0xff] %v3166_v0  ;;  %541 = vst [vmem:[#allocation3 + $0x58] sm:$0xff] %v3166_v0 }
  0x98   : > { %542 = vst [vmem:[#allocation3] sm:$0xff] %v3166_v0  ;;  %543 = vst [vmem:[#allocation3 + $0x8] sm:$0xff] %v3166_v0 }
  0x99   : > { %544 = vst [vmem:[#allocation3 + $0x60] sm:$0xff] %v3166_v0  ;;  %545 = vst [vmem:[#allocation3 + $0x50] sm:$0xff] %v3166_v0 }
  0x9a   : > { %546 = vst [vmem:[#allocation4 + $0x8] sm:$0xff] %v3166_v0  ;;  %547 = vst [vmem:[#allocation4] sm:$0xff] %v3166_v0 }
  0x9b   : > { %548 = vst [vmem:[#allocation4 + $0x48] sm:$0xff] %v3166_v0  ;;  %549 = vst [vmem:[#allocation4 + $0x60] sm:$0xff] %v3166_v0 }
  0x9c   : > { %550 = vst [vmem:[#allocation4 + $0x68] sm:$0xff] %v3166_v0  ;;  %551 = vst [vmem:[#allocation4 + $0x18] sm:$0xff] %v3166_v0 }
  0x9d   : > { %552 = vst [vmem:[#allocation4 + $0x10] sm:$0xff] %v3166_v0  ;;  %553 = vst [vmem:[#allocation4 + $0x38] sm:$0xff] %v3166_v0 }
  0x9e   : > { %554 = vst [vmem:[#allocation4 + $0x40] sm:$0xff] %v3166_v0  ;;  %555 = vst [vmem:[#allocation4 + $0x28] sm:$0xff] %v3166_v0 }
  0x9f   : > { %556 = vst [vmem:[#allocation4 + $0x70] sm:$0xff] %v3166_v0  ;;  %557 = vst [vmem:[#allocation4 + $0x20] sm:$0xff] %v3166_v0 }
  0xa0   : > { %558 = vst [vmem:[#allocation4 + $0x58] sm:$0xff] %v3166_v0  ;;  %559 = vst [vmem:[#allocation4 + $0x30] sm:$0xff] %v3166_v0 }
  0xa1   : > { %560 = vst [vmem:[#allocation4 + $0x50] sm:$0xff] %v3166_v0  ;;  %561 = vst [vmem:[#allocation4 + $0x78] sm:$0xff] %v3166_v0 }
  0xa2   : > { %562 = vst [vmem:[#allocation5 + $0x18] sm:$0xff] %v3166_v0  ;;  %563 = vst [vmem:[#allocation5 + $0x38] sm:$0xff] %v3166_v0 }
  0xa3   : > { %564 = vst [vmem:[#allocation5 + $0x48] sm:$0xff] %v3166_v0  ;;  %565 = vst [vmem:[#allocation5 + $0x40] sm:$0xff] %v3166_v0 }
  0xa4   : > { %566 = vst [vmem:[#allocation5 + $0x28] sm:$0xff] %v3166_v0  ;;  %567 = vst [vmem:[#allocation5] sm:$0xff] %v3166_v0 }
  0xa5   : > { %568 = vst [vmem:[#allocation5 + $0x8] sm:$0xff] %v3166_v0  ;;  %569 = vst [vmem:[#allocation5 + $0x70] sm:$0xff] %v3166_v0 }
  0xa6   : > { %570 = vst [vmem:[#allocation5 + $0x68] sm:$0xff] %v3166_v0  ;;  %571 = vst [vmem:[#allocation5 + $0x60] sm:$0xff] %v3166_v0 }
  0xa7   : > { %572 = vst [vmem:[#allocation5 + $0x78] sm:$0xff] %v3166_v0  ;;  %573 = vst [vmem:[#allocation5 + $0x30] sm:$0xff] %v3166_v0 }
  0xa8   : > { %574 = vst [vmem:[#allocation5 + $0x50] sm:$0xff] %v3166_v0  ;;  %575 = vst [vmem:[#allocation5 + $0x20] sm:$0xff] %v3166_v0 }
  0xa9   : > { %576 = vst [vmem:[#allocation5 + $0x58] sm:$0xff] %v3166_v0  ;;  %577 = vst [vmem:[#allocation5 + $0x10] sm:$0xff] %v3166_v0 }
  0xaa PF: > { %v2883_v1 = vld [vmem:[#allocation8 + $0x38] sm:$0xff]   ;;  %v2885_v3 = vld [vmem:[#allocation8 + $0x30] sm:$0xff]   ;;  %v2887_v5 = vld [vmem:[#allocation8 + $0x28] sm:$0xff]   ;;  %v3167_v46 = vmov 0.0   ;;  %v3168_v56 = vmov 1.0|1.0  }
  0xab   : > { %v2884_v2 = vld [vmem:[#allocation11 + $0x38] sm:$0xff]   ;;  %2648 = vmatprep.subr.bf16.mxu0 %v2883_v1  ;;  %v2886_v4 = vld [vmem:[#allocation11 + $0x30] sm:$0xff]   ;;  %v2888_v6 = vld [vmem:[#allocation11 + $0x28] sm:$0xff]  }
  0xac   : > { %2680 = vmatprep.subr.bf16.mxu1 %v2884_v2  ;;  %2649 = vmatpush3.bf16.msra.mxu0 %v2883_v1  ;;  %v2889_v7 = vld [vmem:[#allocation8 + $0x20] sm:$0xff]   ;;  %v2891_v9 = vld [vmem:[#allocation8 + $0x18] sm:$0xff]   ;;  %v2893_v11 = vld [vmem:[#allocation8 + $0x10] sm:$0xff]  }
  0xad   : > { %2681 = vmatpush3.bf16.msra.mxu1 %v2884_v2  ;;  %2650 = vmatprep.subr.bf16.mxu0 %v2885_v3  ;;  %v2890_v8 = vld [vmem:[#allocation11 + $0x20] sm:$0xff]   ;;  %v2892_v10 = vld [vmem:[#allocation11 + $0x18] sm:$0xff]   ;;  %v2894_v12 = vld [vmem:[#allocation11 + $0x10] sm:$0xff]  }
  0xae   : > { %2682 = vmatprep.subr.bf16.mxu1 %v2886_v4  ;;  %v578_v13 = vld [vmem:[#allocation2 + $0x30] sm:$0xff]  ;;  %v579_v14 = vld [vmem:[#allocation2] sm:$0xff]  ;;  %v595_v16 = vld [vmem:[%s3359_s19 + $0x8] sm:$0xff] }
  0xaf   : > { %v594_v15 = vld [vmem:[%s3359_s19] sm:$0xff]  ;;  %v580_v18 = vld [vmem:[#allocation2 + $0x58] sm:$0xff]  ;;  %v611_v20 = vsub.f32 %v595_v16, %v579_v14  ;;  %v596_v21 = vld [vmem:[%s3359_s19 + $0x10] sm:$0xff] }
  0xb0   : > { %2651 = vmatpush3.bf16.msra.mxu0 %v2885_v3  ;;  %v610_v17 = vsub.f32 %v594_v15, %v578_v13  ;;  %v581_v19 = vld [vmem:[#allocation2 + $0x18] sm:$0xff]  ;;  %v2895_v23 = vld [vmem:[#allocation8 + $0x8] sm:$0xff]   ;;  %v612_v25 = vsub.f32 %v596_v21, %v580_v18  ;;  %v582_v29 = vld [vmem:[#allocation2 + $0x50] sm:$0xff] }
  0xb1   : > { %2683 = vmatpush3.bf16.msra.mxu1 %v2886_v4  ;;  %2652 = vmatprep.subr.bf16.mxu0 %v2887_v5  ;;  %v597_v22 = vld [vmem:[%s3359_s19 + $0x18] sm:$0xff]  ;;  %v2896_v27 = vld [vmem:[#allocation11 + $0x8] sm:$0xff]   ;;  %v627_v28 = vmul.f32 0.5, %v611_v20  ;;  %v598_v34 = vld [vmem:[%s3359_s19 + $0x20] sm:$0xff] }
  0xb2   : > { %2684 = vmatprep.subr.bf16.mxu1 %v2888_v6  ;;  %v626_v24 = vmul.f32 0.5, %v610_v17  ;;  %v613_v26 = vsub.f32 %v597_v22, %v581_v19  ;;  %v628_v31 = vmul.f32 0.5, %v612_v25  ;;  %v583_v33 = vld [vmem:[#allocation2 + $0x68] sm:$0xff]  ;;  %v3465_v36 = vld [vmem:[#allocation8] sm:$0xff]   ;;  %v614_v38 = vsub.f32 %v598_v34, %v582_v29  ;;  %v600_v41 = vld [vmem:[%s3359_s19 + $0x30] sm:$0xff] }
  0xb3   : > { %v599_v35 = vld [vmem:[%s3359_s19 + $0x28] sm:$0xff]  ;;  %v643_v37 = vadd.f32 %v627_v28, %v579_v14  ;;  %v601_v51 = vld [vmem:[%s3359_s19 + $0x38] sm:$0xff]  ;;  %v586_v1 = vld [vmem:[#allocation2 + $0x40] sm:$0xff] }
  0xb4   : > { %2653 = vmatpush3.bf16.msra.mxu0 %v2887_v5  ;;  %v642_v30 = vadd.f32 %v626_v24, %v578_v13  ;;  %v629_v32 = vmul.f32 0.5, %v613_v26  ;;  %v615_v39 = vsub.f32 %v599_v35, %v583_v33  ;;  %v584_v40 = vld [vmem:[#allocation2 + $0x8] sm:$0xff]  ;;  %v644_v43 = vadd.f32 %v628_v31, %v580_v18  ;;  %v3489_v59 = vld [vmem:[#allocation14 + $0x38] sm:$0xff]   ;;  %v2900_v24 = vld [vmem:[#allocation14 + $0x30] sm:$0xff]  }
  0xb5   : > { %2685 = vmatpush3.bf16.msra.mxu1 %v2888_v6  ;;  %2654 = vmatprep.subr.bf16.mxu0 %v2889_v7  ;;  %v3468_v42 = vld [vmem:[#allocation11] sm:$0xff]   ;;  %v616_v45 = vsub.f32 %v600_v41, %v584_v40  ;;  %vm659_vm1 = vcmp.gt.f32.partialorder %v643_v37, 0.5  ;;  %v630_v48 = vmul.f32 0.5, %v614_v38  ;;  %v589_v13 = vld [vmem:[#allocation2 + $0x38] sm:$0xff]  ;;  %v591_v38 = vld [vmem:[#allocation2 + $0x70] sm:$0xff] }
  0xb6   : > { %2686 = vmatprep.subr.bf16.mxu1 %v2890_v8  ;;  %vm658_vm0 = vcmp.gt.f32.partialorder %v642_v30, 0.5  ;;  %v645_v44 = vadd.f32 %v629_v32, %v581_v19  ;;  %v631_v49 = vmul.f32 0.5, %v615_v39  ;;  %v585_v50 = vld [vmem:[#allocation2 + $0x48] sm:$0xff]  ;;  %v2267_v52 = vsel %vm659_vm1, 1.0, %v3167_v46  ;;  %v587_v2 = vld [vmem:[#allocation2 + $0x20] sm:$0xff]  ;;  %v605_v14 = vld [vmem:[%s3359_s19 + $0x58] sm:$0xff] }
  0xb7   : > { %v2266_v47 = vsel %vm658_vm0, 1.0, %v3167_v46  ;;  %vm3475_vm2 = vmpackc.low %vm659_vm1, %vm658_vm0  ;;  %vm660_vm3 = vcmp.gt.f32.partialorder %v644_v43, 0.5  ;;  %v707_v55 = vsub.f32 1.0, %v2267_v52  ;;  %v646_v60 = vadd.f32 %v630_v48, %v582_v29  ;;  %v602_v3 = vld [vmem:[%s3359_s19 + $0x40] sm:$0xff]  ;;  %v607_v39 = vld [vmem:[%s3359_s19 + $0x68] sm:$0xff] }
  0xb8   : > { %2655 = vmatpush3.bf16.msra.mxu0 %v2889_v7  ;;  %v706_v53 = vsub.f32 1.0, %v2266_v47  ;;  %vm661_vm4 = vcmp.gt.f32.partialorder %v645_v44, 0.5  ;;  %2664 = vmatprep.mubr.msk.bf16.mxu0 %vm3475_vm2, %v3168_v56  ;;  %v2268_v57 = vsel %vm660_vm3, 1.0, %v3167_v46  ;;  %v647_v0 = vadd.f32 %v631_v49, %v583_v33  ;;  %v603_v7 = vld [vmem:[%s3359_s19 + $0x48] sm:$0xff]  ;;  %v590_v28 = vld [vmem:[#allocation2 + $0x60] sm:$0xff] }
  0xb9   : > { %2687 = vmatpush3.bf16.msra.mxu1 %v2890_v8  ;;  %2656 = vmatprep.subr.bf16.mxu0 %v2891_v9  ;;  %v2269_v58 = vsel %vm661_vm4, 1.0, %v3167_v46  ;;  %v708_v62 = vsub.f32 1.0, %v2268_v57  ;;  %v723_v4 = vmul.f32 %v707_v55, %v643_v37  ;;  %vm662_vm5 = vcmp.gt.f32.partialorder %v646_v60, 0.5  ;;  %v588_v8 = vld [vmem:[#allocation2 + $0x10] sm:$0xff]  ;;  %vm3504_vm7 = vmpackc.low %vm661_vm4, %vm660_vm3  ;;  %v606_v29 = vld [vmem:[%s3359_s19 + $0x60] sm:$0xff] }
  0xba   : > { %2688 = vmatprep.subr.bf16.mxu1 %v2892_v10  ;;  %2696 = vmatprep.mubr.msk.bf16.mxu1 %vm3475_vm2, %v3168_v56  ;;  %v722_v61 = vmul.f32 %v706_v53, %v642_v30  ;;  %v709_v63 = vsub.f32 1.0, %v2269_v58  ;;  %v617_v5 = vsub.f32 %v601_v51, %v585_v50  ;;  %v632_v6 = vmul.f32 0.5, %v616_v45  ;;  %v2901_v47 = vld [vmem:[#allocation14 + $0x28] sm:$0xff]   ;;  %v592_v57 = vld [vmem:[#allocation2 + $0x78] sm:$0xff]  ;;  %v3651_v54 = vld [vmem:[#allocation10] ss:$0 sm:$0xff] }
  0xbb   : > { %vm663_vm6 = vcmp.gt.f32.partialorder %v647_v0, 0.5  ;;  %739 = vst [vmem:[#allocation2] sm:$0xff] %v723_v4  ;;  %v618_v21 = vsub.f32 %v602_v3, %v586_v1  ;;  %v619_v22 = vsub.f32 %v603_v7, %v587_v2  ;;  %v608_v58 = vld [vmem:[%s3359_s19 + $0x70] sm:$0xff]  ;;  %v3653_v19 = vld [vmem:[#allocation13] ss:$0 sm:$0xff] }
  0xbc   : > { %2657 = vmatpush3.bf16.msra.mxu0 %v2891_v9  ;;  %v604_v9 = vld [vmem:[%s3359_s19 + $0x50] sm:$0xff]  ;;  %738 = vst [vmem:[#allocation2 + $0x30] sm:$0xff] %v722_v61  ;;  %v2271_v15 = vsel %vm663_vm6, 1.0, %v3167_v46  ;;  %v633_v17 = vmul.f32 0.5, %v617_v5  ;;  %v648_v18 = vadd.f32 %v632_v6, %v584_v40  ;;  %vm3519_vm9 = vmpackc.low %vm663_vm6, %vm662_vm5 }
  0xbd   : > { %2689 = vmatpush3.bf16.msra.mxu1 %v2892_v10  ;;  %2658 = vmatprep.subr.bf16.mxu0 %v2893_v11  ;;  %v724_v10 = vmul.f32 %v708_v62, %v644_v43  ;;  %v711_v20 = vsub.f32 1.0, %v2271_v15  ;;  %v634_v32 = vmul.f32 0.5, %v618_v21  ;;  %v635_v33 = vmul.f32 0.5, %v619_v22 }
  0xbe   : > { %2690 = vmatprep.subr.bf16.mxu1 %v2894_v12  ;;  %v649_v26 = vadd.f32 %v633_v17, %v585_v50  ;;  %vm664_vm8 = vcmp.gt.f32.partialorder %v648_v18, 0.5  ;;  %v622_v43 = vsub.f32 %v606_v29, %v590_v28  ;;  %v623_v50 = vsub.f32 %v607_v39, %v591_v38  ;;  %v2903_v17 = vld [vmem:[#allocation14 + $0x18] sm:$0xff]   ;;  %v2906_v39 = vld [vmem:[#allocation14] sm:$0xff]  }
  0xbf   : > { %740 = vst [vmem:[#allocation2 + $0x58] sm:$0xff] %v724_v10  ;;  %v727_v30 = vmul.f32 %v711_v20, %v647_v0  ;;  %v2272_v31 = vsel %vm664_vm8, 1.0, %v3167_v46  ;;  %v650_v41 = vadd.f32 %v634_v32, %v586_v1  ;;  %v609_v0 = vld [vmem:[%s3359_s19 + $0x78] sm:$0xff]  ;;  %v2902_v1 = vld [vmem:[#allocation14 + $0x20] sm:$0xff]  }
  0xc0   : > { %2659 = vmatpush3.bf16.msra.mxu0 %v2893_v11  ;;  %v725_v11 = vmul.f32 %v709_v63, %v645_v44  ;;  %vm665_vm10 = vcmp.gt.f32.partialorder %v649_v26, 0.5  ;;  %v712_v35 = vsub.f32 1.0, %v2272_v31  ;;  %v638_v51 = vmul.f32 0.5, %v622_v43  ;;  %v593_v63 = vld [vmem:[#allocation2 + $0x28] sm:$0xff] }
  0xc1   : > { %2691 = vmatpush3.bf16.msra.mxu1 %v2894_v12  ;;  %2660 = vmatprep.subr.bf16.mxu0 %v2895_v23  ;;  %v2270_v12 = vsel %vm662_vm5, 1.0, %v3167_v46  ;;  %743 = vst [vmem:[#allocation2 + $0x68] sm:$0xff] %v727_v30  ;;  %v2273_v40 = vsel %vm665_vm10, 1.0, %v3167_v46  ;;  %vm666_vm11 = vcmp.gt.f32.partialorder %v650_v41, 0.5  ;;  %vm3549_vm14 = vmpackc.low %vm665_vm10, %vm664_vm8  ;;  %v639_v4 = vmul.f32 0.5, %v623_v50  ;;  %v1340_v43 = vld [vmem:[#allocation4 + $0x48] sm:$0xff] }
  0xc2   : > { %2692 = vmatprep.subr.bf16.mxu1 %v2896_v27  ;;  %v710_v16 = vsub.f32 1.0, %v2270_v12  ;;  %741 = vst [vmem:[#allocation2 + $0x18] sm:$0xff] %v725_v11  ;;  %v713_v44 = vsub.f32 1.0, %v2273_v40  ;;  %v728_v45 = vmul.f32 %v712_v35, %v648_v18  ;;  %v2274_v53 = vsel %vm666_vm11, 1.0, %v3167_v46 }
  0xc3   : > { %v654_v5 = vadd.f32 %v638_v51, %v590_v28  ;;  %v655_v12 = vadd.f32 %v639_v4, %v591_v38  ;;  %v1338_v51 = vld [vmem:[#allocation4 + $0x8] sm:$0xff] }
  0xc4   : > { %2661 = vmatpush3.bf16.msra.mxu0 %v2895_v23  ;;  %v620_v23 = vsub.f32 %v604_v9, %v588_v8  ;;  %v726_v25 = vmul.f32 %v710_v16, %v646_v60  ;;  %v729_v52 = vmul.f32 %v713_v44, %v649_v26  ;;  %744 = vst [vmem:[#allocation2 + $0x8] sm:$0xff] %v728_v45  ;;  %v714_v60 = vsub.f32 1.0, %v2274_v53 }
  0xc5   : > { %2693 = vmatpush3.bf16.msra.mxu1 %v2896_v27  ;;  %2662 = vmatprep.subr.bf16.mxu0 %v3465_v36  ;;  %v621_v27 = vsub.f32 %v605_v14, %v589_v13  ;;  %v624_v9 = vsub.f32 %v608_v58, %v592_v57  ;;  %vm670_vm1 = vcmp.gt.f32.partialorder %v654_v5, 0.5  ;;  %vm671_vm3 = vcmp.gt.f32.partialorder %v655_v12, 0.5 }
  0xc6   : > { %2694 = vmatprep.subr.bf16.mxu1 %v3468_v42  ;;  %742 = vst [vmem:[#allocation2 + $0x50] sm:$0xff] %v726_v25  ;;  %745 = vst [vmem:[#allocation2 + $0x48] sm:$0xff] %v729_v52  ;;  %v730_v6 = vmul.f32 %v714_v60, %v650_v41  ;;  %v2278_v15 = vsel %vm670_vm1, 1.0, %v3167_v46  ;;  %v2279_v21 = vsel %vm671_vm3, 1.0, %v3167_v46  ;;  %v932_v41 = vld [vmem:[#allocation3 + $0x10] sm:$0xff] }
  0xc7   : > { %v637_v37 = vmul.f32 0.5, %v621_v27  ;;  %v640_v16 = vmul.f32 0.5, %v624_v9  ;;  %v718_v18 = vsub.f32 1.0, %v2278_v15  ;;  %v2904_v27 = vld [vmem:[#allocation14 + $0x10] sm:$0xff]   ;;  %vm3602_vm8 = vmpackc.low %vm671_vm3, %vm670_vm1 }
  0xc8   : > { %2663 = vmatpush3.bf16.msra.mxu0 %v3465_v36  ;;  %v636_v36 = vmul.f32 0.5, %v620_v23  ;;  %746 = vst [vmem:[#allocation2 + $0x40] sm:$0xff] %v730_v6  ;;  %v719_v23 = vsub.f32 1.0, %v2279_v21 }
  0xc9   : > { %2695 = vmatpush3.bf16.msra.mxu1 %v3468_v42  ;;  %2712 = vmatprep.subr.bf16.mxu0 %v3489_v59  ;;  %v651_v42 = vadd.f32 %v635_v33, %v587_v2  ;;  %v3533_v49 = vadd.f32 %v637_v37, %v589_v13  ;;  %v625_v13 = vsub.f32 %v609_v0, %v593_v63  ;;  %v2905_v37 = vld [vmem:[#allocation14 + $0x8] sm:$0xff]  }
  0xca   : > { %2744 = vmatprep.subr.bf16.mxu1 %v3489_v59  ;;  %v3531_v48 = vadd.f32 %v636_v36, %v588_v8  ;;  %v656_v22 = vadd.f32 %v640_v16, %v592_v57  ;;  %v735_v28 = vmul.f32 %v719_v23, %v655_v12 }
  0xcb   : > { %2665 = vmatmul.mubr.msk.bf16.vlgmr.msra.gmra.mxu0 %vm3504_vm7, %v3168_v56  ;;  %vm667_vm12 = vcmp.gt.f32.partialorder %v651_v42, 0.5  ;;  %vm669_vm15 = vcmp.gt.f32.partialorder %v3533_v49, 0.5  ;;  %v641_v20 = vmul.f32 0.5, %v625_v13 }
  0xcc   : > { %2697 = vmatmul.mubr.msk.bf16.vlgmr.msra.gmra.mxu1 %vm3504_vm7, %v3168_v56  ;;  %2713 = vmatpush3.bf16.msra.mxu0 %v3489_v59  ;;  %v2275_v55 = vsel %vm667_vm12, 1.0, %v3167_v46  ;;  %vm668_vm13 = vcmp.gt.f32.partialorder %v3531_v48, 0.5  ;;  %v2277_v2 = vsel %vm669_vm15, 1.0, %v3167_v46  ;;  %vm3566_vm0 = vmpackc.low %vm667_vm12, %vm666_vm11  ;;  %vm672_vm5 = vcmp.gt.f32.partialorder %v656_v22, 0.5  ;;  %751 = vst [vmem:[#allocation2 + $0x70] sm:$0xff] %v735_v28 }
  0xcd   : > { %2752 = vmatpush3.bf16.msra.mxu1 %v3489_v59  ;;  %2714 = vmatprep.subr.bf16.mxu0 %v2900_v24  ;;  %v715_v61 = vsub.f32 1.0, %v2275_v55  ;;  %v2276_v62 = vsel %vm668_vm13, 1.0, %v3167_v46  ;;  %v717_v8 = vsub.f32 1.0, %v2277_v2  ;;  %v657_v25 = vadd.f32 %v641_v20, %v593_v63  ;;  %vm3589_vm4 = vmpackc.low %vm669_vm15, %vm668_vm13  ;;  %v933_v55 = vld [vmem:[#allocation3 + $0x40] sm:$0xff]  ;;  %v3661_v2 = vld [vmem:[#allocation3 + $0x68] sm:$0xff] }
  0xce   : > { %2745 = vmatprep.subr.bf16.mxu1 %v2900_v24  ;;  %2668 = vmatprep.mubr.msk.bf16.mxu0 %vm3519_vm9, %v3168_v56  ;;  %v716_v3 = vsub.f32 1.0, %v2276_v62  ;;  %v2280_v29 = vsel %vm672_vm5, 1.0, %v3167_v46 }
  0xcf   : > { %2700 = vmatprep.mubr.msk.bf16.mxu1 %vm3519_vm9, %v3168_v56  ;;  %v731_v7 = vmul.f32 %v715_v61, %v651_v42  ;;  %v733_v14 = vmul.f32 %v717_v8, %v3533_v49  ;;  %vm673_vm6 = vcmp.gt.f32.partialorder %v657_v25, 0.5  ;;  %v720_v31 = vsub.f32 1.0, %v2280_v29  ;;  %v1341_v61 = vld [vmem:[#allocation4 + $0x60] sm:$0xff] }
  0xd0   : > { %2715 = vmatpush3.bf16.msra.mxu0 %v2900_v24  ;;  %v732_v11 = vmul.f32 %v716_v3, %v3531_v48  ;;  %v2281_v30 = vsel %vm673_vm6, 1.0, %v3167_v46  ;;  %vm3617_vm10 = vmpackc.low %vm673_vm6, %vm672_vm5 }
  0xd1   : > { %2753 = vmatpush3.bf16.msra.mxu1 %v2900_v24  ;;  %2716 = vmatprep.subr.bf16.mxu0 %v2901_v47  ;;  %747 = vst [vmem:[#allocation2 + $0x20] sm:$0xff] %v731_v7  ;;  %749 = vst [vmem:[#allocation2 + $0x38] sm:$0xff] %v733_v14  ;;  %v734_v24 = vmul.f32 %v718_v18, %v654_v5  ;;  %v721_v33 = vsub.f32 1.0, %v2281_v30  ;;  %v736_v35 = vmul.f32 %v720_v31, %v656_v22 }
  0xd2   : > { %2746 = vmatprep.subr.bf16.mxu1 %v2901_v47  ;;  %748 = vst [vmem:[#allocation2 + $0x10] sm:$0xff] %v732_v11 }
  0xd3   : > { %2669 = vmatmul.mubr.msk.bf16.gmra.mxu0 %vm3549_vm14, %v3168_v56  ;;  %750 = vst [vmem:[#allocation2 + $0x60] sm:$0xff] %v734_v24  ;;  %v737_v36 = vmul.f32 %v721_v33, %v657_v25  ;;  %752 = vst [vmem:[#allocation2 + $0x78] sm:$0xff] %v736_v35 }
  0xd4   : > { %2701 = vmatmul.mubr.msk.bf16.gmra.mxu1 %vm3549_vm14, %v3168_v56  ;;  %2717 = vmatpush3.bf16.msra.mxu0 %v2901_v47 }
  0xd5   : > { %2754 = vmatpush3.bf16.msra.mxu1 %v2901_v47  ;;  %2718 = vmatprep.subr.bf16.mxu0 %v2902_v1  ;;  %753 = vst [vmem:[#allocation2 + $0x28] sm:$0xff] %v737_v36  ;;  %v930_v47 = vld [vmem:[#allocation3 + $0x28] sm:$0xff]  ;;  %v1339_v36 = vld [vmem:[#allocation4] sm:$0xff] }
  0xd6   : > { %2747 = vmatprep.subr.bf16.mxu1 %v2902_v1  ;;  %2672 = vmatprep.mubr.msk.bf16.mxu0 %vm3566_vm0, %v3168_v56 }
  0xd7   : > { %2704 = vmatprep.mubr.msk.bf16.mxu1 %vm3566_vm0, %v3168_v56 }
  0xd8   : > { %2719 = vmatpush3.bf16.msra.mxu0 %v2902_v1 }
  0xd9   : > { %2755 = vmatpush3.bf16.msra.mxu1 %v2902_v1  ;;  %2720 = vmatprep.subr.bf16.mxu0 %v2903_v17 }
  0xda   : > { %2748 = vmatprep.subr.bf16.mxu1 %v2903_v17 }
  0xdb   : > { %2673 = vmatmul.mubr.msk.bf16.gmra.mxu0 %vm3589_vm4, %v3168_v56 }
  0xdc   : > { %2705 = vmatmul.mubr.msk.bf16.gmra.mxu1 %vm3589_vm4, %v3168_v56  ;;  %2721 = vmatpush3.bf16.msra.mxu0 %v2903_v17 }
  0xdd   : > { %2756 = vmatpush3.bf16.msra.mxu1 %v2903_v17  ;;  %2722 = vmatprep.subr.bf16.mxu0 %v2904_v27 }
  0xde   : > { %2749 = vmatprep.subr.bf16.mxu1 %v2904_v27  ;;  %2676 = vmatprep.mubr.msk.bf16.mxu0 %vm3602_vm8, %v3168_v56 }
  0xdf   : > { %2708 = vmatprep.mubr.msk.bf16.mxu1 %vm3602_vm8, %v3168_v56 }
  0xe0   : > { %2723 = vmatpush3.bf16.msra.mxu0 %v2904_v27 }
  0xe1   : > { %2757 = vmatpush3.bf16.msra.mxu1 %v2904_v27  ;;  %2724 = vmatprep.subr.bf16.mxu0 %v2905_v37 }
  0xe2   : > { %2750 = vmatprep.subr.bf16.mxu1 %v2905_v37 }
  0xe3   : > { %2677 = vmatmul.mubr.msk.bf16.gmra.mxu0 %vm3617_vm10, %v3168_v56 }
  0xe4   : > { %2709 = vmatmul.mubr.msk.bf16.gmra.mxu1 %vm3617_vm10, %v3168_v56  ;;  %2725 = vmatpush3.bf16.msra.mxu0 %v2905_v37 }
  0xe5   : > { %2758 = vmatpush3.bf16.msra.mxu1 %v2905_v37  ;;  %2726 = vmatprep.subr.bf16.mxu0 %v2906_v39 }
  0xe6   : > { %2751 = vmatprep.subr.bf16.mxu1 %v2906_v39  ;;  %2728 = vmatprep.mubr.msk.bf16.mxu0 %vm3475_vm2, %v3168_v56 }
  0xe7   : > { %2736 = vmatprep.mubr.msk.bf16.mxu1 %vm3566_vm0, %v3168_v56 }
  0xe8   : > { %2727 = vmatpush3.bf16.msra.mxu0 %v2906_v39 }
  0xe9   : > { %2759 = vmatpush3.bf16.msra.mxu1 %v2906_v39 }
  0xeb   : > { %2729 = vmatmul.mubr.msk.bf16.vlgmr.msra.gmra.mxu0 %vm3504_vm7, %v3168_v56 }
  0xec   : > { %2737 = vmatmul.mubr.msk.bf16.vlgmr.msra.gmra.mxu1 %vm3589_vm4, %v3168_v56  ;;  %2732 = vmatprep.mubr.msk.bf16.mxu0 %vm3519_vm9, %v3168_v56 }
  0xed   : > { %2740 = vmatprep.mubr.msk.bf16.mxu1 %vm3602_vm8, %v3168_v56 }
  0xf3   : > { %2733 = vmatmul.mubr.msk.bf16.gmra.mxu0 %vm3549_vm14, %v3168_v56 }
  0xf4   : > { %2741 = vmatmul.mubr.msk.bf16.gmra.mxu1 %vm3617_vm10, %v3168_v56 }
 0x18b   : > { %v2666_v40 = vpop.f32.mrf.mxu0 }
 0x18c   : > { %v876_v34 = vadd.f32 %v2666_v40, %v3651_v54  ;;  %v2698_v42 = vpop.f32.mrf.mxu1 }
 0x18d   : > { %v1284_v44 = vadd.f32 %v2698_v42, %v3653_v19  ;;  %v867_v45 = vpop.f32.mrf.mxu0 }
 0x18e   : > { %v948_v48 = vsub.f32 %v876_v34, %v932_v41  ;;  %v868_v49 = vadd.f32 %v3651_v54, %v867_v45  ;;  %v1275_v50 = vpop.f32.mrf.mxu1  ;;  %v1344_v45 = vld [vmem:[#allocation4 + $0x10] sm:$0xff] }
 0x18f   : > { %v1356_v56 = vsub.f32 %v1284_v44, %v1340_v43  ;;  %v1276_v52 = vadd.f32 %v3653_v19, %v1275_v50  ;;  %v2667_v53 = vpop.f32.mrf.mxu0  ;;  %v936_v44 = vld [vmem:[#allocation3 + $0x70] sm:$0xff] }
 0x190   : > { %v964_v57 = vmul.f32 0.5, %v948_v48  ;;  %v946_v58 = vsub.f32 %v868_v49, %v930_v47  ;;  %v879_v59 = vadd.f32 %v2667_v53, %v3651_v54  ;;  %v2699_v60 = vpop.f32.mrf.mxu1 }
 0x191   : > { %v1372_v62 = vmul.f32 0.5, %v1356_v56  ;;  %v1354_v63 = vsub.f32 %v1276_v52, %v1338_v51  ;;  %v1287_v0 = vadd.f32 %v2699_v60, %v3653_v19  ;;  %v870_v1 = vpop.f32.mrf.mxu0  ;;  %v934_v56 = vld [vmem:[#allocation3 + $0x48] sm:$0xff] }
 0x192   : > { %v980_v3 = vadd.f32 %v964_v57, %v932_v41  ;;  %v962_v4 = vmul.f32 0.5, %v946_v58  ;;  %v949_v5 = vsub.f32 %v879_v59, %v933_v55  ;;  %v871_v6 = vadd.f32 %v3651_v54, %v870_v1  ;;  %v1278_v7 = vpop.f32.mrf.mxu1  ;;  %v1342_v52 = vld [vmem:[#allocation4 + $0x68] sm:$0xff] }
 0x193   : > { %v1388_v8 = vadd.f32 %v1372_v62, %v1340_v43  ;;  %v1370_v9 = vmul.f32 0.5, %v1354_v63  ;;  %v1357_v10 = vsub.f32 %v1287_v0, %v1341_v61  ;;  %v1279_v11 = vadd.f32 %v3653_v19, %v1278_v7  ;;  %v2670_v12 = vpop.f32.mrf.mxu0 }
 0x194   : > { %vm996_vm2 = vcmp.gt.f32.partialorder %v980_v3, 0.5  ;;  %v978_v13 = vadd.f32 %v962_v4, %v930_v47  ;;  %v965_v14 = vmul.f32 0.5, %v949_v5  ;;  %v947_v15 = vsub.f32 %v871_v6, %v3661_v2  ;;  %v2702_v16 = vpop.f32.mrf.mxu1 }
 0x195   : > { %v2309_v17 = vsel %vm996_vm2, 1.0, %v3167_v46  ;;  %vm1404_vm7 = vcmp.gt.f32.partialorder %v1388_v8, 0.5  ;;  %v1386_v18 = vadd.f32 %v1370_v9, %v1338_v51  ;;  %v1373_v20 = vmul.f32 0.5, %v1357_v10  ;;  %v883_v27 = vpop.f32.mrf.mxu0 }
 0x196   : > { %v1044_v21 = vsub.f32 1.0, %v2309_v17  ;;  %v2366_v22 = vsel %vm1404_vm7, 1.0, %v3167_v46  ;;  %vm994_vm9 = vcmp.gt.f32.partialorder %v978_v13, 0.5  ;;  %v981_v23 = vadd.f32 %v965_v14, %v933_v55  ;;  %v1291_v31 = vpop.f32.mrf.mxu1 }
 0x197   : > { %v1452_v24 = vsub.f32 1.0, %v2366_v22  ;;  %v3669_v25 = vsel %vm994_vm9, 1.0, %v3167_v46  ;;  %vm1402_vm11 = vcmp.gt.f32.partialorder %v1386_v18, 0.5  ;;  %v1389_v26 = vadd.f32 %v1373_v20, %v1341_v61  ;;  %v2671_v47 = vpop.f32.mrf.mxu0 }
 0x198   : > { %v1060_v28 = vmul.f32 %v1044_v21, %v980_v3  ;;  %v1042_v29 = vsub.f32 1.0, %v3669_v25  ;;  %v3673_v30 = vsel %vm1402_vm11, 1.0, %v3167_v46  ;;  %vm997_vm12 = vcmp.gt.f32.partialorder %v981_v23, 0.5  ;;  %v2703_v53 = vpop.f32.mrf.mxu1  ;;  %v937_v3 = vld [vmem:[#allocation3 + $0x38] sm:$0xff] }
 0x199   : > { %v1468_v32 = vmul.f32 %v1452_v24, %v1388_v8  ;;  %v1450_v33 = vsub.f32 1.0, %v3673_v30  ;;  %v2310_v35 = vsel %vm997_vm12, 1.0, %v3167_v46  ;;  %vm1405_vm13 = vcmp.gt.f32.partialorder %v1389_v26, 0.5  ;;  %v886_v8 = vpop.f32.mrf.mxu0  ;;  %v1345_v24 = vld [vmem:[#allocation4 + $0x38] sm:$0xff] }
 0x19a   : > { %1076 = vst [vmem:[#allocation3 + $0x10] sm:$0xff] %v1060_v28  ;;  %v1058_v37 = vmul.f32 %v1042_v29, %v978_v13  ;;  %v1045_v38 = vsub.f32 1.0, %v2310_v35  ;;  %v2511_v39 = vpack.c.bf16 %v2310_v35, %v2309_v17  ;;  %v2367_v40 = vsel %vm1405_vm13, 1.0, %v3167_v46  ;;  %v1294_v21 = vpop.f32.mrf.mxu1 }
 0x19b   : > { %1484 = vst [vmem:[#allocation4 + $0x48] sm:$0xff] %v1468_v32  ;;  %v1466_v41 = vmul.f32 %v1450_v33, %v1386_v18  ;;  %v1453_v34 = vsub.f32 1.0, %v2367_v40  ;;  %v2535_v42 = vpack.c.bf16 %v2367_v40, %v2366_v22  ;;  %v963_v43 = vmul.f32 0.5, %v947_v15 }
 0x19c   : > { %1074 = vst [vmem:[#allocation3 + $0x28] sm:$0xff] %v1058_v37  ;;  %v1061_v48 = vmul.f32 %v1045_v38, %v981_v23  ;;  %2579 = vst [vmem:[%s3382_s27 + $0x8] sm:$0xff] %v2511_v39   ;;  %v1355_v49 = vsub.f32 %v1279_v11, %v1339_v36  ;;  %v892_v50 = vadd.f32 %v2670_v12, %v3651_v54  ;;  %v935_v37 = vld [vmem:[#allocation3 + $0x30] sm:$0xff]  ;;  %v2706_v38 = vpop.f32.mrf.mxu1 }
 0x19d   : > { %v1300_v51 = vadd.f32 %v2702_v16, %v3653_v19  ;;  %1482 = vst [vmem:[#allocation4 + $0x8] sm:$0xff] %v1466_v41  ;;  %v1469_v55 = vmul.f32 %v1453_v34, %v1389_v26  ;;  %2586 = vst [vmem:[%s3387_s28 + $0x8] sm:$0xff] %v2535_v42   ;;  %v979_v57 = vadd.f32 %v963_v43, %v3661_v2  ;;  %v1343_v42 = vld [vmem:[#allocation4 + $0x18] sm:$0xff] }
 0x19e   : > { %v884_v58 = vadd.f32 %v3651_v54, %v883_v27  ;;  %v1292_v59 = vadd.f32 %v3653_v19, %v1291_v31  ;;  %1077 = vst [vmem:[#allocation3 + $0x40] sm:$0xff] %v1061_v48  ;;  %v1371_v60 = vmul.f32 0.5, %v1355_v49  ;;  %v952_v61 = vsub.f32 %v892_v50, %v936_v44  ;;  %v940_v49 = vld [vmem:[#allocation3 + $0x18] sm:$0xff]  ;;  %v1348_v50 = vld [vmem:[#allocation4 + $0x70] sm:$0xff] }
 0x19f   : > { %v1360_v62 = vsub.f32 %v1300_v51, %v1344_v45  ;;  %v895_v63 = vadd.f32 %v2671_v47, %v3651_v54  ;;  %1485 = vst [vmem:[#allocation4 + $0x60] sm:$0xff] %v1469_v55  ;;  %vm995_vm14 = vcmp.gt.f32.partialorder %v979_v57, 0.5  ;;  %v1303_v4 = vadd.f32 %v2703_v53, %v3653_v19 }
 0x1a0   : > { %v950_v0 = vsub.f32 %v884_v58, %v934_v56  ;;  %v1358_v1 = vsub.f32 %v1292_v59, %v1342_v52  ;;  %v2308_v2 = vsel %vm995_vm14, 1.0, %v3167_v46  ;;  %v1387_v5 = vadd.f32 %v1371_v60, %v1339_v36 }
 0x1a1   : > { %v968_v6 = vmul.f32 0.5, %v952_v61  ;;  %v1376_v7 = vmul.f32 0.5, %v1360_v62  ;;  %v1043_v9 = vsub.f32 1.0, %v2308_v2  ;;  %v2508_v10 = vpack.c.bf16 %v2308_v2, %v3669_v25  ;;  %v2674_v25 = vpop.f32.mrf.mxu0 }
 0x1a2   : > { %v966_v11 = vmul.f32 0.5, %v950_v0  ;;  %v1374_v12 = vmul.f32 0.5, %v1358_v1  ;;  %vm1403_vm15 = vcmp.gt.f32.partialorder %v1387_v5, 0.5  ;;  %v953_v15 = vsub.f32 %v895_v63, %v937_v3  ;;  %v1307_v63 = vpop.f32.mrf.mxu1 }
 0x1a3   : > { %v984_v13 = vadd.f32 %v968_v6, %v936_v44  ;;  %v1392_v14 = vadd.f32 %v1376_v7, %v1344_v45  ;;  %v1059_v16 = vmul.f32 %v1043_v9, %v979_v57  ;;  %2509 = vst [vmem:[%s3382_s27] sm:$0xff] %v2508_v10   ;;  %v2365_v17 = vsel %vm1403_vm15, 1.0, %v3167_v46  ;;  %v899_v43 = vpop.f32.mrf.mxu0 }
 0x1a4   : > { %v982_v18 = vadd.f32 %v966_v11, %v934_v56  ;;  %v1390_v20 = vadd.f32 %v1374_v12, %v1342_v52  ;;  %v1451_v22 = vsub.f32 1.0, %v2365_v17  ;;  %v2532_v23 = vpack.c.bf16 %v2365_v17, %v3673_v30 }
 0x1a5   : > { %vm1000_vm0 = vcmp.gt.f32.partialorder %v984_v13, 0.5  ;;  %vm1408_vm1 = vcmp.gt.f32.partialorder %v1392_v14, 0.5  ;;  %1075 = vst [vmem:[#allocation3 + $0x68] sm:$0xff] %v1059_v16  ;;  %v969_v35 = vmul.f32 0.5, %v953_v15  ;;  %v1361_v36 = vsub.f32 %v1303_v4, %v1345_v24  ;;  %v938_v4 = vld [vmem:[#allocation3 + $0x20] sm:$0xff]  ;;  %v2675_v2 = vpop.f32.mrf.mxu0  ;;  %v2707_v16 = vpop.f32.mrf.mxu1 }
 0x1a6   : > { %v2313_v26 = vsel %vm1000_vm0, 1.0, %v3167_v46  ;;  %v3694_v27 = vsel %vm1408_vm1, 1.0, %v3167_v46  ;;  %vm998_vm3 = vcmp.gt.f32.partialorder %v982_v18, 0.5  ;;  %vm1406_vm4 = vcmp.gt.f32.partialorder %v1390_v20, 0.5  ;;  %2533 = vst [vmem:[%s3387_s28] sm:$0xff] %v2532_v23  }
 0x1a7   : > { %v1467_v28 = vmul.f32 %v1451_v22, %v1387_v5  ;;  %v1048_v29 = vsub.f32 1.0, %v2313_v26  ;;  %v1456_v31 = vsub.f32 1.0, %v3694_v27  ;;  %v3699_v32 = vsel %vm998_vm3, 1.0, %v3167_v46 }
 0x1a8   : > { %v1046_v30 = vsub.f32 1.0, %v3699_v32  ;;  %v3703_v33 = vsel %vm1406_vm4, 1.0, %v3167_v46  ;;  %v887_v34 = vadd.f32 %v3651_v54, %v886_v8  ;;  %v985_v45 = vadd.f32 %v969_v35, %v937_v3  ;;  %v941_v35 = vld [vmem:[#allocation3 + $0x58] sm:$0xff] }
 0x1a9   : > { %1483 = vst [vmem:[#allocation4] sm:$0xff] %v1467_v28  ;;  %v1064_v39 = vmul.f32 %v1048_v29, %v984_v13  ;;  %v1472_v40 = vmul.f32 %v1456_v31, %v1392_v14  ;;  %v1454_v41 = vsub.f32 1.0, %v3703_v33  ;;  %v1377_v47 = vmul.f32 0.5, %v1361_v36  ;;  %v1310_v36 = vpop.f32.mrf.mxu1 }
 0x1aa   : > { %v1062_v44 = vmul.f32 %v1046_v30, %v982_v18  ;;  %v1295_v48 = vadd.f32 %v3653_v19, %v1294_v21  ;;  %v951_v56 = vsub.f32 %v887_v34, %v935_v37  ;;  %v908_v52 = vadd.f32 %v2674_v25, %v3651_v54  ;;  %v902_v21 = vpop.f32.mrf.mxu0  ;;  %v1346_v25 = vld [vmem:[#allocation4 + $0x40] sm:$0xff] }
 0x1ab   : > { %1080 = vst [vmem:[#allocation3 + $0x70] sm:$0xff] %v1064_v39  ;;  %1488 = vst [vmem:[#allocation4 + $0x10] sm:$0xff] %v1472_v40  ;;  %v1470_v51 = vmul.f32 %v1454_v41, %v1390_v20  ;;  %v1316_v53 = vadd.f32 %v2706_v38, %v3653_v19  ;;  %vm1001_vm5 = vcmp.gt.f32.partialorder %v985_v45, 0.5  ;;  %v1393_v55 = vadd.f32 %v1377_v47, %v1345_v24  ;;  %v1349_v40 = vld [vmem:[#allocation4 + $0x20] sm:$0xff]  ;;  %v939_v41 = vld [vmem:[#allocation3 + $0x78] sm:$0xff] }
 0x1ac   : > { %1078 = vst [vmem:[#allocation3 + $0x48] sm:$0xff] %v1062_v44  ;;  %v1359_v57 = vsub.f32 %v1295_v48, %v1343_v42  ;;  %v900_v58 = vadd.f32 %v3651_v54, %v899_v43  ;;  %v2314_v59 = vsel %vm1001_vm5, 1.0, %v3167_v46  ;;  %v967_v60 = vmul.f32 0.5, %v951_v56  ;;  %v2678_v34 = vpop.f32.mrf.mxu0  ;;  %v1347_v47 = vld [vmem:[#allocation4 + $0x28] sm:$0xff]  ;;  %v944_v56 = vld [vmem:[#allocation3 + $0x60] sm:$0xff] }
 0x1ad   : > { %1486 = vst [vmem:[#allocation4 + $0x68] sm:$0xff] %v1470_v51  ;;  %v956_v61 = vsub.f32 %v908_v52, %v940_v49  ;;  %v1364_v62 = vsub.f32 %v1316_v53, %v1348_v50  ;;  %v1049_v0 = vsub.f32 1.0, %v2314_v59  ;;  %v2517_v1 = vpack.c.bf16 %v2314_v59, %v2313_v26 }
 0x1ae   : > { %vm1409_vm6 = vcmp.gt.f32.partialorder %v1393_v55, 0.5  ;;  %v1375_v3 = vmul.f32 0.5, %v1359_v57  ;;  %v983_v6 = vadd.f32 %v967_v60, %v935_v37  ;;  %v954_v15 = vsub.f32 %v900_v58, %v938_v4  ;;  %v2710_v57 = vpop.f32.mrf.mxu1 }
 0x1af   : > { %v2371_v5 = vsel %vm1409_vm6, 1.0, %v3167_v46  ;;  %v972_v7 = vmul.f32 0.5, %v956_v61  ;;  %v1380_v8 = vmul.f32 0.5, %v1364_v62  ;;  %v1065_v9 = vmul.f32 %v1049_v0, %v985_v45  ;;  %2581 = vst [vmem:[%s3382_s27 + $0x18] sm:$0xff] %v2517_v1  }
 0x1b0   : > { %v1457_v10 = vsub.f32 1.0, %v2371_v5  ;;  %v2541_v11 = vpack.c.bf16 %v2371_v5, %v3694_v27  ;;  %v1391_v12 = vadd.f32 %v1375_v3, %v1343_v42  ;;  %vm999_vm8 = vcmp.gt.f32.partialorder %v983_v6, 0.5  ;;  %v1352_v5 = vld [vmem:[#allocation4 + $0x50] sm:$0xff] }
 0x1b1   : > { %v988_v13 = vadd.f32 %v972_v7, %v940_v49  ;;  %v1396_v14 = vadd.f32 %v1380_v8, %v1348_v50  ;;  %1081 = vst [vmem:[#allocation3 + $0x38] sm:$0xff] %v1065_v9  ;;  %v2312_v18 = vsel %vm999_vm8, 1.0, %v3167_v46  ;;  %v1308_v20 = vadd.f32 %v3653_v19, %v1307_v63 }
 0x1b2   : > { %v1473_v17 = vmul.f32 %v1457_v10, %v1393_v55  ;;  %2588 = vst [vmem:[%s3387_s28 + $0x18] sm:$0xff] %v2541_v11   ;;  %vm1407_vm10 = vcmp.gt.f32.partialorder %v1391_v12, 0.5  ;;  %v1047_v22 = vsub.f32 1.0, %v2312_v18  ;;  %v2514_v23 = vpack.c.bf16 %v2312_v18, %v3699_v32  ;;  %v1323_v11 = vpop.f32.mrf.mxu1 }
 0x1b3   : > { %v2369_v24 = vsel %vm1407_vm10, 1.0, %v3167_v46  ;;  %vm1004_vm2 = vcmp.gt.f32.partialorder %v988_v13, 0.5  ;;  %vm1412_vm7 = vcmp.gt.f32.partialorder %v1396_v14, 0.5  ;;  %v970_v32 = vmul.f32 0.5, %v954_v15 }
 0x1b4   : > { %1489 = vst [vmem:[#allocation4 + $0x38] sm:$0xff] %v1473_v17  ;;  %v1455_v26 = vsub.f32 1.0, %v2369_v24  ;;  %v2538_v27 = vpack.c.bf16 %v2369_v24, %v3703_v33  ;;  %v3722_v28 = vsel %vm1004_vm2, 1.0, %v3167_v46  ;;  %v1063_v29 = vmul.f32 %v1047_v22, %v983_v6  ;;  %2580 = vst [vmem:[%s3382_s27 + $0x10] sm:$0xff] %v2514_v23   ;;  %v915_v6 = vpop.f32.mrf.mxu0 }
 0x1b5   : > { %v1052_v31 = vsub.f32 1.0, %v3722_v28  ;;  %v3727_v30 = vsel %vm1412_vm7, 1.0, %v3167_v46  ;;  %v1362_v39 = vsub.f32 %v1308_v20, %v1346_v25  ;;  %v911_v33 = vadd.f32 %v2675_v2, %v3651_v54 }
 0x1b6   : > { %v1471_v37 = vmul.f32 %v1455_v26, %v1391_v12  ;;  %2587 = vst [vmem:[%s3387_s28 + $0x10] sm:$0xff] %v2538_v27   ;;  %v1460_v38 = vsub.f32 1.0, %v3727_v30  ;;  %1079 = vst [vmem:[#allocation3 + $0x30] sm:$0xff] %v1063_v29  ;;  %v986_v43 = vadd.f32 %v970_v32, %v938_v4  ;;  %v1319_v44 = vadd.f32 %v2707_v16, %v3653_v19  ;;  %v2679_v22 = vpop.f32.mrf.mxu0  ;;  %v2711_v26 = vpop.f32.mrf.mxu1 }
 0x1b7   : > { %v1068_v42 = vmul.f32 %v1052_v31, %v988_v13  ;;  %v903_v45 = vadd.f32 %v3651_v54, %v902_v21  ;;  %v1378_v49 = vmul.f32 0.5, %v1362_v39  ;;  %v957_v50 = vsub.f32 %v911_v33, %v941_v35 }
 0x1b8   : > { %1487 = vst [vmem:[#allocation4 + $0x18] sm:$0xff] %v1471_v37  ;;  %v1476_v48 = vmul.f32 %v1460_v38, %v1396_v14  ;;  %v1311_v51 = vadd.f32 %v3653_v19, %v1310_v36  ;;  %vm1002_vm9 = vcmp.gt.f32.partialorder %v986_v43, 0.5  ;;  %v1365_v52 = vsub.f32 %v1319_v44, %v1349_v40  ;;  %v942_v38 = vld [vmem:[#allocation3] sm:$0xff] }
 0x1b9   : > { %1084 = vst [vmem:[#allocation3 + $0x18] sm:$0xff] %v1068_v42  ;;  %v955_v53 = vsub.f32 %v903_v45, %v939_v41  ;;  %v924_v55 = vadd.f32 %v2678_v34, %v3651_v54  ;;  %v2315_v58 = vsel %vm1002_vm9, 1.0, %v3167_v46  ;;  %v1394_v59 = vadd.f32 %v1378_v49, %v1346_v25  ;;  %v945_v34 = vld [vmem:[#allocation3 + $0x50] sm:$0xff]  ;;  %v1353_v42 = vld [vmem:[#allocation4 + $0x78] sm:$0xff] }
 0x1ba   : > { %1492 = vst [vmem:[#allocation4 + $0x70] sm:$0xff] %v1476_v48  ;;  %v973_v60 = vmul.f32 0.5, %v957_v50  ;;  %v1363_v61 = vsub.f32 %v1311_v51, %v1347_v47  ;;  %v1050_v62 = vsub.f32 1.0, %v2315_v58  ;;  %v1381_v63 = vmul.f32 0.5, %v1365_v52  ;;  %v1326_v48 = vpop.f32.mrf.mxu1 }
 0x1bb   : > { %v971_v0 = vmul.f32 0.5, %v955_v53  ;;  %v960_v1 = vsub.f32 %v924_v55, %v944_v56  ;;  %vm1410_vm11 = vcmp.gt.f32.partialorder %v1394_v59, 0.5  ;;  %v1332_v2 = vadd.f32 %v2710_v57, %v3653_v19 }
 0x1bc   : > { %v989_v3 = vadd.f32 %v973_v60, %v941_v35  ;;  %v1379_v4 = vmul.f32 0.5, %v1363_v61  ;;  %v1066_v7 = vmul.f32 %v1050_v62, %v986_v43  ;;  %v2372_v8 = vsel %vm1410_vm11, 1.0, %v3167_v46  ;;  %v918_v43 = vpop.f32.mrf.mxu0  ;;  %v1351_v62 = vld [vmem:[#allocation4 + $0x30] sm:$0xff] }
 0x1bd   : > { %v1397_v9 = vadd.f32 %v1381_v63, %v1349_v40  ;;  %v987_v10 = vadd.f32 %v971_v0, %v939_v41  ;;  %v1458_v12 = vsub.f32 1.0, %v2372_v8  ;;  %v976_v14 = vmul.f32 0.5, %v960_v1  ;;  %v3756_v0 = vld [vmem:[#allocation16] ss:$0 sm:$0xff] }
 0x1be   : > { %vm1005_vm12 = vcmp.gt.f32.partialorder %v989_v3, 0.5  ;;  %v1395_v13 = vadd.f32 %v1379_v4, %v1347_v47  ;;  %1082 = vst [vmem:[#allocation3 + $0x20] sm:$0xff] %v1066_v7  ;;  %v1368_v16 = vsub.f32 %v1332_v2, %v1352_v5  ;;  %v916_v40 = vadd.f32 %v3651_v54, %v915_v6  ;;  %v2730_v63 = vpop.f32.mrf.mxu0 }
 0x1bf   : > { %v2318_v15 = vsel %vm1005_vm12, 1.0, %v3167_v46  ;;  %vm1413_vm13 = vcmp.gt.f32.partialorder %v1397_v9, 0.5  ;;  %vm1003_vm14 = vcmp.gt.f32.partialorder %v987_v10, 0.5  ;;  %v1474_v17 = vmul.f32 %v1458_v12, %v1394_v59 }
 0x1c0   : > { %v1053_v18 = vsub.f32 1.0, %v2318_v15  ;;  %v2523_v20 = vpack.c.bf16 %v2318_v15, %v3722_v28  ;;  %v2375_v21 = vsel %vm1413_vm13, 1.0, %v3167_v46  ;;  %v2316_v25 = vsel %vm1003_vm14, 1.0, %v3167_v46 }
 0x1c1   : > { %v1461_v23 = vsub.f32 1.0, %v2375_v21  ;;  %v2547_v24 = vpack.c.bf16 %v2375_v21, %v3727_v30  ;;  %vm1411_vm15 = vcmp.gt.f32.partialorder %v1395_v13, 0.5  ;;  %1490 = vst [vmem:[#allocation4 + $0x40] sm:$0xff] %v1474_v17  ;;  %v1051_v29 = vsub.f32 1.0, %v2316_v25  ;;  %v1350_v30 = vld [vmem:[#allocation4 + $0x58] sm:$0xff] }
 0x1c2   : > { %v1069_v27 = vmul.f32 %v1053_v18, %v989_v3  ;;  %2583 = vst [vmem:[%s3382_s27 + $0x28] sm:$0xff] %v2523_v20   ;;  %v2520_v31 = vpack.c.bf16 %v2316_v25, %v2315_v58  ;;  %v2373_v32 = vsel %vm1411_vm15, 1.0, %v3167_v46  ;;  %v992_v37 = vadd.f32 %v976_v14, %v944_v56  ;;  %v943_v58 = vld [vmem:[#allocation3 + $0x8] sm:$0xff]  ;;  %v1683_v14 = vpop.f32.mrf.mxu0 }
 0x1c3   : > { %v1477_v35 = vmul.f32 %v1461_v23, %v1397_v9  ;;  %2590 = vst [vmem:[%s3387_s28 + $0x28] sm:$0xff] %v2547_v24   ;;  %v1459_v28 = vsub.f32 1.0, %v2373_v32  ;;  %v2544_v36 = vpack.c.bf16 %v2373_v32, %v2372_v8  ;;  %v1067_v39 = vmul.f32 %v1051_v29, %v987_v10 }
 0x1c4   : > { %1085 = vst [vmem:[#allocation3 + $0x58] sm:$0xff] %v1069_v27  ;;  %2582 = vst [vmem:[%s3382_s27 + $0x20] sm:$0xff] %v2520_v31   ;;  %v1384_v33 = vmul.f32 0.5, %v1368_v16  ;;  %v1324_v41 = vadd.f32 %v3653_v19, %v1323_v11  ;;  %vm1008_vm0 = vcmp.gt.f32.partialorder %v992_v37, 0.5  ;;  %v927_v45 = vadd.f32 %v2679_v22, %v3651_v54  ;;  %v1748_v22 = vld [vmem:[#allocation5 + $0x48] sm:$0xff] }
 0x1c5   : > { %1493 = vst [vmem:[#allocation4 + $0x20] sm:$0xff] %v1477_v35  ;;  %v1475_v44 = vmul.f32 %v1459_v28, %v1395_v13  ;;  %2589 = vst [vmem:[%s3387_s28 + $0x20] sm:$0xff] %v2544_v36   ;;  %v1335_v47 = vadd.f32 %v2711_v26, %v3653_v19  ;;  %v2321_v49 = vsel %vm1008_vm0, 1.0, %v3167_v46  ;;  %v958_v51 = vsub.f32 %v916_v40, %v942_v38  ;;  %v1756_v28 = vld [vmem:[#allocation5 + $0x78] sm:$0xff]  ;;  %v2731_v36 = vpop.f32.mrf.mxu0 }
 0x1c6   : > { %1083 = vst [vmem:[#allocation3 + $0x78] sm:$0xff] %v1067_v39  ;;  %v1400_v50 = vadd.f32 %v1384_v33, %v1352_v5  ;;  %v1366_v56 = vsub.f32 %v1324_v41, %v1350_v30  ;;  %v1056_v52 = vsub.f32 1.0, %v2321_v49  ;;  %v961_v53 = vsub.f32 %v927_v45, %v945_v34  ;;  %v1746_v33 = vld [vmem:[#allocation5 + $0x18] sm:$0xff] }
 0x1c7   : > { %1491 = vst [vmem:[#allocation4 + $0x28] sm:$0xff] %v1475_v44  ;;  %v1369_v55 = vsub.f32 %v1335_v47, %v1353_v42  ;;  %v919_v57 = vadd.f32 %v3651_v54, %v918_v43  ;;  %v974_v59 = vmul.f32 0.5, %v958_v51  ;;  %v1327_v61 = vadd.f32 %v3653_v19, %v1326_v48  ;;  %v2738_v19 = vpop.f32.mrf.mxu1  ;;  %v1749_v51 = vld [vmem:[#allocation5 + $0x40] sm:$0xff] }
 0x1c8   : > { %vm1416_vm1 = vcmp.gt.f32.partialorder %v1400_v50, 0.5  ;;  %v1382_v60 = vmul.f32 0.5, %v1366_v56  ;;  %v1072_v1 = vmul.f32 %v1056_v52, %v992_v37  ;;  %v977_v4 = vmul.f32 0.5, %v961_v53 }
 0x1c9   : > { %v2378_v3 = vsel %vm1416_vm1, 1.0, %v3167_v46  ;;  %v1385_v2 = vmul.f32 0.5, %v1369_v55  ;;  %v990_v6 = vadd.f32 %v974_v59, %v942_v38  ;;  %v959_v8 = vsub.f32 %v919_v57, %v943_v58  ;;  %v1715_v27 = vpop.f32.mrf.mxu1 }
 0x1ca   : > { %v1464_v5 = vsub.f32 1.0, %v2378_v3  ;;  %v1398_v7 = vadd.f32 %v1382_v60, %v1350_v30  ;;  %1088 = vst [vmem:[#allocation3 + $0x60] sm:$0xff] %v1072_v1  ;;  %v993_v54 = vadd.f32 %v977_v4, %v945_v34  ;;  %v1367_v10 = vsub.f32 %v1327_v61, %v1351_v62  ;;  %v1757_v4 = vld [vmem:[#allocation5 + $0x30] sm:$0xff] }
 0x1cb   : > { %v1401_v9 = vadd.f32 %v1385_v2, %v1353_v42  ;;  %v1692_v11 = vadd.f32 %v2730_v63, %v3756_v0  ;;  %vm1006_vm3 = vcmp.gt.f32.partialorder %v990_v6, 0.5  ;;  %v975_v13 = vmul.f32 0.5, %v959_v8  ;;  %v1754_v42 = vld [vmem:[#allocation5 + $0x68] sm:$0xff]  ;;  %v2739_v57 = vpop.f32.mrf.mxu1 }
 0x1cc   : > { %v1480_v12 = vmul.f32 %v1464_v5, %v1400_v50  ;;  %vm1414_vm4 = vcmp.gt.f32.partialorder %v1398_v7, 0.5  ;;  %v2319_v15 = vsel %vm1006_vm3, 1.0, %v3167_v46  ;;  %vm1009_vm5 = vcmp.gt.f32.partialorder %v993_v54, 0.5 }
 0x1cd   : > { %v3762_v16 = vsel %vm1414_vm4, 1.0, %v3167_v46  ;;  %vm1417_vm6 = vcmp.gt.f32.partialorder %v1401_v9, 0.5  ;;  %v1054_v17 = vsub.f32 1.0, %v2319_v15  ;;  %v2322_v20 = vsel %vm1009_vm5, 1.0, %v3167_v46 }
 0x1ce   : > { %1496 = vst [vmem:[#allocation4 + $0x50] sm:$0xff] %v1480_v12  ;;  %v1462_v18 = vsub.f32 1.0, %v3762_v16  ;;  %v2379_v21 = vsel %vm1417_vm6, 1.0, %v3167_v46  ;;  %v1057_v23 = vsub.f32 1.0, %v2322_v20  ;;  %v2529_v24 = vpack.c.bf16 %v2322_v20, %v2321_v49 }
 0x1cf   : > { %v1465_v25 = vsub.f32 1.0, %v2379_v21  ;;  %v2553_v26 = vpack.c.bf16 %v2379_v21, %v2378_v3  ;;  %v1070_v29 = vmul.f32 %v1054_v17, %v990_v6  ;;  %v991_v32 = vadd.f32 %v975_v13, %v943_v58  ;;  %v1747_v13 = vld [vmem:[#allocation5 + $0x38] sm:$0xff] }
 0x1d0   : > { %v1478_v31 = vmul.f32 %v1462_v18, %v1398_v7  ;;  %v1383_v35 = vmul.f32 0.5, %v1367_v10  ;;  %v1073_v37 = vmul.f32 %v1057_v23, %v993_v54  ;;  %2585 = vst [vmem:[%s3382_s27 + $0x38] sm:$0xff] %v2529_v24   ;;  %v1764_v30 = vsub.f32 %v1692_v11, %v1748_v22  ;;  %v1718_v10 = vpop.f32.mrf.mxu1  ;;  %v1755_v23 = vld [vmem:[#allocation5 + $0x60] sm:$0xff] }
 0x1d1   : > { %v1481_v38 = vmul.f32 %v1465_v25, %v1401_v9  ;;  %2592 = vst [vmem:[%s3387_s28 + $0x38] sm:$0xff] %v2553_v26   ;;  %v1724_v39 = vadd.f32 %v2738_v19, %v3756_v0  ;;  %1086 = vst [vmem:[#allocation3] sm:$0xff] %v1070_v29  ;;  %vm1007_vm8 = vcmp.gt.f32.partialorder %v991_v32, 0.5  ;;  %v1684_v41 = vadd.f32 %v3756_v0, %v1683_v14  ;;  %v1752_v29 = vld [vmem:[#allocation5 + $0x8] sm:$0xff] }
 0x1d2   : > { %1494 = vst [vmem:[#allocation4 + $0x58] sm:$0xff] %v1478_v31  ;;  %v1399_v40 = vadd.f32 %v1383_v35, %v1351_v62  ;;  %v1716_v34 = vadd.f32 %v3756_v0, %v1715_v27  ;;  %1089 = vst [vmem:[#allocation3 + $0x50] sm:$0xff] %v1073_v37  ;;  %v2320_v43 = vsel %vm1007_vm8, 1.0, %v3167_v46  ;;  %v1780_v44 = vmul.f32 0.5, %v1764_v30  ;;  %v1686_v62 = vpop.f32.mrf.mxu0  ;;  %v2742_v31 = vpop.f32.mrf.mxu1 }
 0x1d3   : > { %1497 = vst [vmem:[#allocation4 + $0x78] sm:$0xff] %v1481_v38  ;;  %v1772_v45 = vsub.f32 %v1724_v39, %v1756_v28  ;;  %v1695_v47 = vadd.f32 %v2731_v36, %v3756_v0  ;;  %v1055_v48 = vsub.f32 1.0, %v2320_v43  ;;  %v2526_v49 = vpack.c.bf16 %v2320_v43, %v2319_v15 }
 0x1d4   : > { %vm1415_vm10 = vcmp.gt.f32.partialorder %v1399_v40, 0.5  ;;  %v1762_v50 = vsub.f32 %v1684_v41, %v1746_v33  ;;  %v1796_v52 = vadd.f32 %v1780_v44, %v1748_v22  ;;  %v1770_v55 = vsub.f32 %v1716_v34, %v1754_v42  ;;  %v2734_v14 = vpop.f32.mrf.mxu0  ;;  %v1760_v34 = vld [vmem:[#allocation5 + $0x58] sm:$0xff] }
 0x1d5   : > { %v2377_v56 = vsel %vm1415_vm10, 1.0, %v3167_v46  ;;  %v1788_v53 = vmul.f32 0.5, %v1772_v45  ;;  %v1071_v58 = vmul.f32 %v1055_v48, %v991_v32  ;;  %2584 = vst [vmem:[%s3382_s27 + $0x30] sm:$0xff] %v2526_v49   ;;  %v1765_v3 = vsub.f32 %v1695_v47, %v1749_v51  ;;  %v1731_v47 = vpop.f32.mrf.mxu1 }
 0x1d6   : > { %v1463_v59 = vsub.f32 1.0, %v2377_v56  ;;  %v2550_v60 = vpack.c.bf16 %v2377_v56, %v3762_v16  ;;  %v1778_v61 = vmul.f32 0.5, %v1762_v50  ;;  %vm1812_vm2 = vcmp.gt.f32.partialorder %v1796_v52, 0.5  ;;  %v1699_v36 = vpop.f32.mrf.mxu0 }
 0x1d7   : > { %v1804_v63 = vadd.f32 %v1788_v53, %v1756_v28  ;;  %v1786_v1 = vmul.f32 0.5, %v1770_v55  ;;  %1087 = vst [vmem:[#allocation3 + $0x8] sm:$0xff] %v1071_v58  ;;  %v2423_v5 = vsel %vm1812_vm2, 1.0, %v3167_v46  ;;  %v1727_v7 = vadd.f32 %v2739_v57, %v3756_v0  ;;  %v1750_v57 = vld [vmem:[#allocation5 + $0x28] sm:$0xff]  ;;  %v1758_v58 = vld [vmem:[#allocation5 + $0x50] sm:$0xff] }
 0x1d8   : > { %v1479_v2 = vmul.f32 %v1463_v59, %v1399_v40  ;;  %2591 = vst [vmem:[%s3387_s28 + $0x30] sm:$0xff] %v2550_v60   ;;  %v1794_v6 = vadd.f32 %v1778_v61, %v1746_v33  ;;  %v1860_v8 = vsub.f32 1.0, %v2423_v5  ;;  %v1781_v9 = vmul.f32 0.5, %v1765_v3  ;;  %v2735_v56 = vpop.f32.mrf.mxu0 }
 0x1d9   : > { %vm1820_vm7 = vcmp.gt.f32.partialorder %v1804_v63, 0.5  ;;  %v1802_v54 = vadd.f32 %v1786_v1, %v1754_v42  ;;  %v1773_v19 = vsub.f32 %v1727_v7, %v1757_v4  ;;  %v1687_v12 = vadd.f32 %v3756_v0, %v1686_v62 }
 0x1da   : > { %1495 = vst [vmem:[#allocation4 + $0x30] sm:$0xff] %v1479_v2  ;;  %v2431_v11 = vsel %vm1820_vm7, 1.0, %v3167_v46  ;;  %vm1810_vm9 = vcmp.gt.f32.partialorder %v1794_v6, 0.5  ;;  %v1876_v15 = vmul.f32 %v1860_v8, %v1796_v52  ;;  %v1797_v21 = vadd.f32 %v1781_v9, %v1749_v51  ;;  %v1702_v7 = vpop.f32.mrf.mxu0 }
 0x1db   : > { %v1868_v16 = vsub.f32 1.0, %v2431_v11  ;;  %v3783_v17 = vsel %vm1810_vm9, 1.0, %v3167_v46  ;;  %vm1818_vm11 = vcmp.gt.f32.partialorder %v1802_v54, 0.5  ;;  %v1789_v22 = vmul.f32 0.5, %v1773_v19 }
 0x1dc   : > { %v1858_v18 = vsub.f32 1.0, %v3783_v17  ;;  %v3787_v20 = vsel %vm1818_vm11, 1.0, %v3167_v46  ;;  %1892 = vst [vmem:[#allocation5 + $0x48] sm:$0xff] %v1876_v15  ;;  %v1763_v26 = vsub.f32 %v1687_v12, %v1747_v13  ;;  %v1719_v27 = vadd.f32 %v3756_v0, %v1718_v10  ;;  %v1761_v15 = vld [vmem:[#allocation5 + $0x10] sm:$0xff] }
 0x1dd   : > { %v1884_v24 = vmul.f32 %v1868_v16, %v1804_v63  ;;  %v1866_v25 = vsub.f32 1.0, %v3787_v20  ;;  %vm1813_vm12 = vcmp.gt.f32.partialorder %v1797_v21, 0.5  ;;  %v1805_v35 = vadd.f32 %v1789_v22, %v1757_v4  ;;  %v2743_v4 = vpop.f32.mrf.mxu1  ;;  %v1751_v16 = vld [vmem:[#allocation5] sm:$0xff] }
 0x1de   : > { %v1874_v32 = vmul.f32 %v1858_v18, %v1794_v6  ;;  %v1708_v28 = vadd.f32 %v2734_v14, %v3756_v0  ;;  %v2424_v38 = vsel %vm1813_vm12, 1.0, %v3167_v46  ;;  %v1779_v30 = vmul.f32 0.5, %v1763_v26  ;;  %v1753_v14 = vld [vmem:[#allocation5 + $0x70] sm:$0xff] }
 0x1df   : > { %1900 = vst [vmem:[#allocation5 + $0x78] sm:$0xff] %v1884_v24  ;;  %v1882_v37 = vmul.f32 %v1866_v25, %v1802_v54  ;;  %v1771_v39 = vsub.f32 %v1719_v27, %v1755_v23  ;;  %v1861_v33 = vsub.f32 1.0, %v2424_v38  ;;  %v2559_v40 = vpack.c.bf16 %v2424_v38, %v2423_v5 }
 0x1e0   : > { %1890 = vst [vmem:[#allocation5 + $0x18] sm:$0xff] %v1874_v32  ;;  %vm1821_vm13 = vcmp.gt.f32.partialorder %v1805_v35, 0.5  ;;  %v1768_v41 = vsub.f32 %v1708_v28, %v1752_v29  ;;  %v1795_v43 = vadd.f32 %v1779_v30, %v1747_v13  ;;  %v1740_v45 = vadd.f32 %v2742_v31, %v3756_v0  ;;  %v1759_v28 = vld [vmem:[#allocation5 + $0x20] sm:$0xff] }
 0x1e1   : > { %1898 = vst [vmem:[#allocation5 + $0x68] sm:$0xff] %v1882_v37  ;;  %v2432_v42 = vsel %vm1821_vm13, 1.0, %v3167_v46  ;;  %v1787_v44 = vmul.f32 0.5, %v1771_v39  ;;  %v1877_v48 = vmul.f32 %v1861_v33, %v1797_v21  ;;  %2593 = vst [vmem:[%s3392_s16 + $0x8] sm:$0xff] %v2559_v40   ;;  %v1700_v55 = vadd.f32 %v3756_v0, %v1699_v36 }
 0x1e2   : > { %v1869_v49 = vsub.f32 1.0, %v2432_v42  ;;  %v2571_v50 = vpack.c.bf16 %v2432_v42, %v2431_v11  ;;  %v1784_v51 = vmul.f32 0.5, %v1768_v41  ;;  %vm1811_vm14 = vcmp.gt.f32.partialorder %v1795_v43, 0.5 }
 0x1e3   : > { %v1803_v52 = vadd.f32 %v1787_v44, %v1755_v23  ;;  %v1776_v53 = vsub.f32 %v1740_v45, %v1760_v34  ;;  %1893 = vst [vmem:[#allocation5 + $0x40] sm:$0xff] %v1877_v48  ;;  %v2422_v60 = vsel %vm1811_vm14, 1.0, %v3167_v46  ;;  %v1732_v62 = vadd.f32 %v3756_v0, %v1731_v47  ;;  %v1734_v23 = vpop.f32.mrf.mxu1 }
 0x1e4   : > { %v1885_v59 = vmul.f32 %v1869_v49, %v1805_v35  ;;  %2597 = vst [vmem:[%s3392_s16 + $0x28] sm:$0xff] %v2571_v50   ;;  %v1800_v61 = vadd.f32 %v1784_v51, %v1752_v29  ;;  %v1859_v63 = vsub.f32 1.0, %v2422_v60  ;;  %v2556_v1 = vpack.c.bf16 %v2422_v60, %v3783_v17 }
 0x1e5   : > { %vm1819_vm15 = vcmp.gt.f32.partialorder %v1803_v52, 0.5  ;;  %v1792_v3 = vmul.f32 0.5, %v1776_v53  ;;  %v1766_v5 = vsub.f32 %v1700_v55, %v1750_v57  ;;  %v1774_v6 = vsub.f32 %v1732_v62, %v1758_v58 }
 0x1e6   : > { %1901 = vst [vmem:[#allocation5 + $0x30] sm:$0xff] %v1885_v59  ;;  %v2430_v2 = vsel %vm1819_vm15, 1.0, %v3167_v46  ;;  %vm1816_vm0 = vcmp.gt.f32.partialorder %v1800_v61, 0.5  ;;  %v1875_v8 = vmul.f32 %v1859_v63, %v1795_v43  ;;  %2557 = vst [vmem:[%s3392_s16] sm:$0xff] %v2556_v1   ;;  %v1711_v18 = vadd.f32 %v2735_v56, %v3756_v0 }
 0x1e7   : > { %v1867_v54 = vsub.f32 1.0, %v2430_v2  ;;  %v2568_v9 = vpack.c.bf16 %v2430_v2, %v3787_v20  ;;  %v2427_v10 = vsel %vm1816_vm0, 1.0, %v3167_v46  ;;  %v1808_v19 = vadd.f32 %v1792_v3, %v1760_v34 }
 0x1e8   : > { %v1864_v11 = vsub.f32 1.0, %v2427_v10  ;;  %v1782_v12 = vmul.f32 0.5, %v1766_v5  ;;  %v1790_v13 = vmul.f32 0.5, %v1774_v6  ;;  %1891 = vst [vmem:[#allocation5 + $0x38] sm:$0xff] %v1875_v8  ;;  %v1743_v21 = vadd.f32 %v2743_v4, %v3756_v0 }
 0x1e9   : > { %v1883_v17 = vmul.f32 %v1867_v54, %v1803_v52  ;;  %2596 = vst [vmem:[%s3392_s16 + $0x20] sm:$0xff] %v2568_v9   ;;  %v1703_v22 = vadd.f32 %v3756_v0, %v1702_v7  ;;  %vm1824_vm1 = vcmp.gt.f32.partialorder %v1808_v19, 0.5  ;;  %v1769_v27 = vsub.f32 %v1711_v18, %v1753_v14 }
 0x1ea   : > { %v1880_v20 = vmul.f32 %v1864_v11, %v1800_v61  ;;  %v1798_v24 = vadd.f32 %v1782_v12, %v1750_v57  ;;  %v1806_v25 = vadd.f32 %v1790_v13, %v1758_v58  ;;  %v2435_v26 = vsel %vm1824_vm1, 1.0, %v3167_v46 }
 0x1eb   : > { %1899 = vst [vmem:[#allocation5 + $0x60] sm:$0xff] %v1883_v17  ;;  %v1777_v29 = vsub.f32 %v1743_v21, %v1761_v15  ;;  %v1767_v31 = vsub.f32 %v1703_v22, %v1751_v16  ;;  %v1872_v32 = vsub.f32 1.0, %v2435_v26  ;;  %v1735_v35 = vadd.f32 %v3756_v0, %v1734_v23 }
 0x1ec   : > { %1896 = vst [vmem:[#allocation5 + $0x8] sm:$0xff] %v1880_v20  ;;  %vm1814_vm3 = vcmp.gt.f32.partialorder %v1798_v24, 0.5  ;;  %vm1822_vm4 = vcmp.gt.f32.partialorder %v1806_v25, 0.5  ;;  %v1785_v38 = vmul.f32 0.5, %v1769_v27 }
 0x1ed   : > { %v2425_v36 = vsel %vm1814_vm3, 1.0, %v3167_v46  ;;  %v2433_v37 = vsel %vm1822_vm4, 1.0, %v3167_v46  ;;  %v1793_v30 = vmul.f32 0.5, %v1777_v29  ;;  %v1888_v39 = vmul.f32 %v1872_v32, %v1808_v19 }
 0x1ee   : > { %v1862_v33 = vsub.f32 1.0, %v2425_v36  ;;  %v1870_v40 = vsub.f32 1.0, %v2433_v37  ;;  %v1783_v41 = vmul.f32 0.5, %v1767_v31  ;;  %v1801_v34 = vadd.f32 %v1785_v38, %v1753_v14 }
 0x1ef   : > { %v1809_v42 = vadd.f32 %v1793_v30, %v1761_v15  ;;  %v1775_v43 = vsub.f32 %v1735_v35, %v1759_v28  ;;  %1904 = vst [vmem:[#allocation5 + $0x58] sm:$0xff] %v1888_v39 }
 0x1f0   : > { %v1878_v44 = vmul.f32 %v1862_v33, %v1798_v24  ;;  %v1886_v45 = vmul.f32 %v1870_v40, %v1806_v25  ;;  %v1799_v47 = vadd.f32 %v1783_v41, %v1751_v16  ;;  %vm1817_vm5 = vcmp.gt.f32.partialorder %v1801_v34, 0.5 }
 0x1f1   : > { %vm1825_vm6 = vcmp.gt.f32.partialorder %v1809_v42, 0.5  ;;  %v1791_v0 = vmul.f32 0.5, %v1775_v43  ;;  %v2428_v48 = vsel %vm1817_vm5, 1.0, %v3167_v46 }
 0x1f2   : > { %1894 = vst [vmem:[#allocation5 + $0x28] sm:$0xff] %v1878_v44  ;;  %1902 = vst [vmem:[#allocation5 + $0x50] sm:$0xff] %v1886_v45  ;;  %v2436_v49 = vsel %vm1825_vm6, 1.0, %v3167_v46  ;;  %vm1815_vm8 = vcmp.gt.f32.partialorder %v1799_v47, 0.5  ;;  %v1865_v50 = vsub.f32 1.0, %v2428_v48  ;;  %v2565_v51 = vpack.c.bf16 %v2428_v48, %v2427_v10 }
 0x1f3   : > { %v1873_v56 = vsub.f32 1.0, %v2436_v49  ;;  %v2577_v52 = vpack.c.bf16 %v2436_v49, %v2435_v26  ;;  %v2426_v53 = vsel %vm1815_vm8, 1.0, %v3167_v46  ;;  %v1807_v55 = vadd.f32 %v1791_v0, %v1759_v28 }
 0x1f4   : > { %v1881_v57 = vmul.f32 %v1865_v50, %v1801_v34  ;;  %2595 = vst [vmem:[%s3392_s16 + $0x18] sm:$0xff] %v2565_v51   ;;  %v1863_v59 = vsub.f32 1.0, %v2426_v53  ;;  %v2562_v60 = vpack.c.bf16 %v2426_v53, %v2425_v36 }
 0x1f5   : > { %v1889_v58 = vmul.f32 %v1873_v56, %v1809_v42  ;;  %2599 = vst [vmem:[%s3392_s16 + $0x38] sm:$0xff] %v2577_v52   ;;  %vm1823_vm10 = vcmp.gt.f32.partialorder %v1807_v55, 0.5 }
 0x1f6   : > { %1897 = vst [vmem:[#allocation5 + $0x70] sm:$0xff] %v1881_v57  ;;  %v1879_v61 = vmul.f32 %v1863_v59, %v1799_v47  ;;  %2594 = vst [vmem:[%s3392_s16 + $0x10] sm:$0xff] %v2562_v60   ;;  %v2434_v62 = vsel %vm1823_vm10, 1.0, %v3167_v46 }
 0x1f7   : > { %1905 = vst [vmem:[#allocation5 + $0x10] sm:$0xff] %v1889_v58  ;;  %v1871_v63 = vsub.f32 1.0, %v2434_v62  ;;  %v2574_v1 = vpack.c.bf16 %v2434_v62, %v2433_v37 }
 0x1f8   : > { %1895 = vst [vmem:[#allocation5] sm:$0xff] %v1879_v61 }
 0x1f9   : > { %v1887_v3 = vmul.f32 %v1871_v63, %v1807_v55  ;;  %2598 = vst [vmem:[%s3392_s16 + $0x30] sm:$0xff] %v2574_v1  }
 0x1fb   : > { %1903 = vst [vmem:[#allocation5 + $0x20] sm:$0xff] %v1887_v3 }
 0x1fc PF: > { %s26_s14 = sadd.s32 1, %s3153_s14   ;;  %s3884_s30 = smov %s3137_s10 }
 0x1fd   : > { %p23_p8 = scmp.ge.s32.totalorder %s26_s14, 6   ;;  %s3885_s10 = smov %s3141_s11 }
 0x1fe   : > { %s3886_s11 = smov %s3340_s22  ;;  %s3887_s12 = smov %s3149_s13 }
 0x1ff   : > { %s3888_s13 = smov %s3890_s25  ;;  %25 = sbr.rel (!%p23_p8) target bundleno = 11 (0xb), region = 140 }
 0x204   :  { %2066 = vsyncpa [#allocation7], 1 }
 0x205   :  { %2068 = vsyncpa [#allocation7 + $0x1], 1 }
 0x206   :  { %2069 = vsyncpa [#allocation9], 1 }
 0x207   :  { %2070 = vsyncpa [#allocation12], 1 }
 0x208   :  { %2071 = vsyncpa [#allocation15], 1 }

// kernel: sdt_block_forward.4
= control target key start
LH: loop header
LB: loop body
LE: loop exit
PB: predicated region body
PF: predicated region fallthrough
CT: control target
= control target key end

     0   :  { %s4443_s0 = inlined_call_operand.vmem [shape: bf16[4,2,64,128], index: 0, kind: input, shape index: {}]   ;;  %s4444_s1 = inlined_call_operand.vmem [shape: bf16[4,2,64,128], index: 1, kind: input, shape index: {}]   ;;  %s4445_s2 = inlined_call_operand.vmem [shape: bf16[4,2,64,128], index: 2, kind: input, shape index: {}]   ;;  %s4446_s3 = inlined_call_operand.vmem [shape: f32[4,2,64,128], index: 3, kind: input, shape index: {}]   ;;  %s4447_s4 = inlined_call_operand.hbm [shape: bf16[64,64], index: 4, kind: input, shape index: {}]   ;;  %s4448_s5 = inlined_call_operand.hbm [shape: bf16[64,64], index: 5, kind: input, shape index: {}]   ;;  %s4449_s6 = inlined_call_operand.hbm [shape: bf16[64,64], index: 6, kind: input, shape index: {}]   ;;  %s4450_s7 = inlined_call_operand.vmem [shape: bf16[64,64], index: 7, kind: input, shape index: {}]   ;;  %s4451_s8 = inlined_call_operand.vmem [shape: bf16[64,64], index: 8, kind: input, shape index: {}]   ;;  %s4452_s9 = inlined_call_operand.vmem [shape: bf16[64,64], index: 9, kind: input, shape index: {}]   ;;  %s4453_s10 = inlined_call_operand.vmem [shape: bf16[128,128], index: 10, kind: input, shape index: {}]   ;;  %s4454_s11 = inlined_call_operand.vmem [shape: bf16[128,128], index: 11, kind: input, shape index: {}]   ;;  %s4455_s12 = inlined_call_operand.vmem [shape: f32[4,2,64,128], index: 12, kind: output, shape index: {}]  }
   0x1   :  { %4458 = sst [smem:[#allocation11_spill]] %s4447_s4 }
   0x2   :  { %4459 = sst [smem:[#allocation12_spill]] %s4448_s5 }
   0x3   :  { %4460 = sst [smem:[#allocation13_spill]] %s4449_s6 }
   0x4   :  { %4461 = sst [smem:[#allocation14_spill]] %s4454_s11 }
   0x5   :  { %17 = vsyncpa [#allocation4], 0 }
   0x6   :  { %18 = vsyncpa [#allocation6], 0  ;;  %s3744_s21 = smov 0   ;;  %s3746_s22 = smov 0  }
   0x7   :  { %s3748_s23 = smov 0   ;;  %s3750_s24 = smov 0  }
   0x8   :  { %s3752_s25 = smov 0  }
   0x9 LB: > { %4462 = sst [smem:[#allocation10_spill]] %s3670_s25  ;;  %s2790_s26 = sadd.s32 4294967295, %s3670_s25   ;;  %s3670_s25 = sphi %s3752_s25, %s24_s25   ;;  %s3666_s24 = sphi %s3750_s24, %s4474_s24   ;;  %s3662_s23 = sphi %s3748_s23, %s4473_s23   ;;  %s3658_s22 = sphi %s3746_s22, %s4472_s22   ;;  %s3654_s21 = sphi %s3744_s21, %s4471_s21  }
   0xa   : > { %p2792_p0 = scmp.ge.s32.totalorder %s3670_s25, 1  ;;  %p349_p1 = scmp.lt.s32.totalorder %s3670_s25, 9 }
   0xb   : > { %p3772_p2 = scmp.eq.s32.totalorder %s2790_s26, 0  ;;  %s3672_s29 = smov [#allocation5]  }
   0xc   : > { %p3776_p3 = pnand %p2792_p0, %p349_p1  ;;  %s374_s30 = sshll.u32 %s3672_s29, 4  ;;  %s375_s30 = int_to_ptr.vmem [resolvable:$true] %s374_s30 }
   0xd   : > { %s3557_s14 = scalar_lea.vmem %s375_s30, 512  ;;  %p3565_p10 = scmp.lt.s32.totalorder %s375_s30, %s375_s30 }
   0xe   : > { %p3403_p4 = pneg %p3776_p3  ;;  %p3558_p7 = scmp.ne.s32.totalorder %s375_s30, %s3557_s14 }
   0xf   : > { %p3566_p11 = scmp.lt.s32.totalorder %s3557_s14, %s3557_s14 }
  0x10   : > { %p3784_p5 = pnand %p3772_p2, %p3403_p4 }
  0x11   : > { %p3567_p12 = por %p3566_p11, %p3565_p10 }
  0x12   : > { %p3548_p6 = pneg %p3784_p5 }
  0x14   : > { %p3560_p8 = pnand %p3558_p7, %p3548_p6 }
  0x16   : > { %p3561_p9 = pneg %p3560_p8 }
  0x18   : > { %p3568_p13 = pnand %p3567_p12, %p3561_p9 }
  0x1a   : > { %3571 = shalt.err (!%p3568_p13)
}
  0x1b   : > { %s3673_s15 = smov 64   ;;  %s3674_s16 = smov 4  }
  0x1c   : > { %s4466_s5 = sld [smem:[#allocation12_spill]]  ;;  %s33_s19 = sadd.s32 1, %s3662_s23 }
  0x1d   : > { %s36_s20 = sadd.s32 1, %s3666_s24  ;;  %p34_p0 = scmp.ge.s32.totalorder %s33_s19, 4 }
  0x1e   : > { %s3675_s26 = smov [#allocation3]   ;;  %s3676_s14 = smov [#allocation7]  }
  0x1f   : > { %s361_s29 = sshll.u32 %s3675_s26, 4  ;;  %s4476_s19 = smov (%p34_p0, %s33_s19), 0  ;;  %s362_s29 = int_to_ptr.vmem [resolvable:$true] %s361_s29 }
  0x20   : > { %s4478_s20 = smov (!%p34_p0, %s36_s20), %s3666_s24  ;;  %s387_s25 = sshll.u32 %s3676_s14, 4  ;;  %s388_s25 = int_to_ptr.vmem [resolvable:$true] %s387_s25 }
  0x21   : > { %p38_p1 = scmp.ge.s32.totalorder %s4478_s20, 2  ;;  %s3583_s11 = scalar_lea.vmem %s362_s29, 512 }
  0x22   : > { %3409 = dma.hbm_to_vmem [thread:$0]  (!%p3784_p5), %s4466_s5, 512, %s375_s30, [#allocation6], %s3673_s15, %s3673_s15, %s3674_s16  }
  0x23   : > { %p3584_p4 = scmp.ne.s32.totalorder %s362_s29, %s3583_s11  ;;  %p3591_p9 = scmp.lt.s32.totalorder %s362_s29, %s362_s29 }
  0x24   : > { %p3592_p10 = scmp.lt.s32.totalorder %s3583_s11, %s3583_s11 }
  0x25   : > { %p3586_p7 = pnand %p3584_p4, %p3548_p6 }
  0x26   : > { %p3593_p11 = por %p3592_p10, %p3591_p9 }
  0x27   : > { %p3587_p8 = pneg %p3586_p7 }
  0x29   : > { %p3594_p12 = pnand %p3593_p11, %p3587_p8 }
  0x2b   : > { %3597 = shalt.err (!%p3594_p12)
}
  0x2c   : > { %s4467_s4 = sld [smem:[#allocation11_spill]]  ;;  %s4480_s20 = smov (%p38_p1, %s4478_s20), 0 }
  0x2d   : > { %s3609_s18 = scalar_lea.vmem %s388_s25, 512  ;;  %p3617_p7 = scmp.lt.s32.totalorder %s388_s25, %s388_s25 }
  0x2e   : > { %p3610_p13 = scmp.ne.s32.totalorder %s388_s25, %s3609_s18  ;;  %p3618_p8 = scmp.lt.s32.totalorder %s3609_s18, %s3609_s18 }
  0x30   : > { %p3612_p0 = pnand %p3610_p13, %p3548_p6  ;;  %p3619_p9 = por %p3618_p8, %p3617_p7 }
  0x32   : > { %3406 = dma.hbm_to_vmem [thread:$0]  (!%p3784_p5), %s4467_s4, 512, %s362_s29, [#allocation4], %s3673_s15, %s3673_s15, %s3674_s16  }
  0x33   : > { %p3613_p4 = pneg %p3612_p0 }
  0x35   : > { %p3620_p10 = pnand %p3619_p9, %p3613_p4 }
  0x37   : > { %3623 = shalt.err (!%p3620_p10)
}
  0x38   : > { %s4468_s6 = sld [smem:[#allocation13_spill]] }
  0x3a   : > { %466 = sbr.rel (%p3776_p3) target bundleno = 1679 (0x68f), region = 68 }
  0x3e   : > { %3412 = dma.hbm_to_vmem [thread:$0]  (!%p3784_p5), %s4468_s6, 512, %s388_s25, [#allocation6], %s3673_s15, %s3673_s15, %s3674_s16  }
  0x3f   : > { %3645 = dma.done.wait (%p3772_p2), [#allocation4], 512  }
  0x40   : > { %3647 = vsyncadd (%p3772_p2), [#allocation4], 4294966784 }
  0x41   : > { %3649 = dma.done.wait (%p3772_p2), [#allocation6], 1024  }
  0x42   : > { %3651 = vsyncadd (%p3772_p2), [#allocation6], 4294966272  ;;  %p551_p5 = scmp.lt.s32.totalorder %s3654_s21, 3  ;;  %p553_p6 = scmp.lt.s32.totalorder %s3658_s22, 1 }
  0x43   : > { %p2816_p2 = scmp.ne.s32.totalorder %s3654_s21, 0 }
  0x44   : > { %s552_s25 = scalar_select %p551_p5, %s3654_s21, 3 }
  0x45   : > { %s4482_s22 = smov (!%p553_p6, %s3658_s22), 1 }
  0x46   : > { %s2802_s28 = sshll.u32 %s552_s25, 4  ;;  %s2801_s13 = sshll.u32 %s4482_s22, 3 }
  0x47   : > { %s557_s15 = sadd.s32 %s2802_s28, %s2801_s13  ;;  %600 = sbr.rel (%p2816_p2) target bundleno = 78 (0x4e), region = 84 }
  0x48   : > { %s2803_s16 = sshll.u32 %s557_s15, 2  ;;  %s2812_s29 = sshll.u32 %s557_s15, 3 }
  0x49   : > { %s3847_s17 = scalar_lea.vmem %s4443_s0, %s2803_s16  ;;  %s568_s11 = scalar_lea.vmem %s4444_s1, %s2803_s16 }
  0x4a   : > { %s3855_s5 = scalar_lea.vmem %s4445_s2, %s2803_s16  ;;  %s3860_s22 = scalar_lea.vmem %s4446_s3, %s2812_s29 }
  0x4b   : > { %s3865_s15 = scalar_lea.vmem %s4455_s12, %s2812_s29 }
  0x4c   : > { %v3677_v0 = vmov 0.0  }
  0x4d   : > { %601 = vst [vmem:[#allocation2] sm:$0x1] %v3677_v0 }
  0x4e PF: > { %v3868_v1 = vld [vmem:[%s568_s11 + $0x18] sm:$0xff]   ;;  %v3870_v2 = vld [vmem:[%s568_s11 + $0x10] sm:$0xff]   ;;  %v3872_v3 = vld [vmem:[%s568_s11 + $0x8] sm:$0xff]   ;;  %vm686_vm0 = vcmask 523264   ;;  %s4469_s6 = sld [smem:[#allocation14_spill]] }
  0x4f   : > { %v3874_v4 = vld [vmem:[#allocation3] sm:$0xff]   ;;  %3103 = vmatprep.subr.bf16.mxu0 %v3868_v1  ;;  %3119 = vmatprep.subr.bf16.mxu1 %v3868_v1  ;;  %v3898_v7 = vld [vmem:[#allocation3 + $0x8] sm:$0xff]   ;;  %v3902_v9 = vld [vmem:[#allocation3 + $0x10] sm:$0xff]   ;;  %v632_v23 = vunpack.c.l.bf16 %v3868_v1  ;;  %v630_v26 = vunpack.c.l.bf16 %v3870_v2  ;;  %v633_v27 = vunpack.c.h.bf16 %v3868_v1  ;;  %v629_v28 = vunpack.c.h.bf16 %v3872_v3 }
  0x50   : > { %v3878_v5 = vld [vmem:[#allocation5] sm:$0xff]   ;;  %3104 = vmatpush3.bf16.msra.mxu0 %v3868_v1  ;;  %3120 = vmatpush3.bf16.msra.mxu1 %v3868_v1  ;;  %v3900_v8 = vld [vmem:[#allocation5 + $0x8] sm:$0xff]   ;;  %v3904_v10 = vld [vmem:[#allocation5 + $0x10] sm:$0xff]   ;;  %v631_v33 = vunpack.c.h.bf16 %v3870_v2  ;;  %v628_v34 = vunpack.c.l.bf16 %v3872_v3 }
  0x51   : > { %3105 = vmatprep.subr.bf16.mxu0 %v3870_v2  ;;  %3121 = vmatprep.subr.bf16.mxu1 %v3870_v2  ;;  %v3884_v6 = vld [vmem:[%s568_s11] sm:$0xff]  }
  0x52   : > { %3111 = vmatprep.mubr.msk.bf16.mxu0 %vm686_vm0, %v3874_v4  ;;  %3127 = vmatprep.mubr.msk.bf16.mxu1 %vm686_vm0, %v3878_v5  ;;  %v3916_v11 = vld [vmem:[#allocation3 + $0x18] sm:$0xff]   ;;  %v3924_v13 = vld [vmem:[#allocation7] sm:$0xff]   ;;  %v627_v43 = vunpack.c.h.bf16 %v3884_v6  ;;  %v626_v51 = vunpack.c.l.bf16 %v3884_v6 }
  0x53   : > { %v3918_v12 = vld [vmem:[#allocation5 + $0x18] sm:$0xff]  }
  0x54   : > { %3106 = vmatpush3.bf16.msra.mxu0 %v3870_v2  ;;  %3122 = vmatpush3.bf16.msra.mxu1 %v3870_v2  ;;  %v3929_v14 = vld [vmem:[%s4450_s7] sm:$0xff]   ;;  %v3966_v2 = vld [vmem:[%s3855_s5 + $0x18] sm:$0xff]  }
  0x55   : > { %3107 = vmatprep.subr.bf16.mxu0 %v3872_v3  ;;  %3123 = vmatprep.subr.bf16.mxu1 %v3872_v3 }
  0x58   : > { %3108 = vmatpush3.bf16.msra.mxu0 %v3872_v3  ;;  %3124 = vmatpush3.bf16.msra.mxu1 %v3872_v3 }
  0x59   : > { %3109 = vmatprep.subr.bf16.mxu0 %v3884_v6  ;;  %3125 = vmatprep.subr.bf16.mxu1 %v3884_v6 }
  0x5c   : > { %3110 = vmatpush3.bf16.msra.mxu0 %v3884_v6  ;;  %3126 = vmatpush3.bf16.msra.mxu1 %v3884_v6  ;;  %v3971_v6 = vld [vmem:[%s3855_s5 + $0x10] sm:$0xff]  }
  0x5f   : > { %3112 = vmatmul.mubr.msk.bf16.vlgmr.msra.gmra.mxu0 %vm686_vm0, %v3898_v7  ;;  %3128 = vmatmul.mubr.msk.bf16.vlgmr.msra.gmra.mxu1 %vm686_vm0, %v3900_v8 }
  0x60   : > { %3115 = vmatprep.mubr.msk.bf16.mxu0 %vm686_vm0, %v3902_v9  ;;  %3131 = vmatprep.mubr.msk.bf16.mxu1 %vm686_vm0, %v3904_v10 }
  0x67   : > { %3116 = vmatmul.mubr.msk.bf16.gmra.mxu0 %vm686_vm0, %v3916_v11  ;;  %3132 = vmatmul.mubr.msk.bf16.gmra.mxu1 %vm686_vm0, %v3918_v12 }
  0x68   : > { %3143 = vmatprep.mubr.msk.bf16.mxu0 %vm686_vm0, %v3924_v13  ;;  %3159 = vmatprep.mubr.msk.bf16.mxu1 %vm686_vm0, %v3929_v14 }
 0x11f   : > { %v3113_v15 = vpop.f32.mrf.mxu0  ;;  %v3129_v16 = vpop.f32.mrf.mxu1 }
 0x120   : > { %v766_v50 = vmax.f32 %v628_v34, %v3113_v15  ;;  %v879_v52 = vmax.f32 %v628_v34, %v3129_v16  ;;  %v3973_v15 = vld [vmem:[#allocation7 + $0x8] sm:$0xff]  }
 0x121   : > { %v733_v17 = vpop.f32.mrf.mxu0  ;;  %v846_v18 = vpop.f32.mrf.mxu1  ;;  %v3978_v16 = vld [vmem:[%s4450_s7 + $0x8] sm:$0xff]  }
 0x122   : > { %v3957_v60 = vmax.f32 %v766_v50, %v879_v52  ;;  %v764_v61 = vmax.f32 %v626_v51, %v733_v17  ;;  %v877_v62 = vmax.f32 %v626_v51, %v846_v18  ;;  %v3982_v17 = vld [vmem:[#allocation7 + $0x10] sm:$0xff]  }
 0x123   : > { %v3114_v19 = vpop.f32.mrf.mxu0  ;;  %v3130_v20 = vpop.f32.mrf.mxu1  ;;  %v3987_v18 = vld [vmem:[%s4450_s7 + $0x10] sm:$0xff]  }
 0x124   : > { %v767_v41 = vmax.f32 %v629_v28, %v3114_v19  ;;  %v880_v42 = vmax.f32 %v629_v28, %v3130_v20  ;;  %v3963_v1 = vmax.f32 %v764_v61, %v877_v62  ;;  %v3990_v19 = vld [vmem:[%s3855_s5 + $0x8] sm:$0xff]   ;;  %v4005_v20 = vld [vmem:[%s3855_s5] sm:$0xff]  }
 0x125   : > { %v736_v21 = vpop.f32.mrf.mxu0  ;;  %v849_v22 = vpop.f32.mrf.mxu1 }
 0x126   : > { %v3953_v56 = vmax.f32 %v767_v41, %v880_v42  ;;  %v765_v57 = vmax.f32 %v627_v43, %v736_v21  ;;  %v878_v58 = vmax.f32 %v627_v43, %v849_v22  ;;  %v4007_v21 = vld [vmem:[#allocation7 + $0x18] sm:$0xff]  }
 0x127   : > { %v3117_v24 = vpop.f32.mrf.mxu0  ;;  %v3133_v25 = vpop.f32.mrf.mxu1  ;;  %v4012_v22 = vld [vmem:[%s4450_s7 + $0x18] sm:$0xff]  }
 0x128   : > { %v770_v31 = vmax.f32 %v632_v23, %v3117_v24  ;;  %v883_v32 = vmax.f32 %v632_v23, %v3133_v25  ;;  %v902_v63 = vpack.c.bf16 %v3953_v56, %v3957_v60  ;;  %v3961_v0 = vmax.f32 %v765_v57, %v878_v58 }
 0x129   : > { %v749_v29 = vpop.f32.mrf.mxu0  ;;  %v862_v30 = vpop.f32.mrf.mxu1 }
 0x12a   : > { %v768_v37 = vmax.f32 %v630_v26, %v749_v29  ;;  %v881_v38 = vmax.f32 %v630_v26, %v862_v30  ;;  %v3942_v46 = vmax.f32 %v770_v31, %v883_v32  ;;  %v901_v3 = vpack.c.bf16 %v3961_v0, %v3963_v1 }
 0x12b   : > { %v3118_v35 = vpop.f32.mrf.mxu0  ;;  %v3134_v36 = vpop.f32.mrf.mxu1 }
 0x12c   : > { %v771_v39 = vmax.f32 %v633_v27, %v3118_v35  ;;  %v884_v40 = vmax.f32 %v633_v27, %v3134_v36  ;;  %v3947_v53 = vmax.f32 %v768_v37, %v881_v38 }
 0x12d   : > { %v752_v44 = vpop.f32.mrf.mxu0  ;;  %v865_v45 = vpop.f32.mrf.mxu1 }
 0x12e   : > { %v3944_v47 = vmax.f32 %v771_v39, %v884_v40  ;;  %v769_v48 = vmax.f32 %v631_v33, %v752_v44  ;;  %v882_v49 = vmax.f32 %v631_v33, %v865_v45 }
 0x130   : > { %v904_v54 = vpack.c.bf16 %v3944_v47, %v3942_v46  ;;  %v3951_v55 = vmax.f32 %v769_v48, %v882_v49 }
 0x132   : > { %v903_v59 = vpack.c.bf16 %v3951_v55, %v3947_v53  ;;  %3135 = vmatprep.subr.bf16.mxu0 %v904_v54  ;;  %3151 = vmatprep.subr.bf16.mxu1 %v904_v54 }
 0x133   : > { %3136 = vmatpush3.bf16.msra.mxu0 %v904_v54  ;;  %3152 = vmatpush3.bf16.msra.mxu1 %v904_v54 }
 0x134   : > { %3137 = vmatprep.subr.bf16.mxu0 %v903_v59  ;;  %3153 = vmatprep.subr.bf16.mxu1 %v903_v59 }
 0x137   : > { %3138 = vmatpush3.bf16.msra.mxu0 %v903_v59  ;;  %3154 = vmatpush3.bf16.msra.mxu1 %v903_v59 }
 0x138   : > { %3139 = vmatprep.subr.bf16.mxu0 %v902_v63  ;;  %3155 = vmatprep.subr.bf16.mxu1 %v902_v63 }
 0x13b   : > { %3140 = vmatpush3.bf16.msra.mxu0 %v902_v63  ;;  %3156 = vmatpush3.bf16.msra.mxu1 %v902_v63 }
 0x13c   : > { %3141 = vmatprep.subr.bf16.mxu0 %v901_v3  ;;  %3157 = vmatprep.subr.bf16.mxu1 %v901_v3 }
 0x13f   : > { %3142 = vmatpush3.bf16.msra.mxu0 %v901_v3  ;;  %3158 = vmatpush3.bf16.msra.mxu1 %v901_v3  ;;  %v1146_v3 = vunpack.c.h.bf16 %v3966_v2 }
 0x140   : > { %3167 = vmatprep.subr.bf16.mxu0 %v3966_v2  ;;  %3183 = vmatprep.subr.bf16.mxu1 %v3966_v2 }
 0x142   : > { %3144 = vmatmul.mubr.msk.bf16.vlgmr.msra.gmra.mxu0 %vm686_vm0, %v3973_v15  ;;  %3160 = vmatmul.mubr.msk.bf16.vlgmr.msra.gmra.mxu1 %vm686_vm0, %v3978_v16 }
 0x143   : > { %3168 = vmatpush3.bf16.msra.mxu0 %v3966_v2  ;;  %3184 = vmatpush3.bf16.msra.mxu1 %v3966_v2 }
 0x144   : > { %3169 = vmatprep.subr.bf16.mxu0 %v3971_v6  ;;  %3185 = vmatprep.subr.bf16.mxu1 %v3971_v6 }
 0x145   : > { %3147 = vmatprep.mubr.msk.bf16.mxu0 %vm686_vm0, %v3982_v17  ;;  %3163 = vmatprep.mubr.msk.bf16.mxu1 %vm686_vm0, %v3987_v18 }
 0x147   : > { %3170 = vmatpush3.bf16.msra.mxu0 %v3971_v6  ;;  %3186 = vmatpush3.bf16.msra.mxu1 %v3971_v6 }
 0x148   : > { %3171 = vmatprep.subr.bf16.mxu0 %v3990_v19  ;;  %3187 = vmatprep.subr.bf16.mxu1 %v3990_v19 }
 0x14a   : > { %3148 = vmatmul.mubr.msk.bf16.gmra.mxu0 %vm686_vm0, %v4007_v21  ;;  %3164 = vmatmul.mubr.msk.bf16.gmra.mxu1 %vm686_vm0, %v4012_v22 }
 0x14b   : > { %3172 = vmatpush3.bf16.msra.mxu0 %v3990_v19  ;;  %3188 = vmatpush3.bf16.msra.mxu1 %v3990_v19 }
 0x14c   : > { %3173 = vmatprep.subr.bf16.mxu0 %v4005_v20  ;;  %3189 = vmatprep.subr.bf16.mxu1 %v4005_v20 }
 0x14d   : > { %3175 = vmatprep.mubr.msk.bf16.mxu0 %vm686_vm0, %v3874_v4  ;;  %3191 = vmatprep.mubr.msk.bf16.mxu1 %vm686_vm0, %v3878_v5 }
 0x14f   : > { %3174 = vmatpush3.bf16.msra.mxu0 %v4005_v20  ;;  %3190 = vmatpush3.bf16.msra.mxu1 %v4005_v20 }
 0x152   : > { %3176 = vmatmul.mubr.msk.bf16.vlgmr.msra.gmra.mxu0 %vm686_vm0, %v3898_v7  ;;  %3192 = vmatmul.mubr.msk.bf16.vlgmr.msra.gmra.mxu1 %vm686_vm0, %v3900_v8 }
 0x153   : > { %3179 = vmatprep.mubr.msk.bf16.mxu0 %vm686_vm0, %v3902_v9  ;;  %3195 = vmatprep.mubr.msk.bf16.mxu1 %vm686_vm0, %v3904_v10 }
 0x15a   : > { %3180 = vmatmul.mubr.msk.bf16.gmra.mxu0 %vm686_vm0, %v3916_v11  ;;  %3196 = vmatmul.mubr.msk.bf16.gmra.mxu1 %vm686_vm0, %v3918_v12 }
 0x15b   : > { %3207 = vmatprep.mubr.msk.bf16.mxu0 %vm686_vm0, %v3924_v13  ;;  %3223 = vmatprep.mubr.msk.bf16.mxu1 %vm686_vm0, %v3929_v14 }
 0x202   : > { %v3145_v4 = vpop.f32.mrf.mxu0  ;;  %v3161_v5 = vpop.f32.mrf.mxu1 }
 0x203   : > { %v1004_v7 = vmax.f32 %v3957_v60, %v3145_v4  ;;  %v1117_v8 = vmax.f32 %v3957_v60, %v3161_v5 }
 0x204   : > { %v971_v9 = vpop.f32.mrf.mxu0  ;;  %v1084_v10 = vpop.f32.mrf.mxu1 }
 0x205   : > { %v4050_v23 = vmax.f32 %v1004_v7, %v1117_v8  ;;  %v1002_v11 = vmax.f32 %v3963_v1, %v971_v9  ;;  %v1115_v12 = vmax.f32 %v3963_v1, %v1084_v10  ;;  %v1143_v1 = vunpack.c.l.bf16 %v3971_v6 }
 0x206   : > { %v3146_v24 = vpop.f32.mrf.mxu0  ;;  %v3162_v25 = vpop.f32.mrf.mxu1  ;;  %v1144_v9 = vunpack.c.h.bf16 %v3971_v6  ;;  %v1141_v10 = vunpack.c.l.bf16 %v3990_v19 }
 0x207   : > { %v4054_v13 = vmax.f32 %v1002_v11, %v1115_v12  ;;  %v1005_v14 = vmax.f32 %v3953_v56, %v3146_v24  ;;  %v1118_v26 = vmax.f32 %v3953_v56, %v3162_v25 }
 0x208   : > { %v974_v27 = vpop.f32.mrf.mxu0  ;;  %v1087_v28 = vpop.f32.mrf.mxu1 }
 0x209   : > { %v4058_v29 = vmax.f32 %v1005_v14, %v1118_v26  ;;  %v1003_v30 = vmax.f32 %v3961_v0, %v974_v27  ;;  %v1116_v31 = vmax.f32 %v3961_v0, %v1087_v28 }
 0x20a   : > { %v3149_v32 = vpop.f32.mrf.mxu0  ;;  %v3165_v33 = vpop.f32.mrf.mxu1 }
 0x20b   : > { %v4062_v34 = vmax.f32 %v1003_v30, %v1116_v31  ;;  %v1008_v35 = vmax.f32 %v3942_v46, %v3149_v32  ;;  %v1121_v36 = vmax.f32 %v3942_v46, %v3165_v33 }
 0x20c   : > { %v987_v37 = vpop.f32.mrf.mxu0  ;;  %v1100_v38 = vpop.f32.mrf.mxu1 }
 0x20d   : > { %v4066_v39 = vmax.f32 %v1008_v35, %v1121_v36  ;;  %v1006_v40 = vmax.f32 %v3947_v53, %v987_v37  ;;  %v1119_v41 = vmax.f32 %v3947_v53, %v1100_v38 }
 0x20e   : > { %v3150_v42 = vpop.f32.mrf.mxu0  ;;  %v3166_v43 = vpop.f32.mrf.mxu1 }
 0x20f   : > { %v4070_v44 = vmax.f32 %v1006_v40, %v1119_v41  ;;  %v1009_v45 = vmax.f32 %v3944_v47, %v3150_v42  ;;  %v1122_v48 = vmax.f32 %v3944_v47, %v3166_v43  ;;  %v1145_v47 = vunpack.c.l.bf16 %v3966_v2 }
 0x210   : > { %v990_v49 = vpop.f32.mrf.mxu0  ;;  %v1103_v50 = vpop.f32.mrf.mxu1  ;;  %v1140_v2 = vunpack.c.h.bf16 %v4005_v20 }
 0x211   : > { %v4074_v51 = vmax.f32 %v1009_v45, %v1122_v48  ;;  %v1007_v46 = vmax.f32 %v3951_v55, %v990_v49  ;;  %v1120_v52 = vmax.f32 %v3951_v55, %v1103_v50  ;;  %v1142_v55 = vunpack.c.h.bf16 %v3990_v19 }
 0x212   : > { %v3177_v54 = vpop.f32.mrf.mxu0  ;;  %v3193_v56 = vpop.f32.mrf.mxu1  ;;  %v1139_v19 = vunpack.c.l.bf16 %v4005_v20 }
 0x213   : > { %v4078_v57 = vmax.f32 %v1007_v46, %v1120_v52  ;;  %v1238_v36 = vmax.f32 %v1141_v10, %v3177_v54  ;;  %v1311_v37 = vmax.f32 %v1141_v10, %v3193_v56 }
 0x214   : > { %v1205_v53 = vpop.f32.mrf.mxu0  ;;  %v1278_v58 = vpop.f32.mrf.mxu1 }
 0x215   : > { %v4102_v20 = vmax.f32 %v1238_v36, %v1311_v37  ;;  %v1236_v49 = vmax.f32 %v1139_v19, %v1205_v53  ;;  %v1309_v50 = vmax.f32 %v1139_v19, %v1278_v58  ;;  %v3490_v53 = vld [vmem:[%s4451_s8] sm:$0xff]  }
 0x216   : > { %v3178_v59 = vpop.f32.mrf.mxu0  ;;  %v3194_v60 = vpop.f32.mrf.mxu1 }
 0x217   : > { %v1239_v27 = vmax.f32 %v1142_v55, %v3178_v59  ;;  %v1312_v28 = vmax.f32 %v1142_v55, %v3194_v60  ;;  %v4108_v54 = vmax.f32 %v1236_v49, %v1309_v50  ;;  %v3494_v49 = vld [vmem:[%s4451_s8 + $0x10] sm:$0xff]  }
 0x218   : > { %v1208_v61 = vpop.f32.mrf.mxu0  ;;  %v1281_v62 = vpop.f32.mrf.mxu1  ;;  %v3495_v50 = vld [vmem:[%s4452_s9 + $0x10] sm:$0xff]  }
 0x219   : > { %v4098_v42 = vmax.f32 %v1239_v27, %v1312_v28  ;;  %v1237_v43 = vmax.f32 %v1140_v2, %v1208_v61  ;;  %v1310_v45 = vmax.f32 %v1140_v2, %v1281_v62 }
 0x21a   : > { %v3181_v63 = vpop.f32.mrf.mxu0  ;;  %v3197_v0 = vpop.f32.mrf.mxu1 }
 0x21b   : > { %v1242_v7 = vmax.f32 %v1145_v47, %v3181_v63  ;;  %v1315_v8 = vmax.f32 %v1145_v47, %v3197_v0  ;;  %v1326_v46 = vpack.c.bf16 %v4098_v42, %v4102_v20  ;;  %v4106_v52 = vmax.f32 %v1237_v43, %v1310_v45 }
 0x21c   : > { %v1221_v4 = vpop.f32.mrf.mxu0  ;;  %v1294_v5 = vpop.f32.mrf.mxu1 }
 0x21d   : > { %v1240_v24 = vmax.f32 %v1143_v1, %v1221_v4  ;;  %v1313_v25 = vmax.f32 %v1143_v1, %v1294_v5  ;;  %v4087_v32 = vmax.f32 %v1242_v7, %v1315_v8  ;;  %v1325_v56 = vpack.c.bf16 %v4106_v52, %v4108_v54 }
 0x21e   : > { %v3182_v11 = vpop.f32.mrf.mxu0  ;;  %v3198_v12 = vpop.f32.mrf.mxu1 }
 0x21f   : > { %v1243_v14 = vmax.f32 %v1146_v3, %v3182_v11  ;;  %v1316_v26 = vmax.f32 %v1146_v3, %v3198_v12  ;;  %v4092_v38 = vmax.f32 %v1240_v24, %v1313_v25 }
 0x220   : > { %v1224_v30 = vpop.f32.mrf.mxu0  ;;  %v1297_v31 = vpop.f32.mrf.mxu1 }
 0x221   : > { %v4089_v33 = vmax.f32 %v1243_v14, %v1316_v26  ;;  %v1241_v35 = vmax.f32 %v1144_v9, %v1224_v30  ;;  %v1314_v6 = vmax.f32 %v1144_v9, %v1297_v31 }
 0x223   : > { %v1328_v40 = vpack.c.bf16 %v4089_v33, %v4087_v32  ;;  %v4096_v41 = vmax.f32 %v1241_v35, %v1314_v6 }
 0x225   : > { %v1327_v48 = vpack.c.bf16 %v4096_v41, %v4092_v38  ;;  %3199 = vmatprep.subr.bf16.mxu0 %v1328_v40  ;;  %3215 = vmatprep.subr.bf16.mxu1 %v1328_v40 }
 0x226   : > { %3200 = vmatpush3.bf16.msra.mxu0 %v1328_v40  ;;  %3216 = vmatpush3.bf16.msra.mxu1 %v1328_v40 }
 0x227   : > { %3201 = vmatprep.subr.bf16.mxu0 %v1327_v48  ;;  %3217 = vmatprep.subr.bf16.mxu1 %v1327_v48 }
 0x22a   : > { %3202 = vmatpush3.bf16.msra.mxu0 %v1327_v48  ;;  %3218 = vmatpush3.bf16.msra.mxu1 %v1327_v48  ;;  %v3499_v48 = vld [vmem:[%s4469_s6 + $0x38] sm:$0xff]  }
 0x22b   : > { %3203 = vmatprep.subr.bf16.mxu0 %v1326_v46  ;;  %3219 = vmatprep.subr.bf16.mxu1 %v1326_v46 }
 0x22e   : > { %3204 = vmatpush3.bf16.msra.mxu0 %v1326_v46  ;;  %3220 = vmatpush3.bf16.msra.mxu1 %v1326_v46  ;;  %v3500_v46 = vld [vmem:[%s4453_s10 + $0x30] sm:$0xff]  }
 0x22f   : > { %3205 = vmatprep.subr.bf16.mxu0 %v1325_v56  ;;  %3221 = vmatprep.subr.bf16.mxu1 %v1325_v56 }
 0x232   : > { %3206 = vmatpush3.bf16.msra.mxu0 %v1325_v56  ;;  %3222 = vmatpush3.bf16.msra.mxu1 %v1325_v56  ;;  %v3503_v56 = vld [vmem:[%s4469_s6 + $0x28] sm:$0xff]  }
 0x235   : > { %3208 = vmatmul.mubr.msk.bf16.vlgmr.msra.gmra.mxu0 %vm686_vm0, %v3973_v15  ;;  %3224 = vmatmul.mubr.msk.bf16.vlgmr.msra.gmra.mxu1 %vm686_vm0, %v3978_v16  ;;  %v3491_v15 = vld [vmem:[%s4452_s9] sm:$0xff]  }
 0x236   : > { %3211 = vmatprep.mubr.msk.bf16.mxu0 %vm686_vm0, %v3982_v17  ;;  %3227 = vmatprep.mubr.msk.bf16.mxu1 %vm686_vm0, %v3987_v18 }
 0x23d   : > { %3212 = vmatmul.mubr.msk.bf16.gmra.mxu0 %vm686_vm0, %v4007_v21  ;;  %3228 = vmatmul.mubr.msk.bf16.gmra.mxu1 %vm686_vm0, %v4012_v22 }
 0x23e   : > { %3239 = vmatprep.mubr.msk.bf16.mxu0 %vm686_vm0, %v3490_v53  ;;  %3255 = vmatprep.mubr.msk.bf16.mxu1 %vm686_vm0, %v3491_v15  ;;  %v3496_v53 = vld [vmem:[%s4451_s8 + $0x18] sm:$0xff]  }
 0x23f   : > { %v3497_v15 = vld [vmem:[%s4452_s9 + $0x18] sm:$0xff]  }
 0x2f5   : > { %v3209_v16 = vpop.f32.mrf.mxu0  ;;  %v3225_v17 = vpop.f32.mrf.mxu1 }
 0x2f6   : > { %v1396_v12 = vmax.f32 %v4102_v20, %v3209_v16  ;;  %v1469_v24 = vmax.f32 %v4102_v20, %v3225_v17  ;;  %v3493_v20 = vld [vmem:[%s4452_s9 + $0x8] sm:$0xff]   ;;  %v3504_v16 = vld [vmem:[%s4453_s10 + $0x20] sm:$0xff]  }
 0x2f7   : > { %v1363_v18 = vpop.f32.mrf.mxu0  ;;  %v1436_v58 = vpop.f32.mrf.mxu1  ;;  %v3505_v17 = vld [vmem:[%s4469_s6 + $0x20] sm:$0xff]  }
 0x2f8   : > { %v1477_v36 = vmax.f32 %v1396_v12, %v1469_v24  ;;  %v1394_v19 = vmax.f32 %v4108_v54, %v1363_v18  ;;  %v1467_v37 = vmax.f32 %v4108_v54, %v1436_v58  ;;  %v3502_v54 = vld [vmem:[%s4453_s10 + $0x28] sm:$0xff]   ;;  %v3506_v18 = vld [vmem:[%s4453_s10 + $0x18] sm:$0xff]  }
 0x2f9   : > { %v3210_v21 = vpop.f32.mrf.mxu0  ;;  %v3226_v59 = vpop.f32.mrf.mxu1  ;;  %v3507_v58 = vld [vmem:[%s4469_s6 + $0x18] sm:$0xff]  }
 0x2fa   : > { %v1397_v4 = vmax.f32 %v4098_v42, %v3210_v21  ;;  %v1470_v5 = vmax.f32 %v4098_v42, %v3226_v59  ;;  %v1475_v43 = vmax.f32 %v1394_v19, %v1467_v37  ;;  %v3508_v21 = vld [vmem:[%s4453_s10 + $0x10] sm:$0xff]  }
 0x2fb   : > { %v1366_v60 = vpop.f32.mrf.mxu0  ;;  %v1439_v22 = vpop.f32.mrf.mxu1  ;;  %v3509_v59 = vld [vmem:[%s4469_s6 + $0x10] sm:$0xff]  }
 0x2fc   : > { %v1478_v30 = vmax.f32 %v1397_v4, %v1470_v5  ;;  %v1395_v31 = vmax.f32 %v4106_v52, %v1366_v60  ;;  %v4176_v45 = vmul.f32 %v1475_v43, %v4054_v13  ;;  %v3492_v13 = vld [vmem:[%s4451_s8 + $0x8] sm:$0xff]  }
 0x2fd   : > { %v3213_v61 = vpop.f32.mrf.mxu0  ;;  %v3229_v62 = vpop.f32.mrf.mxu1  ;;  %v3510_v60 = vld [vmem:[%s4453_s10 + $0x8] sm:$0xff]  }
 0x2fe   : > { %v1400_v47 = vmax.f32 %v4087_v32, %v3213_v61  ;;  %v1473_v63 = vmax.f32 %v4087_v32, %v3229_v62  ;;  %v1468_v32 = vmax.f32 %v4106_v52, %v1439_v22  ;;  %v3501_v52 = vld [vmem:[%s4469_s6 + $0x30] sm:$0xff]   ;;  %v3511_v22 = vld [vmem:[%s4469_s6 + $0x8] sm:$0xff]   ;;  %v3512_v61 = vld [vmem:[%s4453_s10] sm:$0xff]  }
 0x2ff   : > { %v1379_v0 = vpop.f32.mrf.mxu0  ;;  %v1452_v1 = vpop.f32.mrf.mxu1  ;;  %v3513_v62 = vld [vmem:[%s4469_s6] sm:$0xff]  }
 0x300   : > { %v1398_v3 = vmax.f32 %v4092_v38, %v1379_v0  ;;  %v1471_v55 = vmax.f32 %v4092_v38, %v1452_v1  ;;  %v1481_v9 = vmax.f32 %v1400_v47, %v1473_v63 }
 0x301   : > { %v3214_v7 = vpop.f32.mrf.mxu0  ;;  %v3230_v8 = vpop.f32.mrf.mxu1 }
 0x302   : > { %v1401_v10 = vmax.f32 %v4089_v33, %v3214_v7  ;;  %v1474_v11 = vmax.f32 %v4089_v33, %v3230_v8  ;;  %v1479_v26 = vmax.f32 %v1398_v3, %v1471_v55  ;;  %v4147_v35 = vmul.f32 %v1481_v9, %v4066_v39 }
 0x303   : > { %v1382_v25 = vpop.f32.mrf.mxu0  ;;  %v1455_v14 = vpop.f32.mrf.mxu1  ;;  %v4163_v39 = vmul.f32 %v1478_v30, %v4058_v29 }
 0x304   : > { %v1482_v27 = vmax.f32 %v1401_v10, %v1474_v11  ;;  %v1399_v28 = vmax.f32 %v4096_v41, %v1382_v25  ;;  %v1472_v2 = vmax.f32 %v4096_v41, %v1455_v14  ;;  %v4155_v38 = vmul.f32 %v1479_v26, %v4070_v44 }
 0x305   : > { %v4168_v44 = vmul.f32 %v1477_v36, %v4050_v23 }
 0x306   : > { %v4150_v33 = vmul.f32 %v1482_v27, %v4074_v51  ;;  %v1480_v6 = vmax.f32 %v1399_v28, %v1472_v2  ;;  %v1476_v51 = vmax.f32 %v1395_v31, %v1468_v32 }
 0x307   : > { %v1500_v29 = vpack.c.bf16 %v4163_v39, %v4168_v44 }
 0x308   : > { %v4158_v40 = vmul.f32 %v1480_v6, %v4078_v57  ;;  %v1502_v41 = vpack.c.bf16 %v4150_v33, %v4147_v35  ;;  %v4171_v57 = vmul.f32 %v1476_v51, %v4062_v34  ;;  %v3498_v34 = vld [vmem:[%s4453_s10 + $0x38] sm:$0xff]  }
 0x30a   : > { %3231 = vmatprep.subr.bf16.mxu0 %v1502_v41  ;;  %3247 = vmatprep.subr.bf16.mxu1 %v1502_v41  ;;  %v1501_v42 = vpack.c.bf16 %v4158_v40, %v4155_v38  ;;  %v1499_v23 = vpack.c.bf16 %v4171_v57, %v4176_v45 }
 0x30b   : > { %3232 = vmatpush3.bf16.msra.mxu0 %v1502_v41  ;;  %3248 = vmatpush3.bf16.msra.mxu1 %v1502_v41 }
 0x30c   : > { %3233 = vmatprep.subr.bf16.mxu0 %v1501_v42  ;;  %3249 = vmatprep.subr.bf16.mxu1 %v1501_v42 }
 0x30f   : > { %3234 = vmatpush3.bf16.msra.mxu0 %v1501_v42  ;;  %3250 = vmatpush3.bf16.msra.mxu1 %v1501_v42 }
 0x310   : > { %3235 = vmatprep.subr.bf16.mxu0 %v1500_v29  ;;  %3251 = vmatprep.subr.bf16.mxu1 %v1500_v29 }
 0x313   : > { %3236 = vmatpush3.bf16.msra.mxu0 %v1500_v29  ;;  %3252 = vmatpush3.bf16.msra.mxu1 %v1500_v29 }
 0x314   : > { %3237 = vmatprep.subr.bf16.mxu0 %v1499_v23  ;;  %3253 = vmatprep.subr.bf16.mxu1 %v1499_v23 }
 0x317   : > { %3238 = vmatpush3.bf16.msra.mxu0 %v1499_v23  ;;  %3254 = vmatpush3.bf16.msra.mxu1 %v1499_v23 }
 0x318   : > { %3263 = vmatprep.subr.bf16.mxu0 %v3498_v34  ;;  %3287 = vmatprep.subr.bf16.mxu1 %v3499_v48 }
 0x31a   : > { %3240 = vmatmul.mubr.msk.bf16.vlgmr.msra.gmra.mxu0 %vm686_vm0, %v3492_v13  ;;  %3256 = vmatmul.mubr.msk.bf16.vlgmr.msra.gmra.mxu1 %vm686_vm0, %v3493_v20 }
 0x31b   : > { %3243 = vmatprep.mubr.msk.bf16.mxu0 %vm686_vm0, %v3494_v49  ;;  %3259 = vmatprep.mubr.msk.bf16.mxu1 %vm686_vm0, %v3495_v50  ;;  %v3515_v49 = vld [vmem:[%s4452_s9] sm:$0xff]  }
 0x31c   : > { %3264 = vmatpush3.bf16.msra.mxu0 %v3498_v34  ;;  %3288 = vmatpush3.bf16.msra.mxu1 %v3499_v48 }
 0x31d   : > { %3265 = vmatprep.subr.bf16.mxu0 %v3500_v46  ;;  %3289 = vmatprep.subr.bf16.mxu1 %v3501_v52 }
 0x320   : > { %3266 = vmatpush3.bf16.msra.mxu0 %v3500_v46  ;;  %3290 = vmatpush3.bf16.msra.mxu1 %v3501_v52 }
 0x321   : > { %3267 = vmatprep.subr.bf16.mxu0 %v3502_v54  ;;  %3291 = vmatprep.subr.bf16.mxu1 %v3503_v56 }
 0x322   : > { %3244 = vmatmul.mubr.msk.bf16.gmra.mxu0 %vm686_vm0, %v3496_v53  ;;  %3260 = vmatmul.mubr.msk.bf16.gmra.mxu1 %vm686_vm0, %v3497_v15 }
 0x324   : > { %3268 = vmatpush3.bf16.msra.mxu0 %v3502_v54  ;;  %3292 = vmatpush3.bf16.msra.mxu1 %v3503_v56 }
 0x325   : > { %3269 = vmatprep.subr.bf16.mxu0 %v3504_v16  ;;  %3293 = vmatprep.subr.bf16.mxu1 %v3505_v17 }
 0x328   : > { %3270 = vmatpush3.bf16.msra.mxu0 %v3504_v16  ;;  %3294 = vmatpush3.bf16.msra.mxu1 %v3505_v17 }
 0x329   : > { %3271 = vmatprep.subr.bf16.mxu0 %v3506_v18  ;;  %3295 = vmatprep.subr.bf16.mxu1 %v3507_v58 }
 0x32c   : > { %3272 = vmatpush3.bf16.msra.mxu0 %v3506_v18  ;;  %3296 = vmatpush3.bf16.msra.mxu1 %v3507_v58 }
 0x32d   : > { %3273 = vmatprep.subr.bf16.mxu0 %v3508_v21  ;;  %3297 = vmatprep.subr.bf16.mxu1 %v3509_v59 }
 0x330   : > { %3274 = vmatpush3.bf16.msra.mxu0 %v3508_v21  ;;  %3298 = vmatpush3.bf16.msra.mxu1 %v3509_v59 }
 0x331   : > { %3275 = vmatprep.subr.bf16.mxu0 %v3510_v60  ;;  %3299 = vmatprep.subr.bf16.mxu1 %v3511_v22 }
 0x334   : > { %3276 = vmatpush3.bf16.msra.mxu0 %v3510_v60  ;;  %3300 = vmatpush3.bf16.msra.mxu1 %v3511_v22 }
 0x335   : > { %3277 = vmatprep.subr.bf16.mxu0 %v3512_v61  ;;  %3301 = vmatprep.subr.bf16.mxu1 %v3513_v62 }
 0x338   : > { %3278 = vmatpush3.bf16.msra.mxu0 %v3512_v61  ;;  %3302 = vmatpush3.bf16.msra.mxu1 %v3513_v62 }
 0x3da   : > { %v3241_v47 = vpop.f32.mrf.mxu0  ;;  %v3257_v63 = vpop.f32.mrf.mxu1 }
 0x3db   : > { %v1602_v9 = vmax.f32 %v4168_v44, %v3241_v47  ;;  %v1715_v10 = vmax.f32 %v4168_v44, %v3257_v63 }
 0x3dc   : > { %v1569_v0 = vpop.f32.mrf.mxu0  ;;  %v1682_v1 = vpop.f32.mrf.mxu1 }
 0x3dd   : > { %v1600_v4 = vmax.f32 %v4176_v45, %v1569_v0  ;;  %v1713_v5 = vmax.f32 %v4176_v45, %v1682_v1  ;;  %v1723_v30 = vmax.f32 %v1602_v9, %v1715_v10 }
 0x3de   : > { %v3242_v3 = vpop.f32.mrf.mxu0  ;;  %v3258_v55 = vpop.f32.mrf.mxu1 }
 0x3df   : > { %v1603_v7 = vmax.f32 %v4163_v39, %v3242_v3  ;;  %v1716_v8 = vmax.f32 %v4163_v39, %v3258_v55  ;;  %v1721_v28 = vmax.f32 %v1600_v4, %v1713_v5 }
 0x3e0   : > { %v1572_v11 = vpop.f32.mrf.mxu0  ;;  %v1685_v12 = vpop.f32.mrf.mxu1 }
 0x3e1   : > { %v1601_v24 = vmax.f32 %v4171_v57, %v1572_v11  ;;  %v1714_v25 = vmax.f32 %v4171_v57, %v1685_v12  ;;  %v4260_v14 = vmax.f32 %v1603_v7, %v1716_v8 }
 0x3e2   : > { %v3245_v26 = vpop.f32.mrf.mxu0  ;;  %v3261_v27 = vpop.f32.mrf.mxu1 }
 0x3e3   : > { %v1722_v2 = vmax.f32 %v1601_v24, %v1714_v25  ;;  %v1730_v36 = vpack.c.bf16 %v4260_v14, %v1723_v30  ;;  %v1606_v44 = vmax.f32 %v4147_v35, %v3245_v26  ;;  %v1719_v43 = vmax.f32 %v4147_v35, %v3261_v27  ;;  %v3514_v35 = vld [vmem:[%s4451_s8] sm:$0xff]  }
 0x3e4   : > { %v1585_v31 = vpop.f32.mrf.mxu0  ;;  %v1698_v32 = vpop.f32.mrf.mxu1 }
 0x3e5   : > { %v1729_v6 = vpack.c.bf16 %v1722_v2, %v1721_v28  ;;  %v1604_v19 = vmax.f32 %v4155_v38, %v1585_v31  ;;  %v1717_v39 = vmax.f32 %v4155_v38, %v1698_v32  ;;  %v1727_v13 = vmax.f32 %v1606_v44, %v1719_v43 }
 0x3e6   : > { %v3246_v37 = vpop.f32.mrf.mxu0  ;;  %v3262_v41 = vpop.f32.mrf.mxu1 }
 0x3e7   : > { %v1607_v51 = vmax.f32 %v4150_v33, %v3246_v37  ;;  %v1720_v42 = vmax.f32 %v4150_v33, %v3262_v41  ;;  %3279 = vmatprep.mubr.bf16.mxu0 %v1729_v6  ;;  %3303 = vmatprep.mubr.bf16.mxu1 %v1729_v6  ;;  %v1725_v38 = vmax.f32 %v1604_v19, %v1717_v39 }
 0x3e8   : > { %v1588_v57 = vpop.f32.mrf.mxu0  ;;  %v1701_v29 = vpop.f32.mrf.mxu1  ;;  %3280 = vmatmul.mubr.bf16.vlgmr.msra.gmra.mxu0 %v1730_v36  ;;  %3304 = vmatmul.mubr.bf16.vlgmr.msra.gmra.mxu1 %v1730_v36 }
 0x3e9   : > { %v1605_v45 = vmax.f32 %v4158_v40, %v1588_v57  ;;  %v1718_v23 = vmax.f32 %v4158_v40, %v1701_v29  ;;  %v1728_v34 = vmax.f32 %v1607_v51, %v1720_v42  ;;  %v2039_v57 = vlaneseq  ;;  %v2028_v29 = vld [vmem:[#allocation2] sm:$0x1] }
 0x3eb   : > { %v1726_v48 = vmax.f32 %v1605_v45, %v1718_v23  ;;  %v1732_v33 = vpack.c.bf16 %v1728_v34, %v1727_v13 }
 0x3ed   : > { %v1731_v20 = vpack.c.bf16 %v1726_v48, %v1725_v38 }
 0x3ef   : > { %3283 = vmatprep.mubr.bf16.mxu0 %v1731_v20  ;;  %3307 = vmatprep.mubr.bf16.mxu1 %v1731_v20 }
 0x3f0   : > { %3284 = vmatmul.mubr.bf16.gmra.mxu0 %v1732_v33  ;;  %3308 = vmatmul.mubr.bf16.gmra.mxu1 %v1732_v33 }
 0x3f1   : > { %3319 = vmatprep.mubr.msk.bf16.mxu0 %vm686_vm0, %v3514_v35  ;;  %3335 = vmatprep.mubr.msk.bf16.mxu1 %vm686_vm0, %v3515_v49 }
 0x4a8   : > { %v3281_v40 = vpop.f32.mrf.mxu0  ;;  %v3305_v50 = vpop.f32.mrf.mxu1 }
 0x4a9   : > { %v1864_v18 = vmax.f32 %v1723_v30, %v3281_v40  ;;  %v2001_v58 = vmax.f32 %v1723_v30, %v3305_v50  ;;  %v2956_v50 = vld [vmem:[%s3847_s17 + $0x8] sm:$0xff]  }
 0x4aa   : > { %v1831_v46 = vpop.f32.mrf.mxu0  ;;  %v1968_v52 = vpop.f32.mrf.mxu1 }
 0x4ab   : > { %v1862_v53 = vmax.f32 %v1721_v28, %v1831_v46  ;;  %v1999_v15 = vmax.f32 %v1721_v28, %v1968_v52  ;;  %v2009_v3 = vmax.f32 %v1864_v18, %v2001_v58  ;;  %v3678_v46 = vmov 0.0  }
 0x4ac   : > { %v3282_v54 = vpop.f32.mrf.mxu0  ;;  %v3306_v56 = vpop.f32.mrf.mxu1 }
 0x4ad   : > { %v2007_v61 = vmax.f32 %v1862_v53, %v1999_v15  ;;  %v1865_v62 = vmax.f32 %v4260_v14, %v3282_v54  ;;  %v2002_v47 = vmax.f32 %v4260_v14, %v3306_v56  ;;  %v2946_v15 = vunpack.c.l.bf16 %v2956_v50 }
 0x4ae   : > { %v1834_v16 = vpop.f32.mrf.mxu0  ;;  %v1971_v17 = vpop.f32.mrf.mxu1 }
 0x4af   : > { %v1863_v21 = vmax.f32 %v1722_v2, %v1834_v16  ;;  %v2000_v59 = vmax.f32 %v1722_v2, %v1971_v17  ;;  %v2010_v9 = vmax.f32 %v1865_v62, %v2002_v47  ;;  %v2947_v16 = vunpack.c.h.bf16 %v2956_v50 }
 0x4b0   : > { %v3285_v60 = vpop.f32.mrf.mxu0  ;;  %v3309_v22 = vpop.f32.mrf.mxu1 }
 0x4b1   : > { %v2008_v63 = vmax.f32 %v1863_v21, %v2000_v59  ;;  %v1868_v11 = vmax.f32 %v1727_v13, %v3285_v60  ;;  %v2005_v12 = vmax.f32 %v1727_v13, %v3309_v22  ;;  %v2957_v13 = vld [vmem:[%s3847_s17 + $0x10] sm:$0xff]   ;;  %v2941_v59 = vld [vmem:[%s3847_s17] sm:$0xff]  }
 0x4b2   : > { %v1847_v0 = vpop.f32.mrf.mxu0  ;;  %v1984_v1 = vpop.f32.mrf.mxu1  ;;  %v2950_v40 = vunpack.c.l.bf16 %v2957_v13  ;;  %v2951_v54 = vunpack.c.h.bf16 %v2957_v13 }
 0x4b3   : > { %v2015_v55 = vadd.f32 %v2008_v63, %v2007_v61  ;;  %v1866_v4 = vmax.f32 %v1725_v38, %v1847_v0  ;;  %v2003_v5 = vmax.f32 %v1725_v38, %v1984_v1  ;;  %v2013_v6 = vmax.f32 %v1868_v11, %v2005_v12  ;;  %v3519_v11 = vld [vmem:[%s4452_s9 + $0x10] sm:$0xff]  }
 0x4b4   : > { %v3286_v7 = vpop.f32.mrf.mxu0  ;;  %v3310_v8 = vpop.f32.mrf.mxu1  ;;  %v2040_v38 = vshrl.u32 %v2039_v57, 7  ;;  %v2942_v61 = vunpack.c.l.bf16 %v2941_v59  ;;  %v2943_v0 = vunpack.c.h.bf16 %v2941_v59  ;;  %v3524_v12 = vld [vmem:[%s4453_s10 + $0x30] sm:$0xff]  }
 0x4b5   : > { %v2016_v10 = vadd.f32 %v2015_v55, %v2009_v3  ;;  %v2011_v26 = vmax.f32 %v1866_v4, %v2003_v5  ;;  %v1869_v30 = vmax.f32 %v1728_v34, %v3286_v7  ;;  %v2006_v31 = vmax.f32 %v1728_v34, %v3310_v8  ;;  %v3522_v5 = vld [vmem:[%s4453_s10 + $0x38] sm:$0xff]   ;;  %v3516_v8 = vld [vmem:[%s4451_s8 + $0x8] sm:$0xff]  }
 0x4b6   : > { %v1850_v24 = vpop.f32.mrf.mxu0  ;;  %v1987_v25 = vpop.f32.mrf.mxu1  ;;  %v2041_v33 = vsub.s32 0, %v2040_v38  ;;  %v3523_v7 = vld [vmem:[%s4469_s6 + $0x38] sm:$0xff]  }
 0x4b7   : > { %v2017_v27 = vadd.f32 %v2016_v10, %v2010_v9  ;;  %v1867_v28 = vmax.f32 %v1726_v48, %v1850_v24  ;;  %v2004_v2 = vmax.f32 %v1726_v48, %v1987_v25  ;;  %v2014_v19 = vmax.f32 %v1869_v30, %v2006_v31  ;;  %v2958_v48 = vld [vmem:[%s3847_s17 + $0x18] sm:$0xff]   ;;  %v3517_v9 = vld [vmem:[%s4452_s9 + $0x8] sm:$0xff]   ;;  %v3518_v10 = vld [vmem:[%s4451_s8 + $0x10] sm:$0xff]  }
 0x4b8   : > { %v2954_v35 = vunpack.c.l.bf16 %v2958_v48  ;;  %v2955_v49 = vunpack.c.h.bf16 %v2958_v48  ;;  %v3525_v24 = vld [vmem:[%s4469_s6 + $0x30] sm:$0xff]   ;;  %v3526_v25 = vld [vmem:[%s4453_s10 + $0x28] sm:$0xff]   ;;  %v3530_v30 = vld [vmem:[%s4453_s10 + $0x18] sm:$0xff]  }
 0x4b9   : > { %v2018_v14 = vadd.f32 %v2017_v27, %v2011_v26  ;;  %v2012_v32 = vmax.f32 %v1867_v28, %v2004_v2  ;;  %v3527_v26 = vld [vmem:[%s4469_s6 + $0x28] sm:$0xff]   ;;  %v3520_v27 = vld [vmem:[%s4451_s8 + $0x18] sm:$0xff]   ;;  %v3528_v2 = vld [vmem:[%s4453_s10 + $0x20] sm:$0xff]  }
 0x4ba   : > { %v3521_v28 = vld [vmem:[%s4452_s9 + $0x18] sm:$0xff]  }
 0x4bb   : > { %v2019_v36 = vadd.f32 %v2018_v14, %v2012_v32  ;;  %v3529_v14 = vld [vmem:[%s4469_s6 + $0x20] sm:$0xff]   ;;  %v3531_v31 = vld [vmem:[%s4469_s6 + $0x18] sm:$0xff]   ;;  %v3532_v32 = vld [vmem:[%s4453_s10 + $0x10] sm:$0xff]  }
 0x4bd   : > { %v2020_v37 = vadd.f32 %v2019_v36, %v2013_v6  ;;  %v3533_v6 = vld [vmem:[%s4469_s6 + $0x10] sm:$0xff]   ;;  %v3534_v36 = vld [vmem:[%s4453_s10 + $0x8] sm:$0xff]  }
 0x4bf   : > { %v2021_v41 = vadd.f32 %v2020_v37, %v2014_v19  ;;  %v3535_v19 = vld [vmem:[%s4469_s6 + $0x8] sm:$0xff]   ;;  %v3536_v37 = vld [vmem:[%s4453_s10] sm:$0xff]  }
 0x4c1   : > { %v2022_v39 = vrot.slane %v2021_v41, 4 }
 0x4c3   : > { %v2023_v51 = vadd.f32 %v2022_v39, %v2021_v41  ;;  %v3537_v41 = vld [vmem:[%s4469_s6] sm:$0xff]  }
 0x4c5   : > { %v2024_v42 = vrot.slane %v2023_v51, 2 }
 0x4c7   : > { %v2025_v44 = vadd.f32 %v2024_v42, %v2023_v51 }
 0x4c9   : > { %v2026_v43 = vrot.slane %v2025_v44, 1 }
 0x4cb   : > { %v2027_v45 = vadd.f32 %v2026_v43, %v2025_v44 }
 0x4cd   : > { %v2029_v23 = vsub.f32 %v2027_v45, %v2028_v29 }
 0x4cf   : > { %v2030_v34 = vmul.f32 0.5, %v2029_v23 }
 0x4d1   : > { %v2031_v20 = vadd.f32 %v2030_v34, %v2028_v29 }
 0x4d3   : > { %vm2032_vm1 = vcmp.gt.f32.partialorder %v2031_v20, 0.5 }
 0x4d4   : > { %v2905_v52 = vsel %vm2032_vm1, 1.0, %v3678_v46 }
 0x4d5   : > { %v2035_v56 = vsub.f32 1.0, %v2905_v52  ;;  %v2042_v53 = vrot.slane %v2905_v52, %v2041_v33 }
 0x4d7   : > { %v2036_v17 = vmul.f32 %v2035_v56, %v2031_v20  ;;  %v4284_v18 = vmul.f32 %v2954_v35, %v2042_v53  ;;  %v4286_v58 = vmul.f32 %v2955_v49, %v2042_v53  ;;  %v4288_v21 = vmul.f32 %v2950_v40, %v2042_v53 }
 0x4d8   : > { %v4291_v60 = vmul.f32 %v2951_v54, %v2042_v53  ;;  %v4297_v47 = vmul.f32 %v2946_v15, %v2042_v53  ;;  %v4299_v63 = vmul.f32 %v2947_v16, %v2042_v53  ;;  %v4303_v3 = vmul.f32 %v2942_v61, %v2042_v53 }
 0x4d9   : > { %2037 = vst [vmem:[#allocation2] sm:$0x1] %v2036_v17  ;;  %v2063_v22 = vpack.c.bf16 %v4286_v58, %v4284_v18  ;;  %v4305_v55 = vmul.f32 %v2943_v0, %v2042_v53 }
 0x4da   : > { %v2062_v62 = vpack.c.bf16 %v4291_v60, %v4288_v21  ;;  %v2061_v1 = vpack.c.bf16 %v4299_v63, %v4297_v47 }
 0x4db   : > { %3311 = vmatprep.subr.bf16.mxu0 %v2063_v22  ;;  %3327 = vmatprep.subr.bf16.mxu1 %v2063_v22  ;;  %v2060_v4 = vpack.c.bf16 %v4305_v55, %v4303_v3 }
 0x4dc   : > { %3312 = vmatpush3.bf16.msra.mxu0 %v2063_v22  ;;  %3328 = vmatpush3.bf16.msra.mxu1 %v2063_v22 }
 0x4dd   : > { %3313 = vmatprep.subr.bf16.mxu0 %v2062_v62  ;;  %3329 = vmatprep.subr.bf16.mxu1 %v2062_v62 }
 0x4e0   : > { %3314 = vmatpush3.bf16.msra.mxu0 %v2062_v62  ;;  %3330 = vmatpush3.bf16.msra.mxu1 %v2062_v62 }
 0x4e1   : > { %3315 = vmatprep.subr.bf16.mxu0 %v2061_v1  ;;  %3331 = vmatprep.subr.bf16.mxu1 %v2061_v1 }
 0x4e4   : > { %3316 = vmatpush3.bf16.msra.mxu0 %v2061_v1  ;;  %3332 = vmatpush3.bf16.msra.mxu1 %v2061_v1 }
 0x4e5   : > { %3317 = vmatprep.subr.bf16.mxu0 %v2060_v4  ;;  %3333 = vmatprep.subr.bf16.mxu1 %v2060_v4 }
 0x4e8   : > { %3318 = vmatpush3.bf16.msra.mxu0 %v2060_v4  ;;  %3334 = vmatpush3.bf16.msra.mxu1 %v2060_v4 }
 0x4e9   : > { %3343 = vmatprep.subr.bf16.mxu0 %v3522_v5  ;;  %3367 = vmatprep.subr.bf16.mxu1 %v3523_v7 }
 0x4eb   : > { %3320 = vmatmul.mubr.msk.bf16.vlgmr.msra.gmra.mxu0 %vm686_vm0, %v3516_v8  ;;  %3336 = vmatmul.mubr.msk.bf16.vlgmr.msra.gmra.mxu1 %vm686_vm0, %v3517_v9 }
 0x4ec   : > { %3323 = vmatprep.mubr.msk.bf16.mxu0 %vm686_vm0, %v3518_v10  ;;  %3339 = vmatprep.mubr.msk.bf16.mxu1 %vm686_vm0, %v3519_v11 }
 0x4ed   : > { %3344 = vmatpush3.bf16.msra.mxu0 %v3522_v5  ;;  %3368 = vmatpush3.bf16.msra.mxu1 %v3523_v7 }
 0x4ee   : > { %3345 = vmatprep.subr.bf16.mxu0 %v3524_v12  ;;  %3369 = vmatprep.subr.bf16.mxu1 %v3525_v24 }
 0x4f1   : > { %3346 = vmatpush3.bf16.msra.mxu0 %v3524_v12  ;;  %3370 = vmatpush3.bf16.msra.mxu1 %v3525_v24  ;;  %v2578_v12 = vld [vmem:[%s3860_s22 + $0x10] sm:$0xff] }
 0x4f2   : > { %3347 = vmatprep.subr.bf16.mxu0 %v3526_v25  ;;  %3371 = vmatprep.subr.bf16.mxu1 %v3527_v26 }
 0x4f3   : > { %3324 = vmatmul.mubr.msk.bf16.gmra.mxu0 %vm686_vm0, %v3520_v27  ;;  %3340 = vmatmul.mubr.msk.bf16.gmra.mxu1 %vm686_vm0, %v3521_v28 }
 0x4f5   : > { %3348 = vmatpush3.bf16.msra.mxu0 %v3526_v25  ;;  %3372 = vmatpush3.bf16.msra.mxu1 %v3527_v26 }
 0x4f6   : > { %3349 = vmatprep.subr.bf16.mxu0 %v3528_v2  ;;  %3373 = vmatprep.subr.bf16.mxu1 %v3529_v14 }
 0x4f9   : > { %3350 = vmatpush3.bf16.msra.mxu0 %v3528_v2  ;;  %3374 = vmatpush3.bf16.msra.mxu1 %v3529_v14  ;;  %v2576_v2 = vld [vmem:[%s3860_s22] sm:$0xff] }
 0x4fa   : > { %3351 = vmatprep.subr.bf16.mxu0 %v3530_v30  ;;  %3375 = vmatprep.subr.bf16.mxu1 %v3531_v31 }
 0x4fd   : > { %3352 = vmatpush3.bf16.msra.mxu0 %v3530_v30  ;;  %3376 = vmatpush3.bf16.msra.mxu1 %v3531_v31 }
 0x4fe   : > { %3353 = vmatprep.subr.bf16.mxu0 %v3532_v32  ;;  %3377 = vmatprep.subr.bf16.mxu1 %v3533_v6 }
 0x501   : > { %3354 = vmatpush3.bf16.msra.mxu0 %v3532_v32  ;;  %3378 = vmatpush3.bf16.msra.mxu1 %v3533_v6 }
 0x502   : > { %3355 = vmatprep.subr.bf16.mxu0 %v3534_v36  ;;  %3379 = vmatprep.subr.bf16.mxu1 %v3535_v19 }
 0x505   : > { %3356 = vmatpush3.bf16.msra.mxu0 %v3534_v36  ;;  %3380 = vmatpush3.bf16.msra.mxu1 %v3535_v19  ;;  %v2579_v19 = vld [vmem:[%s3860_s22 + $0x18] sm:$0xff] }
 0x506   : > { %3357 = vmatprep.subr.bf16.mxu0 %v3536_v37  ;;  %3381 = vmatprep.subr.bf16.mxu1 %v3537_v41 }
 0x509   : > { %3358 = vmatpush3.bf16.msra.mxu0 %v3536_v37  ;;  %3382 = vmatpush3.bf16.msra.mxu1 %v3537_v41 }
 0x5ab   : > { %v3321_v39 = vpop.f32.mrf.mxu0  ;;  %v3337_v51 = vpop.f32.mrf.mxu1 }
 0x5ac   : > { %v2163_v34 = vmax.f32 %v4297_v47, %v3321_v39  ;;  %v2276_v48 = vmax.f32 %v4297_v47, %v3337_v51 }
 0x5ad   : > { %v2130_v42 = vpop.f32.mrf.mxu0  ;;  %v2243_v44 = vpop.f32.mrf.mxu1 }
 0x5ae   : > { %v2161_v29 = vmax.f32 %v4303_v3, %v2130_v42  ;;  %v2274_v45 = vmax.f32 %v4303_v3, %v2243_v44  ;;  %v2284_v54 = vmax.f32 %v2163_v34, %v2276_v48  ;;  %v2582_v48 = vld [vmem:[%s3860_s22 + $0x30] sm:$0xff] }
 0x5af   : > { %v3322_v43 = vpop.f32.mrf.mxu0  ;;  %v3338_v57 = vpop.f32.mrf.mxu1 }
 0x5b0   : > { %v2164_v23 = vmax.f32 %v4299_v63, %v3322_v43  ;;  %v2277_v38 = vmax.f32 %v4299_v63, %v3338_v57  ;;  %v2282_v46 = vmax.f32 %v2161_v29, %v2274_v45  ;;  %v2577_v43 = vld [vmem:[%s3860_s22 + $0x8] sm:$0xff] }
 0x5b1   : > { %v2133_v13 = vpop.f32.mrf.mxu0  ;;  %v2246_v20 = vpop.f32.mrf.mxu1 }
 0x5b2   : > { %v2162_v33 = vmax.f32 %v4305_v55, %v2133_v13  ;;  %v2275_v35 = vmax.f32 %v4305_v55, %v2246_v20  ;;  %v2285_v49 = vmax.f32 %v2164_v23, %v2277_v38 }
 0x5b3   : > { %v3325_v40 = vpop.f32.mrf.mxu0  ;;  %v3341_v50 = vpop.f32.mrf.mxu1 }
 0x5b4   : > { %v4389_v52 = vmax.f32 %v2162_v33, %v2275_v35  ;;  %v2291_v16 = vpack.c.bf16 %v2285_v49, %v2284_v54  ;;  %v2167_v63 = vmax.f32 %v4284_v18, %v3325_v40  ;;  %v2280_v0 = vmax.f32 %v4284_v18, %v3341_v50  ;;  %v2580_v50 = vld [vmem:[%s3860_s22 + $0x20] sm:$0xff] }
 0x5b5   : > { %v2146_v56 = vpop.f32.mrf.mxu0  ;;  %v2259_v53 = vpop.f32.mrf.mxu1 }
 0x5b6   : > { %v2290_v15 = vpack.c.bf16 %v4389_v52, %v2282_v46  ;;  %v2165_v17 = vmax.f32 %v4288_v21, %v2146_v56  ;;  %v2278_v61 = vmax.f32 %v4288_v21, %v2259_v53 }
 0x5b7   : > { %v3326_v59 = vpop.f32.mrf.mxu0  ;;  %v3342_v22 = vpop.f32.mrf.mxu1 }
 0x5b8   : > { %v2168_v62 = vmax.f32 %v4286_v58, %v3326_v59  ;;  %v2281_v47 = vmax.f32 %v4286_v58, %v3342_v22  ;;  %3359 = vmatprep.mubr.bf16.mxu0 %v2290_v15  ;;  %3383 = vmatprep.mubr.bf16.mxu1 %v2290_v15  ;;  %v2286_v5 = vmax.f32 %v2165_v17, %v2278_v61 }
 0x5b9   : > { %v2149_v1 = vpop.f32.mrf.mxu0  ;;  %v2262_v3 = vpop.f32.mrf.mxu1  ;;  %3360 = vmatmul.mubr.bf16.vlgmr.msra.gmra.mxu0 %v2291_v16  ;;  %3384 = vmatmul.mubr.bf16.vlgmr.msra.gmra.mxu1 %v2291_v16  ;;  %v2288_v58 = vmax.f32 %v2167_v63, %v2280_v0  ;;  %v2583_v16 = vld [vmem:[%s3860_s22 + $0x38] sm:$0xff]  ;;  %v2581_v63 = vld [vmem:[%s3860_s22 + $0x28] sm:$0xff] }
 0x5ba   : > { %v2166_v55 = vmax.f32 %v4291_v60, %v2149_v1  ;;  %v2279_v4 = vmax.f32 %v4291_v60, %v2262_v3  ;;  %v4400_v21 = vmax.f32 %v2168_v62, %v2281_v47 }
 0x5bc   : > { %v4402_v7 = vmax.f32 %v2166_v55, %v2279_v4  ;;  %v2293_v18 = vpack.c.bf16 %v4400_v21, %v2288_v58 }
 0x5be   : > { %v2292_v8 = vpack.c.bf16 %v4402_v7, %v2286_v5 }
 0x5c0   : > { %3363 = vmatprep.mubr.bf16.mxu0 %v2292_v8  ;;  %3387 = vmatprep.mubr.bf16.mxu1 %v2292_v8 }
 0x5c1   : > { %3364 = vmatmul.mubr.bf16.gmra.mxu0 %v2293_v18  ;;  %3388 = vmatmul.mubr.bf16.gmra.mxu1 %v2293_v18 }
 0x679   : > { %v3361_v9 = vpop.f32.mrf.mxu0  ;;  %v3385_v10 = vpop.f32.mrf.mxu1 }
 0x67a   : > { %v2425_v11 = vmax.f32 %v2284_v54, %v3361_v9  ;;  %v2562_v60 = vmax.f32 %v2284_v54, %v3385_v10 }
 0x67b   : > { %v2392_v24 = vpop.f32.mrf.mxu0  ;;  %v2529_v25 = vpop.f32.mrf.mxu1 }
 0x67c   : > { %v2570_v26 = vmax.f32 %v2425_v11, %v2562_v60  ;;  %v2423_v27 = vmax.f32 %v2282_v46, %v2392_v24  ;;  %v2560_v28 = vmax.f32 %v2282_v46, %v2529_v25 }
 0x67d   : > { %v3362_v14 = vpop.f32.mrf.mxu0  ;;  %v3386_v30 = vpop.f32.mrf.mxu1 }
 0x67e   : > { %v2586_v31 = vadd.f32 %v2578_v12, %v2570_v26  ;;  %v2568_v32 = vmax.f32 %v2423_v27, %v2560_v28  ;;  %v2426_v6 = vmax.f32 %v2285_v49, %v3362_v14  ;;  %v2563_v36 = vmax.f32 %v2285_v49, %v3386_v30 }
 0x67f   : > { %v2395_v37 = vpop.f32.mrf.mxu0  ;;  %v2532_v41 = vpop.f32.mrf.mxu1 }
 0x680   : > { %2594 = vst [vmem:[%s3865_s15 + $0x10] sm:$0xff] %v2586_v31  ;;  %v2584_v39 = vadd.f32 %v2576_v2, %v2568_v32  ;;  %v2571_v51 = vmax.f32 %v2426_v6, %v2563_v36  ;;  %v2424_v42 = vmax.f32 %v4389_v52, %v2395_v37  ;;  %v2561_v44 = vmax.f32 %v4389_v52, %v2532_v41 }
 0x681   : > { %v3365_v57 = vpop.f32.mrf.mxu0  ;;  %v3389_v29 = vpop.f32.mrf.mxu1 }
 0x682   : > { %2592 = vst [vmem:[%s3865_s15] sm:$0xff] %v2584_v39  ;;  %v2587_v45 = vadd.f32 %v2579_v19, %v2571_v51  ;;  %v2569_v23 = vmax.f32 %v2424_v42, %v2561_v44  ;;  %v2429_v38 = vmax.f32 %v2288_v58, %v3365_v57  ;;  %v2566_v34 = vmax.f32 %v2288_v58, %v3389_v29 }
 0x683   : > { %v2408_v13 = vpop.f32.mrf.mxu0  ;;  %v2545_v20 = vpop.f32.mrf.mxu1 }
 0x684   : > { %2595 = vst [vmem:[%s3865_s15 + $0x18] sm:$0xff] %v2587_v45  ;;  %v2585_v33 = vadd.f32 %v2577_v43, %v2569_v23  ;;  %v2574_v35 = vmax.f32 %v2429_v38, %v2566_v34  ;;  %v2427_v49 = vmax.f32 %v2286_v5, %v2408_v13  ;;  %v2564_v40 = vmax.f32 %v2286_v5, %v2545_v20 }
 0x685   : > { %v3366_v46 = vpop.f32.mrf.mxu0  ;;  %v3390_v52 = vpop.f32.mrf.mxu1 }
 0x686   : > { %2593 = vst [vmem:[%s3865_s15 + $0x8] sm:$0xff] %v2585_v33  ;;  %v2590_v54 = vadd.f32 %v2582_v48, %v2574_v35  ;;  %v2572_v56 = vmax.f32 %v2427_v49, %v2564_v40  ;;  %v2430_v53 = vmax.f32 %v4400_v21, %v3366_v46  ;;  %v2567_v15 = vmax.f32 %v4400_v21, %v3390_v52 }
 0x687   : > { %v2411_v17 = vpop.f32.mrf.mxu0  ;;  %v2548_v59 = vpop.f32.mrf.mxu1 }
 0x688   : > { %2598 = vst [vmem:[%s3865_s15 + $0x30] sm:$0xff] %v2590_v54  ;;  %v2588_v22 = vadd.f32 %v2580_v50, %v2572_v56  ;;  %v2575_v61 = vmax.f32 %v2430_v53, %v2567_v15  ;;  %v2428_v62 = vmax.f32 %v4402_v7, %v2411_v17  ;;  %v2565_v47 = vmax.f32 %v4402_v7, %v2548_v59 }
 0x68a   : > { %2596 = vst [vmem:[%s3865_s15 + $0x20] sm:$0xff] %v2588_v22  ;;  %v2591_v0 = vadd.f32 %v2583_v16, %v2575_v61  ;;  %v2573_v1 = vmax.f32 %v2428_v62, %v2565_v47 }
 0x68c   : > { %2599 = vst [vmem:[%s3865_s15 + $0x38] sm:$0xff] %v2591_v0  ;;  %v2589_v3 = vadd.f32 %v2581_v63, %v2573_v1 }
 0x68e   : > { %2597 = vst [vmem:[%s3865_s15 + $0x28] sm:$0xff] %v2589_v3 }
 0x68f PF: > { %s4470_s16 = sld [smem:[#allocation10_spill]]  ;;  %s4471_s21 = smov %s3662_s23 }
 0x690   : > { %s4472_s22 = smov %s3666_s24  ;;  %s4473_s23 = smov %s4476_s19 }
 0x691   : > { %s4474_s24 = smov %s4480_s20 }
 0x695   : > { %s24_s25 = sadd.s32 1, %s4470_s16  }
 0x696   : > { %p21_p3 = scmp.ge.s32.totalorder %s24_s25, 10  }
 0x698   :  { %23 = sbr.rel (!%p21_p3) target bundleno = 9 (0x9), region = 124 }
 0x69d   :  { %2629 = vsyncpa [#allocation4], 1 }
 0x69e   :  { %2631 = vsyncpa [#allocation4 + $0x1], 1 }
 0x69f   :  { %2632 = vsyncpa [#allocation6], 1 }

// kernel: sdt_block_forward.5
= control target key start
LH: loop header
LB: loop body
LE: loop exit
PB: predicated region body
PF: predicated region fallthrough
CT: control target
= control target key end

     0   :  { %10 = vsyncpa [#allocation5], 0  ;;  %s3999_s0 = inlined_call_operand.vmem [shape: f32[4,128,128], index: 0, kind: input, shape index: {}]   ;;  %s4000_s1 = inlined_call_operand.vmem [shape: bf16[128,512], index: 1, kind: input, shape index: {}]   ;;  %s4001_s2 = inlined_call_operand.vmem [shape: f32[1,512], index: 2, kind: input, shape index: {}]   ;;  %s4002_s3 = inlined_call_operand.vmem [shape: bf16[512,128], index: 3, kind: input, shape index: {}]   ;;  %s4003_s4 = inlined_call_operand.vmem [shape: f32[1,128], index: 4, kind: input, shape index: {}]   ;;  %s4004_s5 = inlined_call_operand.hbm [shape: f32[4,128,128], index: 5, kind: output, shape index: {}]  }
   0x1   :  { %12 = vsyncpa [#allocation5 + $0x1], 0  ;;  %s2876_s18 = smov 0   ;;  %s2878_s19 = smov 0  }
   0x2   :  { %s2880_s20 = smov 0   ;;  %s2882_s21 = smov 0  }
   0x3   :  { %s2884_s22 = smov 0   ;;  %s2886_s23 = smov 0  }
   0x4 LB: > { %s2219_s24 = sadd.s32 4294967295, %s2837_s23   ;;  %s2220_s25 = sadd.s32 4294967294, %s2837_s23   ;;  %s2837_s23 = sphi %s2886_s23, %s18_s23   ;;  %s2833_s22 = sphi %s2884_s22, %s4021_s22   ;;  %s2829_s21 = sphi %s2882_s21, %s4020_s21   ;;  %s2825_s20 = sphi %s2880_s20, %s4019_s20   ;;  %s2821_s19 = sphi %s2878_s19, %s4018_s19   ;;  %s2817_s18 = sphi %s2876_s18, %s4017_s18  }
   0x5   : > { %s27_s26 = sadd.s32 1, %s2833_s22  ;;  %s151_s27 = sadd.s32 1, %s2825_s20 }
   0x6   : > { %p28_p0 = scmp.ge.s32.totalorder %s27_s26, 4  ;;  %p161_p1 = scmp.ne.s32.totalorder %s2825_s20, %s2821_s19 }
   0x7   : > { %p162_p2 = scmp.eq.s32.totalorder %s2219_s24, 3  ;;  %p167_p3 = scmp.ne.s32.totalorder %s2821_s19, %s2817_s18 }
   0x8   : > { %s4023_s26 = smov (%p28_p0, %s27_s26), 0  ;;  %p168_p5 = scmp.eq.s32.totalorder %s2220_s25, 3 }
   0x9   : > { %p2916_p4 = por %p162_p2, %p161_p1  ;;  %s146_s29 = ssub.s32 %s2833_s22, %s4023_s26 }
   0xa   : > { %p2223_p6 = scmp.ge.s32.totalorder %s2837_s23, 1  ;;  %p149_p7 = scmp.eq.s32.totalorder %s146_s29, 0 }
   0xb   : > { %p2923_p8 = por %p168_p5, %p167_p3  ;;  %p211_p9 = scmp.lt.s32.totalorder %s2837_s23, 5 }
   0xc   : > { %s2929_s6 = scalar_select %p149_p7, %s2825_s20, %s151_s27  }
   0xd   : > { %p212_p10 = pnand %p2223_p6, %p211_p9 }
   0xe   : > { %s240_s7 = sand.u32 (!%p212_p10), 1, %s2821_s19   ;;  %p244_p11 = scmp.lt.s32.totalorder (!%p212_p10), %s2829_s21, 3 }
   0xf   : > { %215 = sbr.rel (%p212_p10) target bundleno = 643 (0x283), region = 40  ;;  %s2224_s8 = sshll.u32 (!%p212_p10), %s240_s7, 7 }
  0x10   : > { %s2941_s14 = scalar_lea.vmem (!%p212_p10), [#allocation4], %s2224_s8  ;;  %p2227_p12 = scmp.ne.s32.totalorder (!%p212_p10), %s2829_s21, 0 }
  0x14   : > { %s245_s9 = scalar_select %p244_p11, %s2829_s21, 3 }
  0x15   : > { %258 = sbr.rel (%p2227_p12) target bundleno = 67 (0x43), region = 44 }
  0x16   : > { %s2474_s10 = sshll.u32 %s245_s9, 7 }
  0x17   : > { %s2939_s13 = scalar_lea.vmem %s3999_s0, %s2474_s10 }
  0x1a   : > { %v2839_v0 = vmov 0.0  }
  0x1b   : > { %259 = vst [vmem:[#allocation2 + $0x30] sm:$0xff] %v2839_v0  ;;  %260 = vst [vmem:[#allocation2] sm:$0xff] %v2839_v0 }
  0x1c   : > { %261 = vst [vmem:[#allocation2 + $0x58] sm:$0xff] %v2839_v0  ;;  %262 = vst [vmem:[#allocation2 + $0x18] sm:$0xff] %v2839_v0 }
  0x1d   : > { %263 = vst [vmem:[#allocation2 + $0x50] sm:$0xff] %v2839_v0  ;;  %264 = vst [vmem:[#allocation2 + $0x68] sm:$0xff] %v2839_v0 }
  0x1e   : > { %265 = vst [vmem:[#allocation2 + $0x8] sm:$0xff] %v2839_v0  ;;  %266 = vst [vmem:[#allocation2 + $0x48] sm:$0xff] %v2839_v0 }
  0x1f   : > { %267 = vst [vmem:[#allocation2 + $0x40] sm:$0xff] %v2839_v0  ;;  %268 = vst [vmem:[#allocation2 + $0x20] sm:$0xff] %v2839_v0 }
  0x20   : > { %269 = vst [vmem:[#allocation2 + $0x10] sm:$0xff] %v2839_v0  ;;  %270 = vst [vmem:[#allocation2 + $0x38] sm:$0xff] %v2839_v0 }
  0x21   : > { %271 = vst [vmem:[#allocation2 + $0x60] sm:$0xff] %v2839_v0  ;;  %272 = vst [vmem:[#allocation2 + $0x70] sm:$0xff] %v2839_v0 }
  0x22   : > { %273 = vst [vmem:[#allocation2 + $0x78] sm:$0xff] %v2839_v0  ;;  %274 = vst [vmem:[#allocation2 + $0x28] sm:$0xff] %v2839_v0 }
  0x23   : > { %275 = vst [vmem:[#allocation3 + $0xa8] sm:$0xff] %v2839_v0  ;;  %276 = vst [vmem:[#allocation3 + $0x68] sm:$0xff] %v2839_v0 }
  0x24   : > { %277 = vst [vmem:[#allocation3 + $0x110] sm:$0xff] %v2839_v0  ;;  %278 = vst [vmem:[#allocation3 + $0xc0] sm:$0xff] %v2839_v0 }
  0x25   : > { %279 = vst [vmem:[#allocation3 + $0xc8] sm:$0xff] %v2839_v0  ;;  %280 = vst [vmem:[#allocation3 + $0x1b0] sm:$0xff] %v2839_v0 }
  0x26   : > { %281 = vst [vmem:[#allocation3 + $0x70] sm:$0xff] %v2839_v0  ;;  %282 = vst [vmem:[#allocation3 + $0x138] sm:$0xff] %v2839_v0 }
  0x27   : > { %283 = vst [vmem:[#allocation3 + $0x148] sm:$0xff] %v2839_v0  ;;  %284 = vst [vmem:[#allocation3 + $0xf8] sm:$0xff] %v2839_v0 }
  0x28   : > { %285 = vst [vmem:[#allocation3 + $0x178] sm:$0xff] %v2839_v0  ;;  %286 = vst [vmem:[#allocation3 + $0x88] sm:$0xff] %v2839_v0 }
  0x29   : > { %287 = vst [vmem:[#allocation3 + $0xf0] sm:$0xff] %v2839_v0  ;;  %288 = vst [vmem:[#allocation3 + $0x18] sm:$0xff] %v2839_v0 }
  0x2a   : > { %289 = vst [vmem:[#allocation3 + $0x170] sm:$0xff] %v2839_v0  ;;  %290 = vst [vmem:[#allocation3 + $0x40] sm:$0xff] %v2839_v0 }
  0x2b   : > { %291 = vst [vmem:[#allocation3 + $0x80] sm:$0xff] %v2839_v0  ;;  %292 = vst [vmem:[#allocation3 + $0x140] sm:$0xff] %v2839_v0 }
  0x2c   : > { %293 = vst [vmem:[#allocation3 + $0xd8] sm:$0xff] %v2839_v0  ;;  %294 = vst [vmem:[#allocation3 + $0x160] sm:$0xff] %v2839_v0 }
  0x2d   : > { %295 = vst [vmem:[#allocation3 + $0x1d8] sm:$0xff] %v2839_v0  ;;  %296 = vst [vmem:[#allocation3 + $0x1a0] sm:$0xff] %v2839_v0 }
  0x2e   : > { %297 = vst [vmem:[#allocation3 + $0x180] sm:$0xff] %v2839_v0  ;;  %298 = vst [vmem:[#allocation3 + $0x38] sm:$0xff] %v2839_v0 }
  0x2f   : > { %299 = vst [vmem:[#allocation3 + $0xb0] sm:$0xff] %v2839_v0  ;;  %300 = vst [vmem:[#allocation3 + $0x30] sm:$0xff] %v2839_v0 }
  0x30   : > { %301 = vst [vmem:[#allocation3 + $0x1f8] sm:$0xff] %v2839_v0  ;;  %302 = vst [vmem:[#allocation3 + $0x130] sm:$0xff] %v2839_v0 }
  0x31   : > { %303 = vst [vmem:[#allocation3 + $0x158] sm:$0xff] %v2839_v0  ;;  %304 = vst [vmem:[#allocation3 + $0x168] sm:$0xff] %v2839_v0 }
  0x32   : > { %305 = vst [vmem:[#allocation3] sm:$0xff] %v2839_v0  ;;  %306 = vst [vmem:[#allocation3 + $0x28] sm:$0xff] %v2839_v0 }
  0x33   : > { %307 = vst [vmem:[#allocation3 + $0x1a8] sm:$0xff] %v2839_v0  ;;  %308 = vst [vmem:[#allocation3 + $0x8] sm:$0xff] %v2839_v0 }
  0x34   : > { %309 = vst [vmem:[#allocation3 + $0xd0] sm:$0xff] %v2839_v0  ;;  %310 = vst [vmem:[#allocation3 + $0x120] sm:$0xff] %v2839_v0 }
  0x35   : > { %311 = vst [vmem:[#allocation3 + $0x188] sm:$0xff] %v2839_v0  ;;  %312 = vst [vmem:[#allocation3 + $0x58] sm:$0xff] %v2839_v0 }
  0x36   : > { %313 = vst [vmem:[#allocation3 + $0x1b8] sm:$0xff] %v2839_v0  ;;  %314 = vst [vmem:[#allocation3 + $0x20] sm:$0xff] %v2839_v0 }
  0x37   : > { %315 = vst [vmem:[#allocation3 + $0x100] sm:$0xff] %v2839_v0  ;;  %316 = vst [vmem:[#allocation3 + $0x60] sm:$0xff] %v2839_v0 }
  0x38   : > { %317 = vst [vmem:[#allocation3 + $0x50] sm:$0xff] %v2839_v0  ;;  %318 = vst [vmem:[#allocation3 + $0x1f0] sm:$0xff] %v2839_v0 }
  0x39   : > { %319 = vst [vmem:[#allocation3 + $0x198] sm:$0xff] %v2839_v0  ;;  %320 = vst [vmem:[#allocation3 + $0x1e8] sm:$0xff] %v2839_v0 }
  0x3a   : > { %321 = vst [vmem:[#allocation3 + $0xa0] sm:$0xff] %v2839_v0  ;;  %322 = vst [vmem:[#allocation3 + $0x1c0] sm:$0xff] %v2839_v0 }
  0x3b   : > { %323 = vst [vmem:[#allocation3 + $0xe0] sm:$0xff] %v2839_v0  ;;  %324 = vst [vmem:[#allocation3 + $0xe8] sm:$0xff] %v2839_v0 }
  0x3c   : > { %325 = vst [vmem:[#allocation3 + $0xb8] sm:$0xff] %v2839_v0  ;;  %326 = vst [vmem:[#allocation3 + $0x1c8] sm:$0xff] %v2839_v0 }
  0x3d   : > { %327 = vst [vmem:[#allocation3 + $0x1d0] sm:$0xff] %v2839_v0  ;;  %328 = vst [vmem:[#allocation3 + $0x190] sm:$0xff] %v2839_v0 }
  0x3e   : > { %329 = vst [vmem:[#allocation3 + $0x128] sm:$0xff] %v2839_v0  ;;  %330 = vst [vmem:[#allocation3 + $0x150] sm:$0xff] %v2839_v0 }
  0x3f   : > { %331 = vst [vmem:[#allocation3 + $0x98] sm:$0xff] %v2839_v0  ;;  %332 = vst [vmem:[#allocation3 + $0x118] sm:$0xff] %v2839_v0 }
  0x40   : > { %333 = vst [vmem:[#allocation3 + $0x90] sm:$0xff] %v2839_v0  ;;  %334 = vst [vmem:[#allocation3 + $0x1e0] sm:$0xff] %v2839_v0 }
  0x41   : > { %335 = vst [vmem:[#allocation3 + $0x108] sm:$0xff] %v2839_v0  ;;  %336 = vst [vmem:[#allocation3 + $0x48] sm:$0xff] %v2839_v0 }
  0x42   : > { %337 = vst [vmem:[#allocation3 + $0x10] sm:$0xff] %v2839_v0  ;;  %338 = vst [vmem:[#allocation3 + $0x78] sm:$0xff] %v2839_v0 }
  0x43 PF: > { %v2665_v1 = vld [vmem:[%s4000_s1 + $0xe4] ss:$16 sps:$4 sm:$0xff]   ;;  %v2667_v2 = vld [vmem:[%s4000_s1 + $0xec] ss:$16 sps:$4 sm:$0xff]   ;;  %v2840_v3 = vmov 0   ;;  %s2475_s15 = sshll.u32 %s2829_s21, 11 }
  0x44   : > { %769 = vmatprep.mubr.bf16.mxu0 %v2840_v3  ;;  %882 = vmatprep.mubr.bf16.mxu1 %v2840_v3  ;;  %v2669_v4 = vld [vmem:[%s4000_s1 + $0xe0] ss:$16 sps:$4 sm:$0xff]   ;;  %v2670_v5 = vld [vmem:[%s4000_s1 + $0xe8] ss:$16 sps:$4 sm:$0xff]   ;;  %v2671_v6 = vld [vmem:[%s4000_s1 + $0xc4] ss:$16 sps:$4 sm:$0xff]   ;;  %s3946_s25 = scalar_lea.hbm %s4004_s5, %s2475_s15 }
  0x45   : > { %737 = vmatprep.subr.bf16.mxu0 %v2665_v1  ;;  %850 = vmatprep.subr.bf16.mxu1 %v2667_v2  ;;  %v2673_v7 = vld [vmem:[%s4000_s1 + $0xcc] ss:$16 sps:$4 sm:$0xff]   ;;  %v2675_v8 = vld [vmem:[%s4000_s1 + $0xc0] ss:$16 sps:$4 sm:$0xff]   ;;  %v2676_v9 = vld [vmem:[%s4000_s1 + $0xc8] ss:$16 sps:$4 sm:$0xff]  }
  0x46   : > { %738 = vmatpush1.bf16.msra.mxu0 %v2669_v4  ;;  %851 = vmatpush1.bf16.msra.mxu1 %v2670_v5  ;;  %v2677_v10 = vld [vmem:[%s4000_s1 + $0xa4] ss:$16 sps:$4 sm:$0xff]   ;;  %v2679_v11 = vld [vmem:[%s4000_s1 + $0xac] ss:$16 sps:$4 sm:$0xff]   ;;  %v2681_v12 = vld [vmem:[%s4000_s1 + $0xa0] ss:$16 sps:$4 sm:$0xff]  }
  0x47   : > { %739 = vmatprep.subr.bf16.mxu0 %v2671_v6  ;;  %852 = vmatprep.subr.bf16.mxu1 %v2673_v7  ;;  %v2682_v13 = vld [vmem:[%s4000_s1 + $0xa8] ss:$16 sps:$4 sm:$0xff]   ;;  %v2683_v14 = vld [vmem:[%s4000_s1 + $0x84] ss:$16 sps:$4 sm:$0xff]   ;;  %v2685_v15 = vld [vmem:[%s4000_s1 + $0x8c] ss:$16 sps:$4 sm:$0xff]  }
  0x48   : > { %v2687_v16 = vld [vmem:[%s4000_s1 + $0x80] ss:$16 sps:$4 sm:$0xff]   ;;  %v2688_v17 = vld [vmem:[%s4000_s1 + $0x88] ss:$16 sps:$4 sm:$0xff]   ;;  %v2689_v18 = vld [vmem:[%s4000_s1 + $0x64] ss:$16 sps:$4 sm:$0xff]  }
  0x49   : > { %v2691_v19 = vld [vmem:[%s4000_s1 + $0x6c] ss:$16 sps:$4 sm:$0xff]   ;;  %v2693_v20 = vld [vmem:[%s4000_s1 + $0x60] ss:$16 sps:$4 sm:$0xff]   ;;  %v2694_v21 = vld [vmem:[%s4000_s1 + $0x68] ss:$16 sps:$4 sm:$0xff]  }
  0x4a   : > { %740 = vmatpush1.bf16.msra.mxu0 %v2675_v8  ;;  %853 = vmatpush1.bf16.msra.mxu1 %v2676_v9  ;;  %v2695_v22 = vld [vmem:[%s4000_s1 + $0x44] ss:$16 sps:$4 sm:$0xff]   ;;  %v2697_v23 = vld [vmem:[%s4000_s1 + $0x4c] ss:$16 sps:$4 sm:$0xff]   ;;  %v2699_v24 = vld [vmem:[%s4000_s1 + $0x40] ss:$16 sps:$4 sm:$0xff]  }
  0x4b   : > { %741 = vmatprep.subr.bf16.mxu0 %v2677_v10  ;;  %854 = vmatprep.subr.bf16.mxu1 %v2679_v11  ;;  %v2700_v25 = vld [vmem:[%s4000_s1 + $0x48] ss:$16 sps:$4 sm:$0xff]   ;;  %v2701_v26 = vld [vmem:[%s4000_s1 + $0x24] ss:$16 sps:$4 sm:$0xff]   ;;  %v2703_v27 = vld [vmem:[%s4000_s1 + $0x2c] ss:$16 sps:$4 sm:$0xff]  }
  0x4c   : > { %v339_v28 = vld [vmem:[%s2939_s13] sm:$0xff]  ;;  %v340_v29 = vld [vmem:[%s2939_s13 + $0x8] sm:$0xff]  ;;  %v355_v32 = vld [vmem:[#allocation2 + $0x30] sm:$0xff]  ;;  %v2841_v7 = vmov 0.0   ;;  %s2140_s16 = sshll.u32 %s2941_s14, 4  ;;  %s3954_s27 = scalar_lea.sflag [#allocation5], %s240_s7  ;;  %s3948_s16 = int_to_ptr.vmem [resolvable:$true] %s2140_s16 }
  0x4d   : > { %v2705_v30 = vld [vmem:[%s4000_s1 + $0x20] ss:$16 sps:$4 sm:$0xff]   ;;  %v2706_v31 = vld [vmem:[%s4000_s1 + $0x28] ss:$16 sps:$4 sm:$0xff]   ;;  %v2707_v35 = vld [vmem:[%s4000_s1 + $0x4] ss:$16 sps:$4 sm:$0xff]   ;;  %v371_v37 = vsub.f32 %v339_v28, %v355_v32 }
  0x4e   : > { %742 = vmatpush1.bf16.msra.mxu0 %v2681_v12  ;;  %855 = vmatpush1.bf16.msra.mxu1 %v2682_v13  ;;  %v356_v33 = vld [vmem:[#allocation2] sm:$0xff]  ;;  %v341_v34 = vld [vmem:[%s2939_s13 + $0x10] sm:$0xff]  ;;  %v2709_v36 = vld [vmem:[%s4000_s1 + $0xc] ss:$16 sps:$4 sm:$0xff]   ;;  %s2761_s21 = scalar_lea.vmem %s3948_s16, 2048  ;;  %s2843_s29 = smov [#allocation4]  }
  0x4f   : > { %743 = vmatprep.subr.bf16.mxu0 %v2683_v14  ;;  %856 = vmatprep.subr.bf16.mxu1 %v2685_v15  ;;  %v372_v38 = vsub.f32 %v340_v29, %v356_v33  ;;  %v342_v39 = vld [vmem:[%s2939_s13 + $0x18] sm:$0xff]  ;;  %v343_v44 = vld [vmem:[%s2939_s13 + $0x20] sm:$0xff]  ;;  %v344_v45 = vld [vmem:[%s2939_s13 + $0x28] sm:$0xff]  ;;  %v387_v47 = vmul.f32 0.5, %v371_v37  ;;  %p2762_p13 = scmp.ne.s32.totalorder %s3948_s16, %s2761_s21  ;;  %s2765_s8 = sshll.u32 %s2843_s29, 4  ;;  %s2766_s8 = int_to_ptr.vmem [resolvable:$false] %s2765_s8 }
  0x50   : > { %v357_v40 = vld [vmem:[#allocation2 + $0x58] sm:$0xff]  ;;  %v359_v46 = vld [vmem:[#allocation2 + $0x50] sm:$0xff]  ;;  %v360_v49 = vld [vmem:[#allocation2 + $0x68] sm:$0xff]  ;;  %s2767_s9 = scalar_lea.vmem %s2766_s8, 4096  ;;  %p2768_p2 = scmp.lt.s32.totalorder %s3948_s16, %s2766_s8 }
  0x51   : > { %v358_v41 = vld [vmem:[#allocation2 + $0x18] sm:$0xff]  ;;  %v373_v42 = vsub.f32 %v341_v34, %v357_v40  ;;  %v388_v48 = vmul.f32 0.5, %v372_v38  ;;  %v375_v50 = vsub.f32 %v343_v44, %v359_v46  ;;  %v345_v51 = vld [vmem:[%s2939_s13 + $0x30] sm:$0xff]  ;;  %v376_v55 = vsub.f32 %v344_v45, %v360_v49  ;;  %v361_v56 = vld [vmem:[#allocation2 + $0x8] sm:$0xff]  ;;  %p2763_p0 = pnand %p2762_p13, %p2916_p4  ;;  %p2769_p3 = scmp.lt.s32.totalorder %s2767_s9, %s2761_s21 }
  0x52   : > { %744 = vmatpush1.bf16.msra.mxu0 %v2687_v16  ;;  %857 = vmatpush1.bf16.msra.mxu1 %v2688_v17  ;;  %v374_v43 = vsub.f32 %v342_v39, %v358_v41  ;;  %v346_v52 = vld [vmem:[%s2939_s13 + $0x38] sm:$0xff]  ;;  %v362_v57 = vld [vmem:[#allocation2 + $0x48] sm:$0xff]  ;;  %v403_v58 = vadd.f32 %v387_v47, %v355_v32  ;;  %v377_v61 = vsub.f32 %v345_v51, %v361_v56  ;;  %v2711_v62 = vld [vmem:[%s4000_s1] ss:$16 sps:$4 sm:$0xff]   ;;  %v2842_v34 = vmov 1.0|1.0  }
  0x53   : > { %745 = vmatprep.subr.bf16.mxu0 %v2689_v18  ;;  %858 = vmatprep.subr.bf16.mxu1 %v2691_v19  ;;  %v389_v53 = vmul.f32 0.5, %v373_v42  ;;  %v404_v59 = vadd.f32 %v388_v48, %v356_v33  ;;  %v391_v60 = vmul.f32 0.5, %v375_v50  ;;  %v2712_v63 = vld [vmem:[%s4000_s1 + $0x8] ss:$16 sps:$4 sm:$0xff]   ;;  %v392_v2 = vmul.f32 0.5, %v376_v55  ;;  %v347_v10 = vld [vmem:[%s2939_s13 + $0x40] sm:$0xff]  ;;  %p2764_p1 = pneg %p2763_p0  ;;  %p2770_p5 = por %p2769_p3, %p2768_p2 }
  0x54   : > { %v390_v54 = vmul.f32 0.5, %v374_v43  ;;  %v378_v4 = vsub.f32 %v346_v52, %v362_v57  ;;  %vm419_vm0 = vcmp.gt.f32.partialorder %v403_v58, 0.5  ;;  %v393_v6 = vmul.f32 0.5, %v377_v61  ;;  %v3143_v11 = vld [vmem:[#allocation2 + $0x40] sm:$0xff]  ;;  %v348_v16 = vld [vmem:[%s2939_s13 + $0x48] sm:$0xff]  ;;  %v349_v18 = vld [vmem:[%s2939_s13 + $0x50] sm:$0xff] }
  0x55   : > { %v3130_v0 = vadd.f32 %v389_v53, %v357_v40  ;;  %vm420_vm1 = vcmp.gt.f32.partialorder %v404_v59, 0.5  ;;  %v3134_v5 = vadd.f32 %v391_v60, %v359_v46  ;;  %v2228_v8 = vsel %vm419_vm0, 1.0, %v2841_v7  ;;  %v3152_v17 = vld [vmem:[#allocation2 + $0x20] sm:$0xff]  ;;  %v3155_v19 = vld [vmem:[#allocation2 + $0x10] sm:$0xff]  ;;  %v3194_v40 = vld [vmem:[%s2939_s13 + $0x68] sm:$0xff]  ;;  %p2771_p6 = pnand %p2770_p5, %p2764_p1 }
  0x56   : > { %746 = vmatpush1.bf16.msra.mxu0 %v2693_v20  ;;  %859 = vmatpush1.bf16.msra.mxu1 %v2694_v21  ;;  %v3132_v1 = vadd.f32 %v390_v54, %v358_v41  ;;  %v2229_v9 = vsel %vm420_vm1, 1.0, %v2841_v7  ;;  %v467_v12 = vsub.f32 1.0, %v2228_v8  ;;  %vm3159_vm4 = vmpackc.low %vm420_vm1, %vm419_vm0  ;;  %v379_v38 = vsub.f32 %v347_v10, %v3143_v11  ;;  %v351_v39 = vld [vmem:[%s2939_s13 + $0x60] sm:$0xff]  ;;  %v3198_v42 = vld [vmem:[#allocation2 + $0x70] sm:$0xff] }
  0x57   : > { %747 = vmatprep.subr.bf16.mxu0 %v2695_v22  ;;  %860 = vmatprep.subr.bf16.mxu1 %v2697_v23  ;;  %vm421_vm2 = vcmp.gt.f32.partialorder %v3130_v0, 0.5  ;;  %v468_v13 = vsub.f32 1.0, %v2229_v9  ;;  %v3163_v23 = vadd.f32 %v392_v2, %v360_v49  ;;  %vm423_vm5 = vcmp.gt.f32.partialorder %v3134_v5, 0.5  ;;  %v3196_v41 = vld [vmem:[#allocation2 + $0x60] sm:$0xff]  ;;  %v2714_v43 = vld [vmem:[%s4002_s3 + $0x38] sm:$0xff]   ;;  %v353_v10 = vld [vmem:[%s2939_s13 + $0x70] sm:$0xff] }
  0x58   : > { %vm422_vm3 = vcmp.gt.f32.partialorder %v3132_v1, 0.5  ;;  %v2230_v14 = vsel %vm421_vm2, 1.0, %v2841_v7  ;;  %v2232_v29 = vsel %vm423_vm5, 1.0, %v2841_v7  ;;  %v380_v46 = vsub.f32 %v348_v16, %v3152_v17  ;;  %v2715_v48 = vld [vmem:[%s4002_s3 + $0xf8] sm:$0xff]  }
  0x59   : > { %v2231_v15 = vsel %vm422_vm3, 1.0, %v2841_v7  ;;  %v469_v21 = vsub.f32 1.0, %v2230_v14  ;;  %v484_v28 = vmul.f32 %v468_v13, %v404_v59  ;;  %vm424_vm6 = vcmp.gt.f32.partialorder %v3163_v23, 0.5  ;;  %v2716_v51 = vld [vmem:[%s4002_s3 + $0xb8] sm:$0xff]   ;;  %vm3231_vm9 = vmpackc.low %vm422_vm3, %vm421_vm2 }
  0x5a   : > { %748 = vmatpush1.bf16.msra.mxu0 %v2699_v24  ;;  %861 = vmatpush1.bf16.msra.mxu1 %v2700_v25  ;;  %v470_v22 = vsub.f32 1.0, %v2231_v15  ;;  %v350_v24 = vld [vmem:[%s2939_s13 + $0x58] sm:$0xff]  ;;  %v471_v33 = vsub.f32 1.0, %v2232_v29  ;;  %v381_v47 = vsub.f32 %v349_v18, %v3155_v19  ;;  %v395_v49 = vmul.f32 0.5, %v379_v38  ;;  %v2721_v18 = vld [vmem:[%s4002_s3 + $0x68] sm:$0xff]   ;;  %vm3317_vm0 = vmpackc.low %vm424_vm6, %vm423_vm5 }
  0x5b   : > { %749 = vmatprep.subr.bf16.mxu0 %v2701_v26  ;;  %862 = vmatprep.subr.bf16.mxu1 %v2703_v27  ;;  %v3167_v25 = vld [vmem:[#allocation2 + $0x38] sm:$0xff]  ;;  %v483_v27 = vmul.f32 %v467_v12, %v403_v58  ;;  %500 = vst [vmem:[#allocation2] sm:$0xff] %v484_v28  ;;  %v396_v55 = vmul.f32 0.5, %v380_v46  ;;  %v384_v2 = vsub.f32 %v3194_v40, %v3198_v42  ;;  %v2720_v12 = vld [vmem:[%s4002_s3 + $0xb0] sm:$0xff]   ;;  %v2723_v40 = vld [vmem:[%s4002_s3 + $0xe8] sm:$0xff]  }
  0x5c   : > { %v2713_v26 = vld [vmem:[%s4002_s3 + $0x78] sm:$0xff]   ;;  %v486_v32 = vmul.f32 %v470_v22, %v3132_v1  ;;  %v487_v45 = vmul.f32 %v471_v33, %v3134_v5  ;;  %v382_v50 = vsub.f32 %v350_v24, %v3167_v25  ;;  %v3236_v60 = vadd.f32 %v395_v49, %v3143_v11 }
  0x5d   : > { %499 = vst [vmem:[#allocation2 + $0x30] sm:$0xff] %v483_v27  ;;  %v397_v61 = vmul.f32 0.5, %v381_v47  ;;  %v383_v1 = vsub.f32 %v351_v39, %v3196_v41  ;;  %v369_v11 = vld [vmem:[#allocation2 + $0x78] sm:$0xff]  ;;  %v2725_v47 = vld [vmem:[%s4002_s3 + $0x60] sm:$0xff]  }
  0x5e   : > { %750 = vmatpush1.bf16.msra.mxu0 %v2705_v30  ;;  %863 = vmatpush1.bf16.msra.mxu1 %v2706_v31  ;;  %v394_v30 = vmul.f32 0.5, %v378_v4  ;;  %v485_v31 = vmul.f32 %v469_v21, %v3130_v0  ;;  %502 = vst [vmem:[#allocation2 + $0x18] sm:$0xff] %v486_v32  ;;  %503 = vst [vmem:[#allocation2 + $0x50] sm:$0xff] %v487_v45  ;;  %v398_v0 = vmul.f32 0.5, %v382_v50  ;;  %v2719_v4 = vld [vmem:[%s4002_s3 + $0xf0] sm:$0xff]   ;;  %vm427_vm10 = vcmp.gt.f32.partialorder %v3236_v60, 0.5 }
  0x5f   : > { %751 = vmatprep.subr.bf16.mxu0 %v2707_v35  ;;  %864 = vmatprep.subr.bf16.mxu1 %v2709_v36  ;;  %v2233_v35 = vsel %vm424_vm6, 1.0, %v2841_v7  ;;  %v3187_v36 = vadd.f32 %v393_v6, %v361_v56  ;;  %v2717_v56 = vld [vmem:[%s4002_s3 + $0x70] sm:$0xff]   ;;  %v3254_v9 = vadd.f32 %v397_v61, %v3155_v19  ;;  %v2236_v13 = vsel %vm427_vm10, 1.0, %v2841_v7  ;;  %v354_v16 = vld [vmem:[%s2939_s13 + $0x78] sm:$0xff] }
  0x60   : > { %v3189_v37 = vadd.f32 %v394_v30, %v362_v57  ;;  %501 = vst [vmem:[#allocation2 + $0x58] sm:$0xff] %v485_v31  ;;  %v472_v44 = vsub.f32 1.0, %v2233_v35  ;;  %v3265_v14 = vadd.f32 %v398_v0, %v3167_v25  ;;  %v399_v15 = vmul.f32 0.5, %v383_v1  ;;  %v2732_v1 = vld [vmem:[%s4002_s3 + $0x98] sm:$0xff]  }
  0x61   : > { %vm425_vm7 = vcmp.gt.f32.partialorder %v3187_v36, 0.5  ;;  %v475_v20 = vsub.f32 1.0, %v2236_v13  ;;  %vm429_vm12 = vcmp.gt.f32.partialorder %v3254_v9, 0.5  ;;  %v400_v21 = vmul.f32 0.5, %v384_v2  ;;  %v2733_v2 = vld [vmem:[%s4002_s3 + $0x50] sm:$0xff]   ;;  %v2744_v13 = vld [vmem:[%s4002_s3 + $0x80] sm:$0xff]  }
  0x62   : > { %752 = vmatpush1.bf16.msra.mxu0 %v2711_v62  ;;  %865 = vmatpush1.bf16.msra.mxu1 %v2712_v63  ;;  %vm426_vm8 = vcmp.gt.f32.partialorder %v3189_v37, 0.5  ;;  %v488_v52 = vmul.f32 %v472_v44, %v3163_v23  ;;  %v2234_v53 = vsel %vm425_vm7, 1.0, %v2841_v7  ;;  %v2718_v62 = vld [vmem:[%s4002_s3 + $0x30] sm:$0xff]   ;;  %v3242_v63 = vadd.f32 %v396_v55, %v3152_v17  ;;  %v370_v17 = vld [vmem:[#allocation2 + $0x28] sm:$0xff]  ;;  %v2728_v55 = vld [vmem:[%s4002_s3 + $0xa0] sm:$0xff]  }
  0x63   : > { %2476 = vmatprep.subr.bf16.mxu0 %v2713_v26  ;;  %v2235_v54 = vsel %vm426_vm8, 1.0, %v2841_v7  ;;  %2540 = vmatprep.subr.bf16.mxu1 %v2715_v48  ;;  %v473_v58 = vsub.f32 1.0, %v2234_v53  ;;  %vm430_vm13 = vcmp.gt.f32.partialorder %v3265_v14, 0.5  ;;  %v2238_v24 = vsel %vm429_vm12, 1.0, %v2841_v7  ;;  %v2722_v26 = vld [vmem:[%s4002_s3 + $0x28] sm:$0xff]   ;;  %v2727_v53 = vld [vmem:[%s4002_s3 + $0xe0] sm:$0xff]   ;;  %vm3360_vm3 = vmpackc.low %vm426_vm8, %vm425_vm7 }
  0x64   : > { %v474_v59 = vsub.f32 1.0, %v2235_v54  ;;  %504 = vst [vmem:[#allocation2 + $0x68] sm:$0xff] %v488_v52  ;;  %vm428_vm11 = vcmp.gt.f32.partialorder %v3242_v63, 0.5  ;;  %v3288_v25 = vadd.f32 %v399_v15, %v3196_v41  ;;  %v491_v27 = vmul.f32 %v475_v20, %v3236_v60  ;;  %v2724_v41 = vld [vmem:[%s4002_s3 + $0xa8] sm:$0xff]   ;;  %v2726_v52 = vld [vmem:[%s4002_s3 + $0x20] sm:$0xff]   ;;  %vm2286_vm5 = vmpackc.low %vm430_vm13, %vm429_vm12 }
  0x65   : > { %2277 = vmatmul.mubr.msk.bf16.vlgmr.msra.gmra.mxu0 %vm3159_vm4, %v2842_v34  ;;  %2293 = vmatmul.mubr.msk.bf16.vlgmr.msra.gmra.mxu1 %vm3159_vm4, %v2842_v34  ;;  %v489_v6 = vmul.f32 %v473_v58, %v3187_v36  ;;  %v2237_v19 = vsel %vm428_vm11, 1.0, %v2841_v7  ;;  %v2239_v28 = vsel %vm430_vm13, 1.0, %v2841_v7  ;;  %v477_v29 = vsub.f32 1.0, %v2238_v24  ;;  %vm2284_vm4 = vmpackc.low %vm428_vm11, %vm427_vm10  ;;  %v2737_v60 = vld [vmem:[%s4002_s3 + $0x48] sm:$0xff]  }
  0x66   : > { %779 = vmatprep.mubr.bf16.mxu0 %v2840_v3  ;;  %892 = vmatprep.mubr.bf16.mxu1 %v2840_v3  ;;  %v490_v8 = vmul.f32 %v474_v59, %v3189_v37  ;;  %v476_v22 = vsub.f32 1.0, %v2237_v19  ;;  %v3298_v30 = vadd.f32 %v400_v21, %v3198_v42  ;;  %v478_v32 = vsub.f32 1.0, %v2239_v28  ;;  %507 = vst [vmem:[#allocation2 + $0x40] sm:$0xff] %v491_v27  ;;  %v2731_v37 = vld [vmem:[%s4002_s3 + $0xd8] sm:$0xff]   ;;  %v963_v27 = vld [vmem:[#allocation3 + $0xa8] sm:$0xff] }
  0x67   : > { %2477 = vmatpush3.bf16.msra.mxu0 %v2714_v43  ;;  %2541 = vmatpush3.bf16.msra.mxu1 %v2716_v51  ;;  %505 = vst [vmem:[#allocation2 + $0x8] sm:$0xff] %v489_v6  ;;  %vm431_vm14 = vcmp.gt.f32.partialorder %v3288_v25, 0.5  ;;  %v385_v33 = vsub.f32 %v353_v10, %v369_v11  ;;  %v493_v35 = vmul.f32 %v477_v29, %v3254_v9  ;;  %v2735_v6 = vld [vmem:[%s4002_s3 + $0xd0] sm:$0xff]   ;;  %v2740_v9 = vld [vmem:[%s4002_s3 + $0x88] sm:$0xff]   ;;  %v2741_v10 = vld [vmem:[%s4002_s3 + $0x40] sm:$0xff]  }
  0x68   : > { %2478 = vmatprep.subr.bf16.mxu0 %v2717_v56  ;;  %2542 = vmatprep.subr.bf16.mxu1 %v2719_v4  ;;  %506 = vst [vmem:[#allocation2 + $0x48] sm:$0xff] %v490_v8  ;;  %v492_v31 = vmul.f32 %v476_v22, %v3242_v63  ;;  %vm432_vm15 = vcmp.gt.f32.partialorder %v3298_v30, 0.5  ;;  %v2240_v38 = vsel %vm431_vm14, 1.0, %v2841_v7  ;;  %v386_v39 = vsub.f32 %v354_v16, %v370_v17  ;;  %v2729_v56 = vld [vmem:[%s4002_s3 + $0x58] sm:$0xff]   ;;  %v2734_v4 = vld [vmem:[%s4002_s3 + $0x10] sm:$0xff]   ;;  %v2739_v63 = vld [vmem:[%s4002_s3 + $0xc8] sm:$0xff]  }
  0x69   : > { %v494_v43 = vmul.f32 %v478_v32, %v3265_v14  ;;  %v2241_v44 = vsel %vm432_vm15, 1.0, %v2841_v7  ;;  %v479_v45 = vsub.f32 1.0, %v2240_v38  ;;  %v401_v46 = vmul.f32 0.5, %v385_v33  ;;  %509 = vst [vmem:[#allocation2 + $0x10] sm:$0xff] %v493_v35  ;;  %v2736_v8 = vld [vmem:[%s4002_s3 + $0x90] sm:$0xff]   ;;  %vm2288_vm6 = vmpackc.low %vm432_vm15, %vm431_vm14  ;;  %v964_v33 = vld [vmem:[#allocation3 + $0x68] sm:$0xff] }
  0x6a   : > { %508 = vst [vmem:[#allocation2 + $0x20] sm:$0xff] %v492_v31  ;;  %v480_v5 = vsub.f32 1.0, %v2241_v44  ;;  %v402_v23 = vmul.f32 0.5, %v386_v39  ;;  %v557_v14 = vlaneseq  ;;  %v965_v29 = vld [vmem:[#allocation3 + $0x110] sm:$0xff]  ;;  %v966_v38 = vld [vmem:[#allocation3 + $0xc0] sm:$0xff] }
  0x6b   : > { %2479 = vmatpush3.bf16.msra.mxu0 %v2718_v62  ;;  %2543 = vmatpush3.bf16.msra.mxu1 %v2720_v12  ;;  %510 = vst [vmem:[#allocation2 + $0x38] sm:$0xff] %v494_v43  ;;  %v495_v48 = vmul.f32 %v479_v45, %v3288_v25  ;;  %v3329_v49 = vadd.f32 %v401_v46, %v369_v11  ;;  %v2730_v62 = vld [vmem:[%s4002_s3 + $0x18] sm:$0xff]   ;;  %v2743_v11 = vld [vmem:[%s4002_s3 + $0xc0] sm:$0xff]  }
  0x6c   : > { %2480 = vmatprep.subr.bf16.mxu0 %v2721_v18  ;;  %2544 = vmatprep.subr.bf16.mxu1 %v2723_v40  ;;  %v496_v50 = vmul.f32 %v480_v5, %v3298_v30  ;;  %v418_v51 = vadd.f32 %v402_v23, %v370_v17  ;;  %v2742_v12 = vld [vmem:[%s4002_s3] sm:$0xff]   ;;  %v558_v15 = vshrl.u32 %v557_v14, 7  ;;  %v967_v23 = vld [vmem:[#allocation3 + $0xc8] sm:$0xff]  ;;  %v973_v14 = vld [vmem:[#allocation3 + $0x178] sm:$0xff] }
  0x6d   : > { %2279 = vmatmul.mubr.msk.bf16.gmra.mxu0 %vm3231_vm9, %v2842_v34  ;;  %2295 = vmatmul.mubr.msk.bf16.gmra.mxu1 %vm3231_vm9, %v2842_v34  ;;  %511 = vst [vmem:[#allocation2 + $0x60] sm:$0xff] %v495_v48  ;;  %vm433_vm1 = vcmp.gt.f32.partialorder %v3329_v49, 0.5  ;;  %v555_v18 = vld [vmem:[%s4001_s2] sm:$0xf]  ;;  %v969_v48 = vld [vmem:[#allocation3 + $0x70] sm:$0xff] }
  0x6e   : > { %789 = vmatprep.mubr.bf16.mxu0 %v2840_v3  ;;  %902 = vmatprep.mubr.bf16.mxu1 %v2840_v3  ;;  %512 = vst [vmem:[#allocation2 + $0x70] sm:$0xff] %v496_v50  ;;  %vm434_vm2 = vcmp.gt.f32.partialorder %v418_v51, 0.5  ;;  %v2242_v54 = vsel %vm433_vm1, 1.0, %v2841_v7  ;;  %v559_v16 = vsub.s32 0, %v558_v15  ;;  %v567_v17 = vsub.s32 2, %v558_v15 }
  0x6f   : > { %2481 = vmatpush3.bf16.msra.mxu0 %v2722_v26  ;;  %2545 = vmatpush3.bf16.msra.mxu1 %v2724_v41  ;;  %v2243_v58 = vsel %vm434_vm2, 1.0, %v2841_v7  ;;  %v481_v59 = vsub.f32 1.0, %v2242_v54  ;;  %vm2290_vm7 = vmpackc.low %vm434_vm2, %vm433_vm1  ;;  %v563_v19 = vsub.s32 1, %v558_v15  ;;  %v571_v20 = vsub.s32 3, %v558_v15 }
  0x70   : > { %2482 = vmatprep.subr.bf16.mxu0 %v2725_v47  ;;  %2546 = vmatprep.subr.bf16.mxu1 %v2727_v53  ;;  %v482_v61 = vsub.f32 1.0, %v2243_v58  ;;  %v3452_v21 = vrot.slane %v555_v18, %v559_v16  ;;  %v3454_v22 = vrot.slane %v555_v18, %v567_v17 }
  0x71   : > { %v497_v36 = vmul.f32 %v481_v59, %v3329_v49  ;;  %v3456_v24 = vrot.slane %v555_v18, %v563_v19  ;;  %v3458_v25 = vrot.slane %v555_v18, %v571_v20 }
  0x72   : > { %v498_v0 = vmul.f32 %v482_v61, %v418_v51  ;;  %v968_v61 = vld [vmem:[#allocation3 + $0x1b0] sm:$0xff] }
  0x73   : > { %2483 = vmatpush3.bf16.msra.mxu0 %v2726_v52  ;;  %2547 = vmatpush3.bf16.msra.mxu1 %v2728_v55  ;;  %513 = vst [vmem:[#allocation2 + $0x78] sm:$0xff] %v497_v36  ;;  %v970_v36 = vld [vmem:[#allocation3 + $0x138] sm:$0xff] }
  0x74   : > { %2484 = vmatprep.subr.bf16.mxu0 %v2729_v56  ;;  %2548 = vmatprep.subr.bf16.mxu1 %v2731_v37  ;;  %514 = vst [vmem:[#allocation2 + $0x28] sm:$0xff] %v498_v0 }
  0x75   : > { %2281 = vmatmul.mubr.msk.bf16.gmra.mxu0 %vm3317_vm0, %v2842_v34  ;;  %2297 = vmatmul.mubr.msk.bf16.gmra.mxu1 %vm3317_vm0, %v2842_v34 }
  0x76   : > { %799 = vmatprep.mubr.bf16.mxu0 %v2840_v3  ;;  %912 = vmatprep.mubr.bf16.mxu1 %v2840_v3 }
  0x77   : > { %2485 = vmatpush3.bf16.msra.mxu0 %v2730_v62  ;;  %2549 = vmatpush3.bf16.msra.mxu1 %v2732_v1 }
  0x78   : > { %2486 = vmatprep.subr.bf16.mxu0 %v2733_v2  ;;  %2550 = vmatprep.subr.bf16.mxu1 %v2735_v6 }
  0x7b   : > { %2487 = vmatpush3.bf16.msra.mxu0 %v2734_v4  ;;  %2551 = vmatpush3.bf16.msra.mxu1 %v2736_v8 }
  0x7c   : > { %2488 = vmatprep.subr.bf16.mxu0 %v2737_v60  ;;  %2552 = vmatprep.subr.bf16.mxu1 %v2739_v63 }
  0x7d   : > { %2283 = vmatmul.mubr.msk.bf16.gmra.mxu0 %vm3360_vm3, %v2842_v34  ;;  %2299 = vmatmul.mubr.msk.bf16.gmra.mxu1 %vm3360_vm3, %v2842_v34 }
  0x7e   : > { %809 = vmatprep.mubr.bf16.mxu0 %v2840_v3  ;;  %922 = vmatprep.mubr.bf16.mxu1 %v2840_v3 }
  0x7f   : > { %2553 = vmatpush3.bf16.msra.mxu1 %v2740_v9 }
  0x80   : > { %2554 = vmatprep.subr.bf16.mxu1 %v2743_v11 }
  0x83   : > { %2555 = vmatpush3.bf16.msra.mxu1 %v2744_v13  ;;  %v971_v13 = vld [vmem:[#allocation3 + $0x148] sm:$0xff] }
  0x85   : > { %2285 = vmatmul.mubr.msk.bf16.gmra.mxu0 %vm2284_vm4, %v2842_v34  ;;  %2301 = vmatmul.mubr.msk.bf16.gmra.mxu1 %vm2284_vm4, %v2842_v34 }
  0x86   : > { %819 = vmatprep.mubr.bf16.mxu0 %v2840_v3  ;;  %932 = vmatprep.mubr.bf16.mxu1 %v2840_v3 }
  0x8d   : > { %2287 = vmatmul.mubr.msk.bf16.gmra.mxu0 %vm2286_vm5, %v2842_v34  ;;  %2303 = vmatmul.mubr.msk.bf16.gmra.mxu1 %vm2286_vm5, %v2842_v34 }
  0x8e   : > { %829 = vmatprep.mubr.bf16.mxu0 %v2840_v3  ;;  %942 = vmatprep.mubr.bf16.mxu1 %v2840_v3 }
  0x95   : > { %2289 = vmatmul.mubr.msk.bf16.gmra.mxu0 %vm2288_vm6, %v2842_v34  ;;  %2305 = vmatmul.mubr.msk.bf16.gmra.mxu1 %vm2288_vm6, %v2842_v34 }
  0x96   : > { %839 = vmatprep.mubr.bf16.mxu0 %v2840_v3  ;;  %952 = vmatprep.mubr.bf16.mxu1 %v2840_v3  ;;  %v2738_v3 = vld [vmem:[%s4002_s3 + $0x8] sm:$0xff]  }
  0x97   : > { %2489 = vmatpush3.bf16.msra.mxu0 %v2738_v3 }
  0x98   : > { %2490 = vmatprep.subr.bf16.mxu0 %v2741_v10 }
  0x9b   : > { %2491 = vmatpush3.bf16.msra.mxu0 %v2742_v12 }
  0x9d   : > { %2291 = vmatmul.mubr.msk.bf16.gmra.mxu0 %vm2290_vm7, %v2842_v34  ;;  %2307 = vmatmul.mubr.msk.bf16.gmra.mxu1 %vm2290_vm7, %v2842_v34 }
 0x125   : > { %v771_v26 = vpop.f32.mrf.mxu0  ;;  %v884_v28 = vpop.f32.mrf.mxu1 }
 0x126   : > { %v772_v30 = vadd.f32 %v771_v26, %v3452_v21  ;;  %v885_v31 = vadd.f32 %v884_v28, %v3454_v22 }
 0x127   : > { %v773_v32 = vpop.f32.mrf.mxu0  ;;  %v886_v35 = vpop.f32.mrf.mxu1 }
 0x128   : > { %v1027_v39 = vsub.f32 %v772_v30, %v963_v27  ;;  %v1029_v40 = vsub.f32 %v885_v31, %v965_v29  ;;  %v774_v41 = vadd.f32 %v773_v32, %v3456_v24  ;;  %v887_v42 = vadd.f32 %v886_v35, %v3458_v25 }
 0x129   : > { %v775_v43 = vpop.f32.mrf.mxu0  ;;  %v888_v44 = vpop.f32.mrf.mxu1 }
 0x12a   : > { %v1091_v45 = vmul.f32 0.5, %v1027_v39  ;;  %v1093_v46 = vmul.f32 0.5, %v1029_v40  ;;  %v1028_v47 = vsub.f32 %v774_v41, %v964_v33  ;;  %v1030_v5 = vsub.f32 %v887_v42, %v966_v38  ;;  %v972_v41 = vld [vmem:[#allocation3 + $0xf8] sm:$0xff]  ;;  %v974_v42 = vld [vmem:[#allocation3 + $0x88] sm:$0xff] }
 0x12b   : > { %v776_v49 = vadd.f32 %v775_v43, %v3452_v21  ;;  %v889_v50 = vadd.f32 %v888_v44, %v3454_v22  ;;  %v777_v51 = vpop.f32.mrf.mxu0  ;;  %v890_v52 = vpop.f32.mrf.mxu1 }
 0x12c   : > { %v3466_v53 = vadd.f32 %v1091_v45, %v963_v27  ;;  %v3468_v54 = vadd.f32 %v1093_v46, %v965_v29  ;;  %v1092_v55 = vmul.f32 0.5, %v1028_v47  ;;  %v1094_v56 = vmul.f32 0.5, %v1030_v5  ;;  %v975_v47 = vld [vmem:[#allocation3 + $0xf0] sm:$0xff] }
 0x12d   : > { %v1031_v57 = vsub.f32 %v776_v49, %v967_v23  ;;  %v1033_v58 = vsub.f32 %v889_v50, %v969_v48  ;;  %v778_v59 = vadd.f32 %v777_v51, %v3456_v24  ;;  %v891_v62 = vadd.f32 %v890_v52, %v3458_v25  ;;  %v781_v37 = vpop.f32.mrf.mxu0  ;;  %v894_v0 = vpop.f32.mrf.mxu1  ;;  %v977_v5 = vld [vmem:[#allocation3 + $0x170] sm:$0xff] }
 0x12e   : > { %vm1219_vm8 = vcmp.gt.f32.partialorder %v3466_v53, 0.5  ;;  %vm1221_vm9 = vcmp.gt.f32.partialorder %v3468_v54, 0.5  ;;  %v3474_v1 = vadd.f32 %v1092_v55, %v964_v33  ;;  %v3476_v2 = vadd.f32 %v1094_v56, %v966_v38 }
 0x12f   : > { %v2308_v4 = vsel %vm1219_vm8, 1.0, %v2841_v7  ;;  %v2310_v6 = vsel %vm1221_vm9, 1.0, %v2841_v7  ;;  %v1095_v8 = vmul.f32 0.5, %v1031_v57  ;;  %v1097_v60 = vmul.f32 0.5, %v1033_v58  ;;  %v783_v63 = vpop.f32.mrf.mxu0  ;;  %v896_v3 = vpop.f32.mrf.mxu1 }
 0x130   : > { %v1411_v9 = vsub.f32 1.0, %v2308_v4  ;;  %v1413_v10 = vsub.f32 1.0, %v2310_v6  ;;  %v1032_v11 = vsub.f32 %v778_v59, %v968_v61  ;;  %v1034_v12 = vsub.f32 %v891_v62, %v970_v36  ;;  %v976_v59 = vld [vmem:[#allocation3 + $0x18] sm:$0xff]  ;;  %v978_v6 = vld [vmem:[#allocation3 + $0x40] sm:$0xff] }
 0x131   : > { %v3484_v15 = vadd.f32 %v1095_v8, %v967_v23  ;;  %v3486_v16 = vadd.f32 %v1097_v60, %v969_v48  ;;  %v782_v17 = vadd.f32 %v781_v37, %v3452_v21  ;;  %v895_v18 = vadd.f32 %v894_v0, %v3454_v22  ;;  %v785_v19 = vpop.f32.mrf.mxu0  ;;  %v898_v20 = vpop.f32.mrf.mxu1  ;;  %v979_v8 = vld [vmem:[#allocation3 + $0x80] sm:$0xff]  ;;  %v981_v60 = vld [vmem:[#allocation3 + $0xd8] sm:$0xff] }
 0x132   : > { %v1475_v26 = vmul.f32 %v1411_v9, %v3466_v53  ;;  %v1477_v27 = vmul.f32 %v1413_v10, %v3468_v54  ;;  %v1096_v28 = vmul.f32 0.5, %v1032_v11  ;;  %v1098_v29 = vmul.f32 0.5, %v1034_v12 }
 0x133   : > { %vm1223_vm10 = vcmp.gt.f32.partialorder %v3484_v15, 0.5  ;;  %vm1225_vm11 = vcmp.gt.f32.partialorder %v3486_v16, 0.5  ;;  %v1035_v30 = vsub.f32 %v782_v17, %v971_v13  ;;  %v1037_v31 = vsub.f32 %v895_v18, %v973_v14  ;;  %v787_v32 = vpop.f32.mrf.mxu0  ;;  %v900_v33 = vpop.f32.mrf.mxu1 }
 0x134   : > { %1539 = vst [vmem:[#allocation3 + $0xa8] sm:$0xff] %v1475_v26  ;;  %1541 = vst [vmem:[#allocation3 + $0x110] sm:$0xff] %v1477_v27  ;;  %v2312_v35 = vsel %vm1223_vm10, 1.0, %v2841_v7  ;;  %v2314_v38 = vsel %vm1225_vm11, 1.0, %v2841_v7  ;;  %v3500_v39 = vadd.f32 %v1096_v28, %v968_v61  ;;  %v3502_v40 = vadd.f32 %v1098_v29, %v970_v36 }
 0x135   : > { %v1415_v43 = vsub.f32 1.0, %v2312_v35  ;;  %v1417_v44 = vsub.f32 1.0, %v2314_v38  ;;  %v1099_v45 = vmul.f32 0.5, %v1035_v30  ;;  %v1101_v46 = vmul.f32 0.5, %v1037_v31  ;;  %v791_v23 = vpop.f32.mrf.mxu0  ;;  %v904_v48 = vpop.f32.mrf.mxu1  ;;  %vm3530_vm12 = vmpackc.low %vm1223_vm10, %vm1219_vm8 }
 0x136   : > { %v784_v49 = vadd.f32 %v783_v63, %v3456_v24  ;;  %v897_v50 = vadd.f32 %v896_v3, %v3458_v25  ;;  %v786_v51 = vadd.f32 %v785_v19, %v3452_v21  ;;  %v899_v52 = vadd.f32 %v898_v20, %v3454_v22  ;;  %vm2439_vm3 = vmpackc.low %vm1225_vm11, %vm1221_vm9 }
 0x137   : > { %v1479_v55 = vmul.f32 %v1415_v43, %v3484_v15  ;;  %v1481_v56 = vmul.f32 %v1417_v44, %v3486_v16  ;;  %v3510_v57 = vadd.f32 %v1099_v45, %v971_v13  ;;  %v3512_v58 = vadd.f32 %v1101_v46, %v973_v14  ;;  %v793_v61 = vpop.f32.mrf.mxu0  ;;  %v906_v62 = vpop.f32.mrf.mxu1 }
 0x138   : > { %v1036_v36 = vsub.f32 %v784_v49, %v972_v41  ;;  %v1038_v37 = vsub.f32 %v897_v50, %v974_v42  ;;  %v1039_v0 = vsub.f32 %v786_v51, %v975_v47  ;;  %v1041_v4 = vsub.f32 %v899_v52, %v977_v5  ;;  %v982_v49 = vld [vmem:[#allocation3 + $0x160] sm:$0xff] }
 0x139   : > { %1543 = vst [vmem:[#allocation3 + $0xc8] sm:$0xff] %v1479_v55  ;;  %1545 = vst [vmem:[#allocation3 + $0x70] sm:$0xff] %v1481_v56  ;;  %v788_v63 = vadd.f32 %v787_v32, %v3456_v24  ;;  %v901_v3 = vadd.f32 %v900_v33, %v3458_v25  ;;  %v792_v9 = vadd.f32 %v791_v23, %v3452_v21  ;;  %v795_v17 = vpop.f32.mrf.mxu0  ;;  %v908_v18 = vpop.f32.mrf.mxu1  ;;  %vm1220_vm13 = vcmp.gt.f32.partialorder %v3474_v1, 0.5  ;;  %v983_v56 = vld [vmem:[#allocation3 + $0x1d8] sm:$0xff] }
 0x13a   : > { %v905_v10 = vadd.f32 %v904_v48, %v3454_v22  ;;  %v1100_v11 = vmul.f32 0.5, %v1036_v36  ;;  %v1102_v12 = vmul.f32 0.5, %v1038_v37  ;;  %v1103_v13 = vmul.f32 0.5, %v1039_v0  ;;  %v980_v48 = vld [vmem:[#allocation3 + $0x140] sm:$0xff] }
 0x13b   : > { %v1105_v14 = vmul.f32 0.5, %v1041_v4  ;;  %v1040_v19 = vsub.f32 %v788_v63, %v976_v59  ;;  %v1042_v20 = vsub.f32 %v901_v3, %v978_v6  ;;  %v1043_v26 = vsub.f32 %v792_v9, %v979_v8  ;;  %v984_v3 = vld [vmem:[#allocation3 + $0x1a0] sm:$0xff] }
 0x13c   : > { %v1045_v27 = vsub.f32 %v905_v10, %v981_v60  ;;  %v3518_v28 = vadd.f32 %v1100_v11, %v972_v41  ;;  %v3520_v29 = vadd.f32 %v1102_v12, %v974_v42  ;;  %v3522_v30 = vadd.f32 %v1103_v13, %v975_v47  ;;  %v797_v41 = vpop.f32.mrf.mxu0  ;;  %v910_v42 = vpop.f32.mrf.mxu1  ;;  %v986_v11 = vld [vmem:[#allocation3 + $0x38] sm:$0xff]  ;;  %v987_v12 = vld [vmem:[#allocation3 + $0xb0] sm:$0xff] }
 0x13d   : > { %v3524_v31 = vadd.f32 %v1105_v14, %v977_v5  ;;  %v1104_v32 = vmul.f32 0.5, %v1040_v19  ;;  %v1106_v33 = vmul.f32 0.5, %v1042_v20  ;;  %v1107_v35 = vmul.f32 0.5, %v1043_v26  ;;  %v989_v13 = vld [vmem:[#allocation3 + $0x1f8] sm:$0xff] }
 0x13e   : > { %v1109_v38 = vmul.f32 0.5, %v1045_v27  ;;  %vm1224_vm14 = vcmp.gt.f32.partialorder %v3500_v39, 0.5  ;;  %vm1222_vm15 = vcmp.gt.f32.partialorder %v3476_v2, 0.5  ;;  %vm1226_vm0 = vcmp.gt.f32.partialorder %v3502_v40, 0.5  ;;  %v801_v0 = vpop.f32.mrf.mxu0  ;;  %v914_v4 = vpop.f32.mrf.mxu1 }
 0x13f   : > { %v3538_v44 = vadd.f32 %v1104_v32, %v976_v59  ;;  %v3540_v45 = vadd.f32 %v1106_v33, %v978_v6  ;;  %v3542_v53 = vadd.f32 %v1107_v35, %v979_v8  ;;  %vm2405_vm1 = vmpackc.low %vm1224_vm14, %vm1220_vm13  ;;  %v2309_v46 = vsel %vm1220_vm13, 1.0, %v2841_v7  ;;  %v985_v59 = vld [vmem:[#allocation3 + $0x180] sm:$0xff] }
 0x140   : > { %v3544_v15 = vadd.f32 %v1109_v38, %v981_v60  ;;  %v2313_v47 = vsel %vm1224_vm14, 1.0, %v2841_v7  ;;  %2406 = vmatprep.mubr.msk.bf16.mxu0 %vm2405_vm1, %v2842_v34  ;;  %v2311_v5 = vsel %vm1222_vm15, 1.0, %v2841_v7  ;;  %v2315_v23 = vsel %vm1226_vm0, 1.0, %v2841_v7  ;;  %vm2437_vm2 = vmpackc.low %vm1226_vm0, %vm1222_vm15  ;;  %v803_v33 = vpop.f32.mrf.mxu0  ;;  %v916_v35 = vpop.f32.mrf.mxu1 }
 0x141   : > { %v1412_v50 = vsub.f32 1.0, %v2309_v46  ;;  %v1416_v51 = vsub.f32 1.0, %v2313_v47  ;;  %v1414_v52 = vsub.f32 1.0, %v2311_v5  ;;  %v1418_v55 = vsub.f32 1.0, %v2315_v23  ;;  %2438 = vmatprep.mubr.msk.bf16.mxu1 %vm2437_vm2, %v2842_v34  ;;  %2408 = vmatmul.mubr.msk.bf16.vlgmr.msra.gmra.mxu0 %vm3530_vm12, %v2842_v34 }
 0x142   : > { %v794_v36 = vadd.f32 %v793_v61, %v3456_v24  ;;  %v907_v37 = vadd.f32 %v906_v62, %v3458_v25  ;;  %2440 = vmatmul.mubr.msk.bf16.vlgmr.msra.gmra.mxu1 %vm2439_vm3, %v2842_v34  ;;  %v796_v54 = vadd.f32 %v795_v17, %v3452_v21  ;;  %v909_v16 = vadd.f32 %v908_v18, %v3454_v22 }
 0x143   : > { %v1476_v6 = vmul.f32 %v1412_v50, %v3474_v1  ;;  %v1480_v8 = vmul.f32 %v1416_v51, %v3500_v39  ;;  %v1478_v60 = vmul.f32 %v1414_v52, %v3476_v2  ;;  %v1482_v63 = vmul.f32 %v1418_v55, %v3502_v40  ;;  %v805_v52 = vpop.f32.mrf.mxu0  ;;  %v918_v55 = vpop.f32.mrf.mxu1 }
 0x144   : > { %v1044_v61 = vsub.f32 %v794_v36, %v980_v48  ;;  %v1046_v9 = vsub.f32 %v907_v37, %v982_v49  ;;  %v1047_v62 = vsub.f32 %v796_v54, %v983_v56  ;;  %v1049_v10 = vsub.f32 %v909_v16, %v985_v59 }
 0x145   : > { %1540 = vst [vmem:[#allocation3 + $0x68] sm:$0xff] %v1476_v6  ;;  %1544 = vst [vmem:[#allocation3 + $0x1b0] sm:$0xff] %v1480_v8  ;;  %v798_v1 = vadd.f32 %v797_v41, %v3456_v24  ;;  %v911_v39 = vadd.f32 %v910_v42, %v3458_v25  ;;  %v802_v2 = vadd.f32 %v801_v0, %v3452_v21  ;;  %vm1228_vm4 = vcmp.gt.f32.partialorder %v3518_v28, 0.5  ;;  %v988_v6 = vld [vmem:[#allocation3 + $0x30] sm:$0xff] }
 0x146   : > { %1542 = vst [vmem:[#allocation3 + $0xc0] sm:$0xff] %v1478_v60  ;;  %1546 = vst [vmem:[#allocation3 + $0x138] sm:$0xff] %v1482_v63  ;;  %v915_v40 = vadd.f32 %v914_v4, %v3454_v22  ;;  %v1108_v14 = vmul.f32 0.5, %v1044_v61  ;;  %v1110_v17 = vmul.f32 0.5, %v1046_v9  ;;  %v1111_v18 = vmul.f32 0.5, %v1047_v62  ;;  %v990_v8 = vld [vmem:[#allocation3 + $0x130] sm:$0xff] }
 0x147   : > { %v1113_v19 = vmul.f32 0.5, %v1049_v10  ;;  %v1048_v20 = vsub.f32 %v798_v1, %v984_v3  ;;  %v1050_v26 = vsub.f32 %v911_v39, %v986_v11  ;;  %v1051_v27 = vsub.f32 %v802_v2, %v987_v12  ;;  %v807_v10 = vpop.f32.mrf.mxu0 }
 0x148   : > { %v1053_v32 = vsub.f32 %v915_v40, %v989_v13  ;;  %v3572_v38 = vadd.f32 %v1108_v14, %v980_v48  ;;  %v3574_v43 = vadd.f32 %v1110_v17, %v982_v49  ;;  %v3576_v41 = vadd.f32 %v1111_v18, %v983_v56 }
 0x149   : > { %v3578_v42 = vadd.f32 %v1113_v19, %v985_v59  ;;  %v1112_v46 = vmul.f32 0.5, %v1048_v20  ;;  %v1114_v47 = vmul.f32 0.5, %v1050_v26  ;;  %v1115_v5 = vmul.f32 0.5, %v1051_v27  ;;  %v991_v20 = vld [vmem:[#allocation3 + $0x158] sm:$0xff]  ;;  %v993_v26 = vld [vmem:[#allocation3] sm:$0xff]  ;;  %v811_v27 = vpop.f32.mrf.mxu0 }
 0x14a   : > { %v1117_v23 = vmul.f32 0.5, %v1053_v32  ;;  %vm1232_vm5 = vcmp.gt.f32.partialorder %v3538_v44, 0.5  ;;  %vm1230_vm6 = vcmp.gt.f32.partialorder %v3520_v29, 0.5  ;;  %vm1234_vm7 = vcmp.gt.f32.partialorder %v3540_v45, 0.5 }
 0x14b   : > { %v3584_v48 = vadd.f32 %v1112_v46, %v984_v3  ;;  %v3586_v49 = vadd.f32 %v1114_v47, %v986_v11  ;;  %v3588_v50 = vadd.f32 %v1115_v5, %v987_v12  ;;  %vm2409_vm8 = vmpackc.low %vm1232_vm5, %vm1228_vm4  ;;  %v2317_v56 = vsel %vm1228_vm4, 1.0, %v2841_v7  ;;  %v920_v11 = vpop.f32.mrf.mxu1  ;;  %v992_v5 = vld [vmem:[#allocation3 + $0x168] sm:$0xff] }
 0x14c   : > { %v3590_v51 = vadd.f32 %v1117_v23, %v989_v13  ;;  %v2321_v59 = vsel %vm1232_vm5, 1.0, %v2841_v7  ;;  %2410 = vmatprep.mubr.msk.bf16.mxu0 %vm2409_vm8, %v2842_v34  ;;  %v2319_v36 = vsel %vm1230_vm6, 1.0, %v2841_v7  ;;  %v2323_v37 = vsel %vm1234_vm7, 1.0, %v2841_v7  ;;  %vm2441_vm9 = vmpackc.low %vm1234_vm7, %vm1230_vm6 }
 0x14d   : > { %v1420_v54 = vsub.f32 1.0, %v2317_v56  ;;  %v1424_v16 = vsub.f32 1.0, %v2321_v59  ;;  %v1422_v0 = vsub.f32 1.0, %v2319_v36  ;;  %v1426_v4 = vsub.f32 1.0, %v2323_v37  ;;  %2442 = vmatprep.mubr.msk.bf16.mxu1 %vm2441_vm9, %v2842_v34  ;;  %v924_v32 = vpop.f32.mrf.mxu1  ;;  %v995_v36 = vld [vmem:[#allocation3 + $0x1a8] sm:$0xff]  ;;  %v997_v37 = vld [vmem:[#allocation3 + $0xd0] sm:$0xff] }
 0x14e   : > { %v804_v60 = vadd.f32 %v803_v33, %v3456_v24  ;;  %v917_v63 = vadd.f32 %v916_v35, %v3458_v25  ;;  %vm1227_vm10 = vcmp.gt.f32.partialorder %v3510_v57, 0.5  ;;  %vm1231_vm11 = vcmp.gt.f32.partialorder %v3522_v30, 0.5 }
 0x14f   : > { %v1484_v3 = vmul.f32 %v1420_v54, %v3518_v28  ;;  %v1488_v61 = vmul.f32 %v1424_v16, %v3538_v44  ;;  %v1486_v9 = vmul.f32 %v1422_v0, %v3520_v29  ;;  %v1490_v62 = vmul.f32 %v1426_v4, %v3540_v45  ;;  %vm2411_vm12 = vmpackc.low %vm1231_vm11, %vm1227_vm10 }
 0x150   : > { %v1052_v12 = vsub.f32 %v804_v60, %v988_v6  ;;  %v1054_v13 = vsub.f32 %v917_v63, %v990_v8  ;;  %v2316_v1 = vsel %vm1227_vm10, 1.0, %v2841_v7  ;;  %v2320_v39 = vsel %vm1231_vm11, 1.0, %v2841_v7  ;;  %2412 = vmatmul.mubr.msk.bf16.gmra.mxu0 %vm2411_vm12, %v2842_v34 }
 0x151   : > { %1548 = vst [vmem:[#allocation3 + $0xf8] sm:$0xff] %v1484_v3  ;;  %1552 = vst [vmem:[#allocation3 + $0x18] sm:$0xff] %v1488_v61  ;;  %v1419_v28 = vsub.f32 1.0, %v2316_v1  ;;  %v1423_v44 = vsub.f32 1.0, %v2320_v39  ;;  %vm1229_vm13 = vcmp.gt.f32.partialorder %v3512_v58, 0.5  ;;  %vm1233_vm14 = vcmp.gt.f32.partialorder %v3524_v31, 0.5 }
 0x152   : > { %1550 = vst [vmem:[#allocation3 + $0x88] sm:$0xff] %v1486_v9  ;;  %1554 = vst [vmem:[#allocation3 + $0x40] sm:$0xff] %v1490_v62  ;;  %v1116_v29 = vmul.f32 0.5, %v1052_v12  ;;  %v1118_v45 = vmul.f32 0.5, %v1054_v13  ;;  %v2318_v2 = vsel %vm1229_vm13, 1.0, %v2841_v7  ;;  %v2322_v40 = vsel %vm1233_vm14, 1.0, %v2841_v7 }
 0x153   : > { %vm2443_vm15 = vmpackc.low %vm1233_vm14, %vm1229_vm13  ;;  %v1483_v14 = vmul.f32 %v1419_v28, %v3510_v57  ;;  %v1487_v17 = vmul.f32 %v1423_v44, %v3522_v30  ;;  %v1421_v18 = vsub.f32 1.0, %v2318_v2  ;;  %v1425_v19 = vsub.f32 1.0, %v2322_v40  ;;  %v994_v57 = vld [vmem:[#allocation3 + $0x28] sm:$0xff] }
 0x154   : > { %2444 = vmatmul.mubr.msk.bf16.gmra.mxu1 %vm2443_vm15, %v2842_v34  ;;  %v3616_v33 = vadd.f32 %v1116_v29, %v988_v6  ;;  %v3618_v35 = vadd.f32 %v1118_v45, %v990_v8  ;;  %v806_v46 = vadd.f32 %v805_v52, %v3452_v21  ;;  %v919_v47 = vadd.f32 %v918_v55, %v3454_v22 }
 0x155   : > { %1547 = vst [vmem:[#allocation3 + $0x148] sm:$0xff] %v1483_v14  ;;  %1551 = vst [vmem:[#allocation3 + $0xf0] sm:$0xff] %v1487_v17  ;;  %v1485_v30 = vmul.f32 %v1421_v18, %v3512_v58  ;;  %v1489_v23 = vmul.f32 %v1425_v19, %v3524_v31  ;;  %v808_v56 = vadd.f32 %v807_v10, %v3456_v24  ;;  %vm1236_vm0 = vcmp.gt.f32.partialorder %v3572_v38, 0.5  ;;  %v813_v58 = vpop.f32.mrf.mxu0  ;;  %v926_v31 = vpop.f32.mrf.mxu1 }
 0x156   : > { %v921_v59 = vadd.f32 %v920_v11, %v3458_v25  ;;  %v1055_v54 = vsub.f32 %v806_v46, %v991_v20  ;;  %v1057_v16 = vsub.f32 %v919_v47, %v993_v26  ;;  %v812_v52 = vadd.f32 %v811_v27, %v3452_v21 }
 0x157   : > { %v925_v55 = vadd.f32 %v924_v32, %v3454_v22  ;;  %1549 = vst [vmem:[#allocation3 + $0x178] sm:$0xff] %v1485_v30  ;;  %1553 = vst [vmem:[#allocation3 + $0x170] sm:$0xff] %v1489_v23  ;;  %v1056_v0 = vsub.f32 %v808_v56, %v992_v5  ;;  %vm1240_vm1 = vcmp.gt.f32.partialorder %v3584_v48, 0.5  ;;  %v2325_v9 = vsel %vm1236_vm0, 1.0, %v2841_v7  ;;  %v815_v29 = vpop.f32.mrf.mxu0  ;;  %v928_v45 = vpop.f32.mrf.mxu1 }
 0x158   : > { %v1058_v4 = vsub.f32 %v921_v59, %v994_v57  ;;  %v1119_v6 = vmul.f32 0.5, %v1055_v54  ;;  %v1121_v8 = vmul.f32 0.5, %v1057_v16  ;;  %v1059_v60 = vsub.f32 %v812_v52, %v995_v36  ;;  %vm2413_vm2 = vmpackc.low %vm1240_vm1, %vm1236_vm0  ;;  %v999_v52 = vld [vmem:[#allocation3 + $0x188] sm:$0xff] }
 0x159   : > { %v1061_v63 = vsub.f32 %v925_v55, %v997_v37  ;;  %v1120_v3 = vmul.f32 0.5, %v1056_v0  ;;  %v2329_v62 = vsel %vm1240_vm1, 1.0, %v2841_v7  ;;  %2414 = vmatprep.mubr.msk.bf16.mxu0 %vm2413_vm2, %v2842_v34  ;;  %v1428_v28 = vsub.f32 1.0, %v2325_v9  ;;  %v1001_v55 = vld [vmem:[#allocation3 + $0x1b8] sm:$0xff] }
 0x15a   : > { %v1122_v61 = vmul.f32 0.5, %v1058_v4  ;;  %v3633_v10 = vadd.f32 %v1119_v6, %v991_v20  ;;  %v3635_v11 = vadd.f32 %v1121_v8, %v993_v26  ;;  %v1123_v12 = vmul.f32 0.5, %v1059_v60  ;;  %v996_v20 = vld [vmem:[#allocation3 + $0x8] sm:$0xff]  ;;  %v998_v26 = vld [vmem:[#allocation3 + $0x120] sm:$0xff]  ;;  %v1000_v9 = vld [vmem:[#allocation3 + $0x58] sm:$0xff] }
 0x15b   : > { %v1125_v13 = vmul.f32 0.5, %v1061_v63  ;;  %v3637_v1 = vadd.f32 %v1120_v3, %v992_v5  ;;  %v1432_v44 = vsub.f32 1.0, %v2329_v62  ;;  %vm1238_vm3 = vcmp.gt.f32.partialorder %v3574_v43, 0.5 }
 0x15c   : > { %v3639_v39 = vadd.f32 %v1122_v61, %v994_v57  ;;  %v3641_v2 = vadd.f32 %v1123_v12, %v995_v36  ;;  %vm1242_vm4 = vcmp.gt.f32.partialorder %v3586_v49, 0.5  ;;  %v1492_v14 = vmul.f32 %v1428_v28, %v3572_v38  ;;  %v817_v38 = vpop.f32.mrf.mxu0 }
 0x15d   : > { %v3643_v40 = vadd.f32 %v1125_v13, %v997_v37  ;;  %v1496_v17 = vmul.f32 %v1432_v44, %v3584_v48  ;;  %v2327_v18 = vsel %vm1238_vm3, 1.0, %v2841_v7  ;;  %v2331_v19 = vsel %vm1242_vm4, 1.0, %v2841_v7  ;;  %vm2445_vm5 = vmpackc.low %vm1242_vm4, %vm1238_vm3  ;;  %v930_v48 = vpop.f32.mrf.mxu1  ;;  %v1002_v44 = vld [vmem:[#allocation3 + $0x20] sm:$0xff] }
 0x15e   : > { %v1430_v27 = vsub.f32 1.0, %v2327_v18  ;;  %v1434_v32 = vsub.f32 1.0, %v2331_v19  ;;  %2446 = vmatprep.mubr.msk.bf16.mxu1 %vm2445_vm5, %v2842_v34  ;;  %v814_v46 = vadd.f32 %v813_v58, %v3456_v24  ;;  %v927_v47 = vadd.f32 %v926_v31, %v3458_v25  ;;  %1556 = vst [vmem:[#allocation3 + $0x140] sm:$0xff] %v1492_v14  ;;  %v821_v6 = vpop.f32.mrf.mxu0 }
 0x15f   : > { %1560 = vst [vmem:[#allocation3 + $0x1a0] sm:$0xff] %v1496_v17  ;;  %vm1235_vm6 = vcmp.gt.f32.partialorder %v3542_v53, 0.5  ;;  %vm1239_vm7 = vcmp.gt.f32.partialorder %v3576_v41, 0.5  ;;  %vm1237_vm8 = vcmp.gt.f32.partialorder %v3544_v15, 0.5  ;;  %vm1241_vm9 = vcmp.gt.f32.partialorder %v3578_v42, 0.5  ;;  %v934_v8 = vpop.f32.mrf.mxu1 }
 0x160   : > { %v1494_v5 = vmul.f32 %v1430_v27, %v3574_v43  ;;  %v1498_v57 = vmul.f32 %v1434_v32, %v3586_v49  ;;  %v1060_v30 = vsub.f32 %v814_v46, %v996_v20  ;;  %v1062_v23 = vsub.f32 %v927_v47, %v998_v26  ;;  %vm2415_vm10 = vmpackc.low %vm1239_vm7, %vm1235_vm6 }
 0x161   : > { %v2324_v56 = vsel %vm1235_vm6, 1.0, %v2841_v7  ;;  %v2328_v59 = vsel %vm1239_vm7, 1.0, %v2841_v7  ;;  %2416 = vmatmul.mubr.msk.bf16.gmra.mxu0 %vm2415_vm10, %v2842_v34  ;;  %v2326_v36 = vsel %vm1237_vm8, 1.0, %v2841_v7  ;;  %v2330_v37 = vsel %vm1241_vm9, 1.0, %v2841_v7  ;;  %vm2447_vm11 = vmpackc.low %vm1241_vm9, %vm1237_vm8  ;;  %v936_v19 = vpop.f32.mrf.mxu1 }
 0x162   : > { %1558 = vst [vmem:[#allocation3 + $0x160] sm:$0xff] %v1494_v5  ;;  %1562 = vst [vmem:[#allocation3 + $0x38] sm:$0xff] %v1498_v57  ;;  %v1124_v54 = vmul.f32 0.5, %v1060_v30  ;;  %v1126_v43 = vmul.f32 0.5, %v1062_v23  ;;  %v1427_v16 = vsub.f32 1.0, %v2324_v56  ;;  %v1431_v49 = vsub.f32 1.0, %v2328_v59  ;;  %2448 = vmatmul.mubr.msk.bf16.gmra.mxu1 %vm2447_vm11, %v2842_v34 }
 0x163   : > { %v1429_v0 = vsub.f32 1.0, %v2326_v36  ;;  %v1433_v4 = vsub.f32 1.0, %v2330_v37  ;;  %v816_v58 = vadd.f32 %v815_v29, %v3452_v21  ;;  %v929_v31 = vadd.f32 %v928_v45, %v3454_v22  ;;  %v1003_v29 = vld [vmem:[#allocation3 + $0x100] sm:$0xff]  ;;  %v1005_v45 = vld [vmem:[#allocation3 + $0x50] sm:$0xff]  ;;  %v938_v37 = vpop.f32.mrf.mxu1 }
 0x164   : > { %v3668_v60 = vadd.f32 %v1124_v54, %v996_v20  ;;  %v3670_v63 = vadd.f32 %v1126_v43, %v998_v26  ;;  %v1491_v3 = vmul.f32 %v1427_v16, %v3542_v53  ;;  %v1495_v61 = vmul.f32 %v1431_v49, %v3576_v41 }
 0x165   : > { %v1493_v62 = vmul.f32 %v1429_v0, %v3544_v15  ;;  %v1497_v12 = vmul.f32 %v1433_v4, %v3578_v42  ;;  %v1063_v13 = vsub.f32 %v816_v58, %v999_v52  ;;  %v1065_v28 = vsub.f32 %v929_v31, %v1001_v55  ;;  %v823_v42 = vpop.f32.mrf.mxu0  ;;  %v1004_v58 = vld [vmem:[#allocation3 + $0x60] sm:$0xff]  ;;  %v1006_v31 = vld [vmem:[#allocation3 + $0x1f0] sm:$0xff] }
 0x166   : > { %1555 = vst [vmem:[#allocation3 + $0x80] sm:$0xff] %v1491_v3  ;;  %1559 = vst [vmem:[#allocation3 + $0x1d8] sm:$0xff] %v1495_v61  ;;  %v818_v14 = vadd.f32 %v817_v38, %v3456_v24  ;;  %v931_v17 = vadd.f32 %v930_v48, %v3458_v25  ;;  %v822_v53 = vadd.f32 %v821_v6, %v3452_v21  ;;  %vm1244_vm12 = vcmp.gt.f32.partialorder %v3616_v33, 0.5 }
 0x167   : > { %v935_v41 = vadd.f32 %v934_v8, %v3454_v22  ;;  %1557 = vst [vmem:[#allocation3 + $0xd8] sm:$0xff] %v1493_v62  ;;  %1561 = vst [vmem:[#allocation3 + $0x180] sm:$0xff] %v1497_v12  ;;  %v1127_v15 = vmul.f32 0.5, %v1063_v13  ;;  %v1129_v18 = vmul.f32 0.5, %v1065_v28  ;;  %vm1248_vm13 = vcmp.gt.f32.partialorder %v3637_v1, 0.5  ;;  %v825_v36 = vpop.f32.mrf.mxu0 }
 0x168   : > { %v1064_v20 = vsub.f32 %v818_v14, %v1000_v9  ;;  %v1066_v26 = vsub.f32 %v931_v17, %v1002_v44  ;;  %v1067_v27 = vsub.f32 %v822_v53, %v1003_v29  ;;  %vm2417_vm14 = vmpackc.low %vm1248_vm13, %vm1244_vm12  ;;  %v2333_v38 = vsel %vm1244_vm12, 1.0, %v2841_v7  ;;  %v1007_v53 = vld [vmem:[#allocation3 + $0x198] sm:$0xff] }
 0x169   : > { %v1069_v32 = vsub.f32 %v935_v41, %v1005_v45  ;;  %v3682_v46 = vadd.f32 %v1127_v15, %v999_v52  ;;  %v3684_v47 = vadd.f32 %v1129_v18, %v1001_v55  ;;  %v2337_v48 = vsel %vm1248_vm13, 1.0, %v2841_v7  ;;  %2418 = vmatprep.mubr.msk.bf16.mxu0 %vm2417_vm14, %v2842_v34  ;;  %v1009_v41 = vld [vmem:[#allocation3 + $0xa0] sm:$0xff] }
 0x16a   : > { %v1128_v5 = vmul.f32 0.5, %v1064_v20  ;;  %v1130_v57 = vmul.f32 0.5, %v1066_v26  ;;  %v1131_v30 = vmul.f32 0.5, %v1067_v27  ;;  %v1436_v56 = vsub.f32 1.0, %v2333_v38 }
 0x16b   : > { %v1133_v23 = vmul.f32 0.5, %v1069_v32  ;;  %v1440_v59 = vsub.f32 1.0, %v2337_v48  ;;  %vm1246_vm15 = vcmp.gt.f32.partialorder %v3618_v35, 0.5  ;;  %vm1250_vm0 = vcmp.gt.f32.partialorder %v3639_v39, 0.5 }
 0x16c   : > { %v3691_v54 = vadd.f32 %v1128_v5, %v1000_v9  ;;  %v3693_v43 = vadd.f32 %v1130_v57, %v1002_v44  ;;  %v3695_v16 = vadd.f32 %v1131_v30, %v1003_v29  ;;  %vm2449_vm1 = vmpackc.low %vm1250_vm0, %vm1246_vm15  ;;  %v1500_v52 = vmul.f32 %v1436_v56, %v3616_v33  ;;  %v827_v33 = vpop.f32.mrf.mxu0  ;;  %v1008_v5 = vld [vmem:[#allocation3 + $0x1e8] sm:$0xff] }
 0x16d   : > { %v3697_v49 = vadd.f32 %v1133_v23, %v1005_v45  ;;  %v1504_v55 = vmul.f32 %v1440_v59, %v3637_v1  ;;  %v2335_v0 = vsel %vm1246_vm15, 1.0, %v2841_v7  ;;  %v2339_v4 = vsel %vm1250_vm0, 1.0, %v2841_v7  ;;  %2450 = vmatprep.mubr.msk.bf16.mxu1 %vm2449_vm1, %v2842_v34  ;;  %v940_v1 = vpop.f32.mrf.mxu1  ;;  %v1010_v59 = vld [vmem:[#allocation3 + $0x1c0] sm:$0xff] }
 0x16e   : > { %v1438_v6 = vsub.f32 1.0, %v2335_v0  ;;  %v1442_v8 = vsub.f32 1.0, %v2339_v4  ;;  %v824_v3 = vadd.f32 %v823_v42, %v3456_v24  ;;  %v937_v61 = vadd.f32 %v936_v19, %v3458_v25  ;;  %1564 = vst [vmem:[#allocation3 + $0x30] sm:$0xff] %v1500_v52  ;;  %v831_v20 = vpop.f32.mrf.mxu0 }
 0x16f   : > { %1568 = vst [vmem:[#allocation3 + $0x168] sm:$0xff] %v1504_v55  ;;  %vm1243_vm2 = vcmp.gt.f32.partialorder %v3588_v50, 0.5  ;;  %vm1247_vm3 = vcmp.gt.f32.partialorder %v3633_v10, 0.5  ;;  %vm1245_vm4 = vcmp.gt.f32.partialorder %v3590_v51, 0.5  ;;  %vm1249_vm5 = vcmp.gt.f32.partialorder %v3635_v11, 0.5  ;;  %v944_v26 = vpop.f32.mrf.mxu1 }
 0x170   : > { %v1502_v9 = vmul.f32 %v1438_v6, %v3618_v35  ;;  %v1506_v62 = vmul.f32 %v1442_v8, %v3639_v39  ;;  %v1068_v12 = vsub.f32 %v824_v3, %v1004_v58  ;;  %v1070_v13 = vsub.f32 %v937_v61, %v1006_v31  ;;  %vm2419_vm6 = vmpackc.low %vm1247_vm3, %vm1243_vm2 }
 0x171   : > { %v2332_v28 = vsel %vm1243_vm2, 1.0, %v2841_v7  ;;  %v2336_v44 = vsel %vm1247_vm3, 1.0, %v2841_v7  ;;  %2420 = vmatmul.mubr.msk.bf16.gmra.mxu0 %vm2419_vm6, %v2842_v34  ;;  %v2334_v29 = vsel %vm1245_vm4, 1.0, %v2841_v7  ;;  %v2338_v45 = vsel %vm1249_vm5, 1.0, %v2841_v7  ;;  %vm2451_vm7 = vmpackc.low %vm1249_vm5, %vm1245_vm4  ;;  %v946_v4 = vpop.f32.mrf.mxu1 }
 0x172   : > { %1566 = vst [vmem:[#allocation3 + $0x130] sm:$0xff] %v1502_v9  ;;  %1570 = vst [vmem:[#allocation3 + $0x28] sm:$0xff] %v1506_v62  ;;  %v1132_v14 = vmul.f32 0.5, %v1068_v12  ;;  %v1134_v35 = vmul.f32 0.5, %v1070_v13  ;;  %v1435_v17 = vsub.f32 1.0, %v2332_v28  ;;  %v1439_v39 = vsub.f32 1.0, %v2336_v44  ;;  %2452 = vmatmul.mubr.msk.bf16.gmra.mxu1 %vm2451_vm7, %v2842_v34 }
 0x173   : > { %v1437_v15 = vsub.f32 1.0, %v2334_v29  ;;  %v1441_v18 = vsub.f32 1.0, %v2338_v45  ;;  %v826_v42 = vadd.f32 %v825_v36, %v3452_v21  ;;  %v939_v19 = vadd.f32 %v938_v37, %v3454_v22  ;;  %v1011_v36 = vld [vmem:[#allocation3 + $0xe0] sm:$0xff]  ;;  %v1013_v37 = vld [vmem:[#allocation3 + $0xb8] sm:$0xff]  ;;  %v948_v45 = vpop.f32.mrf.mxu1 }
 0x174   : > { %v3720_v27 = vadd.f32 %v1132_v14, %v1004_v58  ;;  %v3722_v32 = vadd.f32 %v1134_v35, %v1006_v31  ;;  %v1499_v38 = vmul.f32 %v1435_v17, %v3588_v50  ;;  %v1503_v48 = vmul.f32 %v1439_v39, %v3633_v10 }
 0x175   : > { %v1501_v57 = vmul.f32 %v1437_v15, %v3590_v51  ;;  %v1505_v30 = vmul.f32 %v1441_v18, %v3635_v11  ;;  %v1071_v23 = vsub.f32 %v826_v42, %v1007_v53  ;;  %v1073_v56 = vsub.f32 %v939_v19, %v1009_v41  ;;  %v833_v11 = vpop.f32.mrf.mxu0  ;;  %v1012_v42 = vld [vmem:[#allocation3 + $0xe8] sm:$0xff] }
 0x176   : > { %1563 = vst [vmem:[#allocation3 + $0xb0] sm:$0xff] %v1499_v38  ;;  %1567 = vst [vmem:[#allocation3 + $0x158] sm:$0xff] %v1503_v48  ;;  %v828_v52 = vadd.f32 %v827_v33, %v3456_v24  ;;  %v941_v55 = vadd.f32 %v940_v1, %v3458_v25  ;;  %v832_v50 = vadd.f32 %v831_v20, %v3452_v21  ;;  %vm1252_vm8 = vcmp.gt.f32.partialorder %v3668_v60, 0.5  ;;  %v1014_v19 = vld [vmem:[#allocation3 + $0x1c8] sm:$0xff] }
 0x177   : > { %v945_v10 = vadd.f32 %v944_v26, %v3454_v22  ;;  %1565 = vst [vmem:[#allocation3 + $0x1f8] sm:$0xff] %v1501_v57  ;;  %1569 = vst [vmem:[#allocation3] sm:$0xff] %v1505_v30  ;;  %v1135_v51 = vmul.f32 0.5, %v1071_v23  ;;  %v1137_v0 = vmul.f32 0.5, %v1073_v56  ;;  %vm1256_vm9 = vcmp.gt.f32.partialorder %v3691_v54, 0.5  ;;  %v835_v29 = vpop.f32.mrf.mxu0 }
 0x178   : > { %v1072_v58 = vsub.f32 %v828_v52, %v1008_v5  ;;  %v1074_v31 = vsub.f32 %v941_v55, %v1010_v59  ;;  %v1075_v6 = vsub.f32 %v832_v50, %v1011_v36  ;;  %vm2421_vm10 = vmpackc.low %vm1256_vm9, %vm1252_vm8  ;;  %v2341_v33 = vsel %vm1252_vm8, 1.0, %v2841_v7  ;;  %v1015_v50 = vld [vmem:[#allocation3 + $0x1d0] sm:$0xff] }
 0x179   : > { %v1077_v8 = vsub.f32 %v945_v10, %v1013_v37  ;;  %v3734_v3 = vadd.f32 %v1135_v51, %v1007_v53  ;;  %v3736_v61 = vadd.f32 %v1137_v0, %v1009_v41  ;;  %v2345_v1 = vsel %vm1256_vm9, 1.0, %v2841_v7  ;;  %2422 = vmatprep.mubr.msk.bf16.mxu0 %vm2421_vm10, %v2842_v34  ;;  %v1017_v10 = vld [vmem:[#allocation3 + $0x128] sm:$0xff] }
 0x17a   : > { %v1136_v9 = vmul.f32 0.5, %v1072_v58  ;;  %v1138_v62 = vmul.f32 0.5, %v1074_v31  ;;  %v1139_v12 = vmul.f32 0.5, %v1075_v6  ;;  %v1444_v28 = vsub.f32 1.0, %v2341_v33 }
 0x17b   : > { %v1141_v13 = vmul.f32 0.5, %v1077_v8  ;;  %v1448_v44 = vsub.f32 1.0, %v2345_v1  ;;  %vm1254_vm11 = vcmp.gt.f32.partialorder %v3670_v63, 0.5  ;;  %vm1258_vm12 = vcmp.gt.f32.partialorder %v3693_v43, 0.5 }
 0x17c   : > { %v3743_v14 = vadd.f32 %v1136_v9, %v1008_v5  ;;  %v3745_v35 = vadd.f32 %v1138_v62, %v1010_v59  ;;  %v3747_v17 = vadd.f32 %v1139_v12, %v1011_v36  ;;  %vm2453_vm13 = vmpackc.low %vm1258_vm12, %vm1254_vm11  ;;  %v1508_v53 = vmul.f32 %v1444_v28, %v3668_v60  ;;  %v837_v60 = vpop.f32.mrf.mxu0  ;;  %v1016_v9 = vld [vmem:[#allocation3 + $0x190] sm:$0xff] }
 0x17d   : > { %v3749_v39 = vadd.f32 %v1141_v13, %v1013_v37  ;;  %v1512_v41 = vmul.f32 %v1448_v44, %v3691_v54  ;;  %v2343_v15 = vsel %vm1254_vm11, 1.0, %v2841_v7  ;;  %v2347_v18 = vsel %vm1258_vm12, 1.0, %v2841_v7  ;;  %2454 = vmatprep.mubr.msk.bf16.mxu1 %vm2453_vm13, %v2842_v34  ;;  %v950_v54 = vpop.f32.mrf.mxu1  ;;  %v1018_v44 = vld [vmem:[#allocation3 + $0x150] sm:$0xff] }
 0x17e   : > { %v1446_v20 = vsub.f32 1.0, %v2343_v15  ;;  %v1450_v26 = vsub.f32 1.0, %v2347_v18  ;;  %v834_v38 = vadd.f32 %v833_v11, %v3456_v24  ;;  %v947_v48 = vadd.f32 %v946_v4, %v3458_v25  ;;  %1572 = vst [vmem:[#allocation3 + $0x8] sm:$0xff] %v1508_v53  ;;  %v841_v58 = vpop.f32.mrf.mxu0 }
 0x17f   : > { %1576 = vst [vmem:[#allocation3 + $0x58] sm:$0xff] %v1512_v41  ;;  %vm1251_vm14 = vcmp.gt.f32.partialorder %v3641_v2, 0.5  ;;  %vm1255_vm15 = vcmp.gt.f32.partialorder %v3682_v46, 0.5  ;;  %vm1253_vm0 = vcmp.gt.f32.partialorder %v3643_v40, 0.5  ;;  %vm1257_vm1 = vcmp.gt.f32.partialorder %v3684_v47, 0.5  ;;  %v954_v31 = vpop.f32.mrf.mxu1 }
 0x180   : > { %v1510_v5 = vmul.f32 %v1446_v20, %v3670_v63  ;;  %v1514_v57 = vmul.f32 %v1450_v26, %v3693_v43  ;;  %v1076_v30 = vsub.f32 %v834_v38, %v1012_v42  ;;  %v1078_v23 = vsub.f32 %v947_v48, %v1014_v19  ;;  %vm2423_vm2 = vmpackc.low %vm1255_vm15, %vm1251_vm14 }
 0x181   : > { %v2340_v56 = vsel %vm1251_vm14, 1.0, %v2841_v7  ;;  %v2344_v59 = vsel %vm1255_vm15, 1.0, %v2841_v7  ;;  %2424 = vmatmul.mubr.msk.bf16.gmra.mxu0 %vm2423_vm2, %v2842_v34  ;;  %v2342_v36 = vsel %vm1253_vm0, 1.0, %v2841_v7  ;;  %v2346_v37 = vsel %vm1257_vm1, 1.0, %v2841_v7  ;;  %vm2455_vm3 = vmpackc.low %vm1257_vm1, %vm1253_vm0 }
 0x182   : > { %1574 = vst [vmem:[#allocation3 + $0x120] sm:$0xff] %v1510_v5  ;;  %1578 = vst [vmem:[#allocation3 + $0x20] sm:$0xff] %v1514_v57  ;;  %v1140_v52 = vmul.f32 0.5, %v1076_v30  ;;  %v1142_v63 = vmul.f32 0.5, %v1078_v23  ;;  %v1443_v55 = vsub.f32 1.0, %v2340_v56  ;;  %v1447_v43 = vsub.f32 1.0, %v2344_v59  ;;  %2456 = vmatmul.mubr.msk.bf16.gmra.mxu1 %vm2455_vm3, %v2842_v34  ;;  %v843_v56 = vpop.f32.mrf.mxu0  ;;  %v956_v59 = vpop.f32.mrf.mxu1 }
 0x183   : > { %v1445_v51 = vsub.f32 1.0, %v2342_v36  ;;  %v1449_v0 = vsub.f32 1.0, %v2346_v37  ;;  %v836_v11 = vadd.f32 %v835_v29, %v3452_v21  ;;  %v949_v4 = vadd.f32 %v948_v45, %v3454_v22  ;;  %v1019_v29 = vld [vmem:[#allocation3 + $0x98] sm:$0xff]  ;;  %v1021_v45 = vld [vmem:[#allocation3 + $0x90] sm:$0xff] }
 0x184   : > { %v3772_v6 = vadd.f32 %v1140_v52, %v1012_v42  ;;  %v3774_v8 = vadd.f32 %v1142_v63, %v1014_v19  ;;  %v1507_v33 = vmul.f32 %v1443_v55, %v3641_v2  ;;  %v1511_v1 = vmul.f32 %v1447_v43, %v3682_v46 }
 0x185   : > { %v1509_v62 = vmul.f32 %v1445_v51, %v3643_v40  ;;  %v1513_v12 = vmul.f32 %v1449_v0, %v3684_v47  ;;  %v1079_v13 = vsub.f32 %v836_v11, %v1015_v50  ;;  %v1081_v28 = vsub.f32 %v949_v4, %v1017_v10  ;;  %v1020_v51 = vld [vmem:[#allocation3 + $0x118] sm:$0xff]  ;;  %v1022_v0 = vld [vmem:[#allocation3 + $0x1e0] sm:$0xff] }
 0x186   : > { %1571 = vst [vmem:[#allocation3 + $0x1a8] sm:$0xff] %v1507_v33  ;;  %1575 = vst [vmem:[#allocation3 + $0x188] sm:$0xff] %v1511_v1  ;;  %v838_v53 = vadd.f32 %v837_v60, %v3456_v24  ;;  %v951_v41 = vadd.f32 %v950_v54, %v3458_v25  ;;  %v842_v2 = vadd.f32 %v841_v58, %v3452_v21  ;;  %vm1260_vm4 = vcmp.gt.f32.partialorder %v3720_v27, 0.5 }
 0x187   : > { %v955_v46 = vadd.f32 %v954_v31, %v3454_v22  ;;  %1573 = vst [vmem:[#allocation3 + $0xd0] sm:$0xff] %v1509_v62  ;;  %1577 = vst [vmem:[#allocation3 + $0x1b8] sm:$0xff] %v1513_v12  ;;  %v1143_v40 = vmul.f32 0.5, %v1079_v13  ;;  %v1145_v15 = vmul.f32 0.5, %v1081_v28  ;;  %vm1264_vm5 = vcmp.gt.f32.partialorder %v3743_v14, 0.5 }
 0x188   : > { %v1080_v47 = vsub.f32 %v838_v53, %v1016_v9  ;;  %v1082_v18 = vsub.f32 %v951_v41, %v1018_v44  ;;  %v1083_v42 = vsub.f32 %v842_v2, %v1019_v29  ;;  %vm2425_vm6 = vmpackc.low %vm1264_vm5, %vm1260_vm4  ;;  %v2349_v38 = vsel %vm1260_vm4, 1.0, %v2841_v7  ;;  %v1023_v53 = vld [vmem:[#allocation3 + $0x108] sm:$0xff]  ;;  %v1025_v41 = vld [vmem:[#allocation3 + $0x10] sm:$0xff] }
 0x189   : > { %v1085_v19 = vsub.f32 %v955_v46, %v1021_v45  ;;  %v3786_v20 = vadd.f32 %v1143_v40, %v1015_v50  ;;  %v3788_v26 = vadd.f32 %v1145_v15, %v1017_v10  ;;  %v2353_v48 = vsel %vm1264_vm5, 1.0, %v2841_v7  ;;  %2426 = vmatprep.mubr.msk.bf16.mxu0 %vm2425_vm6, %v2842_v34 }
 0x18a   : > { %v1144_v60 = vmul.f32 0.5, %v1080_v47  ;;  %v1146_v54 = vmul.f32 0.5, %v1082_v18  ;;  %v1147_v5 = vmul.f32 0.5, %v1083_v42  ;;  %v1452_v30 = vsub.f32 1.0, %v2349_v38 }
 0x18b   : > { %v1149_v57 = vmul.f32 0.5, %v1085_v19  ;;  %v1456_v23 = vsub.f32 1.0, %v2353_v48  ;;  %vm1262_vm7 = vcmp.gt.f32.partialorder %v3722_v32, 0.5  ;;  %vm1266_vm8 = vcmp.gt.f32.partialorder %v3745_v35, 0.5 }
 0x18c   : > { %v3795_v36 = vadd.f32 %v1144_v60, %v1016_v9  ;;  %v3797_v37 = vadd.f32 %v1146_v54, %v1018_v44  ;;  %v3799_v52 = vadd.f32 %v1147_v5, %v1019_v29  ;;  %vm2457_vm9 = vmpackc.low %vm1266_vm8, %vm1262_vm7  ;;  %v1516_v55 = vmul.f32 %v1452_v30, %v3720_v27  ;;  %v845_v27 = vpop.f32.mrf.mxu0  ;;  %v1024_v30 = vld [vmem:[#allocation3 + $0x48] sm:$0xff] }
 0x18d   : > { %v3801_v63 = vadd.f32 %v1149_v57, %v1021_v45  ;;  %v1520_v43 = vmul.f32 %v1456_v23, %v3743_v14  ;;  %v2351_v50 = vsel %vm1262_vm7, 1.0, %v2841_v7  ;;  %v2355_v10 = vsel %vm1266_vm8, 1.0, %v2841_v7  ;;  %2458 = vmatprep.mubr.msk.bf16.mxu1 %vm2457_vm9, %v2842_v34  ;;  %v958_v14 = vpop.f32.mrf.mxu1 }
 0x18e   : > { %v1454_v11 = vsub.f32 1.0, %v2351_v50  ;;  %v1458_v4 = vsub.f32 1.0, %v2355_v10  ;;  %v844_v58 = vadd.f32 %v843_v56, %v3456_v24  ;;  %v957_v31 = vadd.f32 %v956_v59, %v3458_v25  ;;  %1580 = vst [vmem:[#allocation3 + $0x60] sm:$0xff] %v1516_v55  ;;  %v847_v47 = vpop.f32.mrf.mxu0 }
 0x18f   : > { %1584 = vst [vmem:[#allocation3 + $0x1e8] sm:$0xff] %v1520_v43  ;;  %vm1259_vm10 = vcmp.gt.f32.partialorder %v3695_v16, 0.5  ;;  %vm1263_vm11 = vcmp.gt.f32.partialorder %v3734_v3, 0.5  ;;  %vm1261_vm12 = vcmp.gt.f32.partialorder %v3697_v49, 0.5  ;;  %vm1265_vm13 = vcmp.gt.f32.partialorder %v3736_v61, 0.5  ;;  %v960_v18 = vpop.f32.mrf.mxu1 }
 0x190   : > { %v1518_v33 = vmul.f32 %v1454_v11, %v3722_v32  ;;  %v1522_v1 = vmul.f32 %v1458_v4, %v3745_v35  ;;  %v1084_v9 = vsub.f32 %v844_v58, %v1020_v51  ;;  %v1086_v62 = vsub.f32 %v957_v31, %v1022_v0  ;;  %vm2427_vm14 = vmpackc.low %vm1263_vm11, %vm1259_vm10 }
 0x191   : > { %v2348_v12 = vsel %vm1259_vm10, 1.0, %v2841_v7  ;;  %v2352_v13 = vsel %vm1263_vm11, 1.0, %v2841_v7  ;;  %2428 = vmatmul.mubr.msk.bf16.gmra.mxu0 %vm2427_vm14, %v2842_v34  ;;  %v2350_v28 = vsel %vm1261_vm12, 1.0, %v2841_v7  ;;  %v2354_v44 = vsel %vm1265_vm13, 1.0, %v2841_v7  ;;  %vm2459_vm15 = vmpackc.low %vm1265_vm13, %vm1261_vm12 }
 0x192   : > { %1582 = vst [vmem:[#allocation3 + $0x1f0] sm:$0xff] %v1518_v33  ;;  %1586 = vst [vmem:[#allocation3 + $0x1c0] sm:$0xff] %v1522_v1  ;;  %v1148_v29 = vmul.f32 0.5, %v1084_v9  ;;  %v1150_v32 = vmul.f32 0.5, %v1086_v62  ;;  %v1451_v45 = vsub.f32 1.0, %v2348_v12  ;;  %v1455_v35 = vsub.f32 1.0, %v2352_v13  ;;  %2460 = vmatmul.mubr.msk.bf16.gmra.mxu1 %vm2459_vm15, %v2842_v34 }
 0x193   : > { %v1453_v2 = vsub.f32 1.0, %v2350_v28  ;;  %v1457_v46 = vsub.f32 1.0, %v2354_v44  ;;  %v846_v40 = vadd.f32 %v845_v27, %v3452_v21  ;;  %v959_v15 = vadd.f32 %v958_v14, %v3454_v22  ;;  %v1026_v21 = vld [vmem:[#allocation3 + $0x78] sm:$0xff] }
 0x194   : > { %v3824_v42 = vadd.f32 %v1148_v29, %v1020_v51  ;;  %v3826_v19 = vadd.f32 %v1150_v32, %v1022_v0  ;;  %v1515_v38 = vmul.f32 %v1451_v45, %v3695_v16  ;;  %v1519_v48 = vmul.f32 %v1455_v35, %v3734_v3 }
 0x195   : > { %v1517_v60 = vmul.f32 %v1453_v2, %v3697_v49  ;;  %v1521_v54 = vmul.f32 %v1457_v46, %v3736_v61  ;;  %v1087_v5 = vsub.f32 %v846_v40, %v1023_v53  ;;  %v1089_v57 = vsub.f32 %v959_v15, %v1025_v41 }
 0x196   : > { %1579 = vst [vmem:[#allocation3 + $0x100] sm:$0xff] %v1515_v38  ;;  %1583 = vst [vmem:[#allocation3 + $0x198] sm:$0xff] %v1519_v48  ;;  %v848_v22 = vadd.f32 %v847_v47, %v3456_v24  ;;  %v961_v23 = vadd.f32 %v960_v18, %v3458_v25  ;;  %vm1268_vm0 = vcmp.gt.f32.partialorder %v3772_v6, 0.5  ;;  %vm1272_vm1 = vcmp.gt.f32.partialorder %v3795_v36, 0.5 }
 0x197   : > { %1581 = vst [vmem:[#allocation3 + $0x50] sm:$0xff] %v1517_v60  ;;  %1585 = vst [vmem:[#allocation3 + $0xa0] sm:$0xff] %v1521_v54  ;;  %v1151_v16 = vmul.f32 0.5, %v1087_v5  ;;  %v1153_v49 = vmul.f32 0.5, %v1089_v57  ;;  %v2357_v3 = vsel %vm1268_vm0, 1.0, %v2841_v7  ;;  %v2361_v61 = vsel %vm1272_vm1, 1.0, %v2841_v7 }
 0x198   : > { %vm2429_vm2 = vmpackc.low %vm1272_vm1, %vm1268_vm0  ;;  %v1088_v56 = vsub.f32 %v848_v22, %v1024_v30  ;;  %v1090_v59 = vsub.f32 %v961_v23, %v1026_v21  ;;  %v1460_v55 = vsub.f32 1.0, %v2357_v3  ;;  %v1464_v43 = vsub.f32 1.0, %v2361_v61 }
 0x199   : > { %2430 = vmatprep.mubr.msk.bf16.mxu0 %vm2429_vm2, %v2842_v34  ;;  %v3839_v24 = vadd.f32 %v1151_v16, %v1023_v53  ;;  %v3841_v25 = vadd.f32 %v1153_v49, %v1025_v41  ;;  %vm1270_vm3 = vcmp.gt.f32.partialorder %v3774_v8, 0.5  ;;  %vm1274_vm4 = vcmp.gt.f32.partialorder %v3797_v37, 0.5 }
 0x19a   : > { %v1152_v50 = vmul.f32 0.5, %v1088_v56  ;;  %v1154_v10 = vmul.f32 0.5, %v1090_v59  ;;  %v1524_v51 = vmul.f32 %v1460_v55, %v3772_v6  ;;  %v1528_v0 = vmul.f32 %v1464_v43, %v3795_v36  ;;  %vm2461_vm5 = vmpackc.low %vm1274_vm4, %vm1270_vm3 }
 0x19b   : > { %v2359_v11 = vsel %vm1270_vm3, 1.0, %v2841_v7  ;;  %v2363_v4 = vsel %vm1274_vm4, 1.0, %v2841_v7  ;;  %2462 = vmatprep.mubr.msk.bf16.mxu1 %vm2461_vm5, %v2842_v34  ;;  %vm1267_vm6 = vcmp.gt.f32.partialorder %v3747_v17, 0.5  ;;  %vm1271_vm7 = vcmp.gt.f32.partialorder %v3786_v20, 0.5 }
 0x19c   : > { %v1216_v58 = vadd.f32 %v1152_v50, %v1024_v30  ;;  %v1218_v31 = vadd.f32 %v1154_v10, %v1026_v21  ;;  %1588 = vst [vmem:[#allocation3 + $0xe8] sm:$0xff] %v1524_v51  ;;  %1592 = vst [vmem:[#allocation3 + $0x190] sm:$0xff] %v1528_v0  ;;  %v1462_v27 = vsub.f32 1.0, %v2359_v11  ;;  %v1466_v14 = vsub.f32 1.0, %v2363_v4  ;;  %v2746_v0 = vld [vmem:[%s2939_s13 + $0x8] sm:$0xff] }
 0x19d   : > { %vm2431_vm8 = vmpackc.low %vm1271_vm7, %vm1267_vm6  ;;  %v2356_v6 = vsel %vm1267_vm6, 1.0, %v2841_v7  ;;  %v2360_v36 = vsel %vm1271_vm7, 1.0, %v2841_v7  ;;  %vm1269_vm9 = vcmp.gt.f32.partialorder %v3749_v39, 0.5  ;;  %vm1273_vm10 = vcmp.gt.f32.partialorder %v3788_v26, 0.5 }
 0x19e   : > { %2432 = vmatmul.mubr.msk.bf16.gmra.mxu0 %vm2431_vm8, %v2842_v34  ;;  %v1526_v33 = vmul.f32 %v1462_v27, %v3774_v8  ;;  %v1530_v1 = vmul.f32 %v1466_v14, %v3797_v37  ;;  %v1459_v9 = vsub.f32 1.0, %v2356_v6  ;;  %v1463_v62 = vsub.f32 1.0, %v2360_v36  ;;  %vm2463_vm11 = vmpackc.low %vm1273_vm10, %vm1269_vm9 }
 0x19f   : > { %v2358_v12 = vsel %vm1269_vm9, 1.0, %v2841_v7  ;;  %v2362_v13 = vsel %vm1273_vm10, 1.0, %v2841_v7  ;;  %2464 = vmatmul.mubr.msk.bf16.gmra.mxu1 %vm2463_vm11, %v2842_v34  ;;  %vm1276_vm12 = vcmp.gt.f32.partialorder %v3824_v42, 0.5  ;;  %vm1280_vm13 = vcmp.gt.f32.partialorder %v1216_v58, 0.5 }
 0x1a0   : > { %1590 = vst [vmem:[#allocation3 + $0x1c8] sm:$0xff] %v1526_v33  ;;  %1594 = vst [vmem:[#allocation3 + $0x150] sm:$0xff] %v1530_v1  ;;  %v1523_v28 = vmul.f32 %v1459_v9, %v3747_v17  ;;  %v1527_v8 = vmul.f32 %v1463_v62, %v3786_v20  ;;  %v1461_v44 = vsub.f32 1.0, %v2358_v12  ;;  %v1465_v37 = vsub.f32 1.0, %v2362_v13 }
 0x1a1   : > { %vm2433_vm14 = vmpackc.low %vm1280_vm13, %vm1276_vm12  ;;  %v2365_v29 = vsel %vm1276_vm12, 1.0, %v2841_v7  ;;  %v2369_v32 = vsel %vm1280_vm13, 1.0, %v2841_v7  ;;  %vm1278_vm15 = vcmp.gt.f32.partialorder %v3826_v19, 0.5  ;;  %vm1282_vm0 = vcmp.gt.f32.partialorder %v1218_v31, 0.5 }
 0x1a2   : > { %2434 = vmatprep.mubr.msk.bf16.mxu0 %vm2433_vm14, %v2842_v34  ;;  %1587 = vst [vmem:[#allocation3 + $0xe0] sm:$0xff] %v1523_v28  ;;  %1591 = vst [vmem:[#allocation3 + $0x1d0] sm:$0xff] %v1527_v8  ;;  %v1525_v45 = vmul.f32 %v1461_v44, %v3749_v39  ;;  %v1529_v17 = vmul.f32 %v1465_v37, %v3788_v26  ;;  %v1468_v35 = vsub.f32 1.0, %v2365_v29  ;;  %v1472_v20 = vsub.f32 1.0, %v2369_v32  ;;  %v2747_v8 = vld [vmem:[%s2939_s13 + $0x10] sm:$0xff]  ;;  %v2748_v32 = vld [vmem:[%s2939_s13 + $0x18] sm:$0xff] }
 0x1a3   : > { %vm2465_vm1 = vmpackc.low %vm1282_vm0, %vm1278_vm15  ;;  %v2367_v53 = vsel %vm1278_vm15, 1.0, %v2841_v7  ;;  %v2371_v41 = vsel %vm1282_vm0, 1.0, %v2841_v7  ;;  %vm1275_vm2 = vcmp.gt.f32.partialorder %v3799_v52, 0.5  ;;  %vm1279_vm3 = vcmp.gt.f32.partialorder %v3839_v24, 0.5 }
 0x1a4   : > { %2466 = vmatprep.mubr.msk.bf16.mxu1 %vm2465_vm1, %v2842_v34  ;;  %1589 = vst [vmem:[#allocation3 + $0xb8] sm:$0xff] %v1525_v45  ;;  %1593 = vst [vmem:[#allocation3 + $0x128] sm:$0xff] %v1529_v17  ;;  %v1532_v2 = vmul.f32 %v1468_v35, %v3824_v42  ;;  %v1536_v39 = vmul.f32 %v1472_v20, %v1216_v58  ;;  %v1470_v46 = vsub.f32 1.0, %v2367_v53  ;;  %v1474_v26 = vsub.f32 1.0, %v2371_v41 }
 0x1a5   : > { %vm2435_vm4 = vmpackc.low %vm1279_vm3, %vm1275_vm2  ;;  %v2364_v40 = vsel %vm1275_vm2, 1.0, %v2841_v7  ;;  %v2368_v15 = vsel %vm1279_vm3, 1.0, %v2841_v7  ;;  %vm1277_vm5 = vcmp.gt.f32.partialorder %v3801_v63, 0.5  ;;  %vm1281_vm6 = vcmp.gt.f32.partialorder %v3841_v25, 0.5 }
 0x1a6   : > { %2436 = vmatmul.mubr.msk.bf16.gmra.mxu0 %vm2435_vm4, %v2842_v34  ;;  %1596 = vst [vmem:[#allocation3 + $0x118] sm:$0xff] %v1532_v2  ;;  %1600 = vst [vmem:[#allocation3 + $0x48] sm:$0xff] %v1536_v39  ;;  %v1534_v47 = vmul.f32 %v1470_v46, %v3826_v19  ;;  %v1538_v18 = vmul.f32 %v1474_v26, %v1218_v31  ;;  %v1467_v42 = vsub.f32 1.0, %v2364_v40  ;;  %v1471_v38 = vsub.f32 1.0, %v2368_v15 }
 0x1a7   : > { %vm2467_vm7 = vmpackc.low %vm1281_vm6, %vm1277_vm5  ;;  %v2366_v48 = vsel %vm1277_vm5, 1.0, %v2841_v7  ;;  %v2370_v60 = vsel %vm1281_vm6, 1.0, %v2841_v7 }
 0x1a8   : > { %2468 = vmatmul.mubr.msk.bf16.gmra.mxu1 %vm2467_vm7, %v2842_v34  ;;  %1598 = vst [vmem:[#allocation3 + $0x1e0] sm:$0xff] %v1534_v47  ;;  %1602 = vst [vmem:[#allocation3 + $0x78] sm:$0xff] %v1538_v18  ;;  %v1531_v54 = vmul.f32 %v1467_v42, %v3799_v52  ;;  %v1535_v5 = vmul.f32 %v1471_v38, %v3839_v24  ;;  %v1469_v57 = vsub.f32 1.0, %v2366_v48  ;;  %v1473_v30 = vsub.f32 1.0, %v2370_v60  ;;  %v3893_v34 = vld [vmem:[%s4003_s4] ss:$0 sm:$0xff] }
 0x1a9   : > { %v2745_v24 = vld [vmem:[%s2939_s13] sm:$0xff] }
 0x1aa   : > { %1595 = vst [vmem:[#allocation3 + $0x98] sm:$0xff] %v1531_v54  ;;  %1599 = vst [vmem:[#allocation3 + $0x108] sm:$0xff] %v1535_v5  ;;  %v1533_v19 = vmul.f32 %v1469_v57, %v3801_v63  ;;  %v1537_v21 = vmul.f32 %v1473_v30, %v3841_v25  ;;  %v2749_v42 = vld [vmem:[%s2939_s13 + $0x20] sm:$0xff]  ;;  %v2750_v5 = vld [vmem:[%s2939_s13 + $0x28] sm:$0xff] }
 0x1ac   : > { %1597 = vst [vmem:[#allocation3 + $0x90] sm:$0xff] %v1533_v19  ;;  %1601 = vst [vmem:[#allocation3 + $0x10] sm:$0xff] %v1537_v21 }
 0x201   : > { %v2492_v7 = vpop.f32.mrf.mxu0 }
 0x202   : > { %v2556_v22 = vpop.f32.mrf.mxu1 }
 0x203   : > { %v2493_v52 = vpop.f32.mrf.mxu0 }
 0x204   : > { %v2494_v23 = vadd.f32 %v2493_v52, %v2492_v7  ;;  %v2557_v16 = vpop.f32.mrf.mxu1 }
 0x205   : > { %v2495_v49 = vpop.f32.mrf.mxu0  ;;  %v2558_v3 = vadd.f32 %v2557_v16, %v2556_v22 }
 0x206   : > { %v1933_v63 = vadd.f32 %v2494_v23, %v3893_v34  ;;  %v2559_v61 = vpop.f32.mrf.mxu1 }
 0x207   : > { %v2496_v56 = vpop.f32.mrf.mxu0 }
 0x208   : > { %v2030_v59 = vadd.f32 %v2558_v3, %v1933_v63  ;;  %v2497_v55 = vadd.f32 %v2496_v56, %v2495_v49  ;;  %v2560_v43 = vpop.f32.mrf.mxu1 }
 0x209   : > { %v2561_v10 = vadd.f32 %v2560_v43, %v2559_v61 }
 0x20a   : > { %v2092_v25 = vadd.f32 %v2745_v24, %v2030_v59  ;;  %v1936_v50 = vadd.f32 %v2497_v55, %v3893_v34  ;;  %v2751_v59 = vld [vmem:[%s2939_s13 + $0x30] sm:$0xff] }
 0x20c   : > { %2108 = vst [vmem:[%s2941_s14] sm:$0xff] %v2092_v25  ;;  %v2033_v51 = vadd.f32 %v2561_v10, %v1936_v50  ;;  %v2752_v50 = vld [vmem:[%s2939_s13 + $0x38] sm:$0xff] }
 0x20e   : > { %v2093_v11 = vadd.f32 %v2746_v0, %v2033_v51 }
 0x210   : > { %2109 = vst [vmem:[%s2941_s14 + $0x8] sm:$0xff] %v2093_v11  ;;  %v2498_v4 = vpop.f32.mrf.mxu0 }
 0x212   : > { %v2499_v58 = vpop.f32.mrf.mxu0 }
 0x213   : > { %v2500_v27 = vadd.f32 %v2499_v58, %v2498_v4 }
 0x214   : > { %v2562_v31 = vpop.f32.mrf.mxu1  ;;  %v2501_v14 = vpop.f32.mrf.mxu0 }
 0x215   : > { %v1941_v6 = vadd.f32 %v2500_v27, %v3893_v34 }
 0x216   : > { %v2563_v36 = vpop.f32.mrf.mxu1  ;;  %v2502_v1 = vpop.f32.mrf.mxu0 }
 0x217   : > { %v2564_v33 = vadd.f32 %v2563_v36, %v2562_v31  ;;  %v2503_v62 = vadd.f32 %v2502_v1, %v2501_v14 }
 0x218   : > { %v2565_v9 = vpop.f32.mrf.mxu1 }
 0x219   : > { %v2038_v12 = vadd.f32 %v2564_v33, %v1941_v6  ;;  %v1944_v13 = vadd.f32 %v2503_v62, %v3893_v34  ;;  %v2753_v62 = vld [vmem:[%s2939_s13 + $0x40] sm:$0xff] }
 0x21a   : > { %v2566_v28 = vpop.f32.mrf.mxu1 }
 0x21b   : > { %v2094_v44 = vadd.f32 %v2747_v8, %v2038_v12  ;;  %v2567_v37 = vadd.f32 %v2566_v28, %v2565_v9 }
 0x21d   : > { %2110 = vst [vmem:[%s2941_s14 + $0x10] sm:$0xff] %v2094_v44  ;;  %v2041_v29 = vadd.f32 %v2567_v37, %v1944_v13  ;;  %v2754_v44 = vld [vmem:[%s2939_s13 + $0x48] sm:$0xff] }
 0x21f   : > { %v2095_v45 = vadd.f32 %v2748_v32, %v2041_v29 }
 0x221   : > { %2111 = vst [vmem:[%s2941_s14 + $0x18] sm:$0xff] %v2095_v45  ;;  %v2504_v17 = vpop.f32.mrf.mxu0 }
 0x222   : > { %v2568_v35 = vpop.f32.mrf.mxu1 }
 0x223   : > { %v2505_v20 = vpop.f32.mrf.mxu0 }
 0x224   : > { %v2506_v53 = vadd.f32 %v2505_v20, %v2504_v17  ;;  %v2569_v41 = vpop.f32.mrf.mxu1 }
 0x225   : > { %v2507_v2 = vpop.f32.mrf.mxu0  ;;  %v2570_v46 = vadd.f32 %v2569_v41, %v2568_v35 }
 0x226   : > { %v1949_v39 = vadd.f32 %v2506_v53, %v3893_v34  ;;  %v2571_v26 = vpop.f32.mrf.mxu1 }
 0x227   : > { %v2508_v40 = vpop.f32.mrf.mxu0 }
 0x228   : > { %v2046_v15 = vadd.f32 %v2570_v46, %v1949_v39  ;;  %v2509_v47 = vadd.f32 %v2508_v40, %v2507_v2  ;;  %v2572_v18 = vpop.f32.mrf.mxu1 }
 0x229   : > { %v2573_v60 = vadd.f32 %v2572_v18, %v2571_v26 }
 0x22a   : > { %v2096_v38 = vadd.f32 %v2749_v42, %v2046_v15  ;;  %v1952_v48 = vadd.f32 %v2509_v47, %v3893_v34  ;;  %v2755_v15 = vld [vmem:[%s2939_s13 + $0x50] sm:$0xff] }
 0x22c   : > { %2112 = vst [vmem:[%s2941_s14 + $0x20] sm:$0xff] %v2096_v38  ;;  %v2049_v54 = vadd.f32 %v2573_v60, %v1952_v48  ;;  %v2756_v60 = vld [vmem:[%s2939_s13 + $0x58] sm:$0xff] }
 0x22e   : > { %v2097_v57 = vadd.f32 %v2750_v5, %v2049_v54 }
 0x230   : > { %2113 = vst [vmem:[%s2941_s14 + $0x28] sm:$0xff] %v2097_v57 }
 0x231   : > { %v2510_v30 = vpop.f32.mrf.mxu0 }
 0x232   : > { %v2574_v19 = vpop.f32.mrf.mxu1 }
 0x233   : > { %v2511_v21 = vpop.f32.mrf.mxu0 }
 0x234   : > { %v2512_v7 = vadd.f32 %v2511_v21, %v2510_v30  ;;  %v2575_v22 = vpop.f32.mrf.mxu1 }
 0x235   : > { %v2513_v52 = vpop.f32.mrf.mxu0  ;;  %v2576_v16 = vadd.f32 %v2575_v22, %v2574_v19 }
 0x236   : > { %v1957_v23 = vadd.f32 %v2512_v7, %v3893_v34  ;;  %v2577_v49 = vpop.f32.mrf.mxu1 }
 0x237   : > { %v2514_v63 = vpop.f32.mrf.mxu0 }
 0x238   : > { %v2054_v3 = vadd.f32 %v2576_v16, %v1957_v23  ;;  %v2515_v61 = vadd.f32 %v2514_v63, %v2513_v52  ;;  %v2578_v56 = vpop.f32.mrf.mxu1 }
 0x239   : > { %v2579_v24 = vadd.f32 %v2578_v56, %v2577_v49 }
 0x23a   : > { %v2098_v55 = vadd.f32 %v2751_v59, %v2054_v3  ;;  %v1960_v43 = vadd.f32 %v2515_v61, %v3893_v34  ;;  %v2757_v61 = vld [vmem:[%s2939_s13 + $0x60] sm:$0xff] }
 0x23c   : > { %2114 = vst [vmem:[%s2941_s14 + $0x30] sm:$0xff] %v2098_v55  ;;  %v2057_v25 = vadd.f32 %v2579_v24, %v1960_v43 }
 0x23e   : > { %v2099_v10 = vadd.f32 %v2752_v50, %v2057_v25 }
 0x240   : > { %2115 = vst [vmem:[%s2941_s14 + $0x38] sm:$0xff] %v2099_v10 }
 0x241   : > { %v2516_v51 = vpop.f32.mrf.mxu0 }
 0x242   : > { %v2580_v0 = vpop.f32.mrf.mxu1 }
 0x243   : > { %v2517_v11 = vpop.f32.mrf.mxu0 }
 0x244   : > { %v2518_v4 = vadd.f32 %v2517_v11, %v2516_v51  ;;  %v2581_v58 = vpop.f32.mrf.mxu1 }
 0x245   : > { %v2519_v31 = vpop.f32.mrf.mxu0  ;;  %v2582_v14 = vadd.f32 %v2581_v58, %v2580_v0  ;;  %v2758_v0 = vld [vmem:[%s2939_s13 + $0x68] sm:$0xff] }
 0x246   : > { %v1965_v27 = vadd.f32 %v2518_v4, %v3893_v34  ;;  %v2583_v6 = vpop.f32.mrf.mxu1 }
 0x247   : > { %v2520_v36 = vpop.f32.mrf.mxu0 }
 0x248   : > { %v2062_v33 = vadd.f32 %v2582_v14, %v1965_v27  ;;  %v2521_v1 = vadd.f32 %v2520_v36, %v2519_v31  ;;  %v2584_v9 = vpop.f32.mrf.mxu1 }
 0x249   : > { %v2585_v28 = vadd.f32 %v2584_v9, %v2583_v6 }
 0x24a   : > { %v2100_v12 = vadd.f32 %v2753_v62, %v2062_v33  ;;  %v1968_v13 = vadd.f32 %v2521_v1, %v3893_v34  ;;  %v2759_v33 = vld [vmem:[%s2939_s13 + $0x70] sm:$0xff] }
 0x24c   : > { %2116 = vst [vmem:[%s2941_s14 + $0x40] sm:$0xff] %v2100_v12  ;;  %v2065_v8 = vadd.f32 %v2585_v28, %v1968_v13  ;;  %v2760_v13 = vld [vmem:[%s2939_s13 + $0x78] sm:$0xff] }
 0x24e   : > { %v2101_v37 = vadd.f32 %v2754_v44, %v2065_v8 }
 0x250   : > { %2117 = vst [vmem:[%s2941_s14 + $0x48] sm:$0xff] %v2101_v37 }
 0x251   : > { %v2522_v29 = vpop.f32.mrf.mxu0 }
 0x252   : > { %v2586_v32 = vpop.f32.mrf.mxu1 }
 0x253   : > { %v2523_v45 = vpop.f32.mrf.mxu0 }
 0x254   : > { %v2524_v17 = vadd.f32 %v2523_v45, %v2522_v29  ;;  %v2587_v35 = vpop.f32.mrf.mxu1 }
 0x255   : > { %v2525_v20 = vpop.f32.mrf.mxu0  ;;  %v2588_v41 = vadd.f32 %v2587_v35, %v2586_v32 }
 0x256   : > { %v1973_v53 = vadd.f32 %v2524_v17, %v3893_v34  ;;  %v2589_v2 = vpop.f32.mrf.mxu1 }
 0x257   : > { %v2526_v39 = vpop.f32.mrf.mxu0 }
 0x258   : > { %v2070_v46 = vadd.f32 %v2588_v41, %v1973_v53  ;;  %v2527_v26 = vadd.f32 %v2526_v39, %v2525_v20  ;;  %v2590_v40 = vpop.f32.mrf.mxu1 }
 0x259   : > { %v2591_v42 = vadd.f32 %v2590_v40, %v2589_v2 }
 0x25a   : > { %v2102_v47 = vadd.f32 %v2755_v15, %v2070_v46  ;;  %v1976_v18 = vadd.f32 %v2527_v26, %v3893_v34 }
 0x25c   : > { %2118 = vst [vmem:[%s2941_s14 + $0x50] sm:$0xff] %v2102_v47  ;;  %v2073_v38 = vadd.f32 %v2591_v42, %v1976_v18 }
 0x25e   : > { %v2528_v48 = vpop.f32.mrf.mxu0  ;;  %v2103_v54 = vadd.f32 %v2756_v60, %v2073_v38 }
 0x25f   : > { %v2592_v5 = vpop.f32.mrf.mxu1 }
 0x260   : > { %v2529_v57 = vpop.f32.mrf.mxu0  ;;  %2119 = vst [vmem:[%s2941_s14 + $0x58] sm:$0xff] %v2103_v54 }
 0x261   : > { %v2530_v30 = vadd.f32 %v2529_v57, %v2528_v48  ;;  %v2593_v19 = vpop.f32.mrf.mxu1 }
 0x262   : > { %v2531_v21 = vpop.f32.mrf.mxu0  ;;  %v2594_v22 = vadd.f32 %v2593_v19, %v2592_v5 }
 0x263   : > { %v1981_v7 = vadd.f32 %v2530_v30, %v3893_v34  ;;  %v2595_v52 = vpop.f32.mrf.mxu1 }
 0x264   : > { %v2532_v23 = vpop.f32.mrf.mxu0 }
 0x265   : > { %v2078_v16 = vadd.f32 %v2594_v22, %v1981_v7  ;;  %v2533_v49 = vadd.f32 %v2532_v23, %v2531_v21  ;;  %v2596_v63 = vpop.f32.mrf.mxu1 }
 0x266   : > { %v2534_v3 = vpop.f32.mrf.mxu0  ;;  %v2597_v55 = vadd.f32 %v2596_v63, %v2595_v52 }
 0x267   : > { %v2104_v56 = vadd.f32 %v2757_v61, %v2078_v16  ;;  %v1984_v59 = vadd.f32 %v2533_v49, %v3893_v34 }
 0x268   : > { %v2598_v43 = vpop.f32.mrf.mxu1  ;;  %v2535_v24 = vpop.f32.mrf.mxu0 }
 0x269   : > { %2120 = vst [vmem:[%s2941_s14 + $0x60] sm:$0xff] %v2104_v56  ;;  %v2081_v25 = vadd.f32 %v2597_v55, %v1984_v59  ;;  %v2536_v50 = vadd.f32 %v2535_v24, %v2534_v3 }
 0x26a   : > { %v2599_v10 = vpop.f32.mrf.mxu1  ;;  %v2537_v51 = vpop.f32.mrf.mxu0 }
 0x26b   : > { %v2105_v11 = vadd.f32 %v2758_v0, %v2081_v25  ;;  %v1989_v4 = vadd.f32 %v2536_v50, %v3893_v34  ;;  %v2600_v58 = vadd.f32 %v2599_v10, %v2598_v43 }
 0x26c   : > { %v2601_v31 = vpop.f32.mrf.mxu1  ;;  %v2538_v27 = vpop.f32.mrf.mxu0 }
 0x26d   : > { %2121 = vst [vmem:[%s2941_s14 + $0x68] sm:$0xff] %v2105_v11  ;;  %v2086_v14 = vadd.f32 %v2600_v58, %v1989_v4  ;;  %v2539_v6 = vadd.f32 %v2538_v27, %v2537_v51 }
 0x26e   : > { %v2602_v36 = vpop.f32.mrf.mxu1 }
 0x26f   : > { %v2106_v1 = vadd.f32 %v2759_v33, %v2086_v14  ;;  %v1992_v9 = vadd.f32 %v2539_v6, %v3893_v34  ;;  %v2603_v62 = vadd.f32 %v2602_v36, %v2601_v31 }
 0x271   : > { %2122 = vst [vmem:[%s2941_s14 + $0x70] sm:$0xff] %v2106_v1  ;;  %v2089_v12 = vadd.f32 %v2603_v62, %v1992_v9 }
 0x273   : > { %v2107_v28 = vadd.f32 %v2760_v13, %v2089_v12 }
 0x275   : > { %2123 = vst [vmem:[%s2941_s14 + $0x78] sm:$0xff] %v2107_v28 }
 0x276   : > { %2774 = shalt.err (!%p2771_p6)
}
 0x277   : > { %s2775_s7 = scalar_lea.hbm %s3946_s25, 2048  ;;  %s2779_s10 = scalar_lea.hbm %s4004_s5, 8192 }
 0x278   : > { %p2776_p7 = scmp.ne.s32.totalorder %s3946_s25, %s2775_s7  ;;  %p2780_p11 = scmp.lt.s32.totalorder %s3946_s25, %s4004_s5 }
 0x279   : > { %p2781_p12 = scmp.lt.s32.totalorder %s2779_s10, %s2775_s7 }
 0x27a   : > { %p2777_p9 = pnand %p2776_p7, %p2916_p4 }
 0x27b   : > { %p2782_p13 = por %p2781_p12, %p2780_p11 }
 0x27c   : > { %p2778_p10 = pneg %p2777_p9 }
 0x27e   : > { %p2783_p0 = pnand %p2782_p13, %p2778_p10 }
 0x280   : > { %2786 = shalt.err (!%p2783_p0)
}
 0x281   : > { %s2844_s15 = smov 128   ;;  %s2845_s17 = smov 8  }
 0x282   : > { %2604 = dma.vmem_to_hbm [thread:$0]  (%p2916_p4), %s3948_s16, 2048, %s3946_s25, %s3954_s27, %s2844_s15, %s2844_s15, %s2845_s17  }
 0x283 PF: > { %p2610_p1 = scmp.ge.s32.totalorder %s2837_s23, 2  ;;  %s2155_s24 = sand.u32 1, %s2817_s18  }
 0x284   : > { %s2156_s21 = scalar_lea.sflag [#allocation5], %s2155_s24 }
 0x285   : > { %p2607_p2 = pnand %p2610_p1, %p2923_p8 }
 0x287   : > { %p2608_p3 = pneg %p2607_p2 }
 0x289   : > { %2812 = dma.done.wait (%p2608_p3), %s2156_s21, 2048  }
 0x28a   : > { %2814 = vsyncadd (%p2608_p3), %s2156_s21, 4294965248  ;;  %s18_s23 = sadd.s32 1, %s2837_s23   ;;  %s4017_s18 = smov %s2821_s19 }
 0x28b   : > { %p15_p5 = scmp.ge.s32.totalorder %s18_s23, 6   ;;  %s4018_s19 = smov %s2825_s20 }
 0x28c   : > { %s4019_s20 = smov %s2929_s6  ;;  %s4020_s21 = smov %s2833_s22 }
 0x28d   : > { %s4021_s22 = smov %s4023_s26  ;;  %17 = sbr.rel (!%p15_p5) target bundleno = 4 (0x4), region = 79 }
 0x292   :  { %2161 = vsyncpa [#allocation5], 1 }
 0x293   :  { %2163 = vsyncpa [#allocation5 + $0x1], 1 }

</bundles_post_ra>
